<compile_context>
chip_gen: v5e
topology: v5e:2x2
jax: 0.10.0
libtpu: 0.0.40
codegen_flags: <defaults>
</compile_context>

<pallas_src>
import functools

import jax
import jax.numpy as jnp
from jax.experimental import pallas as pl
from jax.experimental.pallas import tpu as pltpu

CPAD = 128     # lane-dense padded class dim for the output slab / w3 columns
INSIDE = 256   # MILAttention featureInside == fc_target hidden width


def _layernorm(v, gamma, beta, eps=1e-5):
    # PyTorch nn.LayerNorm: biased variance over the last dim.
    mu = jnp.mean(v, axis=-1, keepdims=True)
    var = jnp.mean((v - mu) ** 2, axis=-1, keepdims=True)
    return (v - mu) * jax.lax.rsqrt(var + eps) * gamma + beta


def clfnet_kernel(x_ref, wf_ref, w2_ref, w3_ref, par_ref, out_ref, *, bt, patches):
    """Scores `bt` bags per grid step.

    x_ref   : (bt*patches, F) bf16  flattened patch features for this bag block
    wf_ref  : (F, 512)        bf16  [Wv | W1] fused projection (pre-transposed)
    w2_ref  : (256, 128)      bf16  fc_target[3] weight (pre-transposed)
    w3_ref  : (128, CPAD)     bf16  fc_target[6] weight (pre-transposed, padded)
    par_ref : (10, 256)       f32   packed biases / LN params / attention row
    out_ref : (bt, CPAD)      f32   padded logits for this bag block
    """
    p = par_ref[...]
    bv = p[0:1, :]                          # attetion_V bias          (1, 256)
    ww = p[1:2, :].reshape(1, 1, INSIDE)    # attetion_weights row W^T (1,1,256)
    bw = p[2:3, 0:1].reshape(1, 1, 1)       # attetion_weights bias
    b1 = p[3:4, :]                          # fc_target[0] bias        (1, 256)
    g1 = p[4:5, :]                          # LayerNorm(256) gamma
    be1 = p[5:6, :]                         # LayerNorm(256) beta
    b2 = p[6:7, :128]                       # fc_target[3] bias        (1, 128)
    g2 = p[7:8, :128]                       # LayerNorm(128) gamma
    be2 = p[8:9, :128]                      # LayerNorm(128) beta
    b3 = p[9:10, :CPAD]                     # fc_target[6] bias (padded)

    # ---- Fused projection: one (bt*P, 768) x (768, 512) MXU pass. -----------
    # Columns [0:256] = attention-V projection, [256:512] = fc_target[0]
    # projection. Pooling is linear, so project-then-pool == pool-then-project.
    h = jnp.dot(x_ref[...], wf_ref[...], preferred_element_type=jnp.float32)
    hv = jnp.tanh(h[:, :INSIDE] + bv)                     # (bt*P, 256) f32
    hv3 = hv.reshape(bt, patches, INSIDE)                 # (bt, P, 256)
    h13 = h[:, INSIDE:].reshape(bt, patches, INSIDE)      # pre-bias fc1 proj.

    # ---- MILAttention (lengths=None path), att_u = att_v quirk --------------
    att = jnp.sum((hv3 * hv3) * ww, axis=-1, keepdims=True) + bw   # (bt, P, 1)
    # softmax over the patch axis, per bag
    att = att - jnp.max(att, axis=1, keepdims=True)
    e = jnp.exp(att)
    wgt = e * pl.reciprocal(jnp.sum(e, axis=1, keepdims=True), approx=True)

    # ---- MILNet weighted pooling of the projected fc1 features (f32) --------
    pooled = jnp.sum(wgt * h13, axis=1)                   # (bt, 256) f32

    # ---- fc_target tail: +b1 -> ReLU -> LN(256) -> Linear -> ReLU -> LN(128) -> Linear
    y = jnp.maximum(pooled + b1, 0.0)
    y = _layernorm(y, g1, be1)
    y = jnp.maximum(
        jnp.dot(y.astype(jnp.bfloat16), w2_ref[...],
                preferred_element_type=jnp.float32) + b2,
        0.0,
    )
    y = _layernorm(y, g2, be2)
    out_ref[...] = (
        jnp.dot(y.astype(jnp.bfloat16), w3_ref[...],
                preferred_element_type=jnp.float32) + b3
    )


def init_params(key, feature_length=768, linear_length=256, classes=2):
    """Deterministic synthetic parameters (shapes match the PyTorch module).

    Matmul weights are pre-transposed (in, out) and stored in bfloat16; Wv and
    fc_target[0] are concatenated into one (F, 512) fused weight; the small
    vectors are packed into a single (10, 256) f32 array (one DMA)."""
    assert linear_length == INSIDE, "packed-param layout assumes featureInside == 256"
    assert classes <= CPAD
    f32 = jnp.float32
    ks = jax.random.split(key, 10)

    def lin(k, fan_in, fan_out):
        kw, kb = jax.random.split(k)
        wt = jax.random.normal(kw, (fan_in, fan_out), f32) * (1.0 / jnp.sqrt(fan_in))
        b = jax.random.normal(kb, (fan_out,), f32) * 0.01
        return wt, b

    wv, bv = lin(ks[0], feature_length, linear_length)   # attetion_V
    ww, bw = lin(ks[1], linear_length, 1)                 # attetion_weights
    w1, b1 = lin(ks[2], feature_length, 256)              # fc_target[0]
    w2, b2 = lin(ks[3], 256, 128)                         # fc_target[3]
    w3, b3 = lin(ks[4], 128, classes)                     # fc_target[6]
    # Slightly non-trivial LayerNorm params so the LN path is actually tested.
    g1 = 1.0 + 0.1 * jax.random.normal(ks[5], (256,), f32)
    be1 = 0.1 * jax.random.normal(ks[6], (256,), f32)
    g2 = 1.0 + 0.1 * jax.random.normal(ks[7], (128,), f32)
    be2 = 0.1 * jax.random.normal(ks[8], (128,), f32)

    # Pad w3/b3 columns to a lane-dense CPAD so the kernel stores (bt, 128).
    w3p = jnp.zeros((128, CPAD), f32).at[:, :classes].set(w3)
    b3p = jnp.zeros((CPAD,), f32).at[:classes].set(b3)

    def row(v):  # pad a 1-D vector into a width-256 row
        return jnp.zeros((256,), f32).at[: v.shape[0]].set(v)

    packed = jnp.stack(
        [
            row(bv),                        # 0: attetion_V bias
            row(ww[:, 0]),                  # 1: attetion_weights row (W^T)
            jnp.full((256,), bw[0], f32),   # 2: attetion_weights bias (scalar)
            row(b1),                        # 3: fc_target[0] bias
            row(g1),                        # 4: LN(256) gamma
            row(be1),                       # 5: LN(256) beta
            row(b2),                        # 6: fc_target[3] bias
            row(g2),                        # 7: LN(128) gamma
            row(be2),                       # 8: LN(128) beta
            row(b3p),                       # 9: fc_target[6] bias (padded)
        ],
        axis=0,
    )  # (10, 256) f32

    bf16 = jnp.bfloat16
    return {
        "wfused": jnp.concatenate([wv, w1], axis=1).astype(bf16),  # (F, 512)
        "w2": w2.astype(bf16),
        "w3": w3p.astype(bf16),
        "packed": packed,
    }


@functools.partial(jax.jit, static_argnames=("classes", "bt"))
def clfnet_forward(x, race, params, classes=2, bt=32):
    """x: (B, P, F) f32 — B independent bags; x[b] corresponds to one
    ClfNet.forward(x[b][None], race, lengths=None) call.
    race: accepted for interface parity, unused (as in the reference forward).
    bt: bags scored per grid step (32 at P=8 -> 256 MXU rows on v6e/v7x)."""
    B, P, F = x.shape
    cpad = params["w3"].shape[1]

    bt = max(1, min(bt, B))
    n_blk = -(-B // bt)                 # cdiv
    b_pad = n_blk * bt
    if n_blk > 1 and bt % 8 != 0:
        raise ValueError("bt must be a multiple of 8 when B > bt")

    # Only per-step streamed tensor: cast to bf16 (halves DMA bytes) and
    # flatten bags*patches in the wrapper so the kernel needs no big reshape.
    xb = x.astype(jnp.bfloat16)
    if b_pad != B:
        xb = jnp.pad(xb, ((0, b_pad - B), (0, 0), (0, 0)))
    xb = xb.reshape(b_pad * P, F)

    kernel = functools.partial(clfnet_kernel, bt=bt, patches=P)
    out = pl.pallas_call(
        kernel,
        out_shape=jax.ShapeDtypeStruct((b_pad, cpad), jnp.float32),
        grid_spec=pltpu.PrefetchScalarGridSpec(
            num_scalar_prefetch=0,
            grid=(n_blk,),
            in_specs=[
                # Per-block flattened patch features; block index from the grid.
                pl.BlockSpec((bt * P, F), lambda b: (b, 0)),
                # Weights: constant block index -> DMA'd once, VMEM-resident.
                pl.BlockSpec(params["wfused"].shape, lambda b: (0, 0)),
                pl.BlockSpec(params["w2"].shape, lambda b: (0, 0)),
                pl.BlockSpec(params["w3"].shape, lambda b: (0, 0)),
                pl.BlockSpec(params["packed"].shape, lambda b: (0, 0)),
            ],
            out_specs=pl.BlockSpec((bt, cpad), lambda b: (b, 0)),
        ),
        compiler_params=pltpu.CompilerParams(
            dimension_semantics=("parallel",),   # shard bag blocks across TCs (v7x)
            # ~2.6 MB double-buffered blocks + ~2 MB intermediates, headroom.
            vmem_limit_bytes=12 * 1024 * 1024,
        ),
    )(xb, params["wfused"], params["w2"], params["w3"], params["packed"])
    return out[:B, :classes]  # slice lane-dense slab down to (B, classes)


def _reference(x, params, classes=2):
    """Pure-JAX reference mirroring the PyTorch forward per bag, in the
    ORIGINAL pool-then-project order (validates the Wv/W1 fusion algebra).
    Weights are the same bf16-valued tensors upcast to f32; x is quantized to
    bf16 (what the kernel streams) and all math runs in f32."""
    p = params["packed"]
    wf = params["wfused"].astype(jnp.float32)
    wv, w1 = wf[:, :INSIDE], wf[:, INSIDE:]
    w2 = params["w2"].astype(jnp.float32)
    w3 = params["w3"].astype(jnp.float32)
    bv, ww, bw = p[0:1, :], p[1:2, :], p[2:3, 0:1]
    b1, g1, be1 = p[3:4, :], p[4:5, :], p[5:6, :]
    b2, g2, be2 = p[6:7, :128], p[7:8, :128], p[8:9, :128]
    b3 = p[9:10, :CPAD]

    def one_bag(xb):  # xb: (P, F) f32
        xq = xb.astype(jnp.bfloat16).astype(jnp.float32)
        h = jnp.tanh(xq @ wv + bv)                               # (P, 256)
        att = jnp.sum((h * h) * ww, axis=-1, keepdims=True) + bw  # (P, 1)
        att = att - jnp.max(att, axis=0, keepdims=True)
        e = jnp.exp(att)
        w = e / jnp.sum(e, axis=0, keepdims=True)
        feat = jnp.sum(w * xq, axis=0, keepdims=True)            # (1, F)
        y = jnp.maximum(feat @ w1 + b1, 0.0)
        y = _layernorm(y, g1, be1)
        y = jnp.maximum(y @ w2 + b2, 0.0)
        y = _layernorm(y, g2, be2)
        return (y @ w3 + b3)[0]

    outs = jax.vmap(one_bag)(x)          # (B, CPAD)
    return outs[:, :classes]


if __name__ == "__main__":
    FEATURE_LENGTH = 768   # ClfNet default (MILNet featureLength)
    LINEAR_LENGTH = 256    # MILAttention featureInside
    CLASSES = 2
    B = 64                 # bags scored per call
    P = 8                  # patches per bag
    BT = 32                # bags per grid step -> BT*P = 256 MXU rows, 2 blocks

    key = jax.random.PRNGKey(0)
    k_x, k_p = jax.random.split(key)
    x = jax.random.normal(k_x, (B, P, FEATURE_LENGTH), jnp.float32)
    race = jnp.zeros((B,), jnp.int32)  # unused by the reference forward
    params = init_params(k_p, FEATURE_LENGTH, LINEAR_LENGTH, CLASSES)

    preds = clfnet_forward(x, race, params, classes=CLASSES, bt=BT)
    preds = jax.block_until_ready(preds)

    ref = _reference(x, params, classes=CLASSES)
    assert preds.shape == (B, CLASSES)
    assert jnp.allclose(preds, ref, atol=5e-3, rtol=5e-3), (preds, ref)

    print("KERNEL_OK")
</pallas_src>

<mosaic_0001>
module attributes {stable_mosaic.version = 11 : i64} {
  func.func @clfnet_kernel(%arg0: i32, %arg1: memref<256x768xbf16, #tpu.memory_space<vmem>>, %arg2: memref<768x512xbf16, #tpu.memory_space<vmem>>, %arg3: memref<256x128xbf16, #tpu.memory_space<vmem>>, %arg4: memref<128x128xbf16, #tpu.memory_space<vmem>>, %arg5: memref<10x256xf32, #tpu.memory_space<vmem>>, %arg6: memref<32x128xf32, #tpu.memory_space<vmem>>) attributes {dimension_semantics = [#tpu.dimension_semantics<parallel>], iteration_bounds = array<i64: 2>, scalar_prefetch = 0 : i64, scratch_operands = 0 : i64, tpu.core_type = #tpu.core_type<tc>, window_params = [{transform_indices = @transform_0, window_bounds = array<i64: 256, 768>}, {pipeline_mode = #tpu.pipeline_mode<synchronous>, transform_indices = @transform_1, window_bounds = array<i64: 768, 512>}, {pipeline_mode = #tpu.pipeline_mode<synchronous>, transform_indices = @transform_2, window_bounds = array<i64: 256, 128>}, {pipeline_mode = #tpu.pipeline_mode<synchronous>, transform_indices = @transform_3, window_bounds = array<i64: 128, 128>}, {pipeline_mode = #tpu.pipeline_mode<synchronous>, transform_indices = @transform_4, window_bounds = array<i64: 10, 256>}, {transform_indices = @transform_5, window_bounds = array<i64: 32, 128>}]} {
    %c0 = arith.constant 0 : index
    %c0_0 = arith.constant 0 : index
    %0 = vector.load %arg5[%c0, %c0_0] : memref<10x256xf32, #tpu.memory_space<vmem>>, vector<10x256xf32>
    %1 = vector.extract_strided_slice %0 {offsets = [0, 0], sizes = [1, 256], strides = [1, 1]} : vector<10x256xf32> to vector<1x256xf32>
    %2 = vector.extract_strided_slice %0 {offsets = [1, 0], sizes = [1, 256], strides = [1, 1]} : vector<10x256xf32> to vector<1x256xf32>
    %3 = vector.shape_cast %2 : vector<1x256xf32> to vector<1x1x256xf32>
    %4 = vector.extract_strided_slice %0 {offsets = [2, 0], sizes = [1, 1], strides = [1, 1]} : vector<10x256xf32> to vector<1x1xf32>
    %5 = vector.shape_cast %4 : vector<1x1xf32> to vector<1x1x1xf32>
    %6 = vector.extract_strided_slice %0 {offsets = [3, 0], sizes = [1, 256], strides = [1, 1]} : vector<10x256xf32> to vector<1x256xf32>
    %7 = vector.extract_strided_slice %0 {offsets = [4, 0], sizes = [1, 256], strides = [1, 1]} : vector<10x256xf32> to vector<1x256xf32>
    %8 = vector.extract_strided_slice %0 {offsets = [5, 0], sizes = [1, 256], strides = [1, 1]} : vector<10x256xf32> to vector<1x256xf32>
    %9 = vector.extract_strided_slice %0 {offsets = [6, 0], sizes = [1, 128], strides = [1, 1]} : vector<10x256xf32> to vector<1x128xf32>
    %10 = vector.extract_strided_slice %0 {offsets = [7, 0], sizes = [1, 128], strides = [1, 1]} : vector<10x256xf32> to vector<1x128xf32>
    %11 = vector.extract_strided_slice %0 {offsets = [8, 0], sizes = [1, 128], strides = [1, 1]} : vector<10x256xf32> to vector<1x128xf32>
    %12 = vector.extract_strided_slice %0 {offsets = [9, 0], sizes = [1, 128], strides = [1, 1]} : vector<10x256xf32> to vector<1x128xf32>
    %c0_1 = arith.constant 0 : index
    %c0_2 = arith.constant 0 : index
    %13 = vector.load %arg1[%c0_1, %c0_2] : memref<256x768xbf16, #tpu.memory_space<vmem>>, vector<256x768xbf16>
    %c0_3 = arith.constant 0 : index
    %c0_4 = arith.constant 0 : index
    %14 = vector.load %arg2[%c0_3, %c0_4] : memref<768x512xbf16, #tpu.memory_space<vmem>>, vector<768x512xbf16>
    %cst = arith.constant dense<0.000000e+00> : vector<256x512xf32>
    %15 = tpu.matmul %13, %14, %cst {dimension_numbers = #tpu.dot_dimension_numbers<[1], [0], [0], [1], [0, 0, 1, 1], [], []>} : vector<256x768xbf16>, vector<768x512xbf16>, vector<256x512xf32> -> vector<256x512xf32>
    %16 = vector.extract_strided_slice %15 {offsets = [0, 0], sizes = [256, 256], strides = [1, 1]} : vector<256x512xf32> to vector<256x256xf32>
    %17 = vector.broadcast %1 : vector<1x256xf32> to vector<256x256xf32>
    %18 = arith.addf %16, %17 : vector<256x256xf32>
    %19 = math.tanh %18 : vector<256x256xf32>
    %20 = vector.shape_cast %19 : vector<256x256xf32> to vector<32x8x256xf32>
    %21 = vector.extract_strided_slice %15 {offsets = [0, 256], sizes = [256, 256], strides = [1, 1]} : vector<256x512xf32> to vector<256x256xf32>
    %22 = vector.shape_cast %21 : vector<256x256xf32> to vector<32x8x256xf32>
    %23 = arith.mulf %20, %20 : vector<32x8x256xf32>
    %24 = vector.broadcast %3 : vector<1x1x256xf32> to vector<32x8x256xf32>
    %25 = arith.mulf %23, %24 : vector<32x8x256xf32>
    %cst_5 = arith.constant dense<0.000000e+00> : vector<32x8xf32>
    %26 = vector.multi_reduction <add>, %25, %cst_5 [2] : vector<32x8x256xf32> to vector<32x8xf32>
    %27 = vector.shape_cast %26 : vector<32x8xf32> to vector<32x8x1xf32>
    %28 = vector.broadcast %5 : vector<1x1x1xf32> to vector<32x8x1xf32>
    %29 = arith.addf %27, %28 : vector<32x8x1xf32>
    %cst_6 = arith.constant dense<0xFF800000> : vector<32x1xf32>
    %30 = vector.multi_reduction <maximumf>, %29, %cst_6 [1] : vector<32x8x1xf32> to vector<32x1xf32>
    %31 = vector.shape_cast %30 : vector<32x1xf32> to vector<32x1x1xf32>
    %32 = vector.broadcast %31 : vector<32x1x1xf32> to vector<32x8x1xf32>
    %33 = arith.subf %29, %32 : vector<32x8x1xf32>
    %34 = math.exp %33 : vector<32x8x1xf32>
    %cst_7 = arith.constant dense<0.000000e+00> : vector<32x1xf32>
    %35 = vector.multi_reduction <add>, %34, %cst_7 [1] : vector<32x8x1xf32> to vector<32x1xf32>
    %36 = vector.shape_cast %35 : vector<32x1xf32> to vector<32x1x1xf32>
    %37 = tpu.reciprocal %36 {approx = true} : vector<32x1x1xf32> -> vector<32x1x1xf32>
    %38 = vector.broadcast %37 : vector<32x1x1xf32> to vector<32x8x1xf32>
    %39 = arith.mulf %34, %38 : vector<32x8x1xf32>
    %40 = vector.broadcast %39 : vector<32x8x1xf32> to vector<32x8x256xf32>
    %41 = arith.mulf %40, %22 : vector<32x8x256xf32>
    %cst_8 = arith.constant dense<0.000000e+00> : vector<32x256xf32>
    %42 = vector.multi_reduction <add>, %41, %cst_8 [1] : vector<32x8x256xf32> to vector<32x256xf32>
    %43 = vector.broadcast %6 : vector<1x256xf32> to vector<32x256xf32>
    %44 = arith.addf %42, %43 : vector<32x256xf32>
    %cst_9 = arith.constant 0.000000e+00 : f32
    %45 = vector.broadcast %cst_9 : f32 to vector<32x256xf32>
    %46 = arith.maximumf %44, %45 : vector<32x256xf32>
    %cst_10 = arith.constant dense<0.000000e+00> : vector<32xf32>
    %47 = vector.multi_reduction <add>, %46, %cst_10 [1] : vector<32x256xf32> to vector<32xf32>
    %48 = vector.shape_cast %47 : vector<32xf32> to vector<32x1xf32>
    %cst_11 = arith.constant 2.560000e+02 : f32
    %49 = vector.broadcast %cst_11 : f32 to vector<32x1xf32>
    %50 = arith.divf %48, %49 : vector<32x1xf32>
    %51 = vector.broadcast %50 : vector<32x1xf32> to vector<32x256xf32>
    %52 = arith.subf %46, %51 : vector<32x256xf32>
    %53 = arith.mulf %52, %52 : vector<32x256xf32>
    %cst_12 = arith.constant dense<0.000000e+00> : vector<32xf32>
    %54 = vector.multi_reduction <add>, %53, %cst_12 [1] : vector<32x256xf32> to vector<32xf32>
    %55 = vector.shape_cast %54 : vector<32xf32> to vector<32x1xf32>
    %cst_13 = arith.constant 2.560000e+02 : f32
    %56 = vector.broadcast %cst_13 : f32 to vector<32x1xf32>
    %57 = arith.divf %55, %56 : vector<32x1xf32>
    %58 = vector.broadcast %50 : vector<32x1xf32> to vector<32x256xf32>
    %59 = arith.subf %46, %58 : vector<32x256xf32>
    %cst_14 = arith.constant 9.99999974E-6 : f32
    %60 = vector.broadcast %cst_14 : f32 to vector<32x1xf32>
    %61 = arith.addf %57, %60 : vector<32x1xf32>
    %62 = math.rsqrt %61 : vector<32x1xf32>
    %63 = vector.broadcast %62 : vector<32x1xf32> to vector<32x256xf32>
    %64 = arith.mulf %59, %63 : vector<32x256xf32>
    %65 = vector.broadcast %7 : vector<1x256xf32> to vector<32x256xf32>
    %66 = arith.mulf %64, %65 : vector<32x256xf32>
    %67 = vector.broadcast %8 : vector<1x256xf32> to vector<32x256xf32>
    %68 = arith.addf %66, %67 : vector<32x256xf32>
    %69 = arith.truncf %68 : vector<32x256xf32> to vector<32x256xbf16>
    %c0_15 = arith.constant 0 : index
    %c0_16 = arith.constant 0 : index
    %70 = vector.load %arg3[%c0_15, %c0_16] : memref<256x128xbf16, #tpu.memory_space<vmem>>, vector<256x128xbf16>
    %cst_17 = arith.constant dense<0.000000e+00> : vector<32x128xf32>
    %71 = tpu.matmul %69, %70, %cst_17 {dimension_numbers = #tpu.dot_dimension_numbers<[1], [0], [0], [1], [0, 0, 1, 1], [], []>} : vector<32x256xbf16>, vector<256x128xbf16>, vector<32x128xf32> -> vector<32x128xf32>
    %72 = vector.broadcast %9 : vector<1x128xf32> to vector<32x128xf32>
    %73 = arith.addf %71, %72 : vector<32x128xf32>
    %cst_18 = arith.constant 0.000000e+00 : f32
    %74 = vector.broadcast %cst_18 : f32 to vector<32x128xf32>
    %75 = arith.maximumf %73, %74 : vector<32x128xf32>
    %cst_19 = arith.constant dense<0.000000e+00> : vector<32xf32>
    %76 = vector.multi_reduction <add>, %75, %cst_19 [1] : vector<32x128xf32> to vector<32xf32>
    %77 = vector.shape_cast %76 : vector<32xf32> to vector<32x1xf32>
    %cst_20 = arith.constant 1.280000e+02 : f32
    %78 = vector.broadcast %cst_20 : f32 to vector<32x1xf32>
    %79 = arith.divf %77, %78 : vector<32x1xf32>
    %80 = vector.broadcast %79 : vector<32x1xf32> to vector<32x128xf32>
    %81 = arith.subf %75, %80 : vector<32x128xf32>
    %82 = arith.mulf %81, %81 : vector<32x128xf32>
    %cst_21 = arith.constant dense<0.000000e+00> : vector<32xf32>
    %83 = vector.multi_reduction <add>, %82, %cst_21 [1] : vector<32x128xf32> to vector<32xf32>
    %84 = vector.shape_cast %83 : vector<32xf32> to vector<32x1xf32>
    %cst_22 = arith.constant 1.280000e+02 : f32
    %85 = vector.broadcast %cst_22 : f32 to vector<32x1xf32>
    %86 = arith.divf %84, %85 : vector<32x1xf32>
    %87 = vector.broadcast %79 : vector<32x1xf32> to vector<32x128xf32>
    %88 = arith.subf %75, %87 : vector<32x128xf32>
    %cst_23 = arith.constant 9.99999974E-6 : f32
    %89 = vector.broadcast %cst_23 : f32 to vector<32x1xf32>
    %90 = arith.addf %86, %89 : vector<32x1xf32>
    %91 = math.rsqrt %90 : vector<32x1xf32>
    %92 = vector.broadcast %91 : vector<32x1xf32> to vector<32x128xf32>
    %93 = arith.mulf %88, %92 : vector<32x128xf32>
    %94 = vector.broadcast %10 : vector<1x128xf32> to vector<32x128xf32>
    %95 = arith.mulf %93, %94 : vector<32x128xf32>
    %96 = vector.broadcast %11 : vector<1x128xf32> to vector<32x128xf32>
    %97 = arith.addf %95, %96 : vector<32x128xf32>
    %98 = arith.truncf %97 : vector<32x128xf32> to vector<32x128xbf16>
    %c0_24 = arith.constant 0 : index
    %c0_25 = arith.constant 0 : index
    %99 = vector.load %arg4[%c0_24, %c0_25] : memref<128x128xbf16, #tpu.memory_space<vmem>>, vector<128x128xbf16>
    %cst_26 = arith.constant dense<0.000000e+00> : vector<32x128xf32>
    %100 = tpu.matmul %98, %99, %cst_26 {dimension_numbers = #tpu.dot_dimension_numbers<[1], [0], [0], [1], [0, 0, 1, 1], [], []>} : vector<32x128xbf16>, vector<128x128xbf16>, vector<32x128xf32> -> vector<32x128xf32>
    %101 = vector.broadcast %12 : vector<1x128xf32> to vector<32x128xf32>
    %102 = arith.addf %100, %101 : vector<32x128xf32>
    %c0_27 = arith.constant 0 : index
    %c0_28 = arith.constant 0 : index
    %103 = vector.load %arg6[%c0_27, %c0_28] : memref<32x128xf32, #tpu.memory_space<vmem>>, vector<32x128xf32>
    tpu.vector_store %arg6[%c0_27, %c0_28], %102 {strides = array<i32>} : memref<32x128xf32, #tpu.memory_space<vmem>>, vector<32x128xf32>,
    return
  }
  func.func @transform_0(%arg0: i32) -> (i32, i32) {
    %c0_i32 = arith.constant 0 : i32
    %c0_i32_0 = arith.constant 0 : i32
    return %arg0, %c0_i32 : i32, i32
  }
  func.func @transform_1(%arg0: i32) -> (i32, i32) {
    %c0_i32 = arith.constant 0 : i32
    %c0_i32_0 = arith.constant 0 : i32
    %c0_i32_1 = arith.constant 0 : i32
    return %c0_i32, %c0_i32_0 : i32, i32
  }
  func.func @transform_2(%arg0: i32) -> (i32, i32) {
    %c0_i32 = arith.constant 0 : i32
    %c0_i32_0 = arith.constant 0 : i32
    %c0_i32_1 = arith.constant 0 : i32
    return %c0_i32, %c0_i32_0 : i32, i32
  }
  func.func @transform_3(%arg0: i32) -> (i32, i32) {
    %c0_i32 = arith.constant 0 : i32
    %c0_i32_0 = arith.constant 0 : i32
    %c0_i32_1 = arith.constant 0 : i32
    return %c0_i32, %c0_i32_0 : i32, i32
  }
  func.func @transform_4(%arg0: i32) -> (i32, i32) {
    %c0_i32 = arith.constant 0 : i32
    %c0_i32_0 = arith.constant 0 : i32
    %c0_i32_1 = arith.constant 0 : i32
    return %c0_i32, %c0_i32_0 : i32, i32
  }
  func.func @transform_5(%arg0: i32) -> (i32, i32) {
    %c0_i32 = arith.constant 0 : i32
    %c0_i32_0 = arith.constant 0 : i32
    return %arg0, %c0_i32 : i32, i32
  }
}

</mosaic_0001>

<bundles_post_ra>
// kernel: clfnet_forward.1
= control target key start
LH: loop header
LB: loop body
LE: loop exit
PB: predicated region body
PF: predicated region fallthrough
CT: control target
= control target key end

     0   :  { %s9386_s18 = smov 0   ;;  %s14133_s0 = inlined_call_operand.vmem [shape: bf16[512,768], index: 0, kind: input, shape index: {}]   ;;  %s14134_s1 = inlined_call_operand.vmem [shape: bf16[768,512], index: 1, kind: input, shape index: {}]   ;;  %s14135_s2 = inlined_call_operand.vmem [shape: bf16[256,128], index: 2, kind: input, shape index: {}]   ;;  %s14136_s3 = inlined_call_operand.vmem [shape: bf16[128,128], index: 3, kind: input, shape index: {}]   ;;  %s14137_s4 = inlined_call_operand.vmem [shape: f32[10,256], index: 4, kind: input, shape index: {}]   ;;  %s14138_s5 = inlined_call_operand.vmem [shape: f32[64,128], index: 5, kind: output, shape index: {}]  }
   0x1 LB: > { %s7470_s19 = sadd.s32 4294967295, %s9351_s18   ;;  %p7474_p0 = scmp.ge.s32.totalorder %s9351_s18, 1  ;;  %s9351_s18 = sphi %s9386_s18, %s15_s18  }
   0x2   : > { %p189_p1 = scmp.lt.s32.totalorder %s9351_s18, 3 }
   0x4   : > { %p190_p2 = pnand %p7474_p0, %p189_p1 }
   0x6   : > { %193 = sbr.rel (%p190_p2) target bundleno = 2609 (0xa31), region = 40 }
   0xb   : > { %v7977_v0 = vld [vmem:[%s14134_s1 + $0xe0] sm:$0xf]  ;;  %v8855_v1 = vld [vmem:[%s14134_s1 + $0xec] sm:$0xf0]  ;;  %s7475_s11 = sshll.u32 %s7470_s19, 5  ;;  %vm4487_vm0 = vcmask 7168  }
   0xc   : > { %v8105_v2 = vld [vmem:[%s14134_s1 + $0x1e0] sm:$0xf]  ;;  %v7978_v3 = vor.u32 %v8855_v1, %v7977_v0  ;;  %v8887_v4 = vld [vmem:[%s14134_s1 + $0x1ec] sm:$0xf0]  ;;  %p219_p3 = scmp.lt.s32.totalorder %s7475_s11, 63  ;;  %vm5899_vm1 = vcmask 1041409  }
   0xd   : > { %v8233_v5 = vld [vmem:[%s14134_s1 + $0x2e0] sm:$0xf]  ;;  %v8919_v6 = vld [vmem:[%s14134_s1 + $0x2ec] sm:$0xf0]  ;;  %v8106_v7 = vor.u32 %v8887_v4, %v8105_v2  ;;  %vm5902_vm2 = vcmask 1042434   ;;  %vm5905_vm3 = vcmask 1043459  }
   0xe   : > { %v8234_v8 = vor.u32 %v8919_v6, %v8233_v5  ;;  %v8361_v9 = vld [vmem:[%s14134_s1 + $0x3e0] sm:$0xf]  ;;  %v8951_v10 = vld [vmem:[%s14134_s1 + $0x3ec] sm:$0xf0]  ;;  %1962 = vmatpush.bf16.msra.mxu0 %v7978_v3  ;;  %s15218_s11 = smov (!%p219_p3, %s7475_s11), 63  ;;  %vm5908_vm4 = vcmask 1044484  }
   0xf   : > { %v7961_v11 = vld [vmem:[%s14134_s1 + $0xc0] sm:$0xf]  ;;  %v8362_v12 = vor.u32 %v8951_v10, %v8361_v9  ;;  %v8851_v13 = vld [vmem:[%s14134_s1 + $0xcc] sm:$0xf0]  ;;  %2051 = vmatpush.bf16.msra.mxu1 %v8106_v7  ;;  %s9049_s9 = smul.u32 24, %s15218_s11  ;;  %vm5911_vm5 = vcmask 1045509  }
  0x10   : > { %v8089_v14 = vld [vmem:[%s14134_s1 + $0x1c0] sm:$0xf]  ;;  %v8883_v15 = vld [vmem:[%s14134_s1 + $0x1cc] sm:$0xf0]  ;;  %2140 = vmatpush.bf16.msra.mxu2 %v8234_v8  ;;  %v7962_v16 = vor.u32 %v8851_v13, %v7961_v11  ;;  %vm5914_vm6 = vcmask 1046534   ;;  %vm5917_vm7 = vcmask 1047559  }
  0x11   : > { %v8090_v17 = vor.u32 %v8883_v15, %v8089_v14  ;;  %v8217_v18 = vld [vmem:[%s14134_s1 + $0x2c0] sm:$0xf]  ;;  %v8915_v19 = vld [vmem:[%s14134_s1 + $0x2cc] sm:$0xf0]  ;;  %2229 = vmatpush.bf16.msra.mxu3 %v8362_v12  ;;  %s9606_s24 = scalar_lea.vmem %s14133_s0, %s9049_s9  ;;  %s7477_s15 = sshll.u32 %s7470_s19, 2 }
  0x12   : > { %v8345_v20 = vld [vmem:[%s14134_s1 + $0x3c0] sm:$0xf]  ;;  %v8218_v21 = vor.u32 %v8915_v19, %v8217_v18  ;;  %v8947_v22 = vld [vmem:[%s14134_s1 + $0x3cc] sm:$0xf0]  ;;  %1963 = vmatpush.bf16.msra.mxu0 %v7962_v16  ;;  %p226_p4 = scmp.lt.s32.totalorder %s7477_s15, 7 }
  0x13   : > { %v7945_v23 = vld [vmem:[%s14134_s1 + $0xa0] sm:$0xf]  ;;  %v8847_v24 = vld [vmem:[%s14134_s1 + $0xac] sm:$0xf0]  ;;  %v8346_v25 = vor.u32 %v8947_v22, %v8345_v20  ;;  %2052 = vmatpush.bf16.msra.mxu1 %v8090_v17 }
  0x14   : > { %v8073_v26 = vld [vmem:[%s14134_s1 + $0x1a0] sm:$0xf]  ;;  %v8879_v27 = vld [vmem:[%s14134_s1 + $0x1ac] sm:$0xf0]  ;;  %v7946_v29 = vor.u32 %v8847_v24, %v7945_v23  ;;  %2141 = vmatpush.bf16.msra.mxu2 %v8218_v21  ;;  %s15220_s15 = smov (!%p226_p4, %s7477_s15), 7 }
  0x15   : > { %v8201_v28 = vld [vmem:[%s14134_s1 + $0x2a0] sm:$0xf]  ;;  %v8911_v30 = vld [vmem:[%s14134_s1 + $0x2ac] sm:$0xf0]  ;;  %v8074_v33 = vor.u32 %v8879_v27, %v8073_v26  ;;  %2230 = vmatpush.bf16.msra.mxu3 %v8346_v25  ;;  %s7478_s16 = sshll.u32 %s15220_s15, 3 }
  0x16   : > { %v8329_v31 = vld [vmem:[%s14134_s1 + $0x3a0] sm:$0xf]  ;;  %v8943_v32 = vld [vmem:[%s14134_s1 + $0x3ac] sm:$0xf0]  ;;  %v8202_v34 = vor.u32 %v8911_v30, %v8201_v28  ;;  %1964 = vmatpush.bf16.msra.mxu0 %v7946_v29  ;;  %v8853_v28 = vld [vmem:[%s14134_s1 + $0xe4] sm:$0xf]  ;;  %s229_s21 = scalar_lea.vmem %s14138_s5, %s7478_s16 }
  0x17   : > { %v7929_v35 = vld [vmem:[%s14134_s1 + $0x80] sm:$0xf]  ;;  %v8843_v36 = vld [vmem:[%s14134_s1 + $0x8c] sm:$0xf0]  ;;  %v8330_v38 = vor.u32 %v8943_v32, %v8329_v31  ;;  %2053 = vmatpush.bf16.msra.mxu1 %v8074_v33  ;;  %v7979_v29 = vld [vmem:[%s14134_s1 + $0xf0] sm:$0xf0] }
  0x18   : > { %v8057_v37 = vld [vmem:[%s14134_s1 + $0x180] sm:$0xf]  ;;  %v8875_v39 = vld [vmem:[%s14134_s1 + $0x18c] sm:$0xf0]  ;;  %v7930_v44 = vor.u32 %v8843_v36, %v7929_v35  ;;  %2142 = vmatpush.bf16.msra.mxu2 %v8202_v34  ;;  %v8885_v32 = vld [vmem:[%s14134_s1 + $0x1e4] sm:$0xf] }
  0x19   : > { %v8185_v40 = vld [vmem:[%s14134_s1 + $0x280] sm:$0xf]  ;;  %v8907_v41 = vld [vmem:[%s14134_s1 + $0x28c] sm:$0xf0]  ;;  %v8058_v45 = vor.u32 %v8875_v39, %v8057_v37  ;;  %2231 = vmatpush.bf16.msra.mxu3 %v8330_v38  ;;  %v8107_v33 = vld [vmem:[%s14134_s1 + $0x1f0] sm:$0xf0] }
  0x1a   : > { %v8313_v42 = vld [vmem:[%s14134_s1 + $0x380] sm:$0xf]  ;;  %v8939_v43 = vld [vmem:[%s14134_s1 + $0x38c] sm:$0xf0]  ;;  %v8186_v46 = vor.u32 %v8907_v41, %v8185_v40  ;;  %1965 = vmatpush.bf16.msra.mxu0 %v7930_v44  ;;  %v8732_v41 = vld [vmem:[%s9606_s24 + $0x14] sm:$0xf0] }
  0x1b   : > { %v7913_v47 = vld [vmem:[%s14134_s1 + $0x60] sm:$0xf]  ;;  %v8839_v48 = vld [vmem:[%s14134_s1 + $0x6c] sm:$0xf0]  ;;  %v8314_v50 = vor.u32 %v8939_v43, %v8313_v42  ;;  %2054 = vmatpush.bf16.msra.mxu1 %v8058_v45  ;;  %v8729_v42 = vld [vmem:[%s9606_s24 + $0x4] sm:$0xf]  ;;  %v7982_v43 = vor.u32 %v8853_v28, %v7979_v29 }
  0x1c   : > { %v8041_v49 = vld [vmem:[%s14134_s1 + $0x160] sm:$0xf]  ;;  %v8871_v51 = vld [vmem:[%s14134_s1 + $0x16c] sm:$0xf0]  ;;  %v7914_v56 = vor.u32 %v8839_v48, %v7913_v47  ;;  %2143 = vmatpush.bf16.msra.mxu2 %v8186_v46  ;;  %v7483_v45 = vld [vmem:[%s9606_s24 + $0x18] sm:$0xf0]  ;;  %v8110_v48 = vor.u32 %v8885_v32, %v8107_v33 }
  0x1d   : > { %v8169_v52 = vld [vmem:[%s14134_s1 + $0x260] sm:$0xf]  ;;  %v8903_v53 = vld [vmem:[%s14134_s1 + $0x26c] sm:$0xf0]  ;;  %v8042_v57 = vor.u32 %v8871_v51, %v8041_v49  ;;  %2232 = vmatpush.bf16.msra.mxu3 %v8314_v50  ;;  %v7489_v46 = vld [vmem:[%s9606_s24 + $0x8] sm:$0xf]  ;;  %v9625_v49 = vor.u32 %v8729_v42, %v7483_v45 }
  0x1e   : > { %v8297_v54 = vld [vmem:[%s14134_s1 + $0x360] sm:$0xf]  ;;  %v8935_v55 = vld [vmem:[%s14134_s1 + $0x36c] sm:$0xf0]  ;;  %v8170_v58 = vor.u32 %v8903_v53, %v8169_v52  ;;  %1966 = vmatpush.bf16.msra.mxu0 %v7914_v56  ;;  %v8730_v51 = vld [vmem:[%s9606_s24 + $0xc] sm:$0xf] }
  0x1f   : > { %v7897_v59 = vld [vmem:[%s14134_s1 + $0x40] sm:$0xf]  ;;  %v8835_v60 = vld [vmem:[%s14134_s1 + $0x4c] sm:$0xf0]  ;;  %v8298_v62 = vor.u32 %v8935_v55, %v8297_v54  ;;  %2055 = vmatpush.bf16.msra.mxu1 %v8042_v57  ;;  %14490 = vst [vmem:[#allocation3_spill] sm:$0xff] %v9625_v49 }
  0x20   : > { %v8025_v61 = vld [vmem:[%s14134_s1 + $0x140] sm:$0xf]  ;;  %v8867_v63 = vld [vmem:[%s14134_s1 + $0x14c] sm:$0xf0]  ;;  %v7898_v4 = vor.u32 %v8835_v60, %v7897_v59  ;;  %2144 = vmatpush.bf16.msra.mxu2 %v8170_v58  ;;  %v7491_v52 = vld [vmem:[%s9606_s24 + $0x20] sm:$0xf0] }
  0x21   : > { %v8153_v0 = vld [vmem:[%s14134_s1 + $0x240] sm:$0xf]  ;;  %v8899_v1 = vld [vmem:[%s14134_s1 + $0x24c] sm:$0xf0]  ;;  %v8026_v6 = vor.u32 %v8867_v63, %v8025_v61  ;;  %2233 = vmatpush.bf16.msra.mxu3 %v8298_v62  ;;  %v9631_v53 = vor.u32 %v8730_v51, %v7491_v52  ;;  %v8849_v56 = vld [vmem:[%s14134_s1 + $0xc4] sm:$0xf] }
  0x22   : > { %v8281_v2 = vld [vmem:[%s14134_s1 + $0x340] sm:$0xf]  ;;  %v8931_v3 = vld [vmem:[%s14134_s1 + $0x34c] sm:$0xf0]  ;;  %v8154_v7 = vor.u32 %v8899_v1, %v8153_v0  ;;  %1967 = vmatpush.bf16.msra.mxu0 %v7898_v4  ;;  %v7963_v57 = vld [vmem:[%s14134_s1 + $0xd0] sm:$0xf0] }
  0x23   : > { %v7881_v5 = vld [vmem:[%s14134_s1 + $0x20] sm:$0xf]  ;;  %v8831_v8 = vld [vmem:[%s14134_s1 + $0x2c] sm:$0xf0]  ;;  %v8282_v11 = vor.u32 %v8931_v3, %v8281_v2  ;;  %2056 = vmatpush.bf16.msra.mxu1 %v8026_v6  ;;  %14492 = vst [vmem:[#allocation5_spill] sm:$0xff] %v9631_v53  ;;  %v7966_v59 = vor.u32 %v8849_v56, %v7963_v57 }
  0x24   : > { %v8009_v9 = vld [vmem:[%s14134_s1 + $0x120] sm:$0xf]  ;;  %v8863_v10 = vld [vmem:[%s14134_s1 + $0x12c] sm:$0xf0]  ;;  %v7882_v16 = vor.u32 %v8831_v8, %v7881_v5  ;;  %2145 = vmatpush.bf16.msra.mxu2 %v8154_v7  ;;  %v8881_v61 = vld [vmem:[%s14134_s1 + $0x1c4] sm:$0xf] }
  0x25   : > { %v8137_v12 = vld [vmem:[%s14134_s1 + $0x220] sm:$0xf]  ;;  %v8895_v13 = vld [vmem:[%s14134_s1 + $0x22c] sm:$0xf0]  ;;  %v8010_v20 = vor.u32 %v8863_v10, %v8009_v9  ;;  %2234 = vmatpush.bf16.msra.mxu3 %v8282_v11  ;;  %v8091_v62 = vld [vmem:[%s14134_s1 + $0x1d0] sm:$0xf0] }
  0x26   : > { %v8265_v14 = vld [vmem:[%s14134_s1 + $0x320] sm:$0xf]  ;;  %v8927_v15 = vld [vmem:[%s14134_s1 + $0x32c] sm:$0xf0]  ;;  %v8138_v21 = vor.u32 %v8895_v13, %v8137_v12  ;;  %1968 = vmatpush.bf16.msra.mxu0 %v7882_v16  ;;  %v8094_v0 = vor.u32 %v8881_v61, %v8091_v62  ;;  %v8738_v5 = vld [vmem:[%s9606_s24 + $0x44] sm:$0xf0] }
  0x27   : > { %v7865_v17 = vld [vmem:[%s14134_s1] sm:$0xf]  ;;  %v8827_v18 = vld [vmem:[%s14134_s1 + $0xc] sm:$0xf0]  ;;  %v8266_v24 = vor.u32 %v8927_v15, %v8265_v14  ;;  %2057 = vmatpush.bf16.msra.mxu1 %v8010_v20  ;;  %v8735_v6 = vld [vmem:[%s9606_s24 + $0x34] sm:$0xf] }
  0x28   : > { %v7993_v19 = vld [vmem:[%s14134_s1 + $0x100] sm:$0xf]  ;;  %v8859_v22 = vld [vmem:[%s14134_s1 + $0x10c] sm:$0xf0]  ;;  %v7866_v30 = vor.u32 %v8827_v18, %v7865_v17  ;;  %2146 = vmatpush.bf16.msra.mxu2 %v8138_v21  ;;  %v7507_v7 = vld [vmem:[%s9606_s24 + $0x48] sm:$0xf0] }
  0x29   : > { %v8121_v23 = vld [vmem:[%s14134_s1 + $0x200] sm:$0xf]  ;;  %v8891_v25 = vld [vmem:[%s14134_s1 + $0x20c] sm:$0xf0]  ;;  %v7994_v34 = vor.u32 %v8859_v22, %v7993_v19  ;;  %2235 = vmatpush.bf16.msra.mxu3 %v8266_v24  ;;  %v7513_v8 = vld [vmem:[%s9606_s24 + $0x38] sm:$0xf]  ;;  %v9671_v13 = vor.u32 %v8735_v6, %v7507_v7 }
  0x2a   : > { %v8249_v26 = vld [vmem:[%s14134_s1 + $0x300] sm:$0xf]  ;;  %v8923_v27 = vld [vmem:[%s14134_s1 + $0x30c] sm:$0xf0]  ;;  %v8122_v35 = vor.u32 %v8891_v25, %v8121_v23  ;;  %1969 = vmatpush.bf16.msra.mxu0 %v7866_v30  ;;  %v8736_v10 = vld [vmem:[%s9606_s24 + $0x3c] sm:$0xf] }
  0x2b   : > { %v8489_v31 = vld [vmem:[%s14134_s1 + $0x4e0] sm:$0xf]  ;;  %v8983_v36 = vld [vmem:[%s14134_s1 + $0x4ec] sm:$0xf0]  ;;  %v8250_v39 = vor.u32 %v8923_v27, %v8249_v26  ;;  %2058 = vmatpush.bf16.msra.mxu1 %v7994_v34  ;;  %v7515_v11 = vld [vmem:[%s9606_s24 + $0x50] sm:$0xf0] }
  0x2c   : > { %v8617_v37 = vld [vmem:[%s14134_s1 + $0x5e0] sm:$0xf]  ;;  %v9015_v38 = vld [vmem:[%s14134_s1 + $0x5ec] sm:$0xf0]  ;;  %2147 = vmatpush.bf16.msra.mxu2 %v8122_v35  ;;  %v8490_v54 = vor.u32 %v8983_v36, %v8489_v31  ;;  %14494 = vst [vmem:[#allocation7_spill] sm:$0xff] %v9671_v13  ;;  %v9675_v15 = vor.u32 %v8736_v10, %v7515_v11 }
  0x2d   : > { %v7481_v40 = vld [vmem:[%s9606_s24] sm:$0xf]  ;;  %2236 = vmatpush.bf16.msra.mxu3 %v8250_v39  ;;  %v8618_v55 = vor.u32 %v9015_v38, %v8617_v37  ;;  %v8979_v60 = vld [vmem:[%s14134_s1 + $0x4cc] sm:$0xf0]  ;;  %v8744_v17 = vld [vmem:[%s9606_s24 + $0x74] sm:$0xf0] }
  0x2e   : > { %v9620_v44 = vor.u32 %v8732_v41, %v7481_v40  ;;  %v8733_v47 = vld [vmem:[%s9606_s24 + $0x1c] sm:$0xf0]  ;;  %2059 = vmatmul.bf16.vlgmr.msra.gmra.mxu1 %v9625_v49  ;;  %2318 = vmatpush.bf16.msrb.mxu0 %v8490_v54  ;;  %v9011_v2 = vld [vmem:[%s14134_s1 + $0x5cc] sm:$0xf0]  ;;  %14496 = vst [vmem:[#allocation9_spill] sm:$0xff] %v9675_v15 }
  0x2f   : > { %v9627_v50 = vor.u32 %v8733_v47, %v7489_v46  ;;  %2407 = vmatpush.bf16.msrb.mxu1 %v8618_v55  ;;  %v8473_v58 = vld [vmem:[%s14134_s1 + $0x4c0] sm:$0xf]  ;;  %v7505_v4 = vld [vmem:[%s9606_s24 + $0x30] sm:$0xf]  ;;  %v8741_v18 = vld [vmem:[%s9606_s24 + $0x64] sm:$0xf] }
  0x30   : > { %14489 = vst [vmem:[#allocation2_spill] sm:$0xff] %v9620_v44  ;;  %2496 = vmatpush.bf16.msrb.mxu2 %v7982_v43  ;;  %1970 = vmatmul.bf16.vlgmr.msra.gmra.mxu0 %v9620_v44  ;;  %v8474_v63 = vor.u32 %v8979_v60, %v8473_v58  ;;  %v8601_v1 = vld [vmem:[%s14134_s1 + $0x5c0] sm:$0xf]  ;;  %v8739_v9 = vld [vmem:[%s9606_s24 + $0x4c] sm:$0xf0]  ;;  %v9669_v12 = vor.u32 %v8738_v5, %v7505_v4 }
  0x31   : > { %14491 = vst [vmem:[#allocation4_spill] sm:$0xff] %v9627_v50  ;;  %2585 = vmatpush.bf16.msrb.mxu3 %v8110_v48  ;;  %2148 = vmatmul.bf16.vlgmr.msra.gmra.mxu2 %v9627_v50  ;;  %v8602_v3 = vor.u32 %v9011_v2, %v8601_v1  ;;  %v9673_v14 = vor.u32 %v8739_v9, %v7513_v8  ;;  %v7529_v16 = vld [vmem:[%s9606_s24 + $0x60] sm:$0xf]  ;;  %v7531_v19 = vld [vmem:[%s9606_s24 + $0x78] sm:$0xf0] }
  0x32   : > { %2237 = vmatmul.bf16.vlgmr.msra.gmra.mxu3 %v9631_v53  ;;  %2319 = vmatpush.bf16.msrb.mxu0 %v8474_v63  ;;  %14493 = vst [vmem:[#allocation6_spill] sm:$0xff] %v9669_v12  ;;  %v7537_v20 = vld [vmem:[%s9606_s24 + $0x68] sm:$0xf]  ;;  %v8745_v21 = vld [vmem:[%s9606_s24 + $0x7c] sm:$0xf0]  ;;  %v9689_v24 = vor.u32 %v8744_v17, %v7529_v16  ;;  %v9691_v25 = vor.u32 %v8741_v18, %v7531_v19 }
  0x33   : > { %2408 = vmatpush.bf16.msrb.mxu1 %v8602_v3  ;;  %14495 = vst [vmem:[#allocation8_spill] sm:$0xff] %v9673_v14  ;;  %v8742_v22 = vld [vmem:[%s9606_s24 + $0x6c] sm:$0xf]  ;;  %v7539_v23 = vld [vmem:[%s9606_s24 + $0x80] sm:$0xf0]  ;;  %v9693_v26 = vor.u32 %v8745_v21, %v7537_v20 }
  0x34   : > { %2497 = vmatpush.bf16.msrb.mxu2 %v7966_v59  ;;  %14497 = vst [vmem:[#allocation10_spill] sm:$0xff] %v9689_v24  ;;  %v9695_v27 = vor.u32 %v8742_v22, %v7539_v23  ;;  %v8845_v28 = vld [vmem:[%s14134_s1 + $0xa4] sm:$0xf]  ;;  %v7947_v29 = vld [vmem:[%s14134_s1 + $0xb0] sm:$0xf0] }
  0x35   : > { %2586 = vmatpush.bf16.msrb.mxu3 %v8094_v0  ;;  %14498 = vst [vmem:[#allocation11_spill] sm:$0xff] %v9691_v25  ;;  %v8457_v30 = vld [vmem:[%s14134_s1 + $0x4a0] sm:$0xf]  ;;  %v7950_v31 = vor.u32 %v8845_v28, %v7947_v29  ;;  %v8975_v32 = vld [vmem:[%s14134_s1 + $0x4ac] sm:$0xf0] }
  0x36   : > { %14499 = vst [vmem:[#allocation12_spill] sm:$0xff] %v9693_v26  ;;  %v8877_v33 = vld [vmem:[%s14134_s1 + $0x1a4] sm:$0xf]  ;;  %v8075_v34 = vld [vmem:[%s14134_s1 + $0x1b0] sm:$0xf0]  ;;  %v8458_v35 = vor.u32 %v8975_v32, %v8457_v30 }
  0x37   : > { %14500 = vst [vmem:[#allocation13_spill] sm:$0xff] %v9695_v27  ;;  %v8078_v36 = vor.u32 %v8877_v33, %v8075_v34  ;;  %v8585_v37 = vld [vmem:[%s14134_s1 + $0x5a0] sm:$0xf]  ;;  %v9007_v38 = vld [vmem:[%s14134_s1 + $0x5ac] sm:$0xf0] }
  0x38   : > { %2498 = vmatpush.bf16.msrb.mxu2 %v7950_v31  ;;  %v8586_v39 = vor.u32 %v9007_v38, %v8585_v37  ;;  %2320 = vmatpush.bf16.msrb.mxu0 %v8458_v35  ;;  %v7553_v40 = vld [vmem:[%s9606_s24 + $0x90] sm:$0xf]  ;;  %v8750_v41 = vld [vmem:[%s9606_s24 + $0xa4] sm:$0xf0]  ;;  %v8747_v42 = vld [vmem:[%s9606_s24 + $0x94] sm:$0xf] }
  0x39   : > { %2587 = vmatpush.bf16.msrb.mxu3 %v8078_v36  ;;  %v7555_v43 = vld [vmem:[%s9606_s24 + $0xa8] sm:$0xf0]  ;;  %v7561_v45 = vld [vmem:[%s9606_s24 + $0x98] sm:$0xf]  ;;  %v8751_v46 = vld [vmem:[%s9606_s24 + $0xac] sm:$0xf0]  ;;  %v9733_v51 = vor.u32 %v8750_v41, %v7553_v40 }
  0x3a   : > { %2409 = vmatpush.bf16.msrb.mxu1 %v8586_v39  ;;  %v8748_v47 = vld [vmem:[%s9606_s24 + $0x9c] sm:$0xf]  ;;  %v7563_v48 = vld [vmem:[%s9606_s24 + $0xb0] sm:$0xf0]  ;;  %v9735_v52 = vor.u32 %v8747_v42, %v7555_v43  ;;  %v9737_v54 = vor.u32 %v8751_v46, %v7561_v45  ;;  %v7577_v56 = vld [vmem:[%s9606_s24 + $0xc0] sm:$0xf] }
  0x3b   : > { %14501 = vst [vmem:[#allocation14_spill] sm:$0xff] %v9733_v51  ;;  %v9739_v55 = vor.u32 %v8748_v47, %v7563_v48  ;;  %v8756_v57 = vld [vmem:[%s9606_s24 + $0xd4] sm:$0xf0]  ;;  %v8753_v58 = vld [vmem:[%s9606_s24 + $0xc4] sm:$0xf] }
  0x3c   : > { %14502 = vst [vmem:[#allocation15_spill] sm:$0xff] %v9735_v52  ;;  %v7579_v59 = vld [vmem:[%s9606_s24 + $0xd8] sm:$0xf0]  ;;  %v7585_v60 = vld [vmem:[%s9606_s24 + $0xc8] sm:$0xf]  ;;  %v9753_v0 = vor.u32 %v8756_v57, %v7577_v56 }
  0x3d   : > { %14503 = vst [vmem:[#allocation16_spill] sm:$0xff] %v9737_v54  ;;  %v8757_v61 = vld [vmem:[%s9606_s24 + $0xdc] sm:$0xf0]  ;;  %v8754_v62 = vld [vmem:[%s9606_s24 + $0xcc] sm:$0xf]  ;;  %v9755_v1 = vor.u32 %v8753_v58, %v7579_v59 }
  0x3e   : > { %2064 = vmatmul.bf16.gmra.mxu1 %v9671_v13  ;;  %14504 = vst [vmem:[#allocation17_spill] sm:$0xff] %v9739_v55  ;;  %v7587_v63 = vld [vmem:[%s9606_s24 + $0xe0] sm:$0xf0]  ;;  %v9757_v2 = vor.u32 %v8757_v61, %v7585_v60  ;;  %v7931_v5 = vld [vmem:[%s14134_s1 + $0x90] sm:$0xf0] }
  0x3f   : > { %14505 = vst [vmem:[#allocation18_spill] sm:$0xff] %v9753_v0  ;;  %v9759_v3 = vor.u32 %v8754_v62, %v7587_v63  ;;  %v8841_v4 = vld [vmem:[%s14134_s1 + $0x84] sm:$0xf]  ;;  %v8441_v6 = vld [vmem:[%s14134_s1 + $0x480] sm:$0xf] }
  0x40   : > { %1975 = vmatmul.bf16.gmra.mxu0 %v9669_v12  ;;  %14506 = vst [vmem:[#allocation19_spill] sm:$0xff] %v9755_v1  ;;  %v7934_v7 = vor.u32 %v8841_v4, %v7931_v5  ;;  %v8971_v8 = vld [vmem:[%s14134_s1 + $0x48c] sm:$0xf0]  ;;  %v8873_v9 = vld [vmem:[%s14134_s1 + $0x184] sm:$0xf] }
  0x41   : > { %2153 = vmatmul.bf16.gmra.mxu2 %v9673_v14  ;;  %14507 = vst [vmem:[#allocation20_spill] sm:$0xff] %v9757_v2  ;;  %v8059_v10 = vld [vmem:[%s14134_s1 + $0x190] sm:$0xf0]  ;;  %v8442_v11 = vor.u32 %v8971_v8, %v8441_v6  ;;  %v8569_v17 = vld [vmem:[%s14134_s1 + $0x580] sm:$0xf] }
  0x42   : > { %2242 = vmatmul.bf16.gmra.mxu3 %v9675_v15  ;;  %14508 = vst [vmem:[#allocation21_spill] sm:$0xff] %v9759_v3  ;;  %v8062_v16 = vor.u32 %v8873_v9, %v8059_v10  ;;  %v9003_v18 = vld [vmem:[%s14134_s1 + $0x58c] sm:$0xf0]  ;;  %2499 = vmatpush.bf16.msrb.mxu2 %v7934_v7  ;;  %v8762_v21 = vld [vmem:[%s9606_s24 + $0x104] sm:$0xf0] }
  0x43   : > { %v8570_v19 = vor.u32 %v9003_v18, %v8569_v17  ;;  %2321 = vmatpush.bf16.msrb.mxu0 %v8442_v11  ;;  %v7601_v20 = vld [vmem:[%s9606_s24 + $0xf0] sm:$0xf]  ;;  %v8759_v22 = vld [vmem:[%s9606_s24 + $0xf4] sm:$0xf]  ;;  %v7603_v23 = vld [vmem:[%s9606_s24 + $0x108] sm:$0xf0] }
  0x44   : > { %2588 = vmatpush.bf16.msrb.mxu3 %v8062_v16  ;;  %v7609_v28 = vld [vmem:[%s9606_s24 + $0xf8] sm:$0xf]  ;;  %v8763_v29 = vld [vmem:[%s9606_s24 + $0x10c] sm:$0xf0]  ;;  %v8760_v30 = vld [vmem:[%s9606_s24 + $0xfc] sm:$0xf]  ;;  %v9797_v32 = vor.u32 %v8762_v21, %v7601_v20  ;;  %v9799_v33 = vor.u32 %v8759_v22, %v7603_v23 }
  0x45   : > { %2410 = vmatpush.bf16.msrb.mxu1 %v8570_v19  ;;  %v7611_v31 = vld [vmem:[%s9606_s24 + $0x110] sm:$0xf0]  ;;  %v9801_v34 = vor.u32 %v8763_v29, %v7609_v28  ;;  %v7625_v36 = vld [vmem:[%s9606_s24 + $0x120] sm:$0xf]  ;;  %v8768_v37 = vld [vmem:[%s9606_s24 + $0x134] sm:$0xf0] }
  0x46   : > { %14509 = vst [vmem:[#allocation22_spill] sm:$0xff] %v9797_v32  ;;  %v9803_v35 = vor.u32 %v8760_v30, %v7611_v31  ;;  %v8765_v38 = vld [vmem:[%s9606_s24 + $0x124] sm:$0xf]  ;;  %v7627_v39 = vld [vmem:[%s9606_s24 + $0x138] sm:$0xf0]  ;;  %v9817_v45 = vor.u32 %v8768_v37, %v7625_v36 }
  0x47   : > { %14510 = vst [vmem:[#allocation23_spill] sm:$0xff] %v9799_v33  ;;  %v7633_v40 = vld [vmem:[%s9606_s24 + $0x128] sm:$0xf]  ;;  %v8769_v41 = vld [vmem:[%s9606_s24 + $0x13c] sm:$0xf0]  ;;  %v9819_v46 = vor.u32 %v8765_v38, %v7627_v39 }
  0x48   : > { %14511 = vst [vmem:[#allocation24_spill] sm:$0xff] %v9801_v34  ;;  %v8766_v42 = vld [vmem:[%s9606_s24 + $0x12c] sm:$0xf]  ;;  %v7635_v43 = vld [vmem:[%s9606_s24 + $0x140] sm:$0xf0]  ;;  %v9821_v47 = vor.u32 %v8769_v41, %v7633_v40 }
  0x49   : > { %14512 = vst [vmem:[#allocation25_spill] sm:$0xff] %v9803_v35  ;;  %v9823_v48 = vor.u32 %v8766_v42, %v7635_v43  ;;  %v8837_v56 = vld [vmem:[%s14134_s1 + $0x64] sm:$0xf]  ;;  %v7915_v57 = vld [vmem:[%s14134_s1 + $0x70] sm:$0xf0] }
  0x4a   : > { %14513 = vst [vmem:[#allocation26_spill] sm:$0xff] %v9817_v45  ;;  %v8425_v58 = vld [vmem:[%s14134_s1 + $0x460] sm:$0xf]  ;;  %v7918_v59 = vor.u32 %v8837_v56, %v7915_v57  ;;  %v8967_v60 = vld [vmem:[%s14134_s1 + $0x46c] sm:$0xf0] }
  0x4b   : > { %14514 = vst [vmem:[#allocation27_spill] sm:$0xff] %v9819_v46  ;;  %v8869_v61 = vld [vmem:[%s14134_s1 + $0x164] sm:$0xf]  ;;  %v8043_v62 = vld [vmem:[%s14134_s1 + $0x170] sm:$0xf0]  ;;  %v8426_v63 = vor.u32 %v8967_v60, %v8425_v58 }
  0x4c   : > { %14515 = vst [vmem:[#allocation28_spill] sm:$0xff] %v9821_v47  ;;  %v8046_v4 = vor.u32 %v8869_v61, %v8043_v62  ;;  %2500 = vmatpush.bf16.msrb.mxu2 %v7918_v59  ;;  %v8553_v5 = vld [vmem:[%s14134_s1 + $0x560] sm:$0xf]  ;;  %v8999_v6 = vld [vmem:[%s14134_s1 + $0x56c] sm:$0xf0] }
  0x4d   : > { %14516 = vst [vmem:[#allocation29_spill] sm:$0xff] %v9823_v48  ;;  %2322 = vmatpush.bf16.msrb.mxu0 %v8426_v63  ;;  %v8554_v7 = vor.u32 %v8999_v6, %v8553_v5  ;;  %v7649_v8 = vld [vmem:[%s9606_s24 + $0x150] sm:$0xf]  ;;  %v8774_v9 = vld [vmem:[%s9606_s24 + $0x164] sm:$0xf0] }
  0x4e   : > { %2069 = vmatmul.bf16.gmra.mxu1 %v9691_v25  ;;  %2589 = vmatpush.bf16.msrb.mxu3 %v8046_v4  ;;  %v8771_v10 = vld [vmem:[%s9606_s24 + $0x154] sm:$0xf]  ;;  %v7651_v11 = vld [vmem:[%s9606_s24 + $0x168] sm:$0xf0]  ;;  %v7657_v16 = vld [vmem:[%s9606_s24 + $0x158] sm:$0xf]  ;;  %v9861_v20 = vor.u32 %v8774_v9, %v7649_v8 }
  0x4f   : > { %v8775_v17 = vld [vmem:[%s9606_s24 + $0x16c] sm:$0xf0]  ;;  %2411 = vmatpush.bf16.msrb.mxu1 %v8554_v7  ;;  %v8772_v18 = vld [vmem:[%s9606_s24 + $0x15c] sm:$0xf]  ;;  %v7659_v19 = vld [vmem:[%s9606_s24 + $0x170] sm:$0xf0]  ;;  %v9863_v21 = vor.u32 %v8771_v10, %v7651_v11 }
  0x50   : > { %1980 = vmatmul.bf16.gmra.mxu0 %v9689_v24  ;;  %14517 = vst [vmem:[#allocation30_spill] sm:$0xff] %v9861_v20  ;;  %v9865_v22 = vor.u32 %v8775_v17, %v7657_v16  ;;  %v9867_v23 = vor.u32 %v8772_v18, %v7659_v19  ;;  %v7673_v28 = vld [vmem:[%s9606_s24 + $0x180] sm:$0xf]  ;;  %v8780_v29 = vld [vmem:[%s9606_s24 + $0x194] sm:$0xf0] }
  0x51   : > { %2158 = vmatmul.bf16.gmra.mxu2 %v9693_v26  ;;  %14518 = vst [vmem:[#allocation31_spill] sm:$0xff] %v9863_v21  ;;  %v8777_v30 = vld [vmem:[%s9606_s24 + $0x184] sm:$0xf]  ;;  %v7675_v31 = vld [vmem:[%s9606_s24 + $0x198] sm:$0xf0]  ;;  %v9881_v40 = vor.u32 %v8780_v29, %v7673_v28 }
  0x52   : > { %2247 = vmatmul.bf16.gmra.mxu3 %v9695_v27  ;;  %14519 = vst [vmem:[#allocation32_spill] sm:$0xff] %v9865_v22  ;;  %v7681_v36 = vld [vmem:[%s9606_s24 + $0x188] sm:$0xf]  ;;  %v8781_v37 = vld [vmem:[%s9606_s24 + $0x19c] sm:$0xf0]  ;;  %v9883_v42 = vor.u32 %v8777_v30, %v7675_v31 }
  0x53   : > { %14520 = vst [vmem:[#allocation33_spill] sm:$0xff] %v9867_v23  ;;  %v8778_v38 = vld [vmem:[%s9606_s24 + $0x18c] sm:$0xf]  ;;  %v7683_v39 = vld [vmem:[%s9606_s24 + $0x1a0] sm:$0xf0]  ;;  %v9885_v43 = vor.u32 %v8781_v37, %v7681_v36 }
  0x54   : > { %14521 = vst [vmem:[#allocation34_spill] sm:$0xff] %v9881_v40  ;;  %v9887_v57 = vor.u32 %v8778_v38, %v7683_v39  ;;  %v8833_v59 = vld [vmem:[%s14134_s1 + $0x44] sm:$0xf]  ;;  %v7899_v60 = vld [vmem:[%s14134_s1 + $0x50] sm:$0xf0] }
  0x55   : > { %14522 = vst [vmem:[#allocation35_spill] sm:$0xff] %v9883_v42  ;;  %v8409_v61 = vld [vmem:[%s14134_s1 + $0x440] sm:$0xf]  ;;  %v7902_v62 = vor.u32 %v8833_v59, %v7899_v60  ;;  %v8963_v63 = vld [vmem:[%s14134_s1 + $0x44c] sm:$0xf0] }
  0x56   : > { %14523 = vst [vmem:[#allocation36_spill] sm:$0xff] %v9885_v43  ;;  %v8865_v4 = vld [vmem:[%s14134_s1 + $0x144] sm:$0xf]  ;;  %v8027_v5 = vld [vmem:[%s14134_s1 + $0x150] sm:$0xf0]  ;;  %v8410_v7 = vor.u32 %v8963_v63, %v8409_v61 }
  0x57   : > { %14524 = vst [vmem:[#allocation37_spill] sm:$0xff] %v9887_v57  ;;  %v8030_v8 = vor.u32 %v8865_v4, %v8027_v5  ;;  %2501 = vmatpush.bf16.msrb.mxu2 %v7902_v62  ;;  %v8537_v19 = vld [vmem:[%s14134_s1 + $0x540] sm:$0xf]  ;;  %v8995_v28 = vld [vmem:[%s14134_s1 + $0x54c] sm:$0xf0] }
  0x58   : > { %2323 = vmatpush.bf16.msrb.mxu0 %v8410_v7  ;;  %v8538_v29 = vor.u32 %v8995_v28, %v8537_v19  ;;  %v7697_v30 = vld [vmem:[%s9606_s24 + $0x1b0] sm:$0xf]  ;;  %v8786_v31 = vld [vmem:[%s9606_s24 + $0x1c4] sm:$0xf0]  ;;  %v8783_v36 = vld [vmem:[%s9606_s24 + $0x1b4] sm:$0xf] }
  0x59   : > { %2590 = vmatpush.bf16.msrb.mxu3 %v8030_v8  ;;  %v7699_v37 = vld [vmem:[%s9606_s24 + $0x1c8] sm:$0xf0]  ;;  %v7705_v38 = vld [vmem:[%s9606_s24 + $0x1b8] sm:$0xf]  ;;  %v8787_v39 = vld [vmem:[%s9606_s24 + $0x1cc] sm:$0xf0]  ;;  %v9927_v59 = vor.u32 %v8786_v31, %v7697_v30 }
  0x5a   : > { %2412 = vmatpush.bf16.msrb.mxu1 %v8538_v29  ;;  %v9929_v63 = vor.u32 %v8783_v36, %v7699_v37  ;;  %v9931_v4 = vor.u32 %v8787_v39, %v7705_v38  ;;  %v7721_v29 = vld [vmem:[%s9606_s24 + $0x1e0] sm:$0xf]  ;;  %v8792_v30 = vld [vmem:[%s9606_s24 + $0x1f4] sm:$0xf0]  ;;  %v8789_v31 = vld [vmem:[%s9606_s24 + $0x1e4] sm:$0xf] }
  0x5b   : > { %14525 = vst [vmem:[#allocation38_spill] sm:$0xff] %v9927_v59  ;;  %v7723_v36 = vld [vmem:[%s9606_s24 + $0x1f8] sm:$0xf0]  ;;  %v7729_v37 = vld [vmem:[%s9606_s24 + $0x1e8] sm:$0xf] }
  0x5c   : > { %14526 = vst [vmem:[#allocation39_spill] sm:$0xff] %v9929_v63  ;;  %v8793_v38 = vld [vmem:[%s9606_s24 + $0x1fc] sm:$0xf0]  ;;  %v8790_v39 = vld [vmem:[%s9606_s24 + $0x1ec] sm:$0xf] }
  0x5d   : > { %14527 = vst [vmem:[#allocation40_spill] sm:$0xff] %v9931_v4 }
  0x5e   : > { %2074 = vmatmul.bf16.gmra.mxu1 %v9735_v52 }
  0x60   : > { %1985 = vmatmul.bf16.gmra.mxu0 %v9733_v51 }
  0x61   : > { %2163 = vmatmul.bf16.gmra.mxu2 %v9737_v54 }
  0x62   : > { %2252 = vmatmul.bf16.gmra.mxu3 %v9739_v55 }
  0x6e   : > { %2079 = vmatmul.bf16.gmra.mxu1 %v9755_v1 }
  0x70   : > { %1990 = vmatmul.bf16.gmra.mxu0 %v9753_v0 }
  0x71   : > { %2168 = vmatmul.bf16.gmra.mxu2 %v9757_v2  ;;  %v7827_v2 = vld [vmem:[%s9606_s24 + $0x2c0] sm:$0xf0] }
  0x72   : > { %2257 = vmatmul.bf16.gmra.mxu3 %v9759_v3 }
  0x7e   : > { %2084 = vmatmul.bf16.gmra.mxu1 %v9799_v33 }
  0x80   : > { %1995 = vmatmul.bf16.gmra.mxu0 %v9797_v32 }
  0x81   : > { %2173 = vmatmul.bf16.gmra.mxu2 %v9801_v34 }
  0x82   : > { %2262 = vmatmul.bf16.gmra.mxu3 %v9803_v35 }
  0x8e   : > { %2089 = vmatmul.bf16.gmra.mxu1 %v9819_v46 }
  0x90   : > { %2000 = vmatmul.bf16.gmra.mxu0 %v9817_v45 }
  0x91   : > { %2178 = vmatmul.bf16.gmra.mxu2 %v9821_v47 }
  0x92   : > { %2267 = vmatmul.bf16.gmra.mxu3 %v9823_v48 }
  0x9e   : > { %2094 = vmatmul.bf16.gmra.mxu1 %v9863_v21 }
  0xa0   : > { %2005 = vmatmul.bf16.gmra.mxu0 %v9861_v20 }
  0xa1   : > { %2183 = vmatmul.bf16.gmra.mxu2 %v9865_v22 }
  0xa2   : > { %2272 = vmatmul.bf16.gmra.mxu3 %v9867_v23 }
  0xab   : > { %v2060_v56 = vpop.f32.mrf.mxu1 }
  0xad   : > { %v1971_v41 = vpop.f32.mrf.mxu0 }
  0xae   : > { %v2061_v58 = vadd.f32 %v2060_v56, %v1971_v41  ;;  %2099 = vmatmul.bf16.gmra.mxu1 %v9883_v42  ;;  %v8784_v41 = vld [vmem:[%s9606_s24 + $0x1bc] sm:$0xf]  ;;  %v7707_v56 = vld [vmem:[%s9606_s24 + $0x1d0] sm:$0xf0] }
  0xb0   : > { %2010 = vmatmul.bf16.gmra.mxu0 %v9881_v40 }
  0xb1   : > { %2188 = vmatmul.bf16.gmra.mxu2 %v9885_v43  ;;  %v7779_v43 = vld [vmem:[%s9606_s24 + $0x260] sm:$0xf0] }
  0xb2   : > { %2277 = vmatmul.bf16.gmra.mxu3 %v9887_v57 }
  0xb3   : > { %v2062_v16 = vpop.f32.mrf.mxu1 }
  0xb4   : > { %v2149_v6 = vpop.f32.mrf.mxu2 }
  0xb5   : > { %v2150_v9 = vadd.f32 %v2149_v6, %v2061_v58  ;;  %v2238_v10 = vpop.f32.mrf.mxu3  ;;  %v1973_v11 = vpop.f32.mrf.mxu0  ;;  %v9933_v6 = vor.u32 %v8784_v41, %v7707_v56  ;;  %v7731_v41 = vld [vmem:[%s9606_s24 + $0x200] sm:$0xf0] }
  0xb6   : > { %v2063_v18 = vadd.f32 %v2062_v16, %v1973_v11 }
  0xb7   : > { %v9911_v17 = vadd.f32 %v2238_v10, %v2150_v9  ;;  %14528 = vst [vmem:[#allocation41_spill] sm:$0xff] %v9933_v6 }
  0xbb   : > { %v2065_v5 = vpop.f32.mrf.mxu1 }
  0xbc   : > { %v2151_v58 = vpop.f32.mrf.mxu2 }
  0xbd   : > { %v2152_v60 = vadd.f32 %v2151_v58, %v2063_v18  ;;  %v2240_v61 = vpop.f32.mrf.mxu3  ;;  %v1976_v62 = vpop.f32.mrf.mxu0  ;;  %v9951_v58 = vor.u32 %v8792_v30, %v7721_v29  ;;  %v8393_v29 = vld [vmem:[%s14134_s1 + $0x420] sm:$0xf] }
  0xbe   : > { %v2066_v8 = vadd.f32 %v2065_v5, %v1976_v62  ;;  %2104 = vmatmul.bf16.gmra.mxu1 %v9929_v63  ;;  %v9953_v5 = vor.u32 %v8789_v31, %v7723_v36  ;;  %v8959_v31 = vld [vmem:[%s14134_s1 + $0x42c] sm:$0xf0]  ;;  %v8861_v36 = vld [vmem:[%s14134_s1 + $0x124] sm:$0xf] }
  0xbf   : > { %v9935_v7 = vadd.f32 %v2240_v61, %v2152_v60  ;;  %14529 = vst [vmem:[#allocation42_spill] sm:$0xff] %v9951_v58 }
  0xc0   : > { %2015 = vmatmul.bf16.gmra.mxu0 %v9927_v59  ;;  %14530 = vst [vmem:[#allocation43_spill] sm:$0xff] %v9953_v5 }
  0xc1   : > { %2193 = vmatmul.bf16.gmra.mxu2 %v9931_v4 }
  0xc2   : > { %2282 = vmatmul.bf16.gmra.mxu3 %v9933_v6 }
  0xc3   : > { %v2067_v18 = vpop.f32.mrf.mxu1 }
  0xc4   : > { %v2154_v9 = vpop.f32.mrf.mxu2 }
  0xc5   : > { %v2155_v10 = vadd.f32 %v2154_v9, %v2066_v8  ;;  %v2243_v11 = vpop.f32.mrf.mxu3  ;;  %v1978_v16 = vpop.f32.mrf.mxu0  ;;  %v9955_v8 = vor.u32 %v8793_v38, %v7729_v37  ;;  %v8011_v37 = vld [vmem:[%s14134_s1 + $0x130] sm:$0xf0] }
  0xc6   : > { %v2068_v28 = vadd.f32 %v2067_v18, %v1978_v16  ;;  %v8829_v18 = vld [vmem:[%s14134_s1 + $0x24] sm:$0xf] }
  0xc7   : > { %v9941_v19 = vadd.f32 %v2243_v11, %v2155_v10  ;;  %14531 = vst [vmem:[#allocation44_spill] sm:$0xff] %v9955_v8  ;;  %v9957_v10 = vor.u32 %v8790_v39, %v7731_v41  ;;  %v8394_v39 = vor.u32 %v8959_v31, %v8393_v29  ;;  %v8014_v41 = vor.u32 %v8861_v36, %v8011_v37  ;;  %v7745_v31 = vld [vmem:[%s9606_s24 + $0x210] sm:$0xf]  ;;  %v8798_v36 = vld [vmem:[%s9606_s24 + $0x224] sm:$0xf0] }
  0xc8   : > { %v7747_v37 = vld [vmem:[%s9606_s24 + $0x228] sm:$0xf0] }
  0xc9   : > { %14532 = vst [vmem:[#allocation45_spill] sm:$0xff] %v9957_v10  ;;  %2324 = vmatpush.bf16.msrb.mxu0 %v8394_v39  ;;  %2591 = vmatpush.bf16.msrb.mxu3 %v8014_v41  ;;  %v8796_v39 = vld [vmem:[%s9606_s24 + $0x21c] sm:$0xf]  ;;  %v7755_v41 = vld [vmem:[%s9606_s24 + $0x230] sm:$0xf0] }
  0xcb   : > { %v2070_v9 = vpop.f32.mrf.mxu1 }
  0xcc   : > { %v2156_v56 = vpop.f32.mrf.mxu2 }
  0xcd   : > { %v2157_v60 = vadd.f32 %v2156_v56, %v2068_v28  ;;  %v2245_v61 = vpop.f32.mrf.mxu3  ;;  %v1981_v62 = vpop.f32.mrf.mxu0  ;;  %v7883_v28 = vld [vmem:[%s14134_s1 + $0x30] sm:$0xf0] }
  0xce   : > { %v2071_v16 = vadd.f32 %v2070_v9, %v1981_v62  ;;  %2109 = vmatmul.bf16.gmra.mxu1 %v9953_v5  ;;  %v7886_v30 = vor.u32 %v8829_v18, %v7883_v28  ;;  %v8521_v28 = vld [vmem:[%s14134_s1 + $0x520] sm:$0xf] }
  0xcf   : > { %v9959_v11 = vadd.f32 %v2245_v61, %v2157_v60 }
  0xd0   : > { %2020 = vmatmul.bf16.gmra.mxu0 %v9951_v58  ;;  %2502 = vmatpush.bf16.msrb.mxu2 %v7886_v30  ;;  %v8795_v30 = vld [vmem:[%s9606_s24 + $0x214] sm:$0xf] }
  0xd1   : > { %2198 = vmatmul.bf16.gmra.mxu2 %v9955_v8  ;;  %v10001_v6 = vor.u32 %v8795_v30, %v7747_v37 }
  0xd2   : > { %2287 = vmatmul.bf16.gmra.mxu3 %v9957_v10  ;;  %v8799_v10 = vld [vmem:[%s9606_s24 + $0x22c] sm:$0xf0] }
  0xd3   : > { %v2072_v62 = vpop.f32.mrf.mxu1  ;;  %14534 = vst [vmem:[#allocation47_spill] sm:$0xff] %v10001_v6 }
  0xd4   : > { %v2159_v38 = vpop.f32.mrf.mxu2 }
  0xd5   : > { %v2160_v56 = vadd.f32 %v2159_v38, %v2071_v16  ;;  %v2248_v60 = vpop.f32.mrf.mxu3  ;;  %v1983_v61 = vpop.f32.mrf.mxu0  ;;  %v8991_v16 = vld [vmem:[%s14134_s1 + $0x52c] sm:$0xf0]  ;;  %v7753_v38 = vld [vmem:[%s9606_s24 + $0x218] sm:$0xf] }
  0xd6   : > { %v2073_v18 = vadd.f32 %v2072_v62, %v1983_v61  ;;  %v8522_v29 = vor.u32 %v8991_v16, %v8521_v28  ;;  %v10003_v4 = vor.u32 %v8799_v10, %v7753_v38  ;;  %v10005_v16 = vor.u32 %v8796_v39, %v7755_v41  ;;  %v7769_v38 = vld [vmem:[%s9606_s24 + $0x240] sm:$0xf]  ;;  %v8804_v39 = vld [vmem:[%s9606_s24 + $0x254] sm:$0xf0]  ;;  %v8801_v41 = vld [vmem:[%s9606_s24 + $0x244] sm:$0xf] }
  0xd7   : > { %v9983_v9 = vadd.f32 %v2248_v60, %v2160_v56  ;;  %v9999_v60 = vor.u32 %v8798_v36, %v7745_v31  ;;  %v10023_v23 = vor.u32 %v8804_v39, %v7769_v38  ;;  %v8857_v38 = vld [vmem:[%s14134_s1 + $0x104] sm:$0xf]  ;;  %v7995_v39 = vld [vmem:[%s14134_s1 + $0x110] sm:$0xf0] }
  0xd8   : > { %2413 = vmatpush.bf16.msrb.mxu1 %v8522_v29  ;;  %14535 = vst [vmem:[#allocation48_spill] sm:$0xff] %v10003_v4 }
  0xd9   : > { %14533 = vst [vmem:[#allocation46_spill] sm:$0xff] %v9999_v60 }
  0xda   : > { %14536 = vst [vmem:[#allocation49_spill] sm:$0xff] %v10005_v16 }
  0xdb   : > { %v2075_v28 = vpop.f32.mrf.mxu1  ;;  %14537 = vst [vmem:[#allocation50_spill] sm:$0xff] %v10023_v23 }
  0xdc   : > { %v2161_v56 = vpop.f32.mrf.mxu2 }
  0xdd   : > { %v2162_v61 = vadd.f32 %v2161_v56, %v2073_v18  ;;  %v2250_v62 = vpop.f32.mrf.mxu3  ;;  %v1986_v8 = vpop.f32.mrf.mxu0  ;;  %v7771_v56 = vld [vmem:[%s9606_s24 + $0x258] sm:$0xf0] }
  0xde   : > { %v2076_v29 = vadd.f32 %v2075_v28, %v1986_v8  ;;  %2114 = vmatmul.bf16.gmra.mxu1 %v10001_v6  ;;  %v8802_v28 = vld [vmem:[%s9606_s24 + $0x24c] sm:$0xf] }
  0xdf   : > { %v10007_v57 = vadd.f32 %v2250_v62, %v2162_v61  ;;  %v7777_v61 = vld [vmem:[%s9606_s24 + $0x248] sm:$0xf]  ;;  %v8805_v62 = vld [vmem:[%s9606_s24 + $0x25c] sm:$0xf0] }
  0xe0   : > { %2025 = vmatmul.bf16.gmra.mxu0 %v9999_v60  ;;  %v10027_v48 = vor.u32 %v8805_v62, %v7777_v61  ;;  %v7998_v61 = vor.u32 %v8857_v38, %v7995_v39  ;;  %v7793_v38 = vld [vmem:[%s9606_s24 + $0x270] sm:$0xf]  ;;  %v8810_v39 = vld [vmem:[%s9606_s24 + $0x284] sm:$0xf0] }
  0xe1   : > { %2203 = vmatmul.bf16.gmra.mxu2 %v10003_v4 }
  0xe2   : > { %2292 = vmatmul.bf16.gmra.mxu3 %v10005_v16  ;;  %14539 = vst [vmem:[#allocation52_spill] sm:$0xff] %v10027_v48 }
  0xe3   : > { %v2077_v30 = vpop.f32.mrf.mxu1  ;;  %2592 = vmatpush.bf16.msrb.mxu3 %v7998_v61  ;;  %v7803_v61 = vld [vmem:[%s9606_s24 + $0x290] sm:$0xf0] }
  0xe4   : > { %v2164_v10 = vpop.f32.mrf.mxu2 }
  0xe5   : > { %v2165_v18 = vadd.f32 %v2164_v10, %v2076_v29  ;;  %v2253_v31 = vpop.f32.mrf.mxu3  ;;  %v1988_v36 = vpop.f32.mrf.mxu0  ;;  %v10025_v10 = vor.u32 %v8801_v41, %v7771_v56 }
  0xe6   : > { %v2078_v8 = vadd.f32 %v2077_v30, %v1988_v36 }
  0xe7   : > { %v10013_v37 = vadd.f32 %v2253_v31, %v2165_v18  ;;  %14538 = vst [vmem:[#allocation51_spill] sm:$0xff] %v10025_v10  ;;  %v10029_v31 = vor.u32 %v8802_v28, %v7779_v43  ;;  %v7867_v43 = vld [vmem:[%s14134_s1 + $0x10] sm:$0xf0] }
  0xe9   : > { %14540 = vst [vmem:[#allocation53_spill] sm:$0xff] %v10029_v31 }
  0xeb   : > { %v2080_v18 = vpop.f32.mrf.mxu1 }
  0xec   : > { %v2166_v4 = vpop.f32.mrf.mxu2 }
  0xed   : > { %v2167_v16 = vadd.f32 %v2166_v4, %v2078_v8  ;;  %v2255_v22 = vpop.f32.mrf.mxu3  ;;  %v1991_v29 = vpop.f32.mrf.mxu0  ;;  %v8825_v4 = vld [vmem:[%s14134_s1 + $0x4] sm:$0xf]  ;;  %v8955_v8 = vld [vmem:[%s14134_s1 + $0x40c] sm:$0xf0] }
  0xee   : > { %v2081_v30 = vadd.f32 %v2080_v18, %v1991_v29  ;;  %2119 = vmatmul.bf16.gmra.mxu1 %v10025_v10 }
  0xef   : > { %v10031_v36 = vadd.f32 %v2255_v22, %v2167_v16  ;;  %v8377_v22 = vld [vmem:[%s14134_s1 + $0x400] sm:$0xf]  ;;  %v7870_v16 = vor.u32 %v8825_v4, %v7867_v43 }
  0xf0   : > { %2030 = vmatmul.bf16.gmra.mxu0 %v10023_v23  ;;  %v8378_v56 = vor.u32 %v8955_v8, %v8377_v22  ;;  %v8505_v22 = vld [vmem:[%s14134_s1 + $0x500] sm:$0xf] }
  0xf1   : > { %2208 = vmatmul.bf16.gmra.mxu2 %v10027_v48  ;;  %v8811_v48 = vld [vmem:[%s9606_s24 + $0x28c] sm:$0xf0] }
  0xf2   : > { %2297 = vmatmul.bf16.gmra.mxu3 %v10029_v31  ;;  %2503 = vmatpush.bf16.msrb.mxu2 %v7870_v16  ;;  %v8807_v16 = vld [vmem:[%s9606_s24 + $0x274] sm:$0xf]  ;;  %v7801_v31 = vld [vmem:[%s9606_s24 + $0x278] sm:$0xf] }
  0xf3   : > { %v2082_v18 = vpop.f32.mrf.mxu1  ;;  %2325 = vmatpush.bf16.msrb.mxu0 %v8378_v56  ;;  %v8808_v56 = vld [vmem:[%s9606_s24 + $0x27c] sm:$0xf]  ;;  %v10075_v34 = vor.u32 %v8811_v48, %v7801_v31 }
  0xf4   : > { %v2169_v41 = vpop.f32.mrf.mxu2 }
  0xf5   : > { %v2170_v62 = vadd.f32 %v2169_v41, %v2081_v30  ;;  %v2258_v28 = vpop.f32.mrf.mxu3  ;;  %v1993_v29 = vpop.f32.mrf.mxu0  ;;  %v8987_v30 = vld [vmem:[%s14134_s1 + $0x50c] sm:$0xf0]  ;;  %v7795_v41 = vld [vmem:[%s9606_s24 + $0x288] sm:$0xf0]  ;;  %14543 = vst [vmem:[#allocation56_spill] sm:$0xff] %v10075_v34 }
  0xf6   : > { %v2083_v43 = vadd.f32 %v2082_v18, %v1993_v29  ;;  %v8506_v8 = vor.u32 %v8987_v30, %v8505_v22  ;;  %v10073_v35 = vor.u32 %v8807_v16, %v7795_v41  ;;  %v10077_v30 = vor.u32 %v8808_v56, %v7803_v61  ;;  %v7817_v41 = vld [vmem:[%s9606_s24 + $0x2a0] sm:$0xf]  ;;  %v8816_v56 = vld [vmem:[%s9606_s24 + $0x2b4] sm:$0xf0]  ;;  %v8813_v61 = vld [vmem:[%s9606_s24 + $0x2a4] sm:$0xf] }
  0xf7   : > { %v10055_v4 = vadd.f32 %v2258_v28, %v2170_v62  ;;  %v10071_v28 = vor.u32 %v8810_v39, %v7793_v38  ;;  %v10095_v55 = vor.u32 %v8816_v56, %v7817_v41  ;;  %v9013_v41 = vld [vmem:[%s14134_s1 + $0x5e4] sm:$0xf]  ;;  %v8619_v56 = vld [vmem:[%s14134_s1 + $0x5f0] sm:$0xf0] }
  0xf8   : > { %2414 = vmatpush.bf16.msrb.mxu1 %v8506_v8  ;;  %14542 = vst [vmem:[#allocation55_spill] sm:$0xff] %v10073_v35 }
  0xf9   : > { %14541 = vst [vmem:[#allocation54_spill] sm:$0xff] %v10071_v28 }
  0xfa   : > { %14544 = vst [vmem:[#allocation57_spill] sm:$0xff] %v10077_v30 }
  0xfb   : > { %v2085_v22 = vpop.f32.mrf.mxu1  ;;  %14545 = vst [vmem:[#allocation58_spill] sm:$0xff] %v10095_v55 }
  0xfc   : > { %v2171_v62 = vpop.f32.mrf.mxu2 }
  0xfd   : > { %v2172_v29 = vadd.f32 %v2171_v62, %v2083_v43  ;;  %v2260_v18 = vpop.f32.mrf.mxu3  ;;  %v1996_v47 = vpop.f32.mrf.mxu0  ;;  %v7819_v62 = vld [vmem:[%s9606_s24 + $0x2b8] sm:$0xf0] }
  0xfe   : > { %v2086_v8 = vadd.f32 %v2085_v22, %v1996_v47  ;;  %2124 = vmatmul.bf16.gmra.mxu1 %v10073_v35  ;;  %v8814_v22 = vld [vmem:[%s9606_s24 + $0x2ac] sm:$0xf] }
  0xff   : > { %v10079_v3 = vadd.f32 %v2260_v18, %v2172_v29  ;;  %v7825_v29 = vld [vmem:[%s9606_s24 + $0x2a8] sm:$0xf]  ;;  %v8817_v18 = vld [vmem:[%s9606_s24 + $0x2bc] sm:$0xf0] }
 0x100   : > { %2035 = vmatmul.bf16.gmra.mxu0 %v10071_v28  ;;  %v10099_v27 = vor.u32 %v8817_v18, %v7825_v29  ;;  %v8622_v29 = vor.u32 %v9013_v41, %v8619_v56  ;;  %v7841_v41 = vld [vmem:[%s9606_s24 + $0x2d0] sm:$0xf]  ;;  %v8822_v56 = vld [vmem:[%s9606_s24 + $0x2e4] sm:$0xf0] }
 0x101   : > { %2213 = vmatmul.bf16.gmra.mxu2 %v10075_v34 }
 0x102   : > { %2302 = vmatmul.bf16.gmra.mxu3 %v10077_v30  ;;  %14547 = vst [vmem:[#allocation60_spill] sm:$0xff] %v10099_v27 }
 0x103   : > { %v2087_v39 = vpop.f32.mrf.mxu1  ;;  %2941 = vmatpush.bf16.msra.mxu3 %v8622_v29  ;;  %v7851_v29 = vld [vmem:[%s9606_s24 + $0x2f0] sm:$0xf0] }
 0x104   : > { %v2174_v48 = vpop.f32.mrf.mxu2 }
 0x105   : > { %v2175_v31 = vadd.f32 %v2174_v48, %v2086_v8  ;;  %v2263_v43 = vpop.f32.mrf.mxu3  ;;  %v1998_v38 = vpop.f32.mrf.mxu0  ;;  %v10097_v48 = vor.u32 %v8813_v61, %v7819_v62 }
 0x106   : > { %v2088_v47 = vadd.f32 %v2087_v39, %v1998_v38 }
 0x107   : > { %v10085_v16 = vadd.f32 %v2263_v43, %v2175_v31  ;;  %14546 = vst [vmem:[#allocation59_spill] sm:$0xff] %v10097_v48  ;;  %v10101_v43 = vor.u32 %v8814_v22, %v7827_v2  ;;  %v8491_v2 = vld [vmem:[%s14134_s1 + $0x4f0] sm:$0xf0] }
 0x109   : > { %14548 = vst [vmem:[#allocation61_spill] sm:$0xff] %v10101_v43 }
 0x10b   : > { %v2090_v31 = vpop.f32.mrf.mxu1 }
 0x10c   : > { %v2176_v34 = vpop.f32.mrf.mxu2 }
 0x10d   : > { %v2177_v30 = vadd.f32 %v2176_v34, %v2088_v47  ;;  %v2265_v54 = vpop.f32.mrf.mxu3  ;;  %v2001_v8 = vpop.f32.mrf.mxu0  ;;  %v8981_v34 = vld [vmem:[%s14134_s1 + $0x4e4] sm:$0xf]  ;;  %v8235_v47 = vld [vmem:[%s14134_s1 + $0x2f0] sm:$0xf0] }
 0x10e   : > { %v2091_v39 = vadd.f32 %v2090_v31, %v2001_v8  ;;  %2129 = vmatmul.bf16.gmra.mxu1 %v10097_v48 }
 0x10f   : > { %v10103_v38 = vadd.f32 %v2265_v54, %v2177_v30  ;;  %v8917_v54 = vld [vmem:[%s14134_s1 + $0x2e4] sm:$0xf]  ;;  %v8494_v30 = vor.u32 %v8981_v34, %v8491_v2 }
 0x110   : > { %2040 = vmatmul.bf16.gmra.mxu0 %v10095_v55  ;;  %v8238_v62 = vor.u32 %v8917_v54, %v8235_v47  ;;  %v8949_v54 = vld [vmem:[%s14134_s1 + $0x3e4] sm:$0xf] }
 0x111   : > { %2218 = vmatmul.bf16.gmra.mxu2 %v10099_v27  ;;  %v8823_v27 = vld [vmem:[%s9606_s24 + $0x2ec] sm:$0xf0] }
 0x112   : > { %2307 = vmatmul.bf16.gmra.mxu3 %v10101_v43  ;;  %2852 = vmatpush.bf16.msra.mxu2 %v8494_v30  ;;  %v8819_v30 = vld [vmem:[%s9606_s24 + $0x2d4] sm:$0xf]  ;;  %v7849_v43 = vld [vmem:[%s9606_s24 + $0x2d8] sm:$0xf] }
 0x113   : > { %v2092_v31 = vpop.f32.mrf.mxu1  ;;  %2674 = vmatpush.bf16.msra.mxu0 %v8238_v62  ;;  %v8820_v62 = vld [vmem:[%s9606_s24 + $0x2dc] sm:$0xf]  ;;  %v10147_v14 = vor.u32 %v8823_v27, %v7849_v43 }
 0x114   : > { %v2179_v61 = vpop.f32.mrf.mxu2 }
 0x115   : > { %v2180_v18 = vadd.f32 %v2179_v61, %v2091_v39  ;;  %v2268_v22 = vpop.f32.mrf.mxu3  ;;  %v2003_v8 = vpop.f32.mrf.mxu0  ;;  %v8363_v39 = vld [vmem:[%s14134_s1 + $0x3f0] sm:$0xf0]  ;;  %v7843_v61 = vld [vmem:[%s9606_s24 + $0x2e8] sm:$0xf0]  ;;  %14551 = vst [vmem:[#allocation64_spill] sm:$0xff] %v10147_v14 }
 0x116   : > { %v2093_v2 = vadd.f32 %v2092_v31, %v2003_v8  ;;  %v8366_v47 = vor.u32 %v8949_v54, %v8363_v39  ;;  %v10145_v15 = vor.u32 %v8819_v30, %v7843_v61  ;;  %v10149_v39 = vor.u32 %v8820_v62, %v7851_v29  ;;  %v7497_v62 = vld [vmem:[%s9606_s24 + $0x10] sm:$0xf]  ;;  %v8734_v29 = vld [vmem:[%s9606_s24 + $0x24] sm:$0xf0] }
 0x117   : > { %v10127_v34 = vadd.f32 %v2268_v22, %v2180_v18  ;;  %v10143_v22 = vor.u32 %v8822_v56, %v7841_v41 }
 0x118   : > { %2763 = vmatpush.bf16.msra.mxu1 %v8366_v47  ;;  %14550 = vst [vmem:[#allocation63_spill] sm:$0xff] %v10145_v15 }
 0x119   : > { %14549 = vst [vmem:[#allocation62_spill] sm:$0xff] %v10143_v22 }
 0x11a   : > { %14552 = vst [vmem:[#allocation65_spill] sm:$0xff] %v10149_v39 }
 0x11b   : > { %v2095_v54 = vpop.f32.mrf.mxu1 }
 0x11c   : > { %v2181_v18 = vpop.f32.mrf.mxu2 }
 0x11d   : > { %v2182_v8 = vadd.f32 %v2181_v18, %v2093_v2  ;;  %v2270_v31 = vpop.f32.mrf.mxu3  ;;  %v2006_v26 = vpop.f32.mrf.mxu0  ;;  %v8731_v18 = vld [vmem:[%s9606_s24 + $0x14] sm:$0xf] }
 0x11e   : > { %v2096_v47 = vadd.f32 %v2095_v54, %v2006_v26  ;;  %2134 = vmatmul.bf16.gmra.mxu1 %v10145_v15  ;;  %v7499_v26 = vld [vmem:[%s9606_s24 + $0x28] sm:$0xf0] }
 0x11f   : > { %v10151_v53 = vadd.f32 %v2270_v31, %v2182_v8  ;;  %v10163_v31 = vor.u32 %v8734_v29, %v7497_v62  ;;  %v10165_v15 = vor.u32 %v8731_v18, %v7499_v26 }
 0x120   : > { %2045 = vmatmul.bf16.gmra.mxu0 %v10143_v22 }
 0x121   : > { %2223 = vmatmul.bf16.gmra.mxu2 %v10147_v14  ;;  %14553 = vst [vmem:[#allocation66_spill] sm:$0xff] %v10163_v31 }
 0x122   : > { %2312 = vmatmul.bf16.gmra.mxu3 %v10149_v39  ;;  %14554 = vst [vmem:[#allocation67_spill] sm:$0xff] %v10165_v15 }
 0x123   : > { %v2097_v56 = vpop.f32.mrf.mxu1 }
 0x124   : > { %v2184_v27 = vpop.f32.mrf.mxu2 }
 0x125   : > { %v2185_v43 = vadd.f32 %v2184_v27, %v2096_v47  ;;  %v2273_v2 = vpop.f32.mrf.mxu3  ;;  %v2008_v41 = vpop.f32.mrf.mxu0 }
 0x126   : > { %v2098_v61 = vadd.f32 %v2097_v56, %v2008_v41  ;;  %v9009_v41 = vld [vmem:[%s14134_s1 + $0x5c4] sm:$0xf]  ;;  %v8603_v56 = vld [vmem:[%s14134_s1 + $0x5d0] sm:$0xf0] }
 0x127   : > { %v10157_v30 = vadd.f32 %v2273_v2, %v2185_v43  ;;  %v8977_v43 = vld [vmem:[%s14134_s1 + $0x4c4] sm:$0xf]  ;;  %v8475_v2 = vld [vmem:[%s14134_s1 + $0x4d0] sm:$0xf0]  ;;  %v8606_v29 = vor.u32 %v9009_v41, %v8603_v56  ;;  %v7521_v41 = vld [vmem:[%s9606_s24 + $0x40] sm:$0xf] }
 0x128   : > { %v8737_v56 = vld [vmem:[%s9606_s24 + $0x44] sm:$0xf] }
 0x129   : > { %2942 = vmatpush.bf16.msra.mxu3 %v8606_v29 }
 0x12b   : > { %v2100_v39 = vpop.f32.mrf.mxu1 }
 0x12c   : > { %v2186_v8 = vpop.f32.mrf.mxu2 }
 0x12d   : > { %v2187_v54 = vadd.f32 %v2186_v8, %v2098_v61  ;;  %v2275_v50 = vpop.f32.mrf.mxu3  ;;  %v2011_v14 = vpop.f32.mrf.mxu0 }
 0x12e   : > { %v2101_v27 = vadd.f32 %v2100_v39, %v2011_v14  ;;  %2415 = vmatmul.bf16.vlgmr.msrb.gmra.mxu1 %v10165_v15  ;;  %v8478_v14 = vor.u32 %v8977_v43, %v8475_v2  ;;  %v8219_v39 = vld [vmem:[%s14134_s1 + $0x2d0] sm:$0xf0] }
 0x12f   : > { %v10167_v47 = vadd.f32 %v2275_v50, %v2187_v54  ;;  %v8913_v50 = vld [vmem:[%s14134_s1 + $0x2c4] sm:$0xf] }
 0x130   : > { %2326 = vmatmul.bf16.vlgmr.msrb.gmra.mxu0 %v10163_v31  ;;  %v8222_v62 = vor.u32 %v8913_v50, %v8219_v39  ;;  %2853 = vmatpush.bf16.msra.mxu2 %v8478_v14  ;;  %v8347_v50 = vld [vmem:[%s14134_s1 + $0x3d0] sm:$0xf0] }
 0x131   : > { %2504 = vmatmul.bf16.vlgmr.msrb.gmra.mxu2 %v9620_v44 }
 0x132   : > { %2593 = vmatmul.bf16.vlgmr.msrb.gmra.mxu3 %v9625_v49  ;;  %2675 = vmatpush.bf16.msra.mxu0 %v8222_v62  ;;  %v8945_v49 = vld [vmem:[%s14134_s1 + $0x3c4] sm:$0xf] }
 0x133   : > { %v2102_v54 = vpop.f32.mrf.mxu1  ;;  %v8350_v39 = vor.u32 %v8945_v49, %v8347_v50 }
 0x134   : > { %v2189_v61 = vpop.f32.mrf.mxu2 }
 0x135   : > { %v2190_v18 = vadd.f32 %v2189_v61, %v2101_v27  ;;  %v2278_v26 = vpop.f32.mrf.mxu3  ;;  %v2013_v8 = vpop.f32.mrf.mxu0  ;;  %v8740_v27 = vld [vmem:[%s9606_s24 + $0x54] sm:$0xf0]  ;;  %v7523_v61 = vld [vmem:[%s9606_s24 + $0x58] sm:$0xf0]  ;;  %2764 = vmatpush.bf16.msra.mxu1 %v8350_v39 }
 0x136   : > { %v2103_v2 = vadd.f32 %v2102_v54, %v2013_v8  ;;  %v10203_v62 = vor.u32 %v8740_v27, %v7521_v41  ;;  %v10205_v8 = vor.u32 %v8737_v56, %v7523_v61 }
 0x137   : > { %v10191_v43 = vadd.f32 %v2278_v26, %v2190_v18 }
 0x138   : > { %14555 = vst [vmem:[#allocation68_spill] sm:$0xff] %v10203_v62 }
 0x139   : > { %14556 = vst [vmem:[#allocation69_spill] sm:$0xff] %v10205_v8 }
 0x13b   : > { %v2105_v54 = vpop.f32.mrf.mxu1 }
 0x13c   : > { %v2191_v14 = vpop.f32.mrf.mxu2 }
 0x13d   : > { %v2192_v29 = vadd.f32 %v2191_v14, %v2103_v2  ;;  %v2280_v18 = vpop.f32.mrf.mxu3  ;;  %v2016_v26 = vpop.f32.mrf.mxu0  ;;  %v7545_v14 = vld [vmem:[%s9606_s24 + $0x70] sm:$0xf] }
 0x13e   : > { %v2106_v49 = vadd.f32 %v2105_v54, %v2016_v26  ;;  %2420 = vmatmul.bf16.gmra.mxu1 %v10205_v8  ;;  %v7547_v26 = vld [vmem:[%s9606_s24 + $0x88] sm:$0xf0] }
 0x13f   : > { %v10207_v44 = vadd.f32 %v2280_v18, %v2192_v29  ;;  %v8746_v29 = vld [vmem:[%s9606_s24 + $0x84] sm:$0xf0]  ;;  %v8743_v18 = vld [vmem:[%s9606_s24 + $0x74] sm:$0xf] }
 0x140   : > { %2331 = vmatmul.bf16.gmra.mxu0 %v10203_v62  ;;  %v10219_v62 = vor.u32 %v8746_v29, %v7545_v14  ;;  %v10221_v15 = vor.u32 %v8743_v18, %v7547_v26 }
 0x141   : > { %14557 = vst [vmem:[#allocation70_spill] sm:$0xff] %v10207_v44  ;;  %2509 = vmatmul.bf16.gmra.mxu2 %v9669_v12 }
 0x142   : > { %2598 = vmatmul.bf16.gmra.mxu3 %v9671_v13  ;;  %14558 = vst [vmem:[#allocation71_spill] sm:$0xff] %v10219_v62 }
 0x143   : > { %v2107_v27 = vpop.f32.mrf.mxu1  ;;  %14559 = vst [vmem:[#allocation72_spill] sm:$0xff] %v10221_v15 }
 0x144   : > { %v2194_v2 = vpop.f32.mrf.mxu2 }
 0x145   : > { %v2195_v50 = vadd.f32 %v2194_v2, %v2106_v49  ;;  %v2283_v39 = vpop.f32.mrf.mxu3  ;;  %v2018_v41 = vpop.f32.mrf.mxu0 }
 0x146   : > { %v2108_v61 = vadd.f32 %v2107_v27, %v2018_v41  ;;  %v8587_v41 = vld [vmem:[%s14134_s1 + $0x5b0] sm:$0xf0] }
 0x147   : > { %v10213_v56 = vadd.f32 %v2283_v39, %v2195_v50  ;;  %v8973_v50 = vld [vmem:[%s14134_s1 + $0x4a4] sm:$0xf]  ;;  %v8459_v39 = vld [vmem:[%s14134_s1 + $0x4b0] sm:$0xf0] }
 0x14b   : > { %v2110_v13 = vpop.f32.mrf.mxu1 }
 0x14c   : > { %v2196_v54 = vpop.f32.mrf.mxu2 }
 0x14d   : > { %v2197_v8 = vadd.f32 %v2196_v54, %v2108_v61  ;;  %v2285_v44 = vpop.f32.mrf.mxu3  ;;  %v2021_v12 = vpop.f32.mrf.mxu0 }
 0x14e   : > { %v2111_v2 = vadd.f32 %v2110_v13, %v2021_v12  ;;  %2425 = vmatmul.bf16.gmra.mxu1 %v10221_v15  ;;  %v8462_v12 = vor.u32 %v8973_v50, %v8459_v39  ;;  %v8203_v13 = vld [vmem:[%s14134_s1 + $0x2b0] sm:$0xf0] }
 0x14f   : > { %v10223_v49 = vadd.f32 %v2285_v44, %v2197_v8  ;;  %v8909_v44 = vld [vmem:[%s14134_s1 + $0x2a4] sm:$0xf] }
 0x150   : > { %2336 = vmatmul.bf16.gmra.mxu0 %v10219_v62  ;;  %v9005_v8 = vld [vmem:[%s14134_s1 + $0x5a4] sm:$0xf]  ;;  %v8206_v61 = vor.u32 %v8909_v44, %v8203_v13  ;;  %2854 = vmatpush.bf16.msra.mxu2 %v8462_v12  ;;  %v8331_v44 = vld [vmem:[%s14134_s1 + $0x3b0] sm:$0xf0] }
 0x151   : > { %2514 = vmatmul.bf16.gmra.mxu2 %v9689_v24  ;;  %v8590_v14 = vor.u32 %v9005_v8, %v8587_v41  ;;  %v7569_v8 = vld [vmem:[%s9606_s24 + $0xa0] sm:$0xf]  ;;  %v8749_v41 = vld [vmem:[%s9606_s24 + $0xa4] sm:$0xf] }
 0x152   : > { %2603 = vmatmul.bf16.gmra.mxu3 %v9691_v25  ;;  %2676 = vmatpush.bf16.msra.mxu0 %v8206_v61  ;;  %v8941_v25 = vld [vmem:[%s14134_s1 + $0x3a4] sm:$0xf] }
 0x153   : > { %v2112_v54 = vpop.f32.mrf.mxu1  ;;  %2943 = vmatpush.bf16.msra.mxu3 %v8590_v14  ;;  %v8334_v13 = vor.u32 %v8941_v25, %v8331_v44 }
 0x154   : > { %v2199_v27 = vpop.f32.mrf.mxu2 }
 0x155   : > { %v2200_v29 = vadd.f32 %v2199_v27, %v2111_v2  ;;  %v2288_v18 = vpop.f32.mrf.mxu3  ;;  %v2023_v26 = vpop.f32.mrf.mxu0  ;;  %v8752_v2 = vld [vmem:[%s9606_s24 + $0xb4] sm:$0xf0]  ;;  %v7571_v27 = vld [vmem:[%s9606_s24 + $0xb8] sm:$0xf0]  ;;  %2765 = vmatpush.bf16.msra.mxu1 %v8334_v13 }
 0x156   : > { %v2113_v39 = vadd.f32 %v2112_v54, %v2023_v26  ;;  %v10259_v61 = vor.u32 %v8752_v2, %v7569_v8  ;;  %v10261_v26 = vor.u32 %v8749_v41, %v7571_v27 }
 0x157   : > { %v10247_v50 = vadd.f32 %v2288_v18, %v2200_v29 }
 0x158   : > { %14560 = vst [vmem:[#allocation73_spill] sm:$0xff] %v10259_v61 }
 0x159   : > { %14561 = vst [vmem:[#allocation74_spill] sm:$0xff] %v10261_v26 }
 0x15b   : > { %v2115_v54 = vpop.f32.mrf.mxu1 }
 0x15c   : > { %v2201_v12 = vpop.f32.mrf.mxu2 }
 0x15d   : > { %v2202_v14 = vadd.f32 %v2201_v12, %v2113_v39  ;;  %v2290_v29 = vpop.f32.mrf.mxu3  ;;  %v2026_v18 = vpop.f32.mrf.mxu0  ;;  %v7593_v12 = vld [vmem:[%s9606_s24 + $0xd0] sm:$0xf] }
 0x15e   : > { %v2116_v25 = vadd.f32 %v2115_v54, %v2026_v18  ;;  %2430 = vmatmul.bf16.gmra.mxu1 %v10261_v26  ;;  %v7595_v18 = vld [vmem:[%s9606_s24 + $0xe8] sm:$0xf0] }
 0x15f   : > { %v10263_v24 = vadd.f32 %v2290_v29, %v2202_v14  ;;  %v8758_v14 = vld [vmem:[%s9606_s24 + $0xe4] sm:$0xf0]  ;;  %v8755_v29 = vld [vmem:[%s9606_s24 + $0xd4] sm:$0xf] }
 0x160   : > { %2341 = vmatmul.bf16.gmra.mxu0 %v10259_v61  ;;  %v10275_v61 = vor.u32 %v8758_v14, %v7593_v12  ;;  %v10277_v15 = vor.u32 %v8755_v29, %v7595_v18 }
 0x161   : > { %14562 = vst [vmem:[#allocation75_spill] sm:$0xff] %v10263_v24  ;;  %2519 = vmatmul.bf16.gmra.mxu2 %v9733_v51 }
 0x162   : > { %2608 = vmatmul.bf16.gmra.mxu3 %v9735_v52  ;;  %14563 = vst [vmem:[#allocation76_spill] sm:$0xff] %v10275_v61 }
 0x163   : > { %v2117_v2 = vpop.f32.mrf.mxu1  ;;  %14564 = vst [vmem:[#allocation77_spill] sm:$0xff] %v10277_v15 }
 0x164   : > { %v2204_v39 = vpop.f32.mrf.mxu2 }
 0x165   : > { %v2205_v44 = vadd.f32 %v2204_v39, %v2116_v25  ;;  %v2293_v13 = vpop.f32.mrf.mxu3  ;;  %v2028_v8 = vpop.f32.mrf.mxu0 }
 0x166   : > { %v2118_v27 = vadd.f32 %v2117_v2, %v2028_v8  ;;  %v8571_v8 = vld [vmem:[%s14134_s1 + $0x590] sm:$0xf0] }
 0x167   : > { %v10269_v41 = vadd.f32 %v2293_v13, %v2205_v44  ;;  %v8969_v44 = vld [vmem:[%s14134_s1 + $0x484] sm:$0xf]  ;;  %v8443_v13 = vld [vmem:[%s14134_s1 + $0x490] sm:$0xf0] }
 0x16b   : > { %v2120_v52 = vpop.f32.mrf.mxu1 }
 0x16c   : > { %v2206_v54 = vpop.f32.mrf.mxu2 }
 0x16d   : > { %v2207_v26 = vadd.f32 %v2206_v54, %v2118_v27  ;;  %v2295_v24 = vpop.f32.mrf.mxu3  ;;  %v2031_v51 = vpop.f32.mrf.mxu0 }
 0x16e   : > { %v2121_v39 = vadd.f32 %v2120_v52, %v2031_v51  ;;  %2435 = vmatmul.bf16.gmra.mxu1 %v10277_v15  ;;  %v8446_v51 = vor.u32 %v8969_v44, %v8443_v13  ;;  %v8187_v52 = vld [vmem:[%s14134_s1 + $0x290] sm:$0xf0] }
 0x16f   : > { %v10279_v25 = vadd.f32 %v2295_v24, %v2207_v26  ;;  %v8905_v24 = vld [vmem:[%s14134_s1 + $0x284] sm:$0xf] }
 0x170   : > { %2346 = vmatmul.bf16.gmra.mxu0 %v10275_v61  ;;  %v9001_v26 = vld [vmem:[%s14134_s1 + $0x584] sm:$0xf]  ;;  %v8190_v27 = vor.u32 %v8905_v24, %v8187_v52  ;;  %2855 = vmatpush.bf16.msra.mxu2 %v8446_v51  ;;  %v8315_v24 = vld [vmem:[%s14134_s1 + $0x390] sm:$0xf0] }
 0x171   : > { %2524 = vmatmul.bf16.gmra.mxu2 %v9753_v0  ;;  %v8574_v12 = vor.u32 %v9001_v26, %v8571_v8  ;;  %v7617_v26 = vld [vmem:[%s9606_s24 + $0x100] sm:$0xf]  ;;  %v8761_v8 = vld [vmem:[%s9606_s24 + $0x104] sm:$0xf] }
 0x172   : > { %2613 = vmatmul.bf16.gmra.mxu3 %v9755_v1  ;;  %2677 = vmatpush.bf16.msra.mxu0 %v8190_v27  ;;  %v8937_v1 = vld [vmem:[%s14134_s1 + $0x384] sm:$0xf] }
 0x173   : > { %v2122_v54 = vpop.f32.mrf.mxu1  ;;  %2944 = vmatpush.bf16.msra.mxu3 %v8574_v12  ;;  %v8318_v52 = vor.u32 %v8937_v1, %v8315_v24 }
 0x174   : > { %v2209_v2 = vpop.f32.mrf.mxu2 }
 0x175   : > { %v2210_v14 = vadd.f32 %v2209_v2, %v2121_v39  ;;  %v2298_v29 = vpop.f32.mrf.mxu3  ;;  %v2033_v18 = vpop.f32.mrf.mxu0  ;;  %v8764_v39 = vld [vmem:[%s9606_s24 + $0x114] sm:$0xf0]  ;;  %v7619_v2 = vld [vmem:[%s9606_s24 + $0x118] sm:$0xf0]  ;;  %2766 = vmatpush.bf16.msra.mxu1 %v8318_v52 }
 0x176   : > { %v2123_v13 = vadd.f32 %v2122_v54, %v2033_v18  ;;  %v10315_v27 = vor.u32 %v8764_v39, %v7617_v26  ;;  %v10317_v18 = vor.u32 %v8761_v8, %v7619_v2 }
 0x177   : > { %v10303_v44 = vadd.f32 %v2298_v29, %v2210_v14 }
 0x178   : > { %14565 = vst [vmem:[#allocation78_spill] sm:$0xff] %v10315_v27 }
 0x179   : > { %14566 = vst [vmem:[#allocation79_spill] sm:$0xff] %v10317_v18 }
 0x17b   : > { %v2125_v54 = vpop.f32.mrf.mxu1 }
 0x17c   : > { %v2211_v51 = vpop.f32.mrf.mxu2 }
 0x17d   : > { %v2212_v12 = vadd.f32 %v2211_v51, %v2123_v13  ;;  %v2300_v14 = vpop.f32.mrf.mxu3  ;;  %v2036_v29 = vpop.f32.mrf.mxu0  ;;  %v7641_v51 = vld [vmem:[%s9606_s24 + $0x130] sm:$0xf] }
 0x17e   : > { %v2126_v1 = vadd.f32 %v2125_v54, %v2036_v29  ;;  %2440 = vmatmul.bf16.gmra.mxu1 %v10317_v18  ;;  %v7643_v29 = vld [vmem:[%s9606_s24 + $0x148] sm:$0xf0] }
 0x17f   : > { %v10319_v0 = vadd.f32 %v2300_v14, %v2212_v12  ;;  %v8770_v12 = vld [vmem:[%s9606_s24 + $0x144] sm:$0xf0]  ;;  %v8767_v14 = vld [vmem:[%s9606_s24 + $0x134] sm:$0xf] }
 0x180   : > { %2351 = vmatmul.bf16.gmra.mxu0 %v10315_v27  ;;  %v10331_v27 = vor.u32 %v8770_v12, %v7641_v51  ;;  %v10333_v15 = vor.u32 %v8767_v14, %v7643_v29  ;;  %v8997_v51 = vld [vmem:[%s14134_s1 + $0x564] sm:$0xf]  ;;  %v8555_v12 = vld [vmem:[%s14134_s1 + $0x570] sm:$0xf0] }
 0x181   : > { %14567 = vst [vmem:[#allocation80_spill] sm:$0xff] %v10319_v0  ;;  %2529 = vmatmul.bf16.gmra.mxu2 %v9797_v32 }
 0x182   : > { %2618 = vmatmul.bf16.gmra.mxu3 %v9799_v33  ;;  %14569 = vst [vmem:[#allocation82_spill] sm:$0xff] %v10331_v27 }
 0x183   : > { %v2127_v39 = vpop.f32.mrf.mxu1  ;;  %14570 = vst [vmem:[#allocation83_spill] sm:$0xff] %v10333_v15 }
 0x184   : > { %v2214_v13 = vpop.f32.mrf.mxu2 }
 0x185   : > { %v2215_v24 = vadd.f32 %v2214_v13, %v2126_v1  ;;  %v2303_v52 = vpop.f32.mrf.mxu3  ;;  %v2038_v26 = vpop.f32.mrf.mxu0 }
 0x186   : > { %v2128_v2 = vadd.f32 %v2127_v39, %v2038_v26  ;;  %v8427_v26 = vld [vmem:[%s14134_s1 + $0x470] sm:$0xf0] }
 0x187   : > { %v10325_v8 = vadd.f32 %v2303_v52, %v2215_v24  ;;  %v8965_v52 = vld [vmem:[%s14134_s1 + $0x464] sm:$0xf] }
 0x188   : > { %v8430_v39 = vor.u32 %v8965_v52, %v8427_v26 }
 0x189   : > { %14568 = vst [vmem:[#allocation81_spill] sm:$0xff] %v10325_v8 }
 0x18a   : > { %2856 = vmatpush.bf16.msra.mxu2 %v8430_v39 }
 0x18b   : > { %v2130_v33 = vpop.f32.mrf.mxu1 }
 0x18c   : > { %v2216_v54 = vpop.f32.mrf.mxu2 }
 0x18d   : > { %v2217_v18 = vadd.f32 %v2216_v54, %v2128_v2  ;;  %v2305_v0 = vpop.f32.mrf.mxu3  ;;  %v2041_v32 = vpop.f32.mrf.mxu0  ;;  %v8171_v2 = vld [vmem:[%s14134_s1 + $0x270] sm:$0xf0]  ;;  %v8558_v54 = vor.u32 %v8997_v51, %v8555_v12 }
 0x18e   : > { %v2131_v13 = vadd.f32 %v2130_v33, %v2041_v32  ;;  %2445 = vmatmul.bf16.gmra.mxu1 %v10333_v15  ;;  %v8776_v15 = vld [vmem:[%s9606_s24 + $0x174] sm:$0xf0] }
 0x18f   : > { %v10335_v1 = vadd.f32 %v2305_v0, %v2217_v18  ;;  %v8901_v0 = vld [vmem:[%s14134_s1 + $0x264] sm:$0xf]  ;;  %2945 = vmatpush.bf16.msra.mxu3 %v8558_v54 }
 0x190   : > { %2356 = vmatmul.bf16.gmra.mxu0 %v10331_v27  ;;  %v8174_v29 = vor.u32 %v8901_v0, %v8171_v2  ;;  %v8773_v0 = vld [vmem:[%s9606_s24 + $0x164] sm:$0xf]  ;;  %v7667_v2 = vld [vmem:[%s9606_s24 + $0x178] sm:$0xf0] }
 0x191   : > { %14571 = vst [vmem:[#allocation84_spill] sm:$0xff] %v10335_v1  ;;  %2534 = vmatmul.bf16.gmra.mxu2 %v9817_v45  ;;  %v7665_v45 = vld [vmem:[%s9606_s24 + $0x160] sm:$0xf]  ;;  %v10373_v61 = vor.u32 %v8773_v0, %v7667_v2 }
 0x192   : > { %2623 = vmatmul.bf16.gmra.mxu3 %v9819_v46  ;;  %2678 = vmatpush.bf16.msra.mxu0 %v8174_v29  ;;  %v10371_v12 = vor.u32 %v8776_v15, %v7665_v45 }
 0x193   : > { %v2132_v14 = vpop.f32.mrf.mxu1  ;;  %14573 = vst [vmem:[#allocation86_spill] sm:$0xff] %v10373_v61 }
 0x194   : > { %v2219_v24 = vpop.f32.mrf.mxu2  ;;  %14572 = vst [vmem:[#allocation85_spill] sm:$0xff] %v10371_v12 }
 0x195   : > { %v2220_v32 = vadd.f32 %v2219_v24, %v2131_v13  ;;  %v2308_v33 = vpop.f32.mrf.mxu3  ;;  %v2043_v18 = vpop.f32.mrf.mxu0  ;;  %v8933_v13 = vld [vmem:[%s14134_s1 + $0x364] sm:$0xf]  ;;  %v8299_v24 = vld [vmem:[%s14134_s1 + $0x370] sm:$0xf0] }
 0x196   : > { %v2133_v26 = vadd.f32 %v2132_v14, %v2043_v18  ;;  %v8302_v46 = vor.u32 %v8933_v13, %v8299_v24  ;;  %v8779_v13 = vld [vmem:[%s9606_s24 + $0x194] sm:$0xf] }
 0x197   : > { %v10365_v52 = vadd.f32 %v2308_v33, %v2220_v32 }
 0x198   : > { %2767 = vmatpush.bf16.msra.mxu1 %v8302_v46 }
 0x19b   : > { %v2135_v32 = vpop.f32.mrf.mxu1 }
 0x19c   : > { %v2221_v51 = vpop.f32.mrf.mxu2 }
 0x19d   : > { %v2222_v27 = vadd.f32 %v2221_v51, %v2133_v26  ;;  %v2310_v1 = vpop.f32.mrf.mxu3  ;;  %v2046_v8 = vpop.f32.mrf.mxu0 }
 0x19e   : > { %v2136_v18 = vadd.f32 %v2135_v32, %v2046_v8  ;;  %2450 = vmatmul.bf16.gmra.mxu1 %v10373_v61  ;;  %v7691_v8 = vld [vmem:[%s9606_s24 + $0x1a8] sm:$0xf0] }
 0x19f   : > { %v10375_v33 = vadd.f32 %v2310_v1, %v2222_v27  ;;  %v7689_v27 = vld [vmem:[%s9606_s24 + $0x190] sm:$0xf]  ;;  %v8782_v1 = vld [vmem:[%s9606_s24 + $0x1a4] sm:$0xf0]  ;;  %v10389_v32 = vor.u32 %v8779_v13, %v7691_v8  ;;  %v7713_v8 = vld [vmem:[%s9606_s24 + $0x1c0] sm:$0xf] }
 0x1a0   : > { %2361 = vmatmul.bf16.gmra.mxu0 %v10371_v12  ;;  %v10387_v26 = vor.u32 %v8782_v1, %v7689_v27 }
 0x1a1   : > { %2539 = vmatmul.bf16.gmra.mxu2 %v9861_v20  ;;  %14575 = vst [vmem:[#allocation88_spill] sm:$0xff] %v10389_v32 }
 0x1a2   : > { %2628 = vmatmul.bf16.gmra.mxu3 %v9863_v21  ;;  %14574 = vst [vmem:[#allocation87_spill] sm:$0xff] %v10387_v26 }
 0x1a3   : > { %v2137_v14 = vpop.f32.mrf.mxu1 }
 0x1a4   : > { %v2224_v15 = vpop.f32.mrf.mxu2 }
 0x1a5   : > { %v2225_v45 = vadd.f32 %v2224_v15, %v2136_v18  ;;  %v2313_v46 = vpop.f32.mrf.mxu3  ;;  %v2048_v39 = vpop.f32.mrf.mxu0 }
 0x1a6   : > { %v2138_v54 = vadd.f32 %v2137_v14, %v2048_v39 }
 0x1a7   : > { %v10381_v29 = vadd.f32 %v2313_v46, %v2225_v45 }
 0x1ab   : > { %v2416_v15 = vpop.f32.mrf.mxu1 }
 0x1ac   : > { %v2226_v24 = vpop.f32.mrf.mxu2 }
 0x1ad   : > { %v2227_v0 = vadd.f32 %v2226_v24, %v2138_v54  ;;  %v2315_v2 = vpop.f32.mrf.mxu3  ;;  %v2327_v51 = vpop.f32.mrf.mxu0  ;;  %v8788_v24 = vld [vmem:[%s9606_s24 + $0x1d4] sm:$0xf0] }
 0x1ae   : > { %v2328_v18 = vadd.f32 %v2327_v51, %v9911_v17  ;;  %2455 = vmatmul.bf16.gmra.mxu1 %v10389_v32  ;;  %v8961_v51 = vld [vmem:[%s14134_s1 + $0x444] sm:$0xf] }
 0x1af   : > { %v10392_v45 = vadd.f32 %v2315_v2, %v2227_v0  ;;  %v8785_v0 = vld [vmem:[%s9606_s24 + $0x1c4] sm:$0xf]  ;;  %v7715_v2 = vld [vmem:[%s9606_s24 + $0x1d8] sm:$0xf0] }
 0x1b0   : > { %v10394_v46 = vadd.f32 %v2416_v15, %v2328_v18  ;;  %2366 = vmatmul.bf16.gmra.mxu0 %v10387_v26  ;;  %v8411_v18 = vld [vmem:[%s14134_s1 + $0x450] sm:$0xf0]  ;;  %v8897_v15 = vld [vmem:[%s14134_s1 + $0x244] sm:$0xf]  ;;  %v10429_v21 = vor.u32 %v8785_v0, %v7715_v2 }
 0x1b1   : > { %2544 = vmatmul.bf16.gmra.mxu2 %v9881_v40 }
 0x1b2   : > { %14576 = vst [vmem:[#allocation89_spill] sm:$0xff] %v10394_v46  ;;  %2633 = vmatmul.bf16.gmra.mxu3 %v9883_v42 }
 0x1b3   : > { %v2418_v1 = vpop.f32.mrf.mxu1  ;;  %14579 = vst [vmem:[#allocation92_spill] sm:$0xff] %v10429_v21 }
 0x1b4   : > { %v2505_v39 = vpop.f32.mrf.mxu2 }
 0x1b5   : > { %v2594_v14 = vpop.f32.mrf.mxu3  ;;  %v2329_v54 = vpop.f32.mrf.mxu0 }
 0x1b6   : > { %v10400_v17 = vadd.f32 %v2594_v14, %v2505_v39  ;;  %v2330_v27 = vadd.f32 %v2329_v54, %v9935_v7  ;;  %v10418_v39 = vor.u32 %v8788_v24, %v7713_v8  ;;  %v8414_v14 = vor.u32 %v8961_v51, %v8411_v18  ;;  %v8155_v54 = vld [vmem:[%s14134_s1 + $0x250] sm:$0xf0]  ;;  %v8929_v24 = vld [vmem:[%s14134_s1 + $0x344] sm:$0xf] }
 0x1b7   : > { %v8158_v20 = vor.u32 %v8897_v15, %v8155_v54  ;;  %v8283_v51 = vld [vmem:[%s14134_s1 + $0x350] sm:$0xf0] }
 0x1b8   : > { %v10403_v13 = vadd.f32 %v2418_v1, %v2330_v27  ;;  %14578 = vst [vmem:[#allocation91_spill] sm:$0xff] %v10418_v39  ;;  %v8993_v27 = vld [vmem:[%s14134_s1 + $0x544] sm:$0xf]  ;;  %v8539_v1 = vld [vmem:[%s14134_s1 + $0x550] sm:$0xf0]  ;;  %2857 = vmatpush.bf16.msra.mxu2 %v8414_v14  ;;  %v8286_v32 = vor.u32 %v8929_v24, %v8283_v51 }
 0x1b9   : > { %v8542_v8 = vor.u32 %v8993_v27, %v8539_v1  ;;  %2679 = vmatpush.bf16.msra.mxu0 %v8158_v20  ;;  %v8791_v14 = vld [vmem:[%s9606_s24 + $0x1f4] sm:$0xf] }
 0x1ba   : > { %14577 = vst [vmem:[#allocation90_spill] sm:$0xff] %v10403_v13  ;;  %2768 = vmatpush.bf16.msra.mxu1 %v8286_v32  ;;  %v7739_v32 = vld [vmem:[%s9606_s24 + $0x208] sm:$0xf0] }
 0x1bb   : > { %v2421_v46 = vpop.f32.mrf.mxu1  ;;  %2946 = vmatpush.bf16.msra.mxu3 %v8542_v8  ;;  %v10457_v24 = vor.u32 %v8791_v14, %v7739_v32  ;;  %v7761_v32 = vld [vmem:[%s9606_s24 + $0x220] sm:$0xf] }
 0x1bc   : > { %v2507_v7 = vpop.f32.mrf.mxu2 }
 0x1bd   : > { %v2596_v42 = vpop.f32.mrf.mxu3  ;;  %v2332_v40 = vpop.f32.mrf.mxu0  ;;  %14581 = vst [vmem:[#allocation94_spill] sm:$0xff] %v10457_v24 }
 0x1be   : > { %v10437_v18 = vadd.f32 %v2596_v42, %v2507_v7  ;;  %v2333_v13 = vadd.f32 %v2332_v40, %v9941_v19  ;;  %2460 = vmatmul.bf16.gmra.mxu1 %v10429_v21  ;;  %v8794_v7 = vld [vmem:[%s9606_s24 + $0x204] sm:$0xf0] }
 0x1c0   : > { %v10440_v0 = vadd.f32 %v2421_v46, %v2333_v13  ;;  %2371 = vmatmul.bf16.gmra.mxu0 %v10418_v39  ;;  %v7737_v13 = vld [vmem:[%s9606_s24 + $0x1f0] sm:$0xf] }
 0x1c1   : > { %2549 = vmatmul.bf16.gmra.mxu2 %v9927_v59  ;;  %v10455_v27 = vor.u32 %v8794_v7, %v7737_v13 }
 0x1c2   : > { %2638 = vmatmul.bf16.gmra.mxu3 %v9929_v63 }
 0x1c3   : > { %v2423_v15 = vpop.f32.mrf.mxu1  ;;  %14580 = vst [vmem:[#allocation93_spill] sm:$0xff] %v10455_v27 }
 0x1c4   : > { %v2510_v40 = vpop.f32.mrf.mxu2 }
 0x1c5   : > { %v2599_v42 = vpop.f32.mrf.mxu3  ;;  %v2334_v19 = vpop.f32.mrf.mxu0 }
 0x1c6   : > { %v10446_v2 = vadd.f32 %v2599_v42, %v2510_v40  ;;  %v2335_v20 = vadd.f32 %v2334_v19, %v9959_v11 }
 0x1c8   : > { %v10449_v46 = vadd.f32 %v2423_v15, %v2335_v20 }
 0x1cb   : > { %v2426_v40 = vpop.f32.mrf.mxu1 }
 0x1cc   : > { %v2512_v54 = vpop.f32.mrf.mxu2 }
 0x1cd   : > { %v2601_v1 = vpop.f32.mrf.mxu3  ;;  %v2337_v8 = vpop.f32.mrf.mxu0 }
 0x1ce   : > { %v10459_v51 = vadd.f32 %v2601_v1, %v2512_v54  ;;  %v2338_v11 = vadd.f32 %v2337_v8, %v9983_v9  ;;  %2465 = vmatmul.bf16.gmra.mxu1 %v10457_v24  ;;  %v8800_v54 = vld [vmem:[%s9606_s24 + $0x234] sm:$0xf0]  ;;  %v8797_v1 = vld [vmem:[%s9606_s24 + $0x224] sm:$0xf]  ;;  %v7763_v8 = vld [vmem:[%s9606_s24 + $0x238] sm:$0xf0] }
 0x1cf   : > { %v10497_v59 = vor.u32 %v8797_v1, %v7763_v8 }
 0x1d0   : > { %v10462_v42 = vadd.f32 %v2426_v40, %v2338_v11  ;;  %2376 = vmatmul.bf16.gmra.mxu0 %v10455_v27  ;;  %v8957_v11 = vld [vmem:[%s14134_s1 + $0x424] sm:$0xf]  ;;  %v8395_v40 = vld [vmem:[%s14134_s1 + $0x430] sm:$0xf0] }
 0x1d1   : > { %2554 = vmatmul.bf16.gmra.mxu2 %v9951_v58  ;;  %14585 = vst [vmem:[#allocation98_spill] sm:$0xff] %v10497_v59 }
 0x1d2   : > { %14582 = vst [vmem:[#allocation95_spill] sm:$0xff] %v10462_v42  ;;  %2643 = vmatmul.bf16.gmra.mxu3 %v9953_v5  ;;  %v8523_v5 = vld [vmem:[%s14134_s1 + $0x530] sm:$0xf0] }
 0x1d3   : > { %v2428_v7 = vpop.f32.mrf.mxu1 }
 0x1d4   : > { %v2515_v19 = vpop.f32.mrf.mxu2 }
 0x1d5   : > { %v2604_v20 = vpop.f32.mrf.mxu3  ;;  %v2339_v15 = vpop.f32.mrf.mxu0 }
 0x1d6   : > { %v10468_v13 = vadd.f32 %v2604_v20, %v2515_v19  ;;  %v2340_v9 = vadd.f32 %v2339_v15, %v10007_v57  ;;  %v8893_v19 = vld [vmem:[%s14134_s1 + $0x224] sm:$0xf]  ;;  %v10486_v20 = vor.u32 %v8800_v54, %v7761_v32  ;;  %v8398_v15 = vor.u32 %v8957_v11, %v8395_v40  ;;  %v8267_v11 = vld [vmem:[%s14134_s1 + $0x330] sm:$0xf0] }
 0x1d7   : > { %v8925_v54 = vld [vmem:[%s14134_s1 + $0x324] sm:$0xf] }
 0x1d8   : > { %v10471_v14 = vadd.f32 %v2428_v7, %v2340_v9  ;;  %14584 = vst [vmem:[#allocation97_spill] sm:$0xff] %v10486_v20  ;;  %v8139_v9 = vld [vmem:[%s14134_s1 + $0x230] sm:$0xf0]  ;;  %v8989_v7 = vld [vmem:[%s14134_s1 + $0x524] sm:$0xf]  ;;  %2858 = vmatpush.bf16.msra.mxu2 %v8398_v15  ;;  %v8270_v27 = vor.u32 %v8925_v54, %v8267_v11 }
 0x1d9   : > { %v8526_v32 = vor.u32 %v8989_v7, %v8523_v5 }
 0x1da   : > { %14583 = vst [vmem:[#allocation96_spill] sm:$0xff] %v10471_v14  ;;  %v8142_v14 = vor.u32 %v8893_v19, %v8139_v9  ;;  %2769 = vmatpush.bf16.msra.mxu1 %v8270_v27  ;;  %v8806_v19 = vld [vmem:[%s9606_s24 + $0x264] sm:$0xf0]  ;;  %v7787_v27 = vld [vmem:[%s9606_s24 + $0x268] sm:$0xf0] }
 0x1db   : > { %v2431_v24 = vpop.f32.mrf.mxu1  ;;  %2947 = vmatpush.bf16.msra.mxu3 %v8526_v32 }
 0x1dc   : > { %v2517_v57 = vpop.f32.mrf.mxu2  ;;  %2680 = vmatpush.bf16.msra.mxu0 %v8142_v14 }
 0x1dd   : > { %v2606_v58 = vpop.f32.mrf.mxu3  ;;  %v2342_v63 = vpop.f32.mrf.mxu0 }
 0x1de   : > { %v10505_v40 = vadd.f32 %v2606_v58, %v2517_v57  ;;  %v2343_v42 = vadd.f32 %v2342_v63, %v10013_v37  ;;  %2470 = vmatmul.bf16.gmra.mxu1 %v10497_v59  ;;  %v8803_v57 = vld [vmem:[%s9606_s24 + $0x254] sm:$0xf] }
 0x1df   : > { %v10525_v54 = vor.u32 %v8803_v57, %v7787_v27  ;;  %v7809_v27 = vld [vmem:[%s9606_s24 + $0x280] sm:$0xf] }
 0x1e0   : > { %v10508_v5 = vadd.f32 %v2431_v24, %v2343_v42  ;;  %2381 = vmatmul.bf16.gmra.mxu0 %v10486_v20  ;;  %v7785_v42 = vld [vmem:[%s9606_s24 + $0x250] sm:$0xf] }
 0x1e1   : > { %2559 = vmatmul.bf16.gmra.mxu2 %v9999_v60  ;;  %v10523_v9 = vor.u32 %v8806_v19, %v7785_v42  ;;  %14587 = vst [vmem:[#allocation100_spill] sm:$0xff] %v10525_v54 }
 0x1e2   : > { %2648 = vmatmul.bf16.gmra.mxu3 %v10001_v6 }
 0x1e3   : > { %v2433_v8 = vpop.f32.mrf.mxu1  ;;  %14586 = vst [vmem:[#allocation99_spill] sm:$0xff] %v10523_v9 }
 0x1e4   : > { %v2520_v63 = vpop.f32.mrf.mxu2 }
 0x1e5   : > { %v2609_v58 = vpop.f32.mrf.mxu3  ;;  %v2344_v37 = vpop.f32.mrf.mxu0 }
 0x1e6   : > { %v10514_v1 = vadd.f32 %v2609_v58, %v2520_v63  ;;  %v2345_v14 = vadd.f32 %v2344_v37, %v10031_v36 }
 0x1e8   : > { %v10517_v24 = vadd.f32 %v2433_v8, %v2345_v14 }
 0x1eb   : > { %v2436_v63 = vpop.f32.mrf.mxu1 }
 0x1ec   : > { %v2522_v15 = vpop.f32.mrf.mxu2 }
 0x1ed   : > { %v2611_v7 = vpop.f32.mrf.mxu3  ;;  %v2347_v32 = vpop.f32.mrf.mxu0 }
 0x1ee   : > { %v10527_v11 = vadd.f32 %v2611_v7, %v2522_v15  ;;  %v2348_v36 = vadd.f32 %v2347_v32, %v10055_v4  ;;  %2475 = vmatmul.bf16.gmra.mxu1 %v10525_v54  ;;  %v8812_v15 = vld [vmem:[%s9606_s24 + $0x294] sm:$0xf0]  ;;  %v8809_v7 = vld [vmem:[%s9606_s24 + $0x284] sm:$0xf]  ;;  %v7811_v32 = vld [vmem:[%s9606_s24 + $0x298] sm:$0xf0] }
 0x1ef   : > { %v10565_v60 = vor.u32 %v8809_v7, %v7811_v32 }
 0x1f0   : > { %v10530_v58 = vadd.f32 %v2436_v63, %v2348_v36  ;;  %2386 = vmatmul.bf16.gmra.mxu0 %v10523_v9  ;;  %v8953_v36 = vld [vmem:[%s14134_s1 + $0x404] sm:$0xf]  ;;  %v8379_v63 = vld [vmem:[%s14134_s1 + $0x410] sm:$0xf0] }
 0x1f1   : > { %2564 = vmatmul.bf16.gmra.mxu2 %v10023_v23  ;;  %14591 = vst [vmem:[#allocation104_spill] sm:$0xff] %v10565_v60 }
 0x1f2   : > { %14588 = vst [vmem:[#allocation101_spill] sm:$0xff] %v10530_v58  ;;  %2653 = vmatmul.bf16.gmra.mxu3 %v10025_v10  ;;  %v8507_v10 = vld [vmem:[%s14134_s1 + $0x510] sm:$0xf0] }
 0x1f3   : > { %v2438_v19 = vpop.f32.mrf.mxu1 }
 0x1f4   : > { %v2525_v37 = vpop.f32.mrf.mxu2 }
 0x1f5   : > { %v2614_v14 = vpop.f32.mrf.mxu3  ;;  %v2349_v8 = vpop.f32.mrf.mxu0 }
 0x1f6   : > { %v10536_v42 = vadd.f32 %v2614_v14, %v2525_v37  ;;  %v2350_v4 = vadd.f32 %v2349_v8, %v10079_v3  ;;  %v8889_v37 = vld [vmem:[%s14134_s1 + $0x204] sm:$0xf]  ;;  %v10554_v14 = vor.u32 %v8812_v15, %v7809_v27  ;;  %v8382_v8 = vor.u32 %v8953_v36, %v8379_v63  ;;  %v8251_v36 = vld [vmem:[%s14134_s1 + $0x310] sm:$0xf0] }
 0x1f7   : > { %v8921_v15 = vld [vmem:[%s14134_s1 + $0x304] sm:$0xf] }
 0x1f8   : > { %v10539_v57 = vadd.f32 %v2438_v19, %v2350_v4  ;;  %14590 = vst [vmem:[#allocation103_spill] sm:$0xff] %v10554_v14  ;;  %v8123_v4 = vld [vmem:[%s14134_s1 + $0x210] sm:$0xf0]  ;;  %v8985_v19 = vld [vmem:[%s14134_s1 + $0x504] sm:$0xf]  ;;  %2859 = vmatpush.bf16.msra.mxu2 %v8382_v8  ;;  %v8254_v9 = vor.u32 %v8921_v15, %v8251_v36 }
 0x1f9   : > { %v8510_v27 = vor.u32 %v8985_v19, %v8507_v10 }
 0x1fa   : > { %14589 = vst [vmem:[#allocation102_spill] sm:$0xff] %v10539_v57  ;;  %v8126_v57 = vor.u32 %v8889_v37, %v8123_v4  ;;  %2770 = vmatpush.bf16.msra.mxu1 %v8254_v9  ;;  %v8818_v37 = vld [vmem:[%s9606_s24 + $0x2c4] sm:$0xf0]  ;;  %v7835_v9 = vld [vmem:[%s9606_s24 + $0x2c8] sm:$0xf0] }
 0x1fb   : > { %v2441_v54 = vpop.f32.mrf.mxu1  ;;  %2948 = vmatpush.bf16.msra.mxu3 %v8510_v27 }
 0x1fc   : > { %v2527_v3 = vpop.f32.mrf.mxu2  ;;  %2681 = vmatpush.bf16.msra.mxu0 %v8126_v57 }
 0x1fd   : > { %v2616_v23 = vpop.f32.mrf.mxu3  ;;  %v2352_v6 = vpop.f32.mrf.mxu0 }
 0x1fe   : > { %v10573_v63 = vadd.f32 %v2616_v23, %v2527_v3  ;;  %v2353_v58 = vadd.f32 %v2352_v6, %v10085_v16  ;;  %2480 = vmatmul.bf16.gmra.mxu1 %v10565_v60  ;;  %v8815_v3 = vld [vmem:[%s9606_s24 + $0x2b4] sm:$0xf] }
 0x1ff   : > { %v10593_v15 = vor.u32 %v8815_v3, %v7835_v9  ;;  %v7857_v9 = vld [vmem:[%s9606_s24 + $0x2e0] sm:$0xf] }
 0x200   : > { %v10576_v10 = vadd.f32 %v2441_v54, %v2353_v58  ;;  %2391 = vmatmul.bf16.gmra.mxu0 %v10554_v14  ;;  %v7833_v58 = vld [vmem:[%s9606_s24 + $0x2b0] sm:$0xf] }
 0x201   : > { %2569 = vmatmul.bf16.gmra.mxu2 %v10071_v28  ;;  %v10591_v4 = vor.u32 %v8818_v37, %v7833_v58  ;;  %14593 = vst [vmem:[#allocation106_spill] sm:$0xff] %v10593_v15 }
 0x202   : > { %2658 = vmatmul.bf16.gmra.mxu3 %v10073_v35 }
 0x203   : > { %v2443_v32 = vpop.f32.mrf.mxu1  ;;  %14592 = vst [vmem:[#allocation105_spill] sm:$0xff] %v10591_v4 }
 0x204   : > { %v2530_v23 = vpop.f32.mrf.mxu2 }
 0x205   : > { %v2619_v6 = vpop.f32.mrf.mxu3  ;;  %v2354_v16 = vpop.f32.mrf.mxu0 }
 0x206   : > { %v10582_v7 = vadd.f32 %v2619_v6, %v2530_v23  ;;  %v2355_v57 = vadd.f32 %v2354_v16, %v10103_v38 }
 0x208   : > { %v10585_v54 = vadd.f32 %v2443_v32, %v2355_v57 }
 0x20b   : > { %v2446_v23 = vpop.f32.mrf.mxu1 }
 0x20c   : > { %v2532_v8 = vpop.f32.mrf.mxu2 }
 0x20d   : > { %v2621_v19 = vpop.f32.mrf.mxu3  ;;  %v2357_v27 = vpop.f32.mrf.mxu0 }
 0x20e   : > { %v10595_v36 = vadd.f32 %v2621_v19, %v2532_v8  ;;  %v2358_v38 = vadd.f32 %v2357_v27, %v10127_v34  ;;  %2485 = vmatmul.bf16.gmra.mxu1 %v10593_v15  ;;  %v8824_v8 = vld [vmem:[%s9606_s24 + $0x2f4] sm:$0xf0]  ;;  %v8821_v19 = vld [vmem:[%s9606_s24 + $0x2e4] sm:$0xf]  ;;  %v7859_v27 = vld [vmem:[%s9606_s24 + $0x2f8] sm:$0xf0] }
 0x20f   : > { %v10633_v28 = vor.u32 %v8821_v19, %v7859_v27 }
 0x210   : > { %v10598_v6 = vadd.f32 %v2446_v23, %v2358_v38  ;;  %2396 = vmatmul.bf16.gmra.mxu0 %v10591_v4  ;;  %v8241_v38 = vld [vmem:[%s14134_s1 + $0x2e8] sm:$0xf]  ;;  %v8920_v23 = vld [vmem:[%s14134_s1 + $0x2f4] sm:$0xf0] }
 0x211   : > { %2574 = vmatmul.bf16.gmra.mxu2 %v10095_v55  ;;  %14597 = vst [vmem:[#allocation110_spill] sm:$0xff] %v10633_v28 }
 0x212   : > { %14594 = vst [vmem:[#allocation107_spill] sm:$0xff] %v10598_v6  ;;  %2663 = vmatmul.bf16.gmra.mxu3 %v10097_v48  ;;  %v8952_v48 = vld [vmem:[%s14134_s1 + $0x3f4] sm:$0xf0] }
 0x213   : > { %v2448_v37 = vpop.f32.mrf.mxu1 }
 0x214   : > { %v2535_v16 = vpop.f32.mrf.mxu2 }
 0x215   : > { %v2624_v57 = vpop.f32.mrf.mxu3  ;;  %v2359_v32 = vpop.f32.mrf.mxu0 }
 0x216   : > { %v10604_v58 = vadd.f32 %v2624_v57, %v2535_v16  ;;  %v2360_v34 = vadd.f32 %v2359_v32, %v10151_v53  ;;  %v7985_v16 = vld [vmem:[%s14134_s1 + $0xe8] sm:$0xf]  ;;  %v10622_v57 = vor.u32 %v8824_v8, %v7857_v9  ;;  %v8242_v32 = vor.u32 %v8920_v23, %v8241_v38  ;;  %v8888_v38 = vld [vmem:[%s14134_s1 + $0x1f4] sm:$0xf0] }
 0x217   : > { %v8113_v8 = vld [vmem:[%s14134_s1 + $0x1e8] sm:$0xf] }
 0x218   : > { %v10607_v3 = vadd.f32 %v2448_v37, %v2360_v34  ;;  %14596 = vst [vmem:[#allocation109_spill] sm:$0xff] %v10622_v57  ;;  %v8856_v34 = vld [vmem:[%s14134_s1 + $0xf4] sm:$0xf0]  ;;  %v8369_v37 = vld [vmem:[%s14134_s1 + $0x3e8] sm:$0xf]  ;;  %3208 = vmatpush.bf16.msrb.mxu2 %v8242_v32  ;;  %v8114_v4 = vor.u32 %v8888_v38, %v8113_v8  ;;  %v14600_v8 = vld [vmem:[#allocation4_spill] sm:$0xff] }
 0x219   : > { %v8370_v9 = vor.u32 %v8952_v48, %v8369_v37  ;;  %v14598_v48 = vld [vmem:[#allocation63_spill] sm:$0xff]  ;;  %v14601_v38 = vld [vmem:[#allocation5_spill] sm:$0xff] }
 0x21a   : > { %14595 = vst [vmem:[#allocation108_spill] sm:$0xff] %v10607_v3  ;;  %v7986_v3 = vor.u32 %v8856_v34, %v7985_v16  ;;  %3119 = vmatpush.bf16.msrb.mxu1 %v8114_v4 }
 0x21b   : > { %v2451_v15 = vpop.f32.mrf.mxu1  ;;  %3297 = vmatpush.bf16.msrb.mxu3 %v8370_v9 }
 0x21c   : > { %v2537_v53 = vpop.f32.mrf.mxu2  ;;  %3030 = vmatpush.bf16.msrb.mxu0 %v7986_v3 }
 0x21d   : > { %v2626_v55 = vpop.f32.mrf.mxu3  ;;  %v2362_v35 = vpop.f32.mrf.mxu0 }
 0x21e   : > { %v10641_v23 = vadd.f32 %v2626_v55, %v2537_v53  ;;  %v2363_v6 = vadd.f32 %v2362_v35, %v10157_v30  ;;  %2490 = vmatmul.bf16.gmra.mxu1 %v10633_v28 }
 0x220   : > { %v10644_v19 = vadd.f32 %v2451_v15, %v2363_v6  ;;  %2401 = vmatmul.bf16.gmra.mxu0 %v10622_v57 }
 0x221   : > { %2579 = vmatmul.bf16.gmra.mxu2 %v10143_v22 }
 0x222   : > { %2668 = vmatmul.bf16.gmra.mxu3 %v14598_v48 }
 0x223   : > { %v2453_v3 = vpop.f32.mrf.mxu1 }
 0x224   : > { %v2540_v55 = vpop.f32.mrf.mxu2 }
 0x225   : > { %v2629_v27 = vpop.f32.mrf.mxu3  ;;  %v2364_v16 = vpop.f32.mrf.mxu0 }
 0x226   : > { %v10650_v35 = vadd.f32 %v2629_v27, %v2540_v55  ;;  %v2365_v30 = vadd.f32 %v2364_v16, %v10167_v47  ;;  %v14602_v47 = vld [vmem:[#allocation67_spill] sm:$0xff] }
 0x228   : > { %v10653_v53 = vadd.f32 %v2453_v3, %v2365_v30  ;;  %v14603_v3 = vld [vmem:[#allocation70_spill] sm:$0xff] }
 0x22b   : > { %v2456_v37 = vpop.f32.mrf.mxu1 }
 0x22c   : > { %v2542_v15 = vpop.f32.mrf.mxu2 }
 0x22d   : > { %v2631_v6 = vpop.f32.mrf.mxu3  ;;  %v2367_v32 = vpop.f32.mrf.mxu0 }
 0x22e   : > { %v10655_v4 = vadd.f32 %v2631_v6, %v2542_v15  ;;  %v2368_v34 = vadd.f32 %v2367_v32, %v10191_v43  ;;  %2771 = vmatmul.bf16.vlgmr.msra.gmra.mxu1 %v14601_v38  ;;  %v8225_v32 = vld [vmem:[%s14134_s1 + $0x2c8] sm:$0xf] }
 0x230   : > { %v10658_v9 = vadd.f32 %v2456_v37, %v2368_v34  ;;  %2682 = vmatmul.bf16.vlgmr.msra.gmra.mxu0 %v14600_v8  ;;  %v8916_v34 = vld [vmem:[%s14134_s1 + $0x2d4] sm:$0xf0]  ;;  %v7969_v37 = vld [vmem:[%s14134_s1 + $0xc8] sm:$0xf] }
 0x231   : > { %2860 = vmatmul.bf16.vlgmr.msra.gmra.mxu2 %v10163_v31 }
 0x232   : > { %14599 = vst [vmem:[#allocation111_spill] sm:$0xff] %v10658_v9  ;;  %2949 = vmatmul.bf16.vlgmr.msra.gmra.mxu3 %v14602_v47 }
 0x233   : > { %v2458_v6 = vpop.f32.mrf.mxu1 }
 0x234   : > { %v2545_v55 = vpop.f32.mrf.mxu2 }
 0x235   : > { %v2634_v27 = vpop.f32.mrf.mxu3  ;;  %v2369_v16 = vpop.f32.mrf.mxu0 }
 0x236   : > { %v10664_v30 = vadd.f32 %v2634_v27, %v2545_v55  ;;  %v2370_v15 = vadd.f32 %v2369_v16, %v14603_v3  ;;  %v8226_v55 = vor.u32 %v8916_v34, %v8225_v32  ;;  %v8852_v27 = vld [vmem:[%s14134_s1 + $0xd4] sm:$0xf0]  ;;  %v8353_v16 = vld [vmem:[%s14134_s1 + $0x3c8] sm:$0xf] }
 0x237   : > { %v8948_v3 = vld [vmem:[%s14134_s1 + $0x3d4] sm:$0xf0]  ;;  %v7970_v31 = vor.u32 %v8852_v27, %v7969_v37  ;;  %v8097_v32 = vld [vmem:[%s14134_s1 + $0x1c8] sm:$0xf]  ;;  %v14606_v37 = vld [vmem:[#allocation8_spill] sm:$0xff] }
 0x238   : > { %v10667_v43 = vadd.f32 %v2458_v6, %v2370_v15  ;;  %v8354_v48 = vor.u32 %v8948_v3, %v8353_v16  ;;  %v8884_v34 = vld [vmem:[%s14134_s1 + $0x1d4] sm:$0xf0]  ;;  %3209 = vmatpush.bf16.msrb.mxu2 %v8226_v55  ;;  %v14608_v16 = vld [vmem:[#allocation68_spill] sm:$0xff] }
 0x239   : > { %v8098_v38 = vor.u32 %v8884_v34, %v8097_v32  ;;  %3031 = vmatpush.bf16.msrb.mxu0 %v7970_v31  ;;  %v14607_v27 = vld [vmem:[#allocation9_spill] sm:$0xff] }
 0x23a   : > { %14604 = vst [vmem:[#allocation70_spill] sm:$0xff] %v10667_v43  ;;  %3298 = vmatpush.bf16.msrb.mxu3 %v8354_v48  ;;  %v14609_v3 = vld [vmem:[#allocation69_spill] sm:$0xff] }
 0x23b   : > { %v2461_v9 = vpop.f32.mrf.mxu1  ;;  %3120 = vmatpush.bf16.msrb.mxu1 %v8098_v38 }
 0x23c   : > { %v2547_v47 = vpop.f32.mrf.mxu2 }
 0x23d   : > { %v2636_v15 = vpop.f32.mrf.mxu3  ;;  %v2372_v6 = vpop.f32.mrf.mxu0 }
 0x23e   : > { %v10693_v22 = vadd.f32 %v2636_v15, %v2547_v47  ;;  %v2373_v43 = vadd.f32 %v2372_v6, %v10213_v56  ;;  %2776 = vmatmul.bf16.gmra.mxu1 %v14607_v27  ;;  %v14613_v27 = vld [vmem:[#allocation13_spill] sm:$0xff] }
 0x240   : > { %14605 = vst [vmem:[#allocation112_spill] sm:$0xff] %v10693_v22  ;;  %v10696_v8 = vadd.f32 %v2461_v9, %v2373_v43  ;;  %2687 = vmatmul.bf16.gmra.mxu0 %v14606_v37 }
 0x241   : > { %2865 = vmatmul.bf16.gmra.mxu2 %v14608_v16 }
 0x242   : > { %2954 = vmatmul.bf16.gmra.mxu3 %v14609_v3  ;;  %v14612_v3 = vld [vmem:[#allocation12_spill] sm:$0xff] }
 0x243   : > { %v2463_v31 = vpop.f32.mrf.mxu1 }
 0x244   : > { %v2550_v47 = vpop.f32.mrf.mxu2 }
 0x245   : > { %v2639_v15 = vpop.f32.mrf.mxu3  ;;  %v2374_v22 = vpop.f32.mrf.mxu0 }
 0x246   : > { %v10702_v56 = vadd.f32 %v2639_v15, %v2550_v47  ;;  %v2375_v55 = vadd.f32 %v2374_v22, %v10223_v49  ;;  %v14614_v22 = vld [vmem:[#allocation72_spill] sm:$0xff] }
 0x248   : > { %v10705_v48 = vadd.f32 %v2463_v31, %v2375_v55  ;;  %v14616_v31 = vld [vmem:[#allocation75_spill] sm:$0xff] }
 0x24a   : > { %14610 = vst [vmem:[#allocation113_spill] sm:$0xff] %v10705_v48 }
 0x24b   : > { %v2466_v34 = vpop.f32.mrf.mxu1 }
 0x24c   : > { %v2552_v9 = vpop.f32.mrf.mxu2 }
 0x24d   : > { %v2641_v43 = vpop.f32.mrf.mxu3  ;;  %v2377_v6 = vpop.f32.mrf.mxu0 }
 0x24e   : > { %v10707_v38 = vadd.f32 %v2641_v43, %v2552_v9  ;;  %v2378_v32 = vadd.f32 %v2377_v6, %v10247_v50  ;;  %2781 = vmatmul.bf16.gmra.mxu1 %v14613_v27  ;;  %v8209_v6 = vld [vmem:[%s14134_s1 + $0x2a8] sm:$0xf] }
 0x250   : > { %v10710_v16 = vadd.f32 %v2466_v34, %v2378_v32  ;;  %2692 = vmatmul.bf16.gmra.mxu0 %v14612_v3  ;;  %v8912_v32 = vld [vmem:[%s14134_s1 + $0x2b4] sm:$0xf0]  ;;  %v7953_v34 = vld [vmem:[%s14134_s1 + $0xa8] sm:$0xf] }
 0x251   : > { %2870 = vmatmul.bf16.gmra.mxu2 %v10219_v62 }
 0x252   : > { %14611 = vst [vmem:[#allocation114_spill] sm:$0xff] %v10710_v16  ;;  %2959 = vmatmul.bf16.gmra.mxu3 %v14614_v22 }
 0x253   : > { %v2468_v43 = vpop.f32.mrf.mxu1 }
 0x254   : > { %v2555_v49 = vpop.f32.mrf.mxu2 }
 0x255   : > { %v2644_v47 = vpop.f32.mrf.mxu3  ;;  %v2379_v15 = vpop.f32.mrf.mxu0 }
 0x256   : > { %v10716_v55 = vadd.f32 %v2644_v47, %v2555_v49  ;;  %v2380_v9 = vadd.f32 %v2379_v15, %v14616_v31  ;;  %v8210_v49 = vor.u32 %v8912_v32, %v8209_v6  ;;  %v8848_v47 = vld [vmem:[%s14134_s1 + $0xb4] sm:$0xf0]  ;;  %v8337_v15 = vld [vmem:[%s14134_s1 + $0x3a8] sm:$0xf] }
 0x257   : > { %v8944_v31 = vld [vmem:[%s14134_s1 + $0x3b4] sm:$0xf0]  ;;  %v7954_v62 = vor.u32 %v8848_v47, %v7953_v34  ;;  %v8081_v6 = vld [vmem:[%s14134_s1 + $0x1a8] sm:$0xf]  ;;  %v14619_v34 = vld [vmem:[#allocation16_spill] sm:$0xff] }
 0x258   : > { %14615 = vst [vmem:[#allocation115_spill] sm:$0xff] %v10716_v55  ;;  %v10719_v50 = vadd.f32 %v2468_v43, %v2380_v9  ;;  %v8880_v32 = vld [vmem:[%s14134_s1 + $0x1b4] sm:$0xf0]  ;;  %3210 = vmatpush.bf16.msrb.mxu2 %v8210_v49 }
 0x259   : > { %v8082_v55 = vor.u32 %v8880_v32, %v8081_v6  ;;  %3032 = vmatpush.bf16.msrb.mxu0 %v7954_v62  ;;  %v14620_v47 = vld [vmem:[#allocation17_spill] sm:$0xff] }
 0x25a   : > { %14617 = vst [vmem:[#allocation75_spill] sm:$0xff] %v10719_v50  ;;  %v8338_v50 = vor.u32 %v8944_v31, %v8337_v15  ;;  %v14621_v15 = vld [vmem:[#allocation73_spill] sm:$0xff]  ;;  %v14622_v31 = vld [vmem:[#allocation74_spill] sm:$0xff] }
 0x25b   : > { %v2471_v3 = vpop.f32.mrf.mxu1  ;;  %3121 = vmatpush.bf16.msrb.mxu1 %v8082_v55 }
 0x25c   : > { %v2557_v22 = vpop.f32.mrf.mxu2  ;;  %3299 = vmatpush.bf16.msrb.mxu3 %v8338_v50 }
 0x25d   : > { %v2646_v9 = vpop.f32.mrf.mxu3  ;;  %v2382_v43 = vpop.f32.mrf.mxu0 }
 0x25e   : > { %v10745_v16 = vadd.f32 %v2646_v9, %v2557_v22  ;;  %v2383_v27 = vadd.f32 %v2382_v43, %v10269_v41  ;;  %2786 = vmatmul.bf16.gmra.mxu1 %v14620_v47  ;;  %v14627_v47 = vld [vmem:[#allocation21_spill] sm:$0xff] }
 0x260   : > { %14618 = vst [vmem:[#allocation116_spill] sm:$0xff] %v10745_v16  ;;  %v10748_v48 = vadd.f32 %v2471_v3, %v2383_v27  ;;  %2697 = vmatmul.bf16.gmra.mxu0 %v14619_v34 }
 0x261   : > { %2875 = vmatmul.bf16.gmra.mxu2 %v14621_v15 }
 0x262   : > { %2964 = vmatmul.bf16.gmra.mxu3 %v14622_v31  ;;  %v14626_v31 = vld [vmem:[#allocation20_spill] sm:$0xff] }
 0x263   : > { %v2473_v62 = vpop.f32.mrf.mxu1 }
 0x264   : > { %v2560_v22 = vpop.f32.mrf.mxu2 }
 0x265   : > { %v2649_v9 = vpop.f32.mrf.mxu3  ;;  %v2384_v16 = vpop.f32.mrf.mxu0 }
 0x266   : > { %v10754_v41 = vadd.f32 %v2649_v9, %v2560_v22  ;;  %v2385_v49 = vadd.f32 %v2384_v16, %v10279_v25  ;;  %v14628_v22 = vld [vmem:[#allocation76_spill] sm:$0xff]  ;;  %v14629_v25 = vld [vmem:[#allocation77_spill] sm:$0xff] }
 0x268   : > { %v10757_v50 = vadd.f32 %v2473_v62, %v2385_v49 }
 0x26a   : > { %14623 = vst [vmem:[#allocation117_spill] sm:$0xff] %v10757_v50 }
 0x26b   : > { %v2476_v32 = vpop.f32.mrf.mxu1 }
 0x26c   : > { %v2562_v27 = vpop.f32.mrf.mxu2 }
 0x26d   : > { %v2651_v3 = vpop.f32.mrf.mxu3  ;;  %v2387_v43 = vpop.f32.mrf.mxu0 }
 0x26e   : > { %v10759_v55 = vadd.f32 %v2651_v3, %v2562_v27  ;;  %v2388_v6 = vadd.f32 %v2387_v43, %v10303_v44  ;;  %2791 = vmatmul.bf16.gmra.mxu1 %v14627_v47  ;;  %v14631_v27 = vld [vmem:[#allocation80_spill] sm:$0xff]  ;;  %v8193_v43 = vld [vmem:[%s14134_s1 + $0x288] sm:$0xf]  ;;  %v14634_v47 = vld [vmem:[#allocation81_spill] sm:$0xff] }
 0x270   : > { %14624 = vst [vmem:[#allocation118_spill] sm:$0xff] %v10759_v55  ;;  %v10762_v15 = vadd.f32 %v2476_v32, %v2388_v6  ;;  %2702 = vmatmul.bf16.gmra.mxu0 %v14626_v31  ;;  %v8908_v6 = vld [vmem:[%s14134_s1 + $0x294] sm:$0xf0]  ;;  %v7937_v32 = vld [vmem:[%s14134_s1 + $0x88] sm:$0xf] }
 0x271   : > { %2880 = vmatmul.bf16.gmra.mxu2 %v14628_v22 }
 0x272   : > { %14625 = vst [vmem:[#allocation119_spill] sm:$0xff] %v10762_v15  ;;  %2969 = vmatmul.bf16.gmra.mxu3 %v14629_v25 }
 0x273   : > { %v2478_v50 = vpop.f32.mrf.mxu1 }
 0x274   : > { %v2565_v16 = vpop.f32.mrf.mxu2 }
 0x275   : > { %v2654_v9 = vpop.f32.mrf.mxu3  ;;  %v2389_v49 = vpop.f32.mrf.mxu0 }
 0x276   : > { %v10768_v62 = vadd.f32 %v2654_v9, %v2565_v16  ;;  %v2390_v3 = vadd.f32 %v2389_v49, %v14631_v27  ;;  %v8194_v16 = vor.u32 %v8908_v6, %v8193_v43  ;;  %v8844_v9 = vld [vmem:[%s14134_s1 + $0x94] sm:$0xf0]  ;;  %v8065_v43 = vld [vmem:[%s14134_s1 + $0x188] sm:$0xf] }
 0x277   : > { %v8940_v49 = vld [vmem:[%s14134_s1 + $0x394] sm:$0xf0]  ;;  %v7938_v22 = vor.u32 %v8844_v9, %v7937_v32  ;;  %v14636_v32 = vld [vmem:[#allocation24_spill] sm:$0xff] }
 0x278   : > { %14630 = vst [vmem:[#allocation120_spill] sm:$0xff] %v10768_v62  ;;  %v10771_v44 = vadd.f32 %v2478_v50, %v2390_v3  ;;  %v8321_v50 = vld [vmem:[%s14134_s1 + $0x388] sm:$0xf]  ;;  %v8876_v6 = vld [vmem:[%s14134_s1 + $0x194] sm:$0xf0]  ;;  %3211 = vmatpush.bf16.msrb.mxu2 %v8194_v16  ;;  %v14640_v16 = vld [vmem:[#allocation84_spill] sm:$0xff] }
 0x279   : > { %v8066_v55 = vor.u32 %v8876_v6, %v8065_v43  ;;  %3033 = vmatpush.bf16.msrb.mxu0 %v7938_v22  ;;  %v14637_v9 = vld [vmem:[#allocation25_spill] sm:$0xff] }
 0x27a   : > { %14632 = vst [vmem:[#allocation80_spill] sm:$0xff] %v10771_v44  ;;  %v8322_v44 = vor.u32 %v8940_v49, %v8321_v50  ;;  %v14638_v50 = vld [vmem:[#allocation78_spill] sm:$0xff]  ;;  %v14639_v49 = vld [vmem:[#allocation79_spill] sm:$0xff] }
 0x27b   : > { %v2481_v62 = vpop.f32.mrf.mxu1  ;;  %3122 = vmatpush.bf16.msrb.mxu1 %v8066_v55 }
 0x27c   : > { %v2567_v25 = vpop.f32.mrf.mxu2  ;;  %3300 = vmatpush.bf16.msrb.mxu3 %v8322_v44 }
 0x27d   : > { %v2656_v27 = vpop.f32.mrf.mxu3  ;;  %v2392_v3 = vpop.f32.mrf.mxu0 }
 0x27e   : > { %v10797_v15 = vadd.f32 %v2656_v27, %v2567_v25  ;;  %v2393_v31 = vadd.f32 %v2392_v3, %v14634_v47  ;;  %2796 = vmatmul.bf16.gmra.mxu1 %v14637_v9  ;;  %v14645_v9 = vld [vmem:[#allocation29_spill] sm:$0xff] }
 0x280   : > { %14633 = vst [vmem:[#allocation121_spill] sm:$0xff] %v10797_v15  ;;  %v10800_v34 = vadd.f32 %v2481_v62, %v2393_v31  ;;  %2707 = vmatmul.bf16.gmra.mxu0 %v14636_v32 }
 0x281   : > { %2885 = vmatmul.bf16.gmra.mxu2 %v14638_v50 }
 0x282   : > { %14635 = vst [vmem:[#allocation81_spill] sm:$0xff] %v10800_v34  ;;  %2974 = vmatmul.bf16.gmra.mxu3 %v14639_v49  ;;  %v14644_v49 = vld [vmem:[#allocation28_spill] sm:$0xff] }
 0x283   : > { %v2483_v22 = vpop.f32.mrf.mxu1 }
 0x284   : > { %v2570_v25 = vpop.f32.mrf.mxu2 }
 0x285   : > { %v2659_v27 = vpop.f32.mrf.mxu3  ;;  %v2394_v15 = vpop.f32.mrf.mxu0 }
 0x286   : > { %v10806_v47 = vadd.f32 %v2659_v27, %v2570_v25  ;;  %v2395_v3 = vadd.f32 %v2394_v15, %v14640_v16  ;;  %v14646_v25 = vld [vmem:[#allocation82_spill] sm:$0xff]  ;;  %v14647_v15 = vld [vmem:[#allocation83_spill] sm:$0xff]  ;;  %v8904_v16 = vld [vmem:[%s14134_s1 + $0x274] sm:$0xf0] }
 0x287   : > { %v8177_v27 = vld [vmem:[%s14134_s1 + $0x268] sm:$0xf] }
 0x288   : > { %v10809_v44 = vadd.f32 %v2483_v22, %v2395_v3  ;;  %v8840_v3 = vld [vmem:[%s14134_s1 + $0x74] sm:$0xf0]  ;;  %v8305_v22 = vld [vmem:[%s14134_s1 + $0x368] sm:$0xf] }
 0x28a   : > { %14641 = vst [vmem:[#allocation84_spill] sm:$0xff] %v10809_v44  ;;  %v14661_v44 = vld [vmem:[#allocation90_spill] sm:$0xff] }
 0x28b   : > { %v2486_v50 = vpop.f32.mrf.mxu1 }
 0x28c   : > { %v2572_v31 = vpop.f32.mrf.mxu2 }
 0x28d   : > { %v2661_v62 = vpop.f32.mrf.mxu3  ;;  %v2397_v43 = vpop.f32.mrf.mxu0 }
 0x28e   : > { %v10811_v55 = vadd.f32 %v2661_v62, %v2572_v31  ;;  %v2398_v6 = vadd.f32 %v2397_v43, %v10365_v52  ;;  %2801 = vmatmul.bf16.gmra.mxu1 %v14645_v9  ;;  %v7921_v52 = vld [vmem:[%s14134_s1 + $0x68] sm:$0xf]  ;;  %v8936_v31 = vld [vmem:[%s14134_s1 + $0x374] sm:$0xf0] }
 0x28f   : > { %v7922_v43 = vor.u32 %v8840_v3, %v7921_v52  ;;  %v8872_v52 = vld [vmem:[%s14134_s1 + $0x174] sm:$0xf0] }
 0x290   : > { %14642 = vst [vmem:[#allocation122_spill] sm:$0xff] %v10811_v55  ;;  %v10814_v34 = vadd.f32 %v2486_v50, %v2398_v6  ;;  %2712 = vmatmul.bf16.gmra.mxu0 %v14644_v49  ;;  %v8178_v50 = vor.u32 %v8904_v16, %v8177_v27  ;;  %v8306_v6 = vor.u32 %v8936_v31, %v8305_v22  ;;  %v8049_v49 = vld [vmem:[%s14134_s1 + $0x168] sm:$0xf] }
 0x291   : > { %2890 = vmatmul.bf16.gmra.mxu2 %v14646_v25  ;;  %3034 = vmatpush.bf16.msrb.mxu0 %v7922_v43  ;;  %v8050_v22 = vor.u32 %v8872_v52, %v8049_v49  ;;  %v14652_v43 = vld [vmem:[#allocation32_spill] sm:$0xff] }
 0x292   : > { %14643 = vst [vmem:[#allocation123_spill] sm:$0xff] %v10814_v34  ;;  %2979 = vmatmul.bf16.gmra.mxu3 %v14647_v15  ;;  %3212 = vmatpush.bf16.msrb.mxu2 %v8178_v50 }
 0x293   : > { %v2488_v16 = vpop.f32.mrf.mxu1  ;;  %3301 = vmatpush.bf16.msrb.mxu3 %v8306_v6  ;;  %3123 = vmatpush.bf16.msrb.mxu1 %v8050_v22  ;;  %v14653_v6 = vld [vmem:[#allocation33_spill] sm:$0xff]  ;;  %v10866_v22 = vld [vmem:[%s14137_s4] sm:$0xff] }
 0x294   : > { %v2575_v62 = vpop.f32.mrf.mxu2 }
 0x295   : > { %v2664_v15 = vpop.f32.mrf.mxu3  ;;  %v2399_v25 = vpop.f32.mrf.mxu0 }
 0x296   : > { %v10838_v34 = vadd.f32 %v2664_v15, %v2575_v62  ;;  %v2400_v27 = vadd.f32 %v2399_v25, %v10375_v33 }
 0x298   : > { %14648 = vst [vmem:[#allocation124_spill] sm:$0xff] %v10838_v34  ;;  %v10841_v9 = vadd.f32 %v2488_v16, %v2400_v27 }
 0x29a   : > { %14649 = vst [vmem:[#allocation125_spill] sm:$0xff] %v10841_v9 }
 0x29b   : > { %v2491_v25 = vpop.f32.mrf.mxu1 }
 0x29c   : > { %v2577_v3 = vpop.f32.mrf.mxu2 }
 0x29d   : > { %v2666_v50 = vpop.f32.mrf.mxu3  ;;  %v2402_v15 = vpop.f32.mrf.mxu0 }
 0x29e   : > { %v10849_v31 = vadd.f32 %v2666_v50, %v2577_v3  ;;  %v2403_v33 = vadd.f32 %v2402_v15, %v10381_v29  ;;  %2806 = vmatmul.bf16.gmra.mxu1 %v14653_v6 }
 0x2a0   : > { %14650 = vst [vmem:[#allocation126_spill] sm:$0xff] %v10849_v31  ;;  %v10852_v62 = vadd.f32 %v2491_v25, %v2403_v33  ;;  %2717 = vmatmul.bf16.gmra.mxu0 %v14652_v43 }
 0x2a1   : > { %2895 = vmatmul.bf16.gmra.mxu2 %v10371_v12 }
 0x2a2   : > { %14651 = vst [vmem:[#allocation127_spill] sm:$0xff] %v10852_v62  ;;  %2984 = vmatmul.bf16.gmra.mxu3 %v10373_v61  ;;  %v10871_v62 = vperm.slane %v10866_v22, 0 }
 0x2a3   : > { %v2493_v29 = vpop.f32.mrf.mxu1 }
 0x2a4   : > { %v2580_v27 = vpop.f32.mrf.mxu2  ;;  %v4102_v34 = vadd.f32 %v10871_v62, %v14661_v44 }
 0x2a5   : > { %v2669_v49 = vpop.f32.mrf.mxu3  ;;  %v2404_v16 = vpop.f32.mrf.mxu0 }
 0x2a6   : > { %v10858_v52 = vadd.f32 %v2669_v49, %v2580_v27  ;;  %v2405_v3 = vadd.f32 %v2404_v16, %v10392_v45  ;;  %v14657_v45 = vld [vmem:[#allocation36_spill] sm:$0xff]  ;;  %v14658_v49 = vld [vmem:[#allocation37_spill] sm:$0xff] }
 0x2a7   : > { %v14659_v16 = vld [vmem:[#allocation88_spill] sm:$0xff] }
 0x2a8   : > { %14654 = vst [vmem:[#allocation128_spill] sm:$0xff] %v10858_v52  ;;  %v10861_v50 = vadd.f32 %v2493_v29, %v2405_v3  ;;  %v232_v3 = vld [vmem:[%s14137_s4 + $0x8] sm:$0xff]  ;;  %v14660_v29 = vld [vmem:[#allocation89_spill] sm:$0xff] }
 0x2aa   : > { %14655 = vst [vmem:[#allocation129_spill] sm:$0xff] %v10861_v50 }
 0x2ab   : > { %v2772_v61 = vpop.f32.mrf.mxu1 }
 0x2ac   : > { %v2582_v15 = vpop.f32.mrf.mxu2 }
 0x2ad   : > { %v2671_v33 = vpop.f32.mrf.mxu3  ;;  %v2683_v25 = vpop.f32.mrf.mxu0 }
 0x2ae   : > { %v10868_v12 = vadd.f32 %v2671_v33, %v2582_v15  ;;  %v2684_v27 = vadd.f32 %v2683_v25, %v10400_v17  ;;  %2811 = vmatmul.bf16.gmra.mxu1 %v14658_v49  ;;  %v4100_v15 = vadd.f32 %v10871_v62, %v14660_v29  ;;  %v8161_v17 = vld [vmem:[%s14134_s1 + $0x248] sm:$0xf]  ;;  %v8900_v25 = vld [vmem:[%s14134_s1 + $0x254] sm:$0xf0] }
 0x2af   : > { %v8162_v49 = vor.u32 %v8900_v25, %v8161_v17 }
 0x2b0   : > { %14656 = vst [vmem:[#allocation130_spill] sm:$0xff] %v10868_v12  ;;  %2722 = vmatmul.bf16.gmra.mxu0 %v14657_v45  ;;  %v2773_v33 = vadd.f32 %v2772_v61, %v2684_v27  ;;  %v8836_v45 = vld [vmem:[%s14134_s1 + $0x54] sm:$0xf0]  ;;  %v8289_v61 = vld [vmem:[%s14134_s1 + $0x348] sm:$0xf]  ;;  %v10901_v12 = vperm.slane %v232_v3, 0  ;;  %9064 = vtanh.f32 %v4100_v15 }
 0x2b1   : > { %2900 = vmatmul.bf16.gmra.mxu2 %v10387_v26  ;;  %v8932_v27 = vld [vmem:[%s14134_s1 + $0x354] sm:$0xf0] }
 0x2b2   : > { %2989 = vmatmul.bf16.gmra.mxu3 %v14659_v16  ;;  %v7905_v16 = vld [vmem:[%s14134_s1 + $0x48] sm:$0xf]  ;;  %v8290_v52 = vor.u32 %v8932_v27, %v8289_v61  ;;  %3213 = vmatpush.bf16.msrb.mxu2 %v8162_v49 }
 0x2b3   : > { %v7906_v43 = vor.u32 %v8836_v45, %v7905_v16  ;;  %v2774_v17 = vpop.f32.mrf.mxu1 }
 0x2b4   : > { %v2861_v26 = vpop.f32.mrf.mxu2  ;;  %3302 = vmatpush.bf16.msrb.mxu3 %v8290_v52  ;;  %v10912_v52 = vperm.slane %v232_v3, 1 }
 0x2b5   : > { %v2862_v29 = vadd.f32 %v2861_v26, %v2773_v33  ;;  %v2950_v50 = vpop.f32.mrf.mxu3  ;;  %v2685_v6 = vpop.f32.mrf.mxu0  ;;  %3035 = vmatpush.bf16.msrb.mxu0 %v7906_v43 }
 0x2b6   : > { %v2686_v9 = vadd.f32 %v2685_v6, %v10437_v18  ;;  %v9065_v55 = vpop.eup %9064  ;;  %v14662_v18 = vld [vmem:[#allocation40_spill] sm:$0xff]  ;;  %v10910_v6 = vperm.slane %v10866_v22, 1 }
 0x2b7   : > { %v2951_v25 = vadd.f32 %v2950_v50, %v2862_v29  ;;  %v4228_v43 = vmul.f32 %v9065_v55, %v9065_v55  ;;  %v4104_v55 = vadd.f32 %v10871_v62, %v10440_v0 }
 0x2b8   : > { %v2775_v26 = vadd.f32 %v2774_v17, %v2686_v9 }
 0x2b9   : > { %v4101_v31 = vadd.f32 %v10901_v12, %v2951_v25  ;;  %v4294_v29 = vmul.f32 %v10910_v6, %v4228_v43  ;;  %v4106_v43 = vadd.f32 %v10871_v62, %v10449_v46 }
 0x2bb   : > { %9066 = vtanh.f32 %v4101_v31  ;;  %v2777_v61 = vpop.f32.mrf.mxu1  ;;  %v14663_v31 = vld [vmem:[#allocation41_spill] sm:$0xff] }
 0x2bc   : > { %v2863_v33 = vpop.f32.mrf.mxu2  ;;  %9068 = vtanh.f32 %v4102_v34 }
 0x2bd   : > { %v2864_v32 = vadd.f32 %v2863_v33, %v2775_v26  ;;  %v2952_v45 = vpop.f32.mrf.mxu3  ;;  %v2688_v16 = vpop.f32.mrf.mxu0 }
 0x2be   : > { %v2689_v50 = vadd.f32 %v2688_v16, %v10446_v2  ;;  %2816 = vmatmul.bf16.gmra.mxu1 %v14663_v31  ;;  %v8033_v2 = vld [vmem:[%s14134_s1 + $0x148] sm:$0xf] }
 0x2bf   : > { %v2953_v49 = vadd.f32 %v2952_v45, %v2864_v32  ;;  %v8868_v32 = vld [vmem:[%s14134_s1 + $0x154] sm:$0xf0] }
 0x2c0   : > { %2727 = vmatmul.bf16.gmra.mxu0 %v14662_v18  ;;  %v2778_v3 = vadd.f32 %v2777_v61, %v2689_v50  ;;  %v8034_v15 = vor.u32 %v8868_v32, %v8033_v2 }
 0x2c1   : > { %v9067_v44 = vpop.eup %9066  ;;  %v4103_v9 = vadd.f32 %v10901_v12, %v2953_v49  ;;  %2905 = vmatmul.bf16.gmra.mxu2 %v10418_v39 }
 0x2c2   : > { %2994 = vmatmul.bf16.gmra.mxu3 %v10429_v21  ;;  %v4229_v34 = vmul.f32 %v9067_v44, %v9067_v44  ;;  %v9069_v25 = vpop.eup %9068  ;;  %3124 = vmatpush.bf16.msrb.mxu1 %v8034_v15 }
 0x2c3   : > { %9070 = vtanh.f32 %v4103_v9  ;;  %v2779_v16 = vpop.f32.mrf.mxu1  ;;  %v4230_v0 = vmul.f32 %v9069_v25, %v9069_v25 }
 0x2c4   : > { %v2866_v27 = vpop.f32.mrf.mxu2  ;;  %v4295_v17 = vmul.f32 %v10912_v52, %v4229_v34  ;;  %9072 = vtanh.f32 %v4104_v55 }
 0x2c5   : > { %v2867_v26 = vadd.f32 %v2866_v27, %v2778_v3  ;;  %v2955_v33 = vpop.f32.mrf.mxu3  ;;  %v2690_v45 = vpop.f32.mrf.mxu0  ;;  %v4296_v32 = vmul.f32 %v10910_v6, %v4230_v0 }
 0x2c6   : > { %v4358_v49 = vadd.f32 %v4295_v17, %v4294_v29  ;;  %v2691_v21 = vadd.f32 %v2690_v45, %v10459_v51 }
 0x2c7   : > { %v2956_v44 = vadd.f32 %v2955_v33, %v2867_v26  ;;  %v14664_v33 = vld [vmem:[#allocation44_spill] sm:$0xff] }
 0x2c8   : > { %4359 = vadd.xlane.f32.xlu2 %v4358_v49  ;;  %v2780_v34 = vadd.f32 %v2779_v16, %v2691_v21  ;;  %v14665_v16 = vld [vmem:[#allocation45_spill] sm:$0xff] }
 0x2c9   : > { %v9071_v61 = vpop.eup %9070  ;;  %v4105_v50 = vadd.f32 %v10901_v12, %v2956_v44  ;;  %v14666_v49 = vld [vmem:[#allocation93_spill] sm:$0xff]  ;;  %v14667_v44 = vld [vmem:[#allocation94_spill] sm:$0xff] }
 0x2ca   : > { %v4231_v9 = vmul.f32 %v9071_v61, %v9071_v61  ;;  %v9073_v55 = vpop.eup %9072  ;;  %v14668_v61 = vld [vmem:[#allocation95_spill] sm:$0xff] }
 0x2cb   : > { %9074 = vtanh.f32 %v4105_v50  ;;  %v2782_v29 = vpop.f32.mrf.mxu1  ;;  %v4232_v46 = vmul.f32 %v9073_v55, %v9073_v55  ;;  %v4108_v50 = vadd.f32 %v10871_v62, %v14668_v61 }
 0x2cc   : > { %v2868_v2 = vpop.f32.mrf.mxu2  ;;  %v4297_v3 = vmul.f32 %v10912_v52, %v4231_v9  ;;  %9076 = vtanh.f32 %v4106_v43  ;;  %v8896_v43 = vld [vmem:[%s14134_s1 + $0x234] sm:$0xf0] }
 0x2cd   : > { %v2869_v15 = vadd.f32 %v2868_v2, %v2780_v34  ;;  %v2957_v27 = vpop.f32.mrf.mxu3  ;;  %v2693_v51 = vpop.f32.mrf.mxu0  ;;  %v7889_v34 = vld [vmem:[%s14134_s1 + $0x28] sm:$0xf] }
 0x2ce   : > { %v4361_v17 = vadd.f32 %v4297_v3, %v4296_v32  ;;  %v2694_v26 = vadd.f32 %v2693_v51, %v10468_v13  ;;  %2821 = vmatmul.bf16.gmra.mxu1 %v14665_v16  ;;  %v8145_v13 = vld [vmem:[%s14134_s1 + $0x228] sm:$0xf]  ;;  %v4298_v32 = vmul.f32 %v10910_v6, %v4232_v46  ;;  %v8928_v51 = vld [vmem:[%s14134_s1 + $0x334] sm:$0xf0] }
 0x2cf   : > { %v2958_v25 = vadd.f32 %v2957_v27, %v2869_v15  ;;  %v8146_v55 = vor.u32 %v8896_v43, %v8145_v13  ;;  %v8832_v15 = vld [vmem:[%s14134_s1 + $0x34] sm:$0xf0]  ;;  %v8273_v27 = vld [vmem:[%s14134_s1 + $0x328] sm:$0xf] }
 0x2d0   : > { %4362 = vadd.xlane.f32.xlu0 %v4361_v17  ;;  %2732 = vmatmul.bf16.gmra.mxu0 %v14664_v33  ;;  %v2783_v9 = vadd.f32 %v2782_v29, %v2694_v26  ;;  %v7890_v46 = vor.u32 %v8832_v15, %v7889_v34 }
 0x2d1   : > { %v9075_v21 = vpop.eup %9074  ;;  %v4107_v45 = vadd.f32 %v10901_v12, %v2958_v25  ;;  %2910 = vmatmul.bf16.gmra.mxu2 %v14666_v49 }
 0x2d2   : > { %2999 = vmatmul.bf16.gmra.mxu3 %v14667_v44  ;;  %v4233_v0 = vmul.f32 %v9075_v21, %v9075_v21  ;;  %v9077_v29 = vpop.eup %9076  ;;  %v8274_v21 = vor.u32 %v8928_v51, %v8273_v27  ;;  %3214 = vmatpush.bf16.msrb.mxu2 %v8146_v55 }
 0x2d3   : > { %9078 = vtanh.f32 %v4107_v45  ;;  %v2784_v45 = vpop.f32.mrf.mxu1  ;;  %3036 = vmatpush.bf16.msrb.mxu0 %v7890_v46  ;;  %v4234_v43 = vmul.f32 %v9077_v29, %v9077_v29 }
 0x2d4   : > { %v2871_v2 = vpop.f32.mrf.mxu2  ;;  %v4299_v3 = vmul.f32 %v10912_v52, %v4233_v0  ;;  %9080 = vtanh.f32 %v4108_v50  ;;  %3303 = vmatpush.bf16.msrb.mxu3 %v8274_v21  ;;  %v14671_v21 = vld [vmem:[#allocation49_spill] sm:$0xff] }
 0x2d5   : > { %v2872_v17 = vadd.f32 %v2871_v2, %v2783_v9  ;;  %v2960_v25 = vpop.f32.mrf.mxu3  ;;  %v2695_v26 = vpop.f32.mrf.mxu0  ;;  %v14669_v9 = vld [vmem:[#allocation96_spill] sm:$0xff] }
 0x2d6   : > { %v4364_v0 = vadd.f32 %v4299_v3, %v4298_v32  ;;  %v2696_v13 = vadd.f32 %v2695_v26, %v10505_v40  ;;  %v4110_v2 = vadd.f32 %v10871_v62, %v14669_v9  ;;  %v4300_v32 = vmul.f32 %v10910_v6, %v4234_v43  ;;  %v14670_v26 = vld [vmem:[#allocation48_spill] sm:$0xff] }
 0x2d7   : > { %v2961_v61 = vadd.f32 %v2960_v25, %v2872_v17 }
 0x2d8   : > { %4365 = vadd.xlane.f32.xlu1 %v4364_v0  ;;  %v2785_v34 = vadd.f32 %v2784_v45, %v2696_v13  ;;  %v8017_v45 = vld [vmem:[%s14134_s1 + $0x128] sm:$0xf]  ;;  %v4112_v0 = vadd.f32 %v10871_v62, %v10508_v5 }
 0x2d9   : > { %v9079_v44 = vpop.eup %9078  ;;  %v4109_v49 = vadd.f32 %v10901_v12, %v2961_v61 }
 0x2da   : > { %v4235_v39 = vmul.f32 %v9079_v44, %v9079_v44  ;;  %v9081_v3 = vpop.eup %9080 }
 0x2db   : > { %9082 = vtanh.f32 %v4109_v49  ;;  %v2787_v51 = vpop.f32.mrf.mxu1  ;;  %v4236_v25 = vmul.f32 %v9081_v3, %v9081_v3 }
 0x2dc   : > { %v2873_v15 = vpop.f32.mrf.mxu2  ;;  %v4301_v50 = vmul.f32 %v10912_v52, %v4235_v39  ;;  %9084 = vtanh.f32 %v4110_v2 }
 0x2dd   : > { %v2874_v40 = vadd.f32 %v2873_v15, %v2785_v34  ;;  %v2962_v55 = vpop.f32.mrf.mxu3  ;;  %v2698_v27 = vpop.f32.mrf.mxu0  ;;  %v4302_v9 = vmul.f32 %v10910_v6, %v4236_v25 }
 0x2de   : > { %v4367_v29 = vadd.f32 %v4301_v50, %v4300_v32  ;;  %v2699_v44 = vadd.f32 %v2698_v27, %v10514_v1  ;;  %2826 = vmatmul.bf16.gmra.mxu1 %v14671_v21  ;;  %v8864_v1 = vld [vmem:[%s14134_s1 + $0x134] sm:$0xf0] }
 0x2df   : > { %v2963_v17 = vadd.f32 %v2962_v55, %v2874_v40  ;;  %v8018_v13 = vor.u32 %v8864_v1, %v8017_v45 }
 0x2e0   : > { %4368 = vadd.xlane.f32.xlu2 %v4367_v29  ;;  %2737 = vmatmul.bf16.gmra.mxu0 %v14670_v26  ;;  %v2788_v61 = vadd.f32 %v2787_v51, %v2699_v44  ;;  %v4114_v44 = vadd.f32 %v10871_v62, %v10517_v24  ;;  %v14672_v24 = vld [vmem:[#allocation52_spill] sm:$0xff] }
 0x2e1   : > { %v9083_v49 = vpop.eup %9082  ;;  %v4111_v46 = vadd.f32 %v10901_v12, %v2963_v17  ;;  %2915 = vmatmul.bf16.gmra.mxu2 %v10486_v20  ;;  %3125 = vmatpush.bf16.msrb.mxu1 %v8018_v13 }
 0x2e2   : > { %v4237_v39 = vmul.f32 %v9083_v49, %v9083_v49  ;;  %3004 = vmatmul.bf16.gmra.mxu3 %v10497_v59  ;;  %v9085_v34 = vpop.eup %9084 }
 0x2e3   : > { %9086 = vtanh.f32 %v4111_v46  ;;  %v2789_v3 = vpop.f32.mrf.mxu1  ;;  %v4238_v5 = vmul.f32 %v9085_v34, %v9085_v34 }
 0x2e4   : > { %v2876_v43 = vpop.f32.mrf.mxu2  ;;  %v4303_v2 = vmul.f32 %v10912_v52, %v4237_v39  ;;  %9088 = vtanh.f32 %v4112_v0 }
 0x2e5   : > { %v2877_v15 = vadd.f32 %v2876_v43, %v2788_v61  ;;  %v2965_v32 = vpop.f32.mrf.mxu3  ;;  %v2700_v50 = vpop.f32.mrf.mxu0  ;;  %v4304_v46 = vmul.f32 %v10910_v6, %v4238_v5 }
 0x2e6   : > { %v4370_v40 = vadd.f32 %v4303_v2, %v4302_v9  ;;  %v2701_v27 = vadd.f32 %v2700_v50, %v10527_v11  ;;  %v14674_v50 = vld [vmem:[#allocation99_spill] sm:$0xff] }
 0x2e7   : > { %v2966_v55 = vadd.f32 %v2965_v32, %v2877_v15  ;;  %v14673_v32 = vld [vmem:[#allocation53_spill] sm:$0xff] }
 0x2e8   : > { %4371 = vadd.xlane.f32.xlu2 %v4370_v40  ;;  %v2790_v25 = vadd.f32 %v2789_v3, %v2701_v27  ;;  %v14675_v40 = vld [vmem:[#allocation100_spill] sm:$0xff] }
 0x2e9   : > { %v9087_v51 = vpop.eup %9086  ;;  %v4113_v29 = vadd.f32 %v10901_v12, %v2966_v55  ;;  %v14676_v55 = vld [vmem:[#allocation101_spill] sm:$0xff] }
 0x2ea   : > { %v4239_v17 = vmul.f32 %v9087_v51, %v9087_v51  ;;  %v9089_v45 = vpop.eup %9088  ;;  %v4116_v27 = vadd.f32 %v10871_v62, %v14676_v55  ;;  %v8892_v51 = vld [vmem:[%s14134_s1 + $0x214] sm:$0xf0] }
 0x2eb   : > { %9090 = vtanh.f32 %v4113_v29  ;;  %v2792_v61 = vpop.f32.mrf.mxu1  ;;  %v4240_v2 = vmul.f32 %v9089_v45, %v9089_v45  ;;  %v7873_v29 = vld [vmem:[%s14134_s1 + $0x8] sm:$0xf]  ;;  %v8924_v45 = vld [vmem:[%s14134_s1 + $0x314] sm:$0xf0] }
 0x2ec   : > { %v2878_v49 = vpop.f32.mrf.mxu2  ;;  %v4305_v39 = vmul.f32 %v10912_v52, %v4239_v17  ;;  %9092 = vtanh.f32 %v4114_v44 }
 0x2ed   : > { %v2879_v1 = vadd.f32 %v2878_v49, %v2790_v25  ;;  %v2967_v0 = vpop.f32.mrf.mxu3  ;;  %v2703_v11 = vpop.f32.mrf.mxu0  ;;  %v4306_v44 = vmul.f32 %v10910_v6, %v4240_v2 }
 0x2ee   : > { %v4373_v13 = vadd.f32 %v4305_v39, %v4304_v46  ;;  %v2704_v9 = vadd.f32 %v2703_v11, %v10536_v42  ;;  %2831 = vmatmul.bf16.gmra.mxu1 %v14673_v32  ;;  %v8129_v42 = vld [vmem:[%s14134_s1 + $0x208] sm:$0xf]  ;;  %v8828_v46 = vld [vmem:[%s14134_s1 + $0x14] sm:$0xf0] }
 0x2ef   : > { %v2968_v43 = vadd.f32 %v2967_v0, %v2879_v1  ;;  %v8130_v49 = vor.u32 %v8892_v51, %v8129_v42  ;;  %v8257_v39 = vld [vmem:[%s14134_s1 + $0x308] sm:$0xf] }
 0x2f0   : > { %4374 = vadd.xlane.f32.xlu1 %v4373_v13  ;;  %2742 = vmatmul.bf16.gmra.mxu0 %v14672_v24  ;;  %v2793_v5 = vadd.f32 %v2792_v61, %v2704_v9  ;;  %v7874_v13 = vor.u32 %v8828_v46, %v7873_v29 }
 0x2f1   : > { %v9091_v34 = vpop.eup %9090  ;;  %v4115_v15 = vadd.f32 %v10901_v12, %v2968_v43  ;;  %2920 = vmatmul.bf16.gmra.mxu2 %v14674_v50  ;;  %v8258_v43 = vor.u32 %v8924_v45, %v8257_v39 }
 0x2f2   : > { %v4241_v3 = vmul.f32 %v9091_v34, %v9091_v34  ;;  %3009 = vmatmul.bf16.gmra.mxu3 %v14675_v40  ;;  %v9093_v1 = vpop.eup %9092  ;;  %3215 = vmatpush.bf16.msrb.mxu2 %v8130_v49  ;;  %v14716_v40 = vld [vmem:[#allocation20_spill] sm:$0xff] }
 0x2f3   : > { %9094 = vtanh.f32 %v4115_v15  ;;  %v2794_v9 = vpop.f32.mrf.mxu1  ;;  %3037 = vmatpush.bf16.msrb.mxu0 %v7874_v13  ;;  %3304 = vmatpush.bf16.msrb.mxu3 %v8258_v43  ;;  %v14678_v13 = vld [vmem:[#allocation56_spill] sm:$0xff] }
 0x2f4   : > { %v2881_v17 = vpop.f32.mrf.mxu2  ;;  %v4307_v25 = vmul.f32 %v10912_v52, %v4241_v3  ;;  %9096 = vtanh.f32 %v4116_v27  ;;  %v4242_v3 = vmul.f32 %v9093_v1, %v9093_v1 }
 0x2f5   : > { %v2882_v0 = vadd.f32 %v2881_v17, %v2793_v5  ;;  %v2970_v11 = vpop.f32.mrf.mxu3  ;;  %v2705_v61 = vpop.f32.mrf.mxu0  ;;  %v14677_v5 = vld [vmem:[#allocation102_spill] sm:$0xff] }
 0x2f6   : > { %v4376_v2 = vadd.f32 %v4307_v25, %v4306_v44  ;;  %v2706_v15 = vadd.f32 %v2705_v61, %v10573_v63  ;;  %v4118_v17 = vadd.f32 %v10871_v62, %v14677_v5  ;;  %v4308_v44 = vmul.f32 %v10910_v6, %v4242_v3 }
 0x2f7   : > { %v2971_v34 = vadd.f32 %v2970_v11, %v2882_v0  ;;  %v4120_v3 = vadd.f32 %v10871_v62, %v10576_v10 }
 0x2f8   : > { %4377 = vadd.xlane.f32.xlu0 %v4376_v2  ;;  %v2795_v29 = vadd.f32 %v2794_v9, %v2706_v15  ;;  %v14679_v2 = vld [vmem:[#allocation57_spill] sm:$0xff]  ;;  %v8001_v15 = vld [vmem:[%s14134_s1 + $0x108] sm:$0xf] }
 0x2f9   : > { %v9095_v55 = vpop.eup %9094  ;;  %v4117_v42 = vadd.f32 %v10901_v12, %v2971_v34 }
 0x2fa   : > { %v4243_v51 = vmul.f32 %v9095_v55, %v9095_v55  ;;  %v9097_v25 = vpop.eup %9096 }
 0x2fb   : > { %9098 = vtanh.f32 %v4117_v42  ;;  %v2797_v45 = vpop.f32.mrf.mxu1  ;;  %v4244_v61 = vmul.f32 %v9097_v25, %v9097_v25 }
 0x2fc   : > { %v2883_v46 = vpop.f32.mrf.mxu2  ;;  %v4309_v27 = vmul.f32 %v10912_v52, %v4243_v51  ;;  %9100 = vtanh.f32 %v4118_v17 }
 0x2fd   : > { %v2884_v63 = vadd.f32 %v2883_v46, %v2795_v29  ;;  %v2972_v49 = vpop.f32.mrf.mxu3  ;;  %v2708_v39 = vpop.f32.mrf.mxu0  ;;  %v4310_v5 = vmul.f32 %v10910_v6, %v4244_v61 }
 0x2fe   : > { %v4379_v1 = vadd.f32 %v4309_v27, %v4308_v44  ;;  %v2709_v11 = vadd.f32 %v2708_v39, %v10582_v7  ;;  %2836 = vmatmul.bf16.gmra.mxu1 %v14679_v2  ;;  %v8860_v7 = vld [vmem:[%s14134_s1 + $0x114] sm:$0xf0] }
 0x2ff   : > { %v2973_v0 = vadd.f32 %v2972_v49, %v2884_v63  ;;  %v8002_v42 = vor.u32 %v8860_v7, %v8001_v15 }
 0x300   : > { %4380 = vadd.xlane.f32.xlu2 %v4379_v1  ;;  %2747 = vmatmul.bf16.gmra.mxu0 %v14678_v13  ;;  %v2798_v55 = vadd.f32 %v2797_v45, %v2709_v11  ;;  %v4122_v11 = vadd.f32 %v10871_v62, %v10585_v54  ;;  %v14680_v54 = vld [vmem:[#allocation60_spill] sm:$0xff] }
 0x301   : > { %v9099_v43 = vpop.eup %9098  ;;  %v4119_v9 = vadd.f32 %v10901_v12, %v2973_v0  ;;  %2925 = vmatmul.bf16.gmra.mxu2 %v10554_v14  ;;  %3126 = vmatpush.bf16.msrb.mxu1 %v8002_v42  ;;  %v14715_v14 = vld [vmem:[#allocation19_spill] sm:$0xff] }
 0x302   : > { %v4245_v34 = vmul.f32 %v9099_v43, %v9099_v43  ;;  %3014 = vmatmul.bf16.gmra.mxu3 %v10565_v60  ;;  %v9101_v29 = vpop.eup %9100 }
 0x303   : > { %9102 = vtanh.f32 %v4119_v9  ;;  %v2799_v25 = vpop.f32.mrf.mxu1  ;;  %v4246_v10 = vmul.f32 %v9101_v29, %v9101_v29 }
 0x304   : > { %v2886_v51 = vpop.f32.mrf.mxu2  ;;  %v4311_v17 = vmul.f32 %v10912_v52, %v4245_v34  ;;  %9104 = vtanh.f32 %v4120_v3 }
 0x305   : > { %v2887_v46 = vadd.f32 %v2886_v51, %v2798_v55  ;;  %v2975_v44 = vpop.f32.mrf.mxu3  ;;  %v2710_v27 = vpop.f32.mrf.mxu0  ;;  %v4312_v9 = vmul.f32 %v10910_v6, %v4246_v10 }
 0x306   : > { %v4382_v63 = vadd.f32 %v4311_v17, %v4310_v5  ;;  %v2711_v39 = vadd.f32 %v2710_v27, %v10595_v36  ;;  %v14682_v27 = vld [vmem:[#allocation105_spill] sm:$0xff] }
 0x307   : > { %v2976_v49 = vadd.f32 %v2975_v44, %v2887_v46  ;;  %v14681_v44 = vld [vmem:[#allocation61_spill] sm:$0xff] }
 0x308   : > { %4383 = vadd.xlane.f32.xlu0 %v4382_v63  ;;  %v2800_v61 = vadd.f32 %v2799_v25, %v2711_v39  ;;  %v14683_v63 = vld [vmem:[#allocation106_spill] sm:$0xff] }
 0x309   : > { %v9103_v45 = vpop.eup %9102  ;;  %v4121_v1 = vadd.f32 %v10901_v12, %v2976_v49  ;;  %v14684_v49 = vld [vmem:[#allocation107_spill] sm:$0xff] }
 0x30a   : > { %v4247_v0 = vmul.f32 %v9103_v45, %v9103_v45  ;;  %v9105_v15 = vpop.eup %9104  ;;  %v4124_v39 = vadd.f32 %v10871_v62, %v14684_v49  ;;  %v7987_v45 = vld [vmem:[%s14134_s1 + $0xf8] sm:$0xf0] }
 0x30b   : > { %9106 = vtanh.f32 %v4121_v1  ;;  %v2802_v55 = vpop.f32.mrf.mxu1  ;;  %v4248_v17 = vmul.f32 %v9105_v15, %v9105_v15  ;;  %v8497_v1 = vld [vmem:[%s14134_s1 + $0x4e8] sm:$0xf]  ;;  %v8115_v15 = vld [vmem:[%s14134_s1 + $0x1f8] sm:$0xf0] }
 0x30c   : > { %v2888_v43 = vpop.f32.mrf.mxu2  ;;  %v4313_v34 = vmul.f32 %v10912_v52, %v4247_v0  ;;  %9108 = vtanh.f32 %v4122_v11 }
 0x30d   : > { %v2889_v7 = vadd.f32 %v2888_v43, %v2800_v61  ;;  %v2977_v3 = vpop.f32.mrf.mxu3  ;;  %v2713_v36 = vpop.f32.mrf.mxu0  ;;  %v4314_v11 = vmul.f32 %v10910_v6, %v4248_v17 }
 0x30e   : > { %v4385_v42 = vadd.f32 %v4313_v34, %v4312_v9  ;;  %v2714_v5 = vadd.f32 %v2713_v36, %v10604_v58  ;;  %2841 = vmatmul.bf16.gmra.mxu1 %v14681_v44  ;;  %v8854_v58 = vld [vmem:[%s14134_s1 + $0xec] sm:$0xf]  ;;  %v8984_v9 = vld [vmem:[%s14134_s1 + $0x4f4] sm:$0xf0] }
 0x30f   : > { %v2978_v51 = vadd.f32 %v2977_v3, %v2889_v7  ;;  %v7990_v43 = vor.u32 %v8854_v58, %v7987_v45  ;;  %v8886_v34 = vld [vmem:[%s14134_s1 + $0x1ec] sm:$0xf] }
 0x310   : > { %4386 = vadd.xlane.f32.xlu0 %v4385_v42  ;;  %2752 = vmatmul.bf16.gmra.mxu0 %v14680_v54  ;;  %v2803_v10 = vadd.f32 %v2802_v55, %v2714_v5  ;;  %v8498_v42 = vor.u32 %v8984_v9, %v8497_v1 }
 0x311   : > { %v9107_v29 = vpop.eup %9106  ;;  %v4123_v46 = vadd.f32 %v10901_v12, %v2978_v51  ;;  %2930 = vmatmul.bf16.gmra.mxu2 %v14682_v27  ;;  %v8118_v51 = vor.u32 %v8886_v34, %v8115_v15 }
 0x312   : > { %v4249_v25 = vmul.f32 %v9107_v29, %v9107_v29  ;;  %3019 = vmatmul.bf16.gmra.mxu3 %v14683_v63  ;;  %v9109_v7 = vpop.eup %9108  ;;  %3564 = vmatpush.bf16.msra.mxu2 %v7990_v43 }
 0x313   : > { %9110 = vtanh.f32 %v4123_v46  ;;  %v2804_v5 = vpop.f32.mrf.mxu1  ;;  %3386 = vmatpush.bf16.msra.mxu0 %v8498_v42  ;;  %3653 = vmatpush.bf16.msra.mxu3 %v8118_v51  ;;  %v14686_v42 = vld [vmem:[#allocation64_spill] sm:$0xff] }
 0x314   : > { %v2891_v0 = vpop.f32.mrf.mxu2  ;;  %v4315_v61 = vmul.f32 %v10912_v52, %v4249_v25  ;;  %9112 = vtanh.f32 %v4124_v39  ;;  %v4250_v25 = vmul.f32 %v9109_v7, %v9109_v7 }
 0x315   : > { %v2892_v3 = vadd.f32 %v2891_v0, %v2803_v10  ;;  %v2980_v36 = vpop.f32.mrf.mxu3  ;;  %v2715_v55 = vpop.f32.mrf.mxu0  ;;  %v14685_v10 = vld [vmem:[#allocation108_spill] sm:$0xff] }
 0x316   : > { %v4388_v17 = vadd.f32 %v4315_v61, %v4314_v11  ;;  %v2716_v46 = vadd.f32 %v2715_v55, %v10641_v23  ;;  %v4126_v0 = vadd.f32 %v10871_v62, %v14685_v10  ;;  %v4316_v11 = vmul.f32 %v10910_v6, %v4250_v25 }
 0x317   : > { %v2981_v29 = vadd.f32 %v2980_v36, %v2892_v3  ;;  %v4128_v25 = vadd.f32 %v10871_v62, %v10644_v19 }
 0x318   : > { %4389 = vadd.xlane.f32.xlu1 %v4388_v17  ;;  %v2805_v1 = vadd.f32 %v2804_v5, %v2716_v46  ;;  %v14687_v17 = vld [vmem:[#allocation65_spill] sm:$0xff]  ;;  %v8625_v46 = vld [vmem:[%s14134_s1 + $0x5e8] sm:$0xf] }
 0x319   : > { %v9111_v49 = vpop.eup %9110  ;;  %v4125_v58 = vadd.f32 %v10901_v12, %v2981_v29 }
 0x31a   : > { %v4251_v45 = vmul.f32 %v9111_v49, %v9111_v49  ;;  %v9113_v61 = vpop.eup %9112 }
 0x31b   : > { %9114 = vtanh.f32 %v4125_v58  ;;  %v2807_v15 = vpop.f32.mrf.mxu1  ;;  %v4252_v55 = vmul.f32 %v9113_v61, %v9113_v61 }
 0x31c   : > { %v2893_v9 = vpop.f32.mrf.mxu2  ;;  %v4317_v39 = vmul.f32 %v10912_v52, %v4251_v45  ;;  %9116 = vtanh.f32 %v4126_v0 }
 0x31d   : > { %v2894_v23 = vadd.f32 %v2893_v9, %v2805_v1  ;;  %v2982_v43 = vpop.f32.mrf.mxu3  ;;  %v2718_v34 = vpop.f32.mrf.mxu0  ;;  %v4318_v10 = vmul.f32 %v10910_v6, %v4252_v55 }
 0x31e   : > { %v4391_v7 = vadd.f32 %v4317_v39, %v4316_v11  ;;  %v2719_v36 = vadd.f32 %v2718_v34, %v10650_v35  ;;  %2846 = vmatmul.bf16.gmra.mxu1 %v14687_v17  ;;  %v9016_v35 = vld [vmem:[%s14134_s1 + $0x5f4] sm:$0xf0] }
 0x31f   : > { %v2983_v3 = vadd.f32 %v2982_v43, %v2894_v23  ;;  %v8626_v58 = vor.u32 %v9016_v35, %v8625_v46 }
 0x320   : > { %4392 = vadd.xlane.f32.xlu1 %v4391_v7  ;;  %2757 = vmatmul.bf16.gmra.mxu0 %v14686_v42  ;;  %v2808_v49 = vadd.f32 %v2807_v15, %v2719_v36  ;;  %v4130_v36 = vadd.f32 %v10871_v62, %v10653_v53  ;;  %v14688_v53 = vld [vmem:[#allocation2_spill] sm:$0xff] }
 0x321   : > { %v9115_v51 = vpop.eup %9114  ;;  %v4127_v5 = vadd.f32 %v10901_v12, %v2983_v3  ;;  %2935 = vmatmul.bf16.gmra.mxu2 %v10622_v57  ;;  %3475 = vmatpush.bf16.msra.mxu1 %v8626_v58 }
 0x322   : > { %v4253_v29 = vmul.f32 %v9115_v51, %v9115_v51  ;;  %3024 = vmatmul.bf16.gmra.mxu3 %v10633_v28  ;;  %v9117_v1 = vpop.eup %9116 }
 0x323   : > { %9118 = vtanh.f32 %v4127_v5  ;;  %v2809_v61 = vpop.f32.mrf.mxu1  ;;  %v4254_v19 = vmul.f32 %v9117_v1, %v9117_v1 }
 0x324   : > { %v2896_v45 = vpop.f32.mrf.mxu2  ;;  %v4319_v0 = vmul.f32 %v10912_v52, %v4253_v29  ;;  %9120 = vtanh.f32 %v4128_v25 }
 0x325   : > { %v2897_v9 = vadd.f32 %v2896_v45, %v2808_v49  ;;  %v2985_v11 = vpop.f32.mrf.mxu3  ;;  %v2720_v39 = vpop.f32.mrf.mxu0  ;;  %v4320_v5 = vmul.f32 %v10910_v6, %v4254_v19 }
 0x326   : > { %v4394_v23 = vadd.f32 %v4319_v0, %v4318_v10  ;;  %v2721_v34 = vadd.f32 %v2720_v39, %v10655_v4  ;;  %v14690_v39 = vld [vmem:[#allocation4_spill] sm:$0xff] }
 0x327   : > { %v2986_v43 = vadd.f32 %v2985_v11, %v2897_v9  ;;  %v14689_v11 = vld [vmem:[#allocation3_spill] sm:$0xff] }
 0x328   : > { %4395 = vadd.xlane.f32.xlu0 %v4394_v23  ;;  %v2810_v55 = vadd.f32 %v2809_v61, %v2721_v34  ;;  %v14691_v23 = vld [vmem:[#allocation5_spill] sm:$0xff] }
 0x329   : > { %v9119_v15 = vpop.eup %9118  ;;  %v4129_v7 = vadd.f32 %v10901_v12, %v2986_v43  ;;  %v14692_v43 = vld [vmem:[#allocation111_spill] sm:$0xff] }
 0x32a   : > { %v4255_v3 = vmul.f32 %v9119_v15, %v9119_v15  ;;  %v9121_v46 = vpop.eup %9120  ;;  %v4132_v34 = vadd.f32 %v10871_v62, %v14692_v43 }
 0x32b   : > { %9122 = vtanh.f32 %v4129_v7  ;;  %v2812_v49 = vpop.f32.mrf.mxu1  ;;  %v4256_v0 = vmul.f32 %v9121_v46, %v9121_v46 }
 0x32c   : > { %v2898_v51 = vpop.f32.mrf.mxu2  ;;  %v4321_v29 = vmul.f32 %v10912_v52, %v4255_v3  ;;  %9124 = vtanh.f32 %v4130_v36 }
 0x32d   : > { %v2899_v35 = vadd.f32 %v2898_v51, %v2810_v55  ;;  %v2987_v25 = vpop.f32.mrf.mxu3  ;;  %v2723_v4 = vpop.f32.mrf.mxu0  ;;  %v4322_v15 = vmul.f32 %v10910_v6, %v4256_v0  ;;  %v14694_v0 = vld [vmem:[#allocation70_spill] sm:$0xff] }
 0x32e   : > { %v4397_v58 = vadd.f32 %v4321_v29, %v4320_v5  ;;  %v2724_v10 = vadd.f32 %v2723_v4, %v10664_v30  ;;  %3127 = vmatmul.bf16.vlgmr.msrb.gmra.mxu1 %v14689_v11  ;;  %v11114_v4 = vperm.slane %v10866_v22, 2 }
 0x32f   : > { %v2988_v45 = vadd.f32 %v2987_v25, %v2899_v35  ;;  %v14693_v35 = vld [vmem:[#allocation112_spill] sm:$0xff] }
 0x330   : > { %4398 = vadd.xlane.f32.xlu2 %v4397_v58  ;;  %3038 = vmatmul.bf16.vlgmr.msrb.gmra.mxu0 %v14688_v53  ;;  %v2813_v19 = vadd.f32 %v2812_v49, %v2724_v10 }
 0x331   : > { %v9123_v1 = vpop.eup %9122  ;;  %v4131_v9 = vadd.f32 %v10901_v12, %v2988_v45  ;;  %3216 = vmatmul.bf16.vlgmr.msrb.gmra.mxu2 %v14690_v39  ;;  %v14705_v39 = vld [vmem:[#allocation116_spill] sm:$0xff] }
 0x332   : > { %v4257_v61 = vmul.f32 %v9123_v1, %v9123_v1  ;;  %3305 = vmatmul.bf16.vlgmr.msrb.gmra.mxu3 %v14691_v23  ;;  %v9125_v3 = vpop.eup %9124  ;;  %v4134_v1 = vadd.f32 %v10871_v62, %v14694_v0  ;;  %v14696_v0 = vld [vmem:[#allocation7_spill] sm:$0xff] }
 0x333   : > { %9126 = vtanh.f32 %v4131_v9  ;;  %v2814_v5 = vpop.f32.mrf.mxu1  ;;  %v4258_v49 = vmul.f32 %v9125_v3, %v9125_v3 }
 0x334   : > { %v2901_v30 = vpop.f32.mrf.mxu2  ;;  %v4323_v7 = vmul.f32 %v10912_v52, %v4257_v61  ;;  %9128 = vtanh.f32 %v4132_v34 }
 0x335   : > { %v2902_v36 = vadd.f32 %v2901_v30, %v2813_v19  ;;  %v2990_v55 = vpop.f32.mrf.mxu3  ;;  %v2725_v51 = vpop.f32.mrf.mxu0  ;;  %v4324_v19 = vmul.f32 %v10910_v6, %v4258_v49 }
 0x336   : > { %v4400_v29 = vadd.f32 %v4323_v7, %v4322_v15  ;;  %v2726_v25 = vadd.f32 %v2725_v51, %v14693_v35 }
 0x337   : > { %v2991_v46 = vadd.f32 %v2990_v55, %v2902_v36 }
 0x338   : > { %4401 = vadd.xlane.f32.xlu1 %v4400_v29  ;;  %v2815_v9 = vadd.f32 %v2814_v5, %v2726_v25  ;;  %v14695_v25 = vld [vmem:[#allocation6_spill] sm:$0xff] }
 0x339   : > { %v9127_v58 = vpop.eup %9126  ;;  %v4133_v45 = vadd.f32 %v10901_v12, %v2991_v46 }
 0x33a   : > { %v4259_v10 = vmul.f32 %v9127_v58, %v9127_v58  ;;  %v9129_v30 = vpop.eup %9128  ;;  %v4136_v58 = vadd.f32 %v10871_v62, %v10696_v8 }
 0x33b   : > { %9130 = vtanh.f32 %v4133_v45  ;;  %v4360_v61 = vpop.xlane.xlu2 %4359  ;;  %v2817_v55 = vpop.f32.mrf.mxu1  ;;  %v4260_v35 = vmul.f32 %v9129_v30, %v9129_v30 }
 0x33c   : > { %v11120_v43 = vadd.f32 %v11114_v4, %v4360_v61  ;;  %v2903_v34 = vpop.f32.mrf.mxu2  ;;  %v4325_v22 = vmul.f32 %v10912_v52, %v4259_v10  ;;  %9132 = vtanh.f32 %v4134_v1 }
 0x33d   : > { %v2904_v15 = vadd.f32 %v2903_v34, %v2815_v9  ;;  %v2992_v7 = vpop.f32.mrf.mxu3  ;;  %v2728_v3 = vpop.f32.mrf.mxu0  ;;  %v14697_v9 = vld [vmem:[#allocation9_spill] sm:$0xff] }
 0x33e   : > { %v4488_v36 = vsel %vm4487_vm0, %v11120_v43, -inf  ;;  %v4403_v51 = vadd.f32 %v4325_v22, %v4324_v19  ;;  %v2729_v46 = vadd.f32 %v2728_v3, %v10702_v56  ;;  %3132 = vmatmul.bf16.gmra.mxu1 %v14696_v0  ;;  %v4326_v19 = vmul.f32 %v10910_v6, %v4260_v35 }
 0x33f   : > { %v4489_v5 = vrot.slane %v4488_v36, 4  ;;  %v2993_v29 = vadd.f32 %v2992_v7, %v2904_v15 }
 0x340   : > { %4404 = vadd.xlane.f32.xlu0 %v4403_v51  ;;  %3043 = vmatmul.bf16.gmra.mxu0 %v14695_v25  ;;  %v2818_v56 = vadd.f32 %v2817_v55, %v2729_v46  ;;  %v14698_v46 = vld [vmem:[#allocation113_spill] sm:$0xff] }
 0x341   : > { %v9131_v49 = vpop.eup %9130  ;;  %v4490_v45 = vmax.f32 %v4488_v36, %v4489_v5  ;;  %v4135_v10 = vadd.f32 %v10901_v12, %v2993_v29  ;;  %3221 = vmatmul.bf16.gmra.mxu2 %v14606_v37  ;;  %v4138_v35 = vadd.f32 %v10871_v62, %v14698_v46  ;;  %v14702_v37 = vld [vmem:[#allocation12_spill] sm:$0xff] }
 0x342   : > { %v4261_v1 = vmul.f32 %v9131_v49, %v9131_v49  ;;  %3310 = vmatmul.bf16.gmra.mxu3 %v14697_v9  ;;  %v9133_v30 = vpop.eup %9132 }
 0x343   : > { %v4491_v61 = vrot.slane %v4490_v45, 2  ;;  %9134 = vtanh.f32 %v4135_v10  ;;  %v2819_v36 = vpop.f32.mrf.mxu1  ;;  %v4262_v10 = vmul.f32 %v9133_v30, %v9133_v30 }
 0x344   : > { %v2906_v34 = vpop.f32.mrf.mxu2  ;;  %v4327_v22 = vmul.f32 %v10912_v52, %v4261_v1  ;;  %9136 = vtanh.f32 %v4136_v58 }
 0x345   : > { %v4492_v8 = vmax.f32 %v4490_v45, %v4491_v61  ;;  %v2907_v15 = vadd.f32 %v2906_v34, %v2818_v56  ;;  %v2995_v7 = vpop.f32.mrf.mxu3  ;;  %v2730_v3 = vpop.f32.mrf.mxu0 }
 0x346   : > { %v4406_v51 = vadd.f32 %v4327_v22, %v4326_v19  ;;  %v2731_v49 = vadd.f32 %v2730_v3, %v10707_v38  ;;  %v8850_v38 = vld [vmem:[%s14134_s1 + $0xcc] sm:$0xf]  ;;  %v7971_v19 = vld [vmem:[%s14134_s1 + $0xd8] sm:$0xf0] }
 0x347   : > { %v4493_v5 = vrot.slane %v4492_v8, 1  ;;  %v2996_v29 = vadd.f32 %v2995_v7, %v2907_v15  ;;  %v8980_v7 = vld [vmem:[%s14134_s1 + $0x4d4] sm:$0xf0]  ;;  %v8882_v3 = vld [vmem:[%s14134_s1 + $0x1cc] sm:$0xf] }
 0x348   : > { %4407 = vadd.xlane.f32.xlu2 %v4406_v51  ;;  %v2820_v56 = vadd.f32 %v2819_v36, %v2731_v49 }
 0x349   : > { %v9135_v55 = vpop.eup %9134  ;;  %v4494_v9 = vmax.f32 %v4492_v8, %v4493_v5  ;;  %v4137_v1 = vadd.f32 %v10901_v12, %v2996_v29  ;;  %v4328_v8 = vmul.f32 %v10910_v6, %v4262_v10  ;;  %v8099_v10 = vld [vmem:[%s14134_s1 + $0x1d8] sm:$0xf0] }
 0x34a   : > { %v4263_v58 = vmul.f32 %v9135_v55, %v9135_v55  ;;  %v9137_v45 = vpop.eup %9136 }
 0x34b   : > { %v4712_v61 = vsub.f32 %v11120_v43, %v4494_v9  ;;  %9138 = vtanh.f32 %v4137_v1  ;;  %v4366_v34 = vpop.xlane.xlu1 %4365  ;;  %v7974_v43 = vor.u32 %v8850_v38, %v7971_v19  ;;  %v8481_v9 = vld [vmem:[%s14134_s1 + $0x4c8] sm:$0xf]  ;;  %v4264_v55 = vmul.f32 %v9137_v45, %v9137_v45  ;;  %v14700_v19 = vld [vmem:[#allocation10_spill] sm:$0xff] }
 0x34c   : > { %v11148_v22 = vadd.f32 %v11114_v4, %v4366_v34  ;;  %v2908_v30 = vpop.f32.mrf.mxu2  ;;  %v4329_v15 = vmul.f32 %v10912_v52, %v4263_v58  ;;  %9140 = vtanh.f32 %v4138_v35  ;;  %v8482_v49 = vor.u32 %v8980_v7, %v8481_v9  ;;  %v14699_v1 = vld [vmem:[#allocation115_spill] sm:$0xff]  ;;  %v2822_v34 = vpop.f32.mrf.mxu1 }
 0x34d   : > { %v4744_v36 = vmul.f32 1.442695, %v4712_v61  ;;  %v2909_v51 = vadd.f32 %v2908_v30, %v2820_v56  ;;  %v2997_v5 = vpop.f32.mrf.mxu3  ;;  %v2733_v29 = vpop.f32.mrf.mxu0  ;;  %3565 = vmatpush.bf16.msra.mxu2 %v7974_v43  ;;  %v8102_v56 = vor.u32 %v8882_v3, %v8099_v10  ;;  %v14701_v7 = vld [vmem:[#allocation11_spill] sm:$0xff]  ;;  %v14704_v10 = vld [vmem:[#allocation114_spill] sm:$0xff] }
 0x34e   : > { %v4502_v46 = vsel %vm4487_vm0, %v11148_v22, -inf  ;;  %v2734_v58 = vadd.f32 %v2733_v29, %v14699_v1  ;;  %v4409_v38 = vadd.f32 %v4329_v15, %v4328_v8  ;;  %3387 = vmatpush.bf16.msra.mxu0 %v8482_v49  ;;  %3137 = vmatmul.bf16.gmra.mxu1 %v14701_v7  ;;  %v14703_v1 = vld [vmem:[#allocation13_spill] sm:$0xff]  ;;  %v9353_v8 = vmov 0  }
 0x34f   : > { %9142 = vpow2.f32 %v4744_v36  ;;  %v4503_v35 = vrot.slane %v4502_v46, 4  ;;  %v2998_v61 = vadd.f32 %v2997_v5, %v2909_v51  ;;  %9061 = vset.pattern.permute.xlu2 %v9353_v8  ;;  %3654 = vmatpush.bf16.msra.mxu3 %v8102_v56  ;;  %v8609_v51 = vld [vmem:[%s14134_s1 + $0x5c8] sm:$0xf]  ;;  %v9012_v5 = vld [vmem:[%s14134_s1 + $0x5d4] sm:$0xf0]  ;;  %v4330_v49 = vmul.f32 %v10910_v6, %v4264_v55 }
 0x350   : > { %4410 = vadd.xlane.f32.xlu1 %v4409_v38  ;;  %3048 = vmatmul.bf16.gmra.mxu0 %v14700_v19  ;;  %v2823_v3 = vadd.f32 %v2822_v34, %v2734_v58  ;;  %v8610_v34 = vor.u32 %v9012_v5, %v8609_v51 }
 0x351   : > { %v9139_v30 = vpop.eup %9138  ;;  %v4504_v9 = vmax.f32 %v4502_v46, %v4503_v35  ;;  %v4139_v45 = vadd.f32 %v10901_v12, %v2998_v61  ;;  %3226 = vmatmul.bf16.gmra.mxu2 %v14702_v37  ;;  %9062 = vset.pattern.permute.xlu1 %v9353_v8  ;;  %v4140_v46 = vadd.f32 %v10871_v62, %v14704_v10  ;;  %v4363_v37 = vpop.xlane.xlu0 %4362 }
 0x352   : > { %v4265_v29 = vmul.f32 %v9139_v30, %v9139_v30  ;;  %3315 = vmatmul.bf16.gmra.mxu3 %v14703_v1  ;;  %v9141_v15 = vpop.eup %9140  ;;  %9063 = vset.pattern.permute.xlu0 %v9353_v8 }
 0x353   : > { %v4505_v43 = vrot.slane %v4504_v9, 2  ;;  %9144 = vtanh.f32 %v4139_v45  ;;  %v4369_v36 = vpop.xlane.xlu2 %4368  ;;  %3476 = vmatpush.bf16.msra.mxu1 %v8610_v34  ;;  %v4266_v51 = vmul.f32 %v9141_v15, %v9141_v15 }
 0x354   : > { %v11182_v38 = vadd.f32 %v11114_v4, %v4369_v36  ;;  %v2911_v58 = vpop.f32.mrf.mxu2  ;;  %v4331_v35 = vmul.f32 %v10912_v52, %v4265_v29  ;;  %v2824_v36 = vpop.f32.mrf.mxu1  ;;  %9146 = vtanh.f32 %v4140_v46  ;;  %v14706_v46 = vld [vmem:[#allocation75_spill] sm:$0xff] }
 0x355   : > { %v11185_v61 = vpop.eup %9142  ;;  %v4506_v56 = vmax.f32 %v4504_v9, %v4505_v43  ;;  %v2912_v30 = vadd.f32 %v2911_v58, %v2823_v3  ;;  %v3000_v45 = vpop.f32.mrf.mxu3  ;;  %v11193_v58 = vadd.f32 %v11114_v4, %v4363_v37  ;;  %v4332_v15 = vmul.f32 %v10910_v6, %v4266_v51 }
 0x356   : > { %v2735_v1 = vpop.f32.mrf.mxu0  ;;  %v4808_v55 = vsel %vm4487_vm0, %v11185_v61, 0.0  ;;  %v4509_v10 = vsel %vm4487_vm0, %v11182_v38, -inf  ;;  %v4412_v23 = vadd.f32 %v4331_v35, %v4330_v49 }
 0x357   : > { %v4809_v5 = vrot.slane %v4808_v55, 4  ;;  %v4507_v29 = vrot.slane %v4506_v56, 1  ;;  %v4510_v8 = vrot.slane %v4509_v10, 4  ;;  %v2736_v28 = vadd.f32 %v2735_v1, %v14705_v39 }
 0x358   : > { %v3001_v9 = vadd.f32 %v3000_v45, %v2912_v30  ;;  %4413 = vadd.xlane.f32.xlu0 %v4412_v23  ;;  %v4142_v23 = vadd.f32 %v10871_v62, %v14706_v46  ;;  %v4495_v45 = vsel %vm4487_vm0, %v11193_v58, -inf  ;;  %v14709_v46 = vld [vmem:[#allocation16_spill] sm:$0xff] }
 0x359   : > { %v9145_v43 = vpop.eup %9144  ;;  %v4810_v3 = vadd.f32 %v4809_v5, %v4808_v55  ;;  %v4508_v57 = vmax.f32 %v4506_v56, %v4507_v29  ;;  %v4511_v63 = vmax.f32 %v4509_v10, %v4510_v8  ;;  %v2825_v39 = vadd.f32 %v2824_v36, %v2736_v28 }
 0x35a   : > { %v4141_v34 = vadd.f32 %v10901_v12, %v3001_v9  ;;  %v4267_v27 = vmul.f32 %v9145_v43, %v9145_v43  ;;  %v9147_v28 = vpop.eup %9146 }
 0x35b   : > { %v4811_v49 = vrot.slane %v4810_v3, 2  ;;  %v4714_v35 = vsub.f32 %v11148_v22, %v4508_v57  ;;  %v4512_v60 = vrot.slane %v4511_v63, 2  ;;  %v4372_v1 = vpop.xlane.xlu2 %4371 }
 0x35c   : > { %9148 = vtanh.f32 %v4141_v34  ;;  %v11201_v37 = vadd.f32 %v11114_v4, %v4372_v1  ;;  %v2913_v56 = vpop.f32.mrf.mxu2  ;;  %v4333_v30 = vmul.f32 %v10912_v52, %v4267_v27  ;;  %v2827_v8 = vpop.f32.mrf.mxu1  ;;  %v4144_v27 = vadd.f32 %v10871_v62, %v10748_v48 }
 0x35d   : > { %v4513_v55 = vmax.f32 %v4511_v63, %v4512_v60  ;;  %v2914_v10 = vadd.f32 %v2913_v56, %v2825_v39  ;;  %v3002_v51 = vpop.f32.mrf.mxu3  ;;  %v4812_v22 = vadd.f32 %v4811_v49, %v4810_v3  ;;  %v4748_v36 = vmul.f32 1.442695, %v4714_v35  ;;  %v14707_v60 = vld [vmem:[#allocation14_spill] sm:$0xff]  ;;  %v14708_v39 = vld [vmem:[#allocation15_spill] sm:$0xff] }
 0x35e   : > { %v2738_v57 = vpop.f32.mrf.mxu0  ;;  %v4516_v5 = vsel %vm4487_vm0, %v11201_v37, -inf  ;;  %v4415_v9 = vadd.f32 %v4333_v30, %v4332_v15  ;;  %9150 = vtanh.f32 %v4142_v23  ;;  %v4496_v3 = vrot.slane %v4495_v45, 4  ;;  %3142 = vmatmul.bf16.gmra.mxu1 %v14708_v39  ;;  %v14710_v30 = vld [vmem:[#allocation17_spill] sm:$0xff] }
 0x35f   : > { %v2739_v29 = vadd.f32 %v2738_v57, %v10754_v41  ;;  %v4514_v43 = vrot.slane %v4513_v55, 1  ;;  %v4517_v34 = vrot.slane %v4516_v5, 4  ;;  %v3003_v1 = vadd.f32 %v3002_v51, %v2914_v10 }
 0x360   : > { %4416 = vadd.xlane.f32.xlu0 %v4415_v9  ;;  %3053 = vmatmul.bf16.gmra.mxu0 %v14707_v60  ;;  %v4813_v63 = vrot.slane %v4812_v22, 1  ;;  %v4268_v15 = vmul.f32 %v9147_v28, %v9147_v28  ;;  %9152 = vpow2.f32 %v4748_v36 }
 0x361   : > { %v4515_v49 = vmax.f32 %v4513_v55, %v4514_v43  ;;  %v4518_v35 = vmax.f32 %v4516_v5, %v4517_v34  ;;  %3231 = vmatmul.bf16.gmra.mxu2 %v14709_v46  ;;  %v2828_v56 = vadd.f32 %v2827_v8, %v2739_v29  ;;  %v4143_v23 = vadd.f32 %v10901_v12, %v3003_v1 }
 0x362   : > { %v9149_v41 = vpop.eup %9148  ;;  %3320 = vmatmul.bf16.gmra.mxu3 %v14710_v30  ;;  %v4814_v48 = vadd.f32 %v4813_v63, %v4812_v22  ;;  %9154 = vtanh.f32 %v4144_v27  ;;  %v4497_v5 = vmax.f32 %v4495_v45, %v4496_v3  ;;  %v4334_v8 = vmul.f32 %v10910_v6, %v4268_v15  ;;  %v14711_v63 = vld [vmem:[#allocation118_spill] sm:$0xff] }
 0x363   : > { %v4715_v10 = vsub.f32 %v11182_v38, %v4515_v49  ;;  %v4269_v51 = vmul.f32 %v9149_v41, %v9149_v41  ;;  %v4519_v57 = vrot.slane %v4518_v35, 2 }
 0x364   : > { %v2916_v55 = vpop.f32.mrf.mxu2  ;;  %v2829_v29 = vpop.f32.mrf.mxu1  ;;  %9156 = vrcp.f32 %v4814_v48  ;;  %v4498_v3 = vrot.slane %v4497_v5, 2 }
 0x365   : > { %v4520_v9 = vmax.f32 %v4518_v35, %v4519_v57  ;;  %v2917_v43 = vadd.f32 %v2916_v55, %v2828_v56  ;;  %v3005_v34 = vpop.f32.mrf.mxu3  ;;  %v4335_v28 = vmul.f32 %v10912_v52, %v4269_v51  ;;  %v4750_v36 = vmul.f32 1.442695, %v4715_v10  ;;  %v9151_v22 = vpop.eup %9150  ;;  %v7955_v51 = vld [vmem:[%s14134_s1 + $0xb8] sm:$0xf0] }
 0x366   : > { %v2740_v46 = vpop.f32.mrf.mxu0  ;;  %9158 = vtanh.f32 %v4143_v23  ;;  %v11220_v1 = vpop.eup %9152  ;;  %v14712_v23 = vld [vmem:[#allocation117_spill] sm:$0xff] }
 0x367   : > { %v4521_v38 = vrot.slane %v4520_v9, 1  ;;  %v2741_v49 = vadd.f32 %v2740_v46, %v14711_v63  ;;  %v3006_v27 = vadd.f32 %v3005_v34, %v2917_v43  ;;  %v4418_v45 = vadd.f32 %v4335_v28, %v4334_v8  ;;  %v8846_v46 = vld [vmem:[%s14134_s1 + $0xac] sm:$0xf]  ;;  %v8976_v34 = vld [vmem:[%s14134_s1 + $0x4b4] sm:$0xf0] }
 0x368   : > { %v9155_v41 = vpop.eup %9154  ;;  %9160 = vpow2.f32 %v4750_v36  ;;  %v4822_v15 = vsel %vm4487_vm0, %v11220_v1, 0.0  ;;  %v4146_v55 = vadd.f32 %v10871_v62, %v14712_v23  ;;  %v7958_v43 = vor.u32 %v8846_v46, %v7955_v51 }
 0x369   : > { %v4522_v35 = vmax.f32 %v4520_v9, %v4521_v38  ;;  %v4145_v56 = vadd.f32 %v10901_v12, %v3006_v27  ;;  %4419 = vadd.xlane.f32.xlu0 %v4418_v45  ;;  %v2830_v10 = vadd.f32 %v2829_v29, %v2741_v49  ;;  %v4499_v36 = vmax.f32 %v4497_v5, %v4498_v3  ;;  %v8878_v27 = vld [vmem:[%s14134_s1 + $0x1ac] sm:$0xf]  ;;  %v8083_v45 = vld [vmem:[%s14134_s1 + $0x1b8] sm:$0xf0]  ;;  %v14713_v3 = vld [vmem:[#allocation120_spill] sm:$0xff] }
 0x36a   : > { %v9157_v57 = vpop.eup %9156  ;;  %3566 = vmatpush.bf16.msra.mxu2 %v7958_v43  ;;  %v4270_v51 = vmul.f32 %v9151_v22, %v9151_v22  ;;  %v4272_v5 = vmul.f32 %v9155_v41, %v9155_v41  ;;  %v8086_v23 = vor.u32 %v8878_v27, %v8083_v45 }
 0x36b   : > { %v4716_v48 = vsub.f32 %v11201_v37, %v4522_v35  ;;  %9162 = vtanh.f32 %v4145_v56  ;;  %v8465_v37 = vld [vmem:[%s14134_s1 + $0x4a8] sm:$0xf]  ;;  %v5064_v63 = vmul.f32 %v9157_v57, %v11185_v61  ;;  %v4823_v35 = vrot.slane %v4822_v15, 4  ;;  %v14714_v57 = vld [vmem:[#allocation18_spill] sm:$0xff] }
 0x36c   : > { %v2918_v9 = vpop.f32.mrf.mxu2  ;;  %v9159_v28 = vpop.eup %9158  ;;  %v8466_v46 = vor.u32 %v8976_v34, %v8465_v37  ;;  %v4500_v30 = vrot.slane %v4499_v36, 1  ;;  %v14717_v37 = vld [vmem:[#allocation21_spill] sm:$0xff]  ;;  %v4336_v34 = vmul.f32 %v10910_v6, %v4270_v51  ;;  %3655 = vmatpush.bf16.msra.mxu3 %v8086_v23 }
 0x36d   : > { %v4752_v29 = vmul.f32 1.442695, %v4716_v48  ;;  %v2919_v8 = vadd.f32 %v2918_v9, %v2830_v10  ;;  %v3007_v38 = vpop.f32.mrf.mxu3  ;;  %v2832_v56 = vpop.f32.mrf.mxu1  ;;  %5098 = vperm.xlu2 %9061, %v5064_v63   ;;  %v4271_v9 = vmul.f32 %v9159_v28, %v9159_v28  ;;  %v4824_v22 = vadd.f32 %v4823_v35, %v4822_v15  ;;  %v9008_v15 = vld [vmem:[%s14134_s1 + $0x5b4] sm:$0xf0] }
 0x36e   : > { %v2743_v49 = vpop.f32.mrf.mxu0  ;;  %v11248_v61 = vpop.eup %9160  ;;  %3147 = vmatmul.bf16.gmra.mxu1 %v14715_v14  ;;  %3388 = vmatpush.bf16.msra.mxu0 %v8466_v46  ;;  %v4338_v63 = vmul.f32 %v10910_v6, %v4272_v5  ;;  %v14718_v46 = vld [vmem:[#allocation119_spill] sm:$0xff] }
 0x36f   : > { %9164 = vpow2.f32 %v4752_v29  ;;  %v2744_v48 = vadd.f32 %v2743_v49, %v14713_v3  ;;  %v3008_v10 = vadd.f32 %v3007_v38, %v2919_v8  ;;  %v4829_v29 = vsel %vm4487_vm0, %v11248_v61, 0.0  ;;  %v8593_v38 = vld [vmem:[%s14134_s1 + $0x5a8] sm:$0xf] }
 0x370   : > { %3058 = vmatmul.bf16.gmra.mxu0 %v14714_v57  ;;  %9166 = vtanh.f32 %v4146_v55  ;;  %v8594_v45 = vor.u32 %v9008_v15, %v8593_v38  ;;  %v4337_v35 = vmul.f32 %v10912_v52, %v4271_v9  ;;  %v4148_v51 = vadd.f32 %v10871_v62, %v14718_v46  ;;  %v14719_v9 = vld [vmem:[#allocation121_spill] sm:$0xff] }
 0x371   : > { %3236 = vmatmul.bf16.gmra.mxu2 %v14716_v40  ;;  %v9163_v43 = vpop.eup %9162  ;;  %v4147_v41 = vadd.f32 %v10901_v12, %v3008_v10  ;;  %v2833_v28 = vadd.f32 %v2832_v56, %v2744_v48  ;;  %v4501_v3 = vmax.f32 %v4499_v36, %v4500_v30  ;;  %v4825_v5 = vrot.slane %v4824_v22, 2  ;;  %v11279_v30 = vpop.xlane.xlu0 %4377 }
 0x372   : > { %3325 = vmatmul.bf16.gmra.mxu3 %v14717_v37  ;;  %v4273_v8 = vmul.f32 %v9163_v43, %v9163_v43  ;;  %3477 = vmatpush.bf16.msra.mxu1 %v8594_v45  ;;  %v4830_v40 = vrot.slane %v4829_v29, 4  ;;  %v11281_v50 = vadd.f32 %v4337_v35, %v4336_v34 }
 0x373   : > { %v4381_v55 = vpop.xlane.xlu2 %4380  ;;  %9168 = vtanh.f32 %v4147_v41  ;;  %v4713_v59 = vsub.f32 %v11193_v58, %v4501_v3 }
 0x374   : > { %v11266_v49 = vadd.f32 %v11114_v4, %v4381_v55  ;;  %v2921_v27 = vpop.f32.mrf.mxu2  ;;  %v4339_v43 = vmul.f32 %v10912_v52, %v4273_v8  ;;  %9170 = vtanh.f32 %v4148_v51  ;;  %v4831_v39 = vadd.f32 %v4830_v40, %v4829_v29 }
 0x375   : > { %v11269_v56 = vpop.eup %9164  ;;  %v2922_v48 = vadd.f32 %v2921_v27, %v2833_v28  ;;  %v3010_v10 = vpop.f32.mrf.mxu3 }
 0x376   : > { %v2745_v23 = vpop.f32.mrf.mxu0  ;;  %v4836_v41 = vsel %vm4487_vm0, %v11269_v56, 0.0  ;;  %v4537_v55 = vsel %vm4487_vm0, %v11266_v49, -inf  ;;  %v2834_v15 = vpop.f32.mrf.mxu1  ;;  %v4424_v8 = vadd.f32 %v4339_v43, %v4338_v63  ;;  %v4746_v63 = vmul.f32 1.442695, %v4713_v59  ;;  %v14720_v43 = vld [vmem:[#allocation80_spill] sm:$0xff] }
 0x377   : > { %v2746_v38 = vadd.f32 %v2745_v23, %v14719_v9  ;;  %v9167_v37 = vpop.eup %9166  ;;  %v4837_v46 = vrot.slane %v4836_v41, 4  ;;  %v4538_v36 = vrot.slane %v4537_v55, 4  ;;  %v3011_v28 = vadd.f32 %v3010_v10, %v2922_v48 }
 0x378   : > { %4425 = vadd.xlane.f32.xlu1 %v4424_v8  ;;  %v4274_v23 = vmul.f32 %v9167_v37, %v9167_v37  ;;  %v4826_v9 = vadd.f32 %v4825_v5, %v4824_v22  ;;  %v4150_v51 = vadd.f32 %v10871_v62, %v14720_v43 }
 0x379   : > { %v2835_v27 = vadd.f32 %v2834_v15, %v2746_v38  ;;  %v4838_v20 = vadd.f32 %v4837_v46, %v4836_v41  ;;  %v4539_v14 = vmax.f32 %v4537_v55, %v4538_v36  ;;  %v9169_v57 = vpop.eup %9168  ;;  %v4149_v45 = vadd.f32 %v10901_v12, %v3011_v28  ;;  %v14721_v38 = vld [vmem:[#allocation22_spill] sm:$0xff]  ;;  %v14722_v46 = vld [vmem:[#allocation23_spill] sm:$0xff] }
 0x37a   : > { %v4275_v7 = vmul.f32 %v9169_v57, %v9169_v57  ;;  %v4340_v40 = vmul.f32 %v10910_v6, %v4274_v23  ;;  %v4827_v22 = vrot.slane %v4826_v9, 1  ;;  %v4832_v57 = vrot.slane %v4831_v39, 2  ;;  %v9171_v59 = vpop.eup %9170  ;;  %v4375_v23 = vpop.xlane.xlu1 %4374 }
 0x37b   : > { %v4540_v60 = vrot.slane %v4539_v14, 2  ;;  %v4839_v19 = vrot.slane %v4838_v20, 2  ;;  %9172 = vtanh.f32 %v4149_v45  ;;  %v11290_v5 = vpop.xlane.xlu0 %4383  ;;  %v4276_v45 = vmul.f32 %v9171_v59, %v9171_v59 }
 0x37c   : > { %v2923_v48 = vpop.f32.mrf.mxu2  ;;  %v4341_v3 = vmul.f32 %v10912_v52, %v4275_v7  ;;  %9174 = vpow2.f32 %v4746_v63  ;;  %v4828_v8 = vadd.f32 %v4827_v22, %v4826_v9  ;;  %v4833_v63 = vadd.f32 %v4832_v57, %v4831_v39  ;;  %v14726_v9 = vld [vmem:[#allocation122_spill] sm:$0xff] }
 0x37d   : > { %v4541_v34 = vmax.f32 %v4539_v14, %v4540_v60  ;;  %v2924_v35 = vadd.f32 %v2923_v48, %v2835_v27  ;;  %v3012_v10 = vpop.f32.mrf.mxu3  ;;  %v4840_v7 = vadd.f32 %v4839_v19, %v4838_v20  ;;  %9176 = vtanh.f32 %v4150_v51  ;;  %v14724_v27 = vld [vmem:[#allocation25_spill] sm:$0xff] }
 0x37e   : > { %v2748_v58 = vpop.f32.mrf.mxu0  ;;  %v2837_v37 = vpop.f32.mrf.mxu1  ;;  %v4427_v55 = vadd.f32 %v4341_v3, %v4340_v40  ;;  %3152 = vmatmul.bf16.gmra.mxu1 %v14722_v46  ;;  %v4342_v39 = vmul.f32 %v10910_v6, %v4276_v45  ;;  %v8842_v45 = vld [vmem:[%s14134_s1 + $0x8c] sm:$0xf] }
 0x37f   : > { %v2749_v41 = vadd.f32 %v2748_v58, %v10806_v47  ;;  %v4542_v29 = vrot.slane %v4541_v34, 1  ;;  %v3013_v14 = vadd.f32 %v3012_v10, %v2924_v35  ;;  %v14723_v47 = vld [vmem:[#allocation24_spill] sm:$0xff]  ;;  %v4841_v35 = vrot.slane %v4840_v7, 1 }
 0x380   : > { %3063 = vmatmul.bf16.gmra.mxu0 %v14721_v38  ;;  %4428 = vadd.xlane.f32.xlu0 %v4427_v55  ;;  %v14729_v38 = vld [vmem:[#allocation26_spill] sm:$0xff] }
 0x381   : > { %v2838_v60 = vadd.f32 %v2837_v37, %v2749_v41  ;;  %v4543_v15 = vmax.f32 %v4541_v34, %v4542_v29  ;;  %3241 = vmatmul.bf16.gmra.mxu2 %v14723_v47  ;;  %v9173_v36 = vpop.eup %9172  ;;  %v4151_v28 = vadd.f32 %v10901_v12, %v3013_v14  ;;  %v14725_v34 = vld [vmem:[#allocation81_spill] sm:$0xff]  ;;  %v11301_v41 = vadd.f32 %v11114_v4, %v4375_v23 }
 0x382   : > { %3330 = vmatmul.bf16.gmra.mxu3 %v14724_v27  ;;  %v4277_v20 = vmul.f32 %v9173_v36, %v9173_v36  ;;  %v4152_v10 = vadd.f32 %v10871_v62, %v14725_v34  ;;  %v4842_v22 = vadd.f32 %v4841_v35, %v4840_v7  ;;  %v4834_v14 = vrot.slane %v4833_v63, 1  ;;  %v7939_v23 = vld [vmem:[%s14134_s1 + $0x98] sm:$0xf0]  ;;  %v14728_v27 = vld [vmem:[#allocation84_spill] sm:$0xff] }
 0x383   : > { %v4719_v48 = vsub.f32 %v11266_v49, %v4543_v15  ;;  %9178 = vtanh.f32 %v4151_v28  ;;  %v11304_v49 = vpop.eup %9174  ;;  %v4387_v55 = vpop.xlane.xlu0 %4386  ;;  %v4523_v36 = vsel %vm4487_vm0, %v11301_v41, -inf  ;;  %v7942_v34 = vor.u32 %v8842_v45, %v7939_v23 }
 0x384   : > { %v2926_v19 = vpop.f32.mrf.mxu2  ;;  %9180 = vrcp.f32 %v4828_v8  ;;  %v9177_v57 = vpop.eup %9176  ;;  %v4815_v15 = vsel %vm4487_vm0, %v11304_v49, 0.0 }
 0x385   : > { %v4758_v58 = vmul.f32 1.442695, %v4719_v48  ;;  %v2927_v3 = vadd.f32 %v2926_v19, %v2838_v60  ;;  %v3015_v43 = vpop.f32.mrf.mxu3  ;;  %v4343_v60 = vmul.f32 %v10912_v52, %v4277_v20  ;;  %v4278_v48 = vmul.f32 %v9177_v57, %v9177_v57  ;;  %3567 = vmatpush.bf16.msra.mxu2 %v7942_v34 }
 0x386   : > { %v2750_v51 = vpop.f32.mrf.mxu0  ;;  %v2839_v40 = vpop.f32.mrf.mxu1  ;;  %v11322_v20 = vadd.f32 %v11114_v4, %v4387_v55  ;;  %v14727_v55 = vld [vmem:[#allocation124_spill] sm:$0xff] }
 0x387   : > { %v2751_v37 = vadd.f32 %v2750_v51, %v14726_v9  ;;  %9182 = vpow2.f32 %v4758_v58  ;;  %v3016_v29 = vadd.f32 %v3015_v43, %v2927_v3  ;;  %v11313_v8 = vadd.f32 %v4343_v60, %v4342_v39  ;;  %v8972_v58 = vld [vmem:[%s14134_s1 + $0x494] sm:$0xf0]  ;;  %v8874_v3 = vld [vmem:[%s14134_s1 + $0x18c] sm:$0xf] }
 0x388   : > { %9184 = vtanh.f32 %v4152_v10  ;;  %v8449_v10 = vld [vmem:[%s14134_s1 + $0x488] sm:$0xf]  ;;  %v4835_v43 = vadd.f32 %v4834_v14, %v4833_v63  ;;  %v4816_v9 = vrot.slane %v4815_v15, 4 }
 0x389   : > { %v2840_v59 = vadd.f32 %v2839_v40, %v2751_v37  ;;  %v4153_v28 = vadd.f32 %v10901_v12, %v3016_v29  ;;  %v9179_v7 = vpop.eup %9178  ;;  %9186 = vrcp.f32 %v4842_v22  ;;  %v4524_v37 = vrot.slane %v4523_v36, 4  ;;  %v8067_v29 = vld [vmem:[%s14134_s1 + $0x198] sm:$0xf0] }
 0x38a   : > { %v9181_v35 = vpop.eup %9180  ;;  %v8450_v57 = vor.u32 %v8972_v58, %v8449_v10  ;;  %v8070_v63 = vor.u32 %v8874_v3, %v8067_v29  ;;  %v4279_v14 = vmul.f32 %v9179_v7, %v9179_v7  ;;  %v4344_v10 = vmul.f32 %v10910_v6, %v4278_v48  ;;  %v14731_v29 = vld [vmem:[#allocation28_spill] sm:$0xff] }
 0x38b   : > { %9188 = vtanh.f32 %v4153_v28  ;;  %v4551_v58 = vsel %vm4487_vm0, %v11322_v20, -inf  ;;  %v4817_v3 = vadd.f32 %v4816_v9, %v4815_v15 }
 0x38c   : > { %v2928_v19 = vpop.f32.mrf.mxu2  ;;  %3389 = vmatpush.bf16.msra.mxu0 %v8450_v57  ;;  %3656 = vmatpush.bf16.msra.mxu3 %v8070_v63  ;;  %9190 = vrcp.f32 %v4835_v43  ;;  %v14733_v43 = vld [vmem:[#allocation123_spill] sm:$0xff] }
 0x38d   : > { %v11333_v51 = vpop.eup %9182  ;;  %v2929_v40 = vadd.f32 %v2928_v19, %v2840_v59  ;;  %v3017_v22 = vpop.f32.mrf.mxu3  ;;  %v4154_v59 = vadd.f32 %v10871_v62, %v14728_v27  ;;  %v5066_v27 = vmul.f32 %v9181_v35, %v11220_v1  ;;  %v4156_v15 = vadd.f32 %v10871_v62, %v14733_v43  ;;  %v8577_v1 = vld [vmem:[%s14134_s1 + $0x588] sm:$0xf] }
 0x38e   : > { %v2753_v39 = vpop.f32.mrf.mxu0  ;;  %v4857_v60 = vsel %vm4487_vm0, %v11333_v51, 0.0  ;;  %v2842_v45 = vpop.f32.mrf.mxu1 }
 0x38f   : > { %v2754_v28 = vadd.f32 %v2753_v39, %v14727_v55  ;;  %v9185_v23 = vpop.eup %9184  ;;  %v4858_v19 = vrot.slane %v4857_v60, 4  ;;  %v3018_v47 = vadd.f32 %v3017_v22, %v2929_v40  ;;  %v14730_v39 = vld [vmem:[#allocation27_spill] sm:$0xff]  ;;  %v4525_v55 = vmax.f32 %v4523_v36, %v4524_v37  ;;  %v14732_v40 = vld [vmem:[#allocation29_spill] sm:$0xff] }
 0x390   : > { %3068 = vmatmul.bf16.gmra.mxu0 %v14729_v38  ;;  %v9187_v34 = vpop.eup %9186  ;;  %3157 = vmatmul.bf16.gmra.mxu1 %v14730_v39  ;;  %v4280_v48 = vmul.f32 %v9185_v23, %v9185_v23  ;;  %v4345_v22 = vmul.f32 %v10912_v52, %v4279_v14  ;;  %9192 = vtanh.f32 %v4154_v59  ;;  %v9004_v36 = vld [vmem:[%s14134_s1 + $0x594] sm:$0xf0]  ;;  %v14734_v39 = vld [vmem:[#allocation126_spill] sm:$0xff] }
 0x391   : > { %v2843_v46 = vadd.f32 %v2842_v45, %v2754_v28  ;;  %v4859_v7 = vadd.f32 %v4858_v19, %v4857_v60  ;;  %3246 = vmatmul.bf16.gmra.mxu2 %v14731_v29  ;;  %v9189_v57 = vpop.eup %9188  ;;  %v4155_v0 = vadd.f32 %v10901_v12, %v3018_v47  ;;  %v4552_v60 = vrot.slane %v4551_v58, 4  ;;  %5108 = vperm.xlu1 %9062, %v5066_v27  }
 0x392   : > { %3335 = vmatmul.bf16.gmra.mxu3 %v14732_v40  ;;  %v5068_v35 = vmul.f32 %v9187_v34, %v11269_v56  ;;  %v8578_v37 = vor.u32 %v9004_v36, %v8577_v1  ;;  %v11362_v28 = vadd.f32 %v4345_v22, %v4344_v10  ;;  %v4818_v45 = vrot.slane %v4817_v3, 2  ;;  %v9191_v27 = vpop.eup %9190  ;;  %v14735_v36 = vld [vmem:[#allocation125_spill] sm:$0xff] }
 0x393   : > { %v4860_v9 = vrot.slane %v4859_v7, 2  ;;  %9194 = vtanh.f32 %v4155_v0  ;;  %v4281_v63 = vmul.f32 %v9189_v57, %v9189_v57  ;;  %v4526_v43 = vrot.slane %v4525_v55, 2 }
 0x394   : > { %v2931_v47 = vpop.f32.mrf.mxu2  ;;  %5118 = vperm.xlu0 %9063, %v5068_v35   ;;  %3478 = vmatpush.bf16.msra.mxu1 %v8578_v37  ;;  %v4553_v29 = vmax.f32 %v4551_v58, %v4552_v60  ;;  %v4346_v10 = vmul.f32 %v10910_v6, %v4280_v48  ;;  %9196 = vtanh.f32 %v4156_v15  ;;  %v4819_v57 = vadd.f32 %v4818_v45, %v4817_v3 }
 0x395   : > { %v2932_v14 = vadd.f32 %v2931_v47, %v2843_v46  ;;  %v3020_v23 = vpop.f32.mrf.mxu3  ;;  %v4861_v19 = vadd.f32 %v4860_v9, %v4859_v7  ;;  %v5067_v46 = vmul.f32 %v9191_v27, %v11248_v61  ;;  %v4347_v7 = vmul.f32 %v10912_v52, %v4281_v63 }
 0x396   : > { %v2755_v59 = vpop.f32.mrf.mxu0  ;;  %v2844_v40 = vpop.f32.mrf.mxu1  ;;  %4422 = vadd.xlane.f32.xlu2 %v11281_v50  ;;  %v4527_v9 = vmax.f32 %v4525_v55, %v4526_v43  ;;  %v11371_v58 = vadd.f32 %v11114_v4, %v11279_v30  ;;  %v4554_v50 = vrot.slane %v4553_v29, 2  ;;  %v4158_v47 = vadd.f32 %v10871_v62, %v14735_v36  ;;  %v14737_v43 = vld [vmem:[#allocation30_spill] sm:$0xff] }
 0x397   : > { %v2756_v0 = vadd.f32 %v2755_v59, %v14734_v39  ;;  %v3021_v38 = vadd.f32 %v3020_v23, %v2932_v14  ;;  %v4862_v56 = vrot.slane %v4861_v19, 1  ;;  %v9193_v34 = vpop.eup %9192  ;;  %v11374_v48 = vadd.f32 %v4347_v7, %v4346_v10 }
 0x398   : > { %v4282_v61 = vmul.f32 %v9193_v34, %v9193_v34  ;;  %v4820_v30 = vrot.slane %v4819_v57, 1  ;;  %v4528_v45 = vrot.slane %v4527_v9, 1  ;;  %v4555_v59 = vmax.f32 %v4553_v29, %v4554_v50  ;;  %v14738_v34 = vld [vmem:[#allocation31_spill] sm:$0xff]  ;;  %v14740_v29 = vld [vmem:[#allocation33_spill] sm:$0xff] }
 0x399   : > { %v9195_v22 = vpop.eup %9194  ;;  %v4157_v39 = vadd.f32 %v10901_v12, %v3021_v38  ;;  %v4863_v60 = vadd.f32 %v4862_v56, %v4861_v19  ;;  %v2845_v1 = vadd.f32 %v2844_v40, %v2756_v0  ;;  %5113 = vperm.xlu1 %9062, %v5067_v46   ;;  %v4530_v38 = vsel %vm4487_vm0, %v11371_v58, -inf  ;;  %v14736_v40 = vld [vmem:[#allocation128_spill] sm:$0xff] }
 0x39a   : > { %v4283_v3 = vmul.f32 %v9195_v22, %v9195_v22  ;;  %v9197_v23 = vpop.eup %9196  ;;  %v4348_v0 = vmul.f32 %v10910_v6, %v4282_v61  ;;  %v4531_v10 = vrot.slane %v4530_v38, 4  ;;  %v14739_v46 = vld [vmem:[#allocation32_spill] sm:$0xff]  ;;  %v4821_v7 = vadd.f32 %v4820_v30, %v4819_v57 }
 0x39b   : > { %9198 = vtanh.f32 %v4157_v39  ;;  %v4529_v39 = vmax.f32 %v4527_v9, %v4528_v45  ;;  %v4556_v61 = vrot.slane %v4555_v59, 1 }
 0x39c   : > { %v2933_v15 = vpop.f32.mrf.mxu2  ;;  %9200 = vrcp.f32 %v4863_v60  ;;  %v4349_v56 = vmul.f32 %v10912_v52, %v4283_v3 }
 0x39d   : > { %v2934_v55 = vadd.f32 %v2933_v15, %v2845_v1  ;;  %v3022_v35 = vpop.f32.mrf.mxu3  ;;  %9202 = vtanh.f32 %v4158_v47  ;;  %v4284_v15 = vmul.f32 %v9197_v23, %v9197_v23  ;;  %v4717_v45 = vsub.f32 %v11301_v41, %v4529_v39 }
 0x39e   : > { %v2758_v37 = vpop.f32.mrf.mxu0  ;;  %v2847_v14 = vpop.f32.mrf.mxu1  ;;  %v11388_v50 = vadd.f32 %v4349_v56, %v4348_v0  ;;  %v14742_v56 = vld [vmem:[#allocation127_spill] sm:$0xff] }
 0x39f   : > { %v2759_v63 = vadd.f32 %v2758_v37, %v14736_v40  ;;  %v3023_v19 = vadd.f32 %v3022_v35, %v2934_v55  ;;  %v4532_v35 = vmax.f32 %v4530_v38, %v4531_v10  ;;  %v4557_v38 = vmax.f32 %v4555_v59, %v4556_v61  ;;  %v8838_v59 = vld [vmem:[%s14134_s1 + $0x6c] sm:$0xf] }
 0x3a0   : > { %3073 = vmatmul.bf16.gmra.mxu0 %v14737_v43  ;;  %3162 = vmatmul.bf16.gmra.mxu1 %v14738_v34  ;;  %v4350_v10 = vmul.f32 %v10910_v6, %v4284_v15  ;;  %v7923_v15 = vld [vmem:[%s14134_s1 + $0x78] sm:$0xf0] }
 0x3a1   : > { %v2848_v27 = vadd.f32 %v2847_v14, %v2759_v63  ;;  %3251 = vmatmul.bf16.gmra.mxu2 %v14739_v46  ;;  %v9199_v22 = vpop.eup %9198  ;;  %v4159_v60 = vadd.f32 %v10901_v12, %v3023_v19  ;;  %v14741_v63 = vld [vmem:[#allocation130_spill] sm:$0xff] }
 0x3a2   : > { %3340 = vmatmul.bf16.gmra.mxu3 %v14740_v29  ;;  %v9201_v1 = vpop.eup %9200  ;;  %v4285_v36 = vmul.f32 %v9199_v22, %v9199_v22 }
 0x3a3   : > { %v4399_v3 = vpop.xlane.xlu2 %4398  ;;  %9204 = vtanh.f32 %v4159_v60  ;;  %v5071_v57 = vmul.f32 %v9201_v1, %v11333_v51  ;;  %v9203_v0 = vpop.eup %9202  ;;  %v4160_v51 = vadd.f32 %v10871_v62, %v14742_v56  ;;  %v4754_v1 = vmul.f32 1.442695, %v4717_v45  ;;  %v8433_v45 = vld [vmem:[%s14134_s1 + $0x468] sm:$0xf] }
 0x3a4   : > { %v11391_v47 = vadd.f32 %v11114_v4, %v4399_v3  ;;  %v2936_v55 = vpop.f32.mrf.mxu2  ;;  %9206 = vrcp.f32 %v4821_v7  ;;  %v4351_v19 = vmul.f32 %v10912_v52, %v4285_v36  ;;  %v4533_v3 = vrot.slane %v4532_v35, 2 }
 0x3a5   : > { %v2937_v9 = vadd.f32 %v2936_v55, %v2848_v27  ;;  %v3025_v37 = vpop.f32.mrf.mxu3  ;;  %5133 = vperm.xlu0 %9063, %v5071_v57   ;;  %v4286_v57 = vmul.f32 %v9203_v0, %v9203_v0  ;;  %9208 = vtanh.f32 %v4160_v51 }
 0x3a6   : > { %v2760_v30 = vpop.f32.mrf.mxu0  ;;  %v4579_v40 = vsel %vm4487_vm0, %v11391_v47, -inf  ;;  %v2849_v23 = vpop.f32.mrf.mxu1  ;;  %v11402_v39 = vadd.f32 %v4351_v19, %v4350_v10  ;;  %v4534_v10 = vmax.f32 %v4532_v35, %v4533_v3  ;;  %v14745_v3 = vld [vmem:[#allocation35_spill] sm:$0xff] }
 0x3a7   : > { %v2761_v14 = vadd.f32 %v2760_v30, %v14741_v63  ;;  %v4580_v27 = vrot.slane %v4579_v40, 4  ;;  %v3026_v7 = vadd.f32 %v3025_v37, %v2937_v9  ;;  %v4721_v30 = vsub.f32 %v11322_v20, %v4557_v38  ;;  %v8968_v20 = vld [vmem:[%s14134_s1 + $0x474] sm:$0xf0] }
 0x3a8   : > { %v7926_v37 = vor.u32 %v8838_v59, %v7923_v15  ;;  %v8434_v38 = vor.u32 %v8968_v20, %v8433_v45  ;;  %v8561_v20 = vld [vmem:[%s14134_s1 + $0x568] sm:$0xf] }
 0x3a9   : > { %v2850_v22 = vadd.f32 %v2849_v23, %v2761_v14  ;;  %v4581_v41 = vmax.f32 %v4579_v40, %v4580_v27  ;;  %v9205_v60 = vpop.eup %9204  ;;  %v4161_v55 = vadd.f32 %v10901_v12, %v3026_v7  ;;  %v8870_v40 = vld [vmem:[%s14134_s1 + $0x16c] sm:$0xf]  ;;  %v14743_v14 = vld [vmem:[#allocation129_spill] sm:$0xff] }
 0x3aa   : > { %v9207_v36 = vpop.eup %9206  ;;  %v4287_v61 = vmul.f32 %v9205_v60, %v9205_v60  ;;  %v4162_v23 = vadd.f32 %v10871_v62, %v14743_v14  ;;  %v8051_v27 = vld [vmem:[%s14134_s1 + $0x178] sm:$0xf0]  ;;  %3568 = vmatpush.bf16.msra.mxu2 %v7926_v37  ;;  %v4762_v62 = vmul.f32 1.442695, %v4721_v30  ;;  %3390 = vmatpush.bf16.msra.mxu0 %v8434_v38 }
 0x3ab   : > { %v4582_v63 = vrot.slane %v4581_v41, 2  ;;  %9210 = vtanh.f32 %v4161_v55  ;;  %v5065_v7 = vmul.f32 %v9207_v36, %v11304_v49  ;;  %v4352_v55 = vmul.f32 %v10910_v6, %v4286_v57  ;;  %v9209_v35 = vpop.eup %9208  ;;  %v14746_v57 = vld [vmem:[#allocation36_spill] sm:$0xff] }
 0x3ac   : > { %v2938_v9 = vpop.f32.mrf.mxu2  ;;  %v4353_v59 = vmul.f32 %v10912_v52, %v4287_v61  ;;  %9212 = vpow2.f32 %v4754_v1  ;;  %v4535_v1 = vrot.slane %v4534_v10, 1  ;;  %v14747_v61 = vld [vmem:[#allocation37_spill] sm:$0xff]  ;;  %v4288_v14 = vmul.f32 %v9209_v35, %v9209_v35 }
 0x3ad   : > { %v4583_v19 = vmax.f32 %v4581_v41, %v4582_v63  ;;  %v2939_v0 = vadd.f32 %v2938_v9, %v2850_v22  ;;  %v3027_v56 = vpop.f32.mrf.mxu3  ;;  %v8054_v22 = vor.u32 %v8870_v40, %v8051_v27  ;;  %v14744_v9 = vld [vmem:[#allocation34_spill] sm:$0xff]  ;;  %9214 = vtanh.f32 %v4162_v23  ;;  %v9000_v40 = vld [vmem:[%s14134_s1 + $0x574] sm:$0xf0] }
 0x3ae   : > { %v3039_v51 = vpop.f32.mrf.mxu0  ;;  %v3128_v60 = vpop.f32.mrf.mxu1  ;;  %5103 = vperm.xlu2 %9061, %v5065_v7   ;;  %v11430_v45 = vadd.f32 %v4353_v59, %v4352_v55  ;;  %9216 = vpow2.f32 %v4762_v62  ;;  %v4536_v27 = vmax.f32 %v4534_v10, %v4535_v1 }
 0x3af   : > { %v4584_v41 = vrot.slane %v4583_v19, 1  ;;  %v3028_v63 = vadd.f32 %v3027_v56, %v2939_v0  ;;  %v3129_v15 = vadd.f32 %v3128_v60, %v3039_v51  ;;  %3657 = vmatpush.bf16.msra.mxu3 %v8054_v22  ;;  %v4354_v22 = vmul.f32 %v10910_v6, %v4288_v14 }
 0x3b0   : > { %3078 = vmatmul.bf16.gmra.mxu0 %v14744_v9  ;;  %3167 = vmatmul.bf16.gmra.mxu1 %v14745_v3  ;;  %v4718_v35 = vsub.f32 %v11371_v58, %v4536_v27 }
 0x3b1   : > { %v4585_v49 = vmax.f32 %v4583_v19, %v4584_v41  ;;  %3256 = vmatmul.bf16.gmra.mxu2 %v14746_v57  ;;  %v9211_v36 = vpop.eup %9210  ;;  %v4163_v30 = vadd.f32 %v10901_v12, %v3028_v63  ;;  %v8562_v19 = vor.u32 %v9000_v40, %v8561_v20 }
 0x3b2   : > { %3345 = vmatmul.bf16.gmra.mxu3 %v14747_v61  ;;  %v4289_v37 = vmul.f32 %v9211_v36, %v9211_v36  ;;  %v11442_v0 = vpop.eup %9212 }
 0x3b3   : > { %9218 = vtanh.f32 %v4163_v30  ;;  %v4725_v12 = vsub.f32 %v11391_v47, %v4585_v49  ;;  %3479 = vmatpush.bf16.msra.mxu1 %v8562_v19  ;;  %v9215_v55 = vpop.eup %9214  ;;  %v4843_v59 = vsel %vm4487_vm0, %v11442_v0, 0.0 }
 0x3b4   : > { %v3217_v23 = vpop.f32.mrf.mxu2  ;;  %v4355_v60 = vmul.f32 %v10912_v52, %v4289_v37  ;;  %v11451_v63 = vpop.eup %9216  ;;  %v4290_v10 = vmul.f32 %v9215_v55, %v9215_v55  ;;  %v4844_v36 = vrot.slane %v4843_v59, 4 }
 0x3b5   : > { %v3218_v56 = vadd.f32 %v3217_v23, %v3129_v15  ;;  %v3306_v51 = vpop.f32.mrf.mxu3  ;;  %v4770_v47 = vmul.f32 1.442695, %v4725_v12  ;;  %v4871_v40 = vsel %vm4487_vm0, %v11451_v63, 0.0 }
 0x3b6   : > { %v3041_v38 = vpop.f32.mrf.mxu0  ;;  %v3130_v7 = vpop.f32.mrf.mxu1  ;;  %v11454_v49 = vadd.f32 %v4355_v60, %v4354_v22  ;;  %v4845_v27 = vadd.f32 %v4844_v36, %v4843_v59  ;;  %v4872_v60 = vrot.slane %v4871_v40, 4 }
 0x3b7   : > { %v11448_v62 = vadd.f32 %v3306_v51, %v3218_v56  ;;  %v3131_v41 = vadd.f32 %v3130_v7, %v3041_v38  ;;  %9220 = vpow2.f32 %v4770_v47  ;;  %v4756_v56 = vmul.f32 1.442695, %v4718_v35 }
 0x3b8   : > { %v4356_v38 = vmul.f32 %v10910_v6, %v4290_v10  ;;  %v4846_v6 = vrot.slane %v4845_v27, 2  ;;  %v4873_v35 = vadd.f32 %v4872_v60, %v4871_v40 }
 0x3b9   : > { %v9219_v15 = vpop.eup %9218  ;;  %9222 = vpow2.f32 %v4756_v56 }
 0x3ba   : > { %v4291_v30 = vmul.f32 %v9219_v15, %v9219_v15  ;;  %v14748_v15 = vld [vmem:[#allocation38_spill] sm:$0xff]  ;;  %v4847_v56 = vadd.f32 %v4846_v6, %v4845_v27  ;;  %v7907_v27 = vld [vmem:[%s14134_s1 + $0x58] sm:$0xf0] }
 0x3bb   : > { %v4408_v1 = vpop.xlane.xlu2 %4407 }
 0x3bc   : > { %v4471_v37 = vadd.f32 %v11114_v4, %v4408_v1  ;;  %v3219_v20 = vpop.f32.mrf.mxu2  ;;  %v4357_v12 = vmul.f32 %v10912_v52, %v4291_v30  ;;  %v14749_v1 = vld [vmem:[#allocation39_spill] sm:$0xff]  ;;  %v4848_v6 = vrot.slane %v4847_v56, 1 }
 0x3bd   : > { %v3220_v14 = vadd.f32 %v3219_v20, %v3131_v41  ;;  %v3308_v23 = vpop.f32.mrf.mxu3  ;;  %v11470_v52 = vpop.eup %9220 }
 0x3be   : > { %v3044_v19 = vpop.f32.mrf.mxu0  ;;  %v4600_v58 = vsel %vm4487_vm0, %v4471_v37, -inf  ;;  %v3133_v51 = vpop.f32.mrf.mxu1  ;;  %v11465_v47 = vadd.f32 %v4357_v12, %v4356_v38  ;;  %v4849_v46 = vadd.f32 %v4848_v6, %v4847_v56  ;;  %v11518_v56 = vadd.f32 %v11114_v4, %v11290_v5 }
 0x3bf   : > { %v4601_v7 = vrot.slane %v4600_v58, 4  ;;  %v11462_v55 = vadd.f32 %v3308_v23, %v3220_v14  ;;  %v3134_v22 = vadd.f32 %v3133_v51, %v3044_v19  ;;  %v4899_v23 = vsel %vm4487_vm0, %v11470_v52, 0.0 }
 0x3c0   : > { %3083 = vmatmul.bf16.gmra.mxu0 %v14748_v15  ;;  %3172 = vmatmul.bf16.gmra.mxu1 %v14749_v1  ;;  %v4874_v51 = vrot.slane %v4873_v35, 2  ;;  %v4900_v40 = vrot.slane %v4899_v23, 4  ;;  %v4544_v5 = vsel %vm4487_vm0, %v11518_v56, -inf }
 0x3c1   : > { %v4602_v41 = vmax.f32 %v4600_v58, %v4601_v7  ;;  %3261 = vmatmul.bf16.gmra.mxu2 %v14662_v18  ;;  %v11475_v58 = vpop.eup %9222 }
 0x3c2   : > { %3350 = vmatmul.bf16.gmra.mxu3 %v14663_v31 }
 0x3c3   : > { %v4603_v59 = vrot.slane %v4602_v41, 2  ;;  %4431 = vadd.xlane.f32.xlu1 %v11313_v8  ;;  %v4850_v8 = vsel %vm4487_vm0, %v11475_v58, 0.0 }
 0x3c4   : > { %v3222_v10 = vpop.f32.mrf.mxu2 }
 0x3c5   : > { %v4604_v36 = vmax.f32 %v4602_v41, %v4603_v59  ;;  %v3223_v30 = vadd.f32 %v3222_v10, %v3134_v22  ;;  %v3311_v20 = vpop.f32.mrf.mxu3  ;;  %v8834_v41 = vld [vmem:[%s14134_s1 + $0x4c] sm:$0xf]  ;;  %v11487_v59 = vpop.xlane.xlu1 %4389 }
 0x3c6   : > { %v3046_v14 = vpop.f32.mrf.mxu0  ;;  %v3135_v19 = vpop.f32.mrf.mxu1 }
 0x3c7   : > { %v4605_v12 = vrot.slane %v4604_v36, 1  ;;  %v11477_v38 = vadd.f32 %v3311_v20, %v3223_v30  ;;  %v3136_v7 = vadd.f32 %v3135_v19, %v3046_v14  ;;  %v7910_v30 = vor.u32 %v8834_v41, %v7907_v27  ;;  %v8866_v20 = vld [vmem:[%s14134_s1 + $0x14c] sm:$0xf]  ;;  %v8035_v41 = vld [vmem:[%s14134_s1 + $0x158] sm:$0xf0] }
 0x3c8   : > { %v4875_v14 = vadd.f32 %v4874_v51, %v4873_v35  ;;  %v4901_v19 = vadd.f32 %v4900_v40, %v4899_v23  ;;  %v4851_v27 = vrot.slane %v4850_v8, 4  ;;  %v8038_v29 = vor.u32 %v8866_v20, %v8035_v41  ;;  %v14750_v23 = vld [vmem:[#allocation42_spill] sm:$0xff] }
 0x3c9   : > { %v4606_v60 = vmax.f32 %v4604_v36, %v4605_v12  ;;  %v8417_v36 = vld [vmem:[%s14134_s1 + $0x448] sm:$0xf]  ;;  %3569 = vmatpush.bf16.msra.mxu2 %v7910_v30 }
 0x3ca   : > { %v4902_v51 = vrot.slane %v4901_v19, 2  ;;  %v4876_v40 = vrot.slane %v4875_v14, 1  ;;  %3658 = vmatpush.bf16.msra.mxu3 %v8038_v29 }
 0x3cb   : > { %v4728_v22 = vsub.f32 %v4471_v37, %v4606_v60  ;;  %v8964_v37 = vld [vmem:[%s14134_s1 + $0x454] sm:$0xf0] }
 0x3cc   : > { %v3224_v10 = vpop.f32.mrf.mxu2  ;;  %v8418_v61 = vor.u32 %v8964_v37, %v8417_v36  ;;  %v4903_v30 = vadd.f32 %v4902_v51, %v4901_v19 }
 0x3cd   : > { %v4776_v12 = vmul.f32 1.442695, %v4728_v22  ;;  %v3225_v60 = vadd.f32 %v3224_v10, %v3136_v7  ;;  %v3313_v31 = vpop.f32.mrf.mxu3  ;;  %v14751_v7 = vld [vmem:[#allocation43_spill] sm:$0xff]  ;;  %v4852_v22 = vadd.f32 %v4851_v27, %v4850_v8  ;;  %v4877_v10 = vadd.f32 %v4876_v40, %v4875_v14 }
 0x3ce   : > { %v3049_v18 = vpop.f32.mrf.mxu0  ;;  %v3138_v57 = vpop.f32.mrf.mxu1  ;;  %3391 = vmatpush.bf16.msra.mxu0 %v8418_v61  ;;  %v4904_v14 = vrot.slane %v4903_v30, 1 }
 0x3cf   : > { %9224 = vpow2.f32 %v4776_v12  ;;  %v11501_v1 = vadd.f32 %v3313_v31, %v3225_v60  ;;  %v3139_v35 = vadd.f32 %v3138_v57, %v3049_v18  ;;  %4446 = vadd.xlane.f32.xlu0 %v11430_v45  ;;  %v8545_v31 = vld [vmem:[%s14134_s1 + $0x548] sm:$0xf]  ;;  %v8996_v18 = vld [vmem:[%s14134_s1 + $0x554] sm:$0xf0]  ;;  %v4853_v36 = vrot.slane %v4852_v22, 2 }
 0x3d0   : > { %3088 = vmatmul.bf16.gmra.mxu0 %v14750_v23  ;;  %3177 = vmatmul.bf16.gmra.mxu1 %v14751_v7  ;;  %9226 = vrcp.f32 %v4849_v46  ;;  %v8546_v57 = vor.u32 %v8996_v18, %v8545_v31  ;;  %v4393_v46 = vpop.xlane.xlu1 %4392  ;;  %v4545_v31 = vrot.slane %v4544_v5, 4 }
 0x3d1   : > { %3266 = vmatmul.bf16.gmra.mxu2 %v14664_v33  ;;  %9228 = vrcp.f32 %v4877_v10  ;;  %v11528_v19 = vadd.f32 %v11114_v4, %v4393_v46  ;;  %v4854_v51 = vadd.f32 %v4853_v36, %v4852_v22  ;;  %v14752_v33 = vld [vmem:[#allocation46_spill] sm:$0xff] }
 0x3d2   : > { %3355 = vmatmul.bf16.gmra.mxu3 %v14665_v16  ;;  %3480 = vmatpush.bf16.msra.mxu1 %v8546_v57  ;;  %v4546_v22 = vmax.f32 %v4544_v5, %v4545_v31 }
 0x3d4   : > { %v3227_v45 = vpop.f32.mrf.mxu2  ;;  %v4547_v5 = vrot.slane %v4546_v22, 2 }
 0x3d5   : > { %v11514_v61 = vpop.eup %9224  ;;  %v3228_v8 = vadd.f32 %v3227_v45, %v3139_v35  ;;  %v3316_v6 = vpop.f32.mrf.mxu3 }
 0x3d6   : > { %v3051_v29 = vpop.f32.mrf.mxu0  ;;  %v4920_v37 = vsel %vm4487_vm0, %v11514_v61, 0.0  ;;  %v3140_v20 = vpop.f32.mrf.mxu1 }
 0x3d7   : > { %v4921_v12 = vrot.slane %v4920_v37, 4  ;;  %v11522_v60 = vadd.f32 %v3316_v6, %v3228_v8  ;;  %v3141_v41 = vadd.f32 %v3140_v20, %v3051_v29  ;;  %v9227_v27 = vpop.eup %9226  ;;  %4434 = vadd.xlane.f32.xlu2 %v11362_v28  ;;  %v4905_v6 = vadd.f32 %v4904_v14, %v4903_v30 }
 0x3d8   : > { %v5069_v45 = vmul.f32 %v9227_v27, %v11442_v0  ;;  %v4855_v20 = vrot.slane %v4854_v51, 1  ;;  %v4402_v36 = vpop.xlane.xlu1 %4401 }
 0x3d9   : > { %v4922_v35 = vadd.f32 %v4921_v12, %v4920_v37  ;;  %v4565_v37 = vsel %vm4487_vm0, %v11528_v19, -inf  ;;  %v9229_v12 = vpop.eup %9228  ;;  %9230 = vrcp.f32 %v4905_v6  ;;  %v11541_v14 = vadd.f32 %v11114_v4, %v4402_v36 }
 0x3da   : > { %v4566_v0 = vrot.slane %v4565_v37, 4  ;;  %v5073_v27 = vmul.f32 %v9229_v12, %v11451_v63  ;;  %v4548_v63 = vmax.f32 %v4546_v22, %v4547_v5  ;;  %v8830_v22 = vld [vmem:[%s14134_s1 + $0x2c] sm:$0xf]  ;;  %v7891_v5 = vld [vmem:[%s14134_s1 + $0x38] sm:$0xf0] }
 0x3db   : > { %v4923_v40 = vrot.slane %v4922_v35, 2 }
 0x3dc   : > { %v3229_v18 = vpop.f32.mrf.mxu2  ;;  %5123 = vperm.xlu1 %9062, %v5069_v45   ;;  %v4567_v31 = vmax.f32 %v4565_v37, %v4566_v0  ;;  %v4549_v0 = vrot.slane %v4548_v63, 1 }
 0x3dd   : > { %v3230_v57 = vadd.f32 %v3229_v18, %v3141_v41  ;;  %v3318_v8 = vpop.f32.mrf.mxu3  ;;  %v4924_v29 = vadd.f32 %v4923_v40, %v4922_v35  ;;  %v14753_v41 = vld [vmem:[#allocation47_spill] sm:$0xff]  ;;  %v4856_v35 = vadd.f32 %v4855_v20, %v4854_v51 }
 0x3de   : > { %v3054_v28 = vpop.f32.mrf.mxu0  ;;  %v3143_v10 = vpop.f32.mrf.mxu1  ;;  %v4568_v12 = vrot.slane %v4567_v31, 2 }
 0x3df   : > { %v11533_v46 = vadd.f32 %v3318_v8, %v3230_v57  ;;  %v3144_v16 = vadd.f32 %v3143_v10, %v3054_v28  ;;  %v4925_v30 = vrot.slane %v4924_v29, 1  ;;  %9232 = vrcp.f32 %v4856_v35  ;;  %v9231_v6 = vpop.eup %9230 }
 0x3e0   : > { %3093 = vmatmul.bf16.gmra.mxu0 %v14752_v33  ;;  %3182 = vmatmul.bf16.gmra.mxu1 %v14753_v41  ;;  %v4586_v10 = vsel %vm4487_vm0, %v11541_v14, -inf  ;;  %v4411_v51 = vpop.xlane.xlu1 %4410  ;;  %v5077_v37 = vmul.f32 %v9231_v6, %v11470_v52  ;;  %v8401_v52 = vld [vmem:[%s14134_s1 + $0x428] sm:$0xf] }
 0x3e1   : > { %3271 = vmatmul.bf16.gmra.mxu2 %v14670_v26  ;;  %v4926_v57 = vadd.f32 %v4925_v30, %v4924_v29  ;;  %v4587_v36 = vrot.slane %v4586_v10, 4  ;;  %v4550_v26 = vmax.f32 %v4548_v63, %v4549_v0  ;;  %v14755_v33 = vld [vmem:[#allocation51_spill] sm:$0xff] }
 0x3e2   : > { %3360 = vmatmul.bf16.gmra.mxu3 %v14671_v21 }
 0x3e3   : > { %5143 = vperm.xlu0 %9063, %v5073_v27   ;;  %9234 = vrcp.f32 %v4926_v57  ;;  %v4569_v27 = vmax.f32 %v4567_v31, %v4568_v12  ;;  %v8960_v31 = vld [vmem:[%s14134_s1 + $0x434] sm:$0xf0]  ;;  %v4720_v63 = vsub.f32 %v11518_v56, %v4550_v26 }
 0x3e4   : > { %v3232_v40 = vpop.f32.mrf.mxu2 }
 0x3e5   : > { %v3233_v18 = vadd.f32 %v3232_v40, %v3144_v16  ;;  %v3321_v45 = vpop.f32.mrf.mxu3  ;;  %v11549_v16 = vadd.f32 %v11114_v4, %v4411_v51  ;;  %v9233_v29 = vpop.eup %9232  ;;  %v4570_v41 = vrot.slane %v4569_v27, 1 }
 0x3e6   : > { %v3056_v8 = vpop.f32.mrf.mxu0  ;;  %v3145_v28 = vpop.f32.mrf.mxu1 }
 0x3e7   : > { %v11545_v21 = vadd.f32 %v3321_v45, %v3233_v18  ;;  %v3146_v20 = vadd.f32 %v3145_v28, %v3056_v8  ;;  %v4588_v18 = vmax.f32 %v4586_v10, %v4587_v36  ;;  %v7894_v8 = vor.u32 %v8830_v22, %v7891_v5  ;;  %v8862_v28 = vld [vmem:[%s14134_s1 + $0x12c] sm:$0xf]  ;;  %v8019_v36 = vld [vmem:[%s14134_s1 + $0x138] sm:$0xf0] }
 0x3e8   : > { %v4607_v51 = vsel %vm4487_vm0, %v11549_v16, -inf  ;;  %v5070_v10 = vmul.f32 %v9233_v29, %v11475_v58  ;;  %v8402_v22 = vor.u32 %v8960_v31, %v8401_v52  ;;  %v8022_v5 = vor.u32 %v8862_v28, %v8019_v36 }
 0x3e9   : > { %v9235_v6 = vpop.eup %9234  ;;  %3570 = vmatpush.bf16.msra.mxu2 %v7894_v8  ;;  %v4571_v0 = vmax.f32 %v4569_v27, %v4570_v41  ;;  %v8529_v8 = vld [vmem:[%s14134_s1 + $0x528] sm:$0xf]  ;;  %v4760_v41 = vmul.f32 1.442695, %v4720_v63  ;;  %v14757_v63 = vld [vmem:[#allocation54_spill] sm:$0xff] }
 0x3ea   : > { %v5080_v58 = vmul.f32 %v9235_v6, %v11514_v61  ;;  %3392 = vmatpush.bf16.msra.mxu0 %v8402_v22  ;;  %3659 = vmatpush.bf16.msra.mxu3 %v8022_v5  ;;  %v8992_v61 = vld [vmem:[%s14134_s1 + $0x534] sm:$0xf0] }
 0x3eb   : > { %5163 = vperm.xlu0 %9063, %v5077_v37   ;;  %v4426_v37 = vpop.xlane.xlu1 %4425  ;;  %v8530_v6 = vor.u32 %v8992_v61, %v8529_v8  ;;  %v4723_v27 = vsub.f32 %v11528_v19, %v4571_v0  ;;  %9236 = vpow2.f32 %v4760_v41  ;;  %v14758_v19 = vld [vmem:[#allocation55_spill] sm:$0xff] }
 0x3ec   : > { %v3234_v30 = vpop.f32.mrf.mxu2  ;;  %v11580_v29 = vadd.f32 %v11114_v4, %v4426_v37 }
 0x3ed   : > { %v3235_v35 = vadd.f32 %v3234_v30, %v3146_v20  ;;  %v3323_v40 = vpop.f32.mrf.mxu3  ;;  %v14754_v30 = vld [vmem:[#allocation50_spill] sm:$0xff]  ;;  %3481 = vmatpush.bf16.msra.mxu1 %v8530_v6  ;;  %v11596_v6 = vpop.xlane.xlu0 %4395 }
 0x3ee   : > { %v3059_v45 = vpop.f32.mrf.mxu0  ;;  %v3148_v57 = vpop.f32.mrf.mxu1  ;;  %v4642_v37 = vsel %vm4487_vm0, %v11580_v29, -inf }
 0x3ef   : > { %v11568_v20 = vadd.f32 %v3323_v40, %v3235_v35  ;;  %v3149_v12 = vadd.f32 %v3148_v57, %v3059_v45  ;;  %5128 = vperm.xlu2 %9061, %v5070_v10   ;;  %v4589_v35 = vrot.slane %v4588_v18, 2  ;;  %v4608_v40 = vrot.slane %v4607_v51, 4 }
 0x3f0   : > { %3098 = vmatmul.bf16.gmra.mxu0 %v14754_v30  ;;  %3187 = vmatmul.bf16.gmra.mxu1 %v14755_v33  ;;  %v4643_v5 = vrot.slane %v4642_v37, 4 }
 0x3f1   : > { %3276 = vmatmul.bf16.gmra.mxu2 %v14672_v24  ;;  %v4590_v31 = vmax.f32 %v4588_v18, %v4589_v35  ;;  %v4609_v28 = vmax.f32 %v4607_v51, %v4608_v40  ;;  %v4766_v18 = vmul.f32 1.442695, %v4723_v27 }
 0x3f2   : > { %3365 = vmatmul.bf16.gmra.mxu3 %v14673_v32  ;;  %v4644_v8 = vmax.f32 %v4642_v37, %v4643_v5 }
 0x3f3   : > { %5178 = vperm.xlu0 %9063, %v5080_v58   ;;  %v4610_v22 = vrot.slane %v4609_v28, 2  ;;  %9238 = vpow2.f32 %v4766_v18 }
 0x3f4   : > { %v3237_v52 = vpop.f32.mrf.mxu2 }
 0x3f5   : > { %v3238_v45 = vadd.f32 %v3237_v52, %v3149_v12  ;;  %v3326_v57 = vpop.f32.mrf.mxu3  ;;  %v4591_v12 = vrot.slane %v4590_v31, 1  ;;  %v4611_v52 = vmax.f32 %v4609_v28, %v4610_v22  ;;  %v11605_v28 = vpop.permute.xlu2 %5098 }
 0x3f6   : > { %v3061_v10 = vpop.f32.mrf.mxu0  ;;  %v3150_v36 = vpop.f32.mrf.mxu1  ;;  %14759 = vst [vmem:[#allocation90_spill] sm:$0xff] %v11605_v28 }
 0x3f7   : > { %v11591_v26 = vadd.f32 %v3326_v57, %v3238_v45  ;;  %v3151_v56 = vadd.f32 %v3150_v36, %v3061_v10  ;;  %v4592_v40 = vmax.f32 %v4590_v31, %v4591_v12  ;;  %v4612_v10 = vrot.slane %v4611_v52, 1  ;;  %v11603_v31 = vpop.eup %9236 }
 0x3f8   : > { %v4645_v36 = vrot.slane %v4644_v8, 2  ;;  %v4864_v41 = vsel %vm4487_vm0, %v11603_v31, 0.0 }
 0x3f9   : > { %v4726_v0 = vsub.f32 %v11541_v14, %v4592_v40  ;;  %v4613_v12 = vmax.f32 %v4611_v52, %v4612_v10  ;;  %v4865_v40 = vrot.slane %v4864_v41, 4  ;;  %v7875_v10 = vld [vmem:[%s14134_s1 + $0x18] sm:$0xf0] }
 0x3fa   : > { %v4646_v22 = vmax.f32 %v4644_v8, %v4645_v36 }
 0x3fb   : > { %v4772_v27 = vmul.f32 1.442695, %v4726_v0  ;;  %v8826_v0 = vld [vmem:[%s14134_s1 + $0xc] sm:$0xf] }
 0x3fc   : > { %v3239_v58 = vpop.f32.mrf.mxu2  ;;  %v4647_v52 = vrot.slane %v4646_v22, 1 }
 0x3fd   : > { %v3240_v51 = vadd.f32 %v3239_v58, %v3151_v56  ;;  %v3328_v35 = vpop.f32.mrf.mxu3  ;;  %v11609_v58 = vpop.eup %9238  ;;  %9240 = vpow2.f32 %v4772_v27  ;;  %v8003_v27 = vld [vmem:[%s14134_s1 + $0x118] sm:$0xf0] }
 0x3fe   : > { %v3064_v61 = vpop.f32.mrf.mxu0  ;;  %v3153_v32 = vpop.f32.mrf.mxu1  ;;  %v4648_v28 = vmax.f32 %v4646_v22, %v4647_v52 }
 0x3ff   : > { %v11594_v45 = vadd.f32 %v3328_v35, %v3240_v51  ;;  %v3154_v57 = vadd.f32 %v3153_v32, %v3064_v61  ;;  %v11613_v35 = vpop.xlane.xlu0 %4404  ;;  %v4885_v61 = vsel %vm4487_vm0, %v11609_v58, 0.0 }
 0x400   : > { %3103 = vmatmul.bf16.gmra.mxu0 %v14757_v63  ;;  %3192 = vmatmul.bf16.gmra.mxu1 %v14758_v19 }
 0x401   : > { %14756 = vst [vmem:[#allocation89_spill] sm:$0xff] %v11594_v45  ;;  %3281 = vmatmul.bf16.gmra.mxu2 %v14678_v13  ;;  %v4866_v13 = vadd.f32 %v4865_v40, %v4864_v41  ;;  %v14762_v41 = vld [vmem:[#allocation58_spill] sm:$0xff] }
 0x402   : > { %3370 = vmatmul.bf16.gmra.mxu3 %v14679_v2 }
 0x403   : > { %v4867_v52 = vrot.slane %v4866_v13, 2 }
 0x404   : > { %v3242_v32 = vpop.f32.mrf.mxu2 }
 0x405   : > { %v3243_v37 = vadd.f32 %v3242_v32, %v3154_v57  ;;  %v3331_v56 = vpop.f32.mrf.mxu3  ;;  %v4729_v57 = vsub.f32 %v11549_v16, %v4613_v12  ;;  %v8956_v16 = vld [vmem:[%s14134_s1 + $0x414] sm:$0xf0]  ;;  %v4886_v12 = vrot.slane %v4885_v61, 4 }
 0x406   : > { %v3066_v14 = vpop.f32.mrf.mxu0  ;;  %v3155_v5 = vpop.f32.mrf.mxu1  ;;  %4437 = vadd.xlane.f32.xlu1 %v11374_v48  ;;  %v8385_v48 = vld [vmem:[%s14134_s1 + $0x408] sm:$0xf] }
 0x407   : > { %v11611_v18 = vadd.f32 %v3331_v56, %v3243_v37  ;;  %v3156_v51 = vadd.f32 %v3155_v5, %v3066_v14  ;;  %v7878_v37 = vor.u32 %v8826_v0, %v7875_v10  ;;  %v8858_v56 = vld [vmem:[%s14134_s1 + $0x10c] sm:$0xf]  ;;  %v8386_v2 = vor.u32 %v8956_v16, %v8385_v48  ;;  %v8513_v0 = vld [vmem:[%s14134_s1 + $0x508] sm:$0xf]  ;;  %v8988_v10 = vld [vmem:[%s14134_s1 + $0x514] sm:$0xf0] }
 0x408   : > { %v4778_v24 = vmul.f32 1.442695, %v4729_v57  ;;  %v8514_v16 = vor.u32 %v8988_v10, %v8513_v0  ;;  %v4887_v22 = vadd.f32 %v4886_v12, %v4885_v61  ;;  %v14763_v57 = vld [vmem:[#allocation59_spill] sm:$0xff]  ;;  %v8243_v61 = vld [vmem:[%s14134_s1 + $0x2f8] sm:$0xf0] }
 0x409   : > { %14760 = vst [vmem:[#allocation95_spill] sm:$0xff] %v11611_v18  ;;  %v4423_v8 = vpop.xlane.xlu2 %4422  ;;  %3571 = vmatpush.bf16.msra.mxu2 %v7878_v37  ;;  %3393 = vmatpush.bf16.msra.mxu0 %v8386_v2  ;;  %v4734_v37 = vsub.f32 %v11580_v29, %v4648_v28  ;;  %v9014_v12 = vld [vmem:[%s14134_s1 + $0x5ec] sm:$0xf]  ;;  %v8627_v10 = vld [vmem:[%s14134_s1 + $0x5f8] sm:$0xf0] }
 0x40a   : > { %v11629_v36 = vadd.f32 %v11114_v4, %v4423_v8  ;;  %v8006_v8 = vor.u32 %v8858_v56, %v8003_v27  ;;  %v11650_v56 = vpop.eup %9240  ;;  %v11652_v27 = vpop.xlane.xlu0 %4413  ;;  %9242 = vpow2.f32 %v4778_v24  ;;  %3482 = vmatpush.bf16.msra.mxu1 %v8514_v16  ;;  %v11670_v24 = vadd.f32 %v11114_v4, %v11487_v59 }
 0x40b   : > { %v4906_v2 = vsel %vm4487_vm0, %v11650_v56, 0.0  ;;  %v4788_v16 = vmul.f32 1.442695, %v4734_v37  ;;  %v4868_v37 = vadd.f32 %v4867_v52, %v4866_v13 }
 0x40c   : > { %v3244_v32 = vpop.f32.mrf.mxu2  ;;  %v4635_v19 = vsel %vm4487_vm0, %v11629_v36, -inf  ;;  %3660 = vmatpush.bf16.msra.mxu3 %v8006_v8 }
 0x40d   : > { %v3245_v14 = vadd.f32 %v3244_v32, %v3156_v51  ;;  %v3333_v5 = vpop.f32.mrf.mxu3  ;;  %v4636_v51 = vrot.slane %v4635_v19, 4  ;;  %9244 = vpow2.f32 %v4788_v16 }
 0x40e   : > { %v3069_v63 = vpop.f32.mrf.mxu0  ;;  %v3158_v18 = vpop.f32.mrf.mxu1  ;;  %4443 = vadd.xlane.f32.xlu1 %v11402_v39  ;;  %v8982_v39 = vld [vmem:[%s14134_s1 + $0x4ec] sm:$0xf] }
 0x40f   : > { %v11648_v48 = vadd.f32 %v3333_v5, %v3245_v14  ;;  %v3159_v32 = vadd.f32 %v3158_v18, %v3069_v63  ;;  %v4637_v40 = vmax.f32 %v4635_v19, %v4636_v51  ;;  %v8499_v19 = vld [vmem:[%s14134_s1 + $0x4f8] sm:$0xf0]  ;;  %v8918_v18 = vld [vmem:[%s14134_s1 + $0x2ec] sm:$0xf]  ;;  %v4888_v14 = vrot.slane %v4887_v22, 2 }
 0x410   : > { %3108 = vmatmul.bf16.gmra.mxu0 %v14762_v41  ;;  %3197 = vmatmul.bf16.gmra.mxu1 %v14763_v57  ;;  %v8502_v28 = vor.u32 %v8982_v39, %v8499_v19  ;;  %v8246_v59 = vor.u32 %v8918_v18, %v8243_v61  ;;  %v4907_v51 = vrot.slane %v4906_v2, 4 }
 0x411   : > { %14761 = vst [vmem:[#allocation96_spill] sm:$0xff] %v11648_v48  ;;  %3286 = vmatmul.bf16.gmra.mxu2 %v14680_v54  ;;  %v4638_v63 = vrot.slane %v4637_v40, 2  ;;  %v4889_v61 = vadd.f32 %v4888_v14, %v4887_v22 }
 0x412   : > { %3375 = vmatmul.bf16.gmra.mxu3 %v14681_v44  ;;  %3920 = vmatpush.bf16.msrb.mxu2 %v8502_v28  ;;  %v8630_v44 = vor.u32 %v9014_v12, %v8627_v10  ;;  %v4558_v28 = vsel %vm4487_vm0, %v11670_v24, -inf  ;;  %v11699_v12 = vadd.f32 %v11114_v4, %v11596_v6 }
 0x413   : > { %v4639_v5 = vmax.f32 %v4637_v40, %v4638_v63  ;;  %3742 = vmatpush.bf16.msrb.mxu0 %v8246_v59  ;;  %v8371_v40 = vld [vmem:[%s14134_s1 + $0x3f8] sm:$0xf0]  ;;  %v11692_v63 = vpop.eup %9242  ;;  %v4890_v6 = vrot.slane %v4889_v61, 1 }
 0x414   : > { %v3247_v29 = vpop.f32.mrf.mxu2  ;;  %4009 = vmatpush.bf16.msrb.mxu3 %v8630_v44  ;;  %v4927_v13 = vsel %vm4487_vm0, %v11692_v63, 0.0 }
 0x415   : > { %v3248_v8 = vadd.f32 %v3247_v29, %v3159_v32  ;;  %v3336_v0 = vpop.f32.mrf.mxu3  ;;  %v4640_v54 = vrot.slane %v4639_v5, 1  ;;  %v8950_v32 = vld [vmem:[%s14134_s1 + $0x3ec] sm:$0xf]  ;;  %v4928_v10 = vrot.slane %v4927_v13, 4 }
 0x416   : > { %v3071_v39 = vpop.f32.mrf.mxu0  ;;  %v3160_v19 = vpop.f32.mrf.mxu1  ;;  %4452 = vadd.xlane.f32.xlu1 %v11465_v47  ;;  %v8374_v29 = vor.u32 %v8950_v32, %v8371_v40  ;;  %v4559_v47 = vrot.slane %v4558_v28, 4  ;;  %v14766_v32 = vld [vmem:[#allocation62_spill] sm:$0xff] }
 0x417   : > { %v11684_v57 = vadd.f32 %v3336_v0, %v3248_v8  ;;  %v3161_v41 = vadd.f32 %v3160_v19, %v3071_v39  ;;  %v4641_v18 = vmax.f32 %v4639_v5, %v4640_v54  ;;  %v4908_v8 = vadd.f32 %v4907_v51, %v4906_v2  ;;  %v11701_v0 = vpop.xlane.xlu0 %4416  ;;  %v11711_v19 = vpop.eup %9244 }
 0x418   : > { %4440 = vadd.xlane.f32.xlu2 %v11388_v50  ;;  %3831 = vmatpush.bf16.msrb.mxu1 %v8374_v29  ;;  %v4869_v54 = vrot.slane %v4868_v37, 1  ;;  %v4572_v2 = vsel %vm4487_vm0, %v11699_v12, -inf  ;;  %v14767_v29 = vld [vmem:[#allocation63_spill] sm:$0xff] }
 0x419   : > { %14764 = vst [vmem:[#allocation101_spill] sm:$0xff] %v11684_v57  ;;  %v4733_v44 = vsub.f32 %v11629_v36, %v4641_v18  ;;  %v4909_v59 = vrot.slane %v4908_v8, 2  ;;  %v4560_v36 = vmax.f32 %v4558_v28, %v4559_v47  ;;  %v4891_v18 = vadd.f32 %v4890_v6, %v4889_v61 }
 0x41a   : > { %v4870_v40 = vadd.f32 %v4869_v54, %v4868_v37  ;;  %v11723_v54 = vpop.permute.xlu1 %5108 }
 0x41b   : > { %v4786_v22 = vmul.f32 1.442695, %v4733_v44  ;;  %v4929_v44 = vadd.f32 %v4928_v10, %v4927_v13  ;;  %14768 = vst [vmem:[#allocation107_spill] sm:$0xff] %v11723_v54 }
 0x41c   : > { %v3249_v52 = vpop.f32.mrf.mxu2 }
 0x41d   : > { %v3250_v14 = vadd.f32 %v3249_v52, %v3161_v41  ;;  %v3338_v5 = vpop.f32.mrf.mxu3  ;;  %9246 = vpow2.f32 %v4786_v22  ;;  %v4573_v41 = vrot.slane %v4572_v2, 4  ;;  %v4910_v52 = vadd.f32 %v4909_v59, %v4908_v8 }
 0x41e   : > { %v3074_v51 = vpop.f32.mrf.mxu0  ;;  %v3163_v50 = vpop.f32.mrf.mxu1  ;;  %v4962_v22 = vsel %vm4487_vm0, %v11711_v19, 0.0  ;;  %9248 = vrcp.f32 %v4870_v40  ;;  %v4930_v6 = vrot.slane %v4929_v44, 2 }
 0x41f   : > { %v11709_v16 = vadd.f32 %v3338_v5, %v3250_v14  ;;  %v3164_v39 = vadd.f32 %v3163_v50, %v3074_v51  ;;  %v4561_v14 = vrot.slane %v4560_v36, 2  ;;  %v11719_v5 = vpop.xlane.xlu0 %4419  ;;  %v4574_v37 = vmax.f32 %v4572_v2, %v4573_v41 }
 0x420   : > { %3113 = vmatmul.bf16.gmra.mxu0 %v14766_v32  ;;  %3202 = vmatmul.bf16.gmra.mxu1 %v14767_v29  ;;  %9250 = vrcp.f32 %v4891_v18  ;;  %v4963_v10 = vrot.slane %v4962_v22, 4  ;;  %v4911_v50 = vrot.slane %v4910_v52, 1  ;;  %v4931_v32 = vadd.f32 %v4930_v6, %v4929_v44 }
 0x421   : > { %14765 = vst [vmem:[#allocation102_spill] sm:$0xff] %v11709_v16  ;;  %3291 = vmatmul.bf16.gmra.mxu2 %v14686_v42  ;;  %v4562_v41 = vmax.f32 %v4560_v36, %v4561_v14 }
 0x422   : > { %3380 = vmatmul.bf16.gmra.mxu3 %v14687_v17  ;;  %v11729_v17 = vadd.f32 %v11114_v4, %v11613_v35  ;;  %v4964_v54 = vadd.f32 %v4963_v10, %v4962_v22  ;;  %v4912_v29 = vadd.f32 %v4911_v50, %v4910_v52  ;;  %v4932_v52 = vrot.slane %v4931_v32, 1 }
 0x423   : > { %v11721_v47 = vpop.eup %9246  ;;  %v4563_v45 = vrot.slane %v4562_v41, 1 }
 0x424   : > { %v3252_v28 = vpop.f32.mrf.mxu2  ;;  %v4955_v8 = vsel %vm4487_vm0, %v11721_v47, 0.0  ;;  %v9249_v18 = vpop.eup %9248  ;;  %v4593_v57 = vsel %vm4487_vm0, %v11729_v17, -inf  ;;  %v4965_v14 = vrot.slane %v4964_v54, 2  ;;  %9252 = vrcp.f32 %v4912_v29  ;;  %v14771_v29 = vld [vmem:[#allocation67_spill] sm:$0xff] }
 0x425   : > { %v3253_v61 = vadd.f32 %v3252_v28, %v3164_v39  ;;  %v3341_v13 = vpop.f32.mrf.mxu3  ;;  %v4956_v40 = vrot.slane %v4955_v8, 4  ;;  %v4575_v39 = vrot.slane %v4574_v37, 2  ;;  %v4594_v36 = vrot.slane %v4593_v57, 4 }
 0x426   : > { %v3076_v59 = vpop.f32.mrf.mxu0  ;;  %v3165_v51 = vpop.f32.mrf.mxu1  ;;  %v4564_v50 = vmax.f32 %v4562_v41, %v4563_v45  ;;  %v4933_v45 = vadd.f32 %v4932_v52, %v4931_v32 }
 0x427   : > { %v11731_v42 = vadd.f32 %v3341_v13, %v3253_v61  ;;  %v3166_v2 = vadd.f32 %v3165_v51, %v3076_v59  ;;  %v4957_v28 = vadd.f32 %v4956_v40, %v4955_v8  ;;  %v9251_v16 = vpop.eup %9250  ;;  %v11735_v33 = vpop.xlane.xlu0 %4428  ;;  %v4576_v30 = vmax.f32 %v4574_v37, %v4575_v39 }
 0x428   : > { %v5075_v6 = vmul.f32 %v9251_v16, %v11609_v58  ;;  %v11740_v40 = vpop.permute.xlu1 %5113  ;;  %v5072_v37 = vmul.f32 %v9249_v18, %v11603_v31  ;;  %v11746_v39 = vadd.f32 %v11114_v4, %v11652_v27  ;;  %v4966_v58 = vadd.f32 %v4965_v14, %v4964_v54 }
 0x429   : > { %v4958_v48 = vrot.slane %v4957_v28, 2  ;;  %14769 = vst [vmem:[#allocation108_spill] sm:$0xff] %v11740_v40  ;;  %v4722_v16 = vsub.f32 %v11670_v24, %v4564_v50  ;;  %v14781_v40 = vld [vmem:[#allocation72_spill] sm:$0xff] }
 0x42a   : > { %v9253_v31 = vpop.eup %9252  ;;  %v4967_v32 = vrot.slane %v4966_v58, 1 }
 0x42b   : > { %v4959_v59 = vadd.f32 %v4958_v48, %v4957_v28  ;;  %v4577_v48 = vrot.slane %v4576_v30, 1  ;;  %v5078_v14 = vmul.f32 %v9253_v31, %v11650_v56 }
 0x42c   : > { %v3254_v35 = vpop.f32.mrf.mxu2 }
 0x42d   : > { %v3255_v61 = vadd.f32 %v3254_v35, %v3166_v2  ;;  %v3343_v13 = vpop.f32.mrf.mxu3  ;;  %v4960_v10 = vrot.slane %v4959_v59, 1  ;;  %v14770_v2 = vld [vmem:[#allocation66_spill] sm:$0xff]  ;;  %v4595_v35 = vmax.f32 %v4593_v57, %v4594_v36  ;;  %v4578_v18 = vmax.f32 %v4576_v30, %v4577_v48 }
 0x42e   : > { %v3079_v8 = vpop.f32.mrf.mxu0  ;;  %v3168_v51 = vpop.f32.mrf.mxu1  ;;  %v4764_v30 = vmul.f32 1.442695, %v4722_v16 }
 0x42f   : > { %v11737_v44 = vadd.f32 %v3343_v13, %v3255_v61  ;;  %v3169_v22 = vadd.f32 %v3168_v51, %v3079_v8  ;;  %5153 = vperm.xlu1 %9062, %v5075_v6   ;;  %v4961_v28 = vadd.f32 %v4960_v10, %v4959_v59  ;;  %v11752_v41 = vpop.permute.xlu0 %5118  ;;  %v4614_v61 = vsel %vm4487_vm0, %v11746_v39, -inf }
 0x430   : > { %3394 = vmatmul.bf16.vlgmr.msra.gmra.mxu0 %v14770_v2  ;;  %3483 = vmatmul.bf16.vlgmr.msra.gmra.mxu1 %v14771_v29  ;;  %14772 = vst [vmem:[#allocation2_spill] sm:$0xff] %v11752_v41  ;;  %v4596_v59 = vrot.slane %v4595_v35, 2  ;;  %v4615_v8 = vrot.slane %v4614_v61, 4  ;;  %v14780_v41 = vld [vmem:[#allocation71_spill] sm:$0xff] }
 0x431   : > { %5138 = vperm.xlu2 %9061, %v5072_v37   ;;  %3572 = vmatmul.bf16.vlgmr.msra.gmra.mxu2 %v14688_v53  ;;  %9254 = vrcp.f32 %v4961_v28 }
 0x432   : > { %3661 = vmatmul.bf16.vlgmr.msra.gmra.mxu3 %v14689_v11  ;;  %9256 = vrcp.f32 %v4933_v45  ;;  %v11758_v11 = vadd.f32 %v11114_v4, %v11701_v0  ;;  %v4597_v10 = vmax.f32 %v4595_v35, %v4596_v59  ;;  %v4968_v0 = vadd.f32 %v4967_v32, %v4966_v58 }
 0x433   : > { %9258 = vpow2.f32 %v4764_v30  ;;  %v4616_v28 = vmax.f32 %v4614_v61, %v4615_v8  ;;  %v14775_v30 = vld [vmem:[#allocation69_spill] sm:$0xff] }
 0x434   : > { %v3257_v27 = vpop.f32.mrf.mxu2  ;;  %v4621_v37 = vsel %vm4487_vm0, %v11758_v11, -inf  ;;  %9260 = vrcp.f32 %v4968_v0 }
 0x435   : > { %v3258_v13 = vadd.f32 %v3257_v27, %v3169_v22  ;;  %v3346_v57 = vpop.f32.mrf.mxu3  ;;  %v4724_v22 = vsub.f32 %v11699_v12, %v4578_v18  ;;  %v4598_v18 = vrot.slane %v4597_v10, 1  ;;  %v4617_v61 = vrot.slane %v4616_v28, 2 }
 0x436   : > { %v3081_v36 = vpop.f32.mrf.mxu0  ;;  %v3170_v53 = vpop.f32.mrf.mxu1 }
 0x437   : > { %v11760_v54 = vadd.f32 %v3346_v57, %v3258_v13  ;;  %v3171_v24 = vadd.f32 %v3170_v53, %v3081_v36  ;;  %v4432_v51 = vpop.xlane.xlu1 %4431  ;;  %v9255_v52 = vpop.eup %9254  ;;  %5168 = vperm.xlu1 %9062, %v5078_v14   ;;  %v4768_v16 = vmul.f32 1.442695, %v4724_v22  ;;  %v14774_v14 = vld [vmem:[#allocation68_spill] sm:$0xff]  ;;  %v4599_v8 = vmax.f32 %v4597_v10, %v4598_v18 }
 0x438   : > { %v11765_v6 = vadd.f32 %v11114_v4, %v4432_v51  ;;  %v5085_v50 = vmul.f32 %v9255_v52, %v11721_v47  ;;  %v9257_v48 = vpop.eup %9256  ;;  %v11772_v45 = vpop.permute.xlu0 %5133  ;;  %v4622_v47 = vrot.slane %v4621_v37, 4  ;;  %v11783_v52 = vadd.f32 %v11114_v4, %v11719_v5 }
 0x439   : > { %14773 = vst [vmem:[#allocation3_spill] sm:$0xff] %v11772_v45  ;;  %v5081_v53 = vmul.f32 %v9257_v48, %v11692_v63  ;;  %9262 = vpow2.f32 %v4768_v16  ;;  %v11786_v63 = vpop.permute.xlu2 %5103  ;;  %v4727_v5 = vsub.f32 %v11729_v17, %v4599_v8 }
 0x43a   : > { %v4656_v56 = vsel %vm4487_vm0, %v11765_v6, -inf  ;;  %5203 = vperm.xlu0 %9063, %v5085_v50   ;;  %v4623_v51 = vmax.f32 %v4621_v37, %v4622_v47  ;;  %14776 = vst [vmem:[#allocation111_spill] sm:$0xff] %v11786_v63  ;;  %v14777_v50 = vld [vmem:[#allocation7_spill] sm:$0xff] }
 0x43b   : > { %v4657_v12 = vrot.slane %v4656_v56, 4 }
 0x43c   : > { %v3259_v31 = vpop.f32.mrf.mxu2 }
 0x43d   : > { %v3260_v27 = vadd.f32 %v3259_v31, %v3171_v24  ;;  %v3348_v35 = vpop.f32.mrf.mxu3  ;;  %v4658_v58 = vmax.f32 %v4656_v56, %v4657_v12  ;;  %v11779_v24 = vpop.eup %9258  ;;  %v4618_v56 = vmax.f32 %v4616_v28, %v4617_v61 }
 0x43e   : > { %v3084_v13 = vpop.f32.mrf.mxu0  ;;  %v3173_v57 = vpop.f32.mrf.mxu1  ;;  %v4878_v10 = vsel %vm4487_vm0, %v11779_v24, 0.0 }
 0x43f   : > { %v11774_v59 = vadd.f32 %v3348_v35, %v3260_v27  ;;  %v3174_v36 = vadd.f32 %v3173_v57, %v3084_v13  ;;  %v4659_v32 = vrot.slane %v4658_v58, 2  ;;  %5183 = vperm.xlu1 %9062, %v5081_v53   ;;  %v9261_v0 = vpop.eup %9260  ;;  %v4624_v27 = vrot.slane %v4623_v51, 2 }
 0x440   : > { %3399 = vmatmul.bf16.gmra.mxu0 %v14774_v14  ;;  %3488 = vmatmul.bf16.gmra.mxu1 %v14775_v30  ;;  %v4879_v53 = vrot.slane %v4878_v10, 4  ;;  %v4619_v61 = vrot.slane %v4618_v56, 1 }
 0x441   : > { %v4660_v22 = vmax.f32 %v4658_v58, %v4659_v32  ;;  %3577 = vmatmul.bf16.gmra.mxu2 %v14695_v25  ;;  %v4628_v25 = vsel %vm4487_vm0, %v11783_v52, -inf  ;;  %v11794_v58 = vpop.eup %9262  ;;  %v4625_v8 = vmax.f32 %v4623_v51, %v4624_v27  ;;  %v8483_v51 = vld [vmem:[%s14134_s1 + $0x4d8] sm:$0xf0] }
 0x442   : > { %3666 = vmatmul.bf16.gmra.mxu3 %v14777_v50  ;;  %v4447_v12 = vpop.xlane.xlu0 %4446  ;;  %v4629_v32 = vrot.slane %v4628_v25, 4  ;;  %v11805_v50 = vsel %vm4487_vm0, %v11794_v58, 0.0 }
 0x443   : > { %v4661_v48 = vrot.slane %v4660_v22, 1  ;;  %v11797_v28 = vadd.f32 %v11114_v4, %v4447_v12 }
 0x444   : > { %v3262_v31 = vpop.f32.mrf.mxu2 }
 0x445   : > { %v3263_v37 = vadd.f32 %v3262_v31, %v3174_v36  ;;  %v3351_v16 = vpop.f32.mrf.mxu3  ;;  %v4662_v35 = vmax.f32 %v4660_v22, %v4661_v48  ;;  %v5086_v36 = vmul.f32 %v9261_v0, %v11711_v19  ;;  %v4774_v48 = vmul.f32 1.442695, %v4727_v5 }
 0x446   : > { %v3086_v18 = vpop.f32.mrf.mxu0  ;;  %v3175_v47 = vpop.f32.mrf.mxu1  ;;  %v4691_v12 = vsel %vm4487_vm0, %v11797_v28, -inf  ;;  %v11809_v31 = vadd.f32 %v4879_v53, %v4878_v10  ;;  %v4630_v5 = vmax.f32 %v4628_v25, %v4629_v32  ;;  %v4626_v53 = vrot.slane %v4625_v8, 1 }
 0x447   : > { %v11799_v13 = vadd.f32 %v3351_v16, %v3263_v37  ;;  %v3176_v57 = vadd.f32 %v3175_v47, %v3086_v18  ;;  %v4736_v17 = vsub.f32 %v11765_v6, %v4662_v35  ;;  %5208 = vperm.xlu1 %9062, %v5086_v36   ;;  %v4620_v37 = vmax.f32 %v4618_v56, %v4619_v61  ;;  %v8978_v6 = vld [vmem:[%s14134_s1 + $0x4cc] sm:$0xf]  ;;  %v8227_v18 = vld [vmem:[%s14134_s1 + $0x2d8] sm:$0xf0] }
 0x448   : > { %v8914_v16 = vld [vmem:[%s14134_s1 + $0x2cc] sm:$0xf]  ;;  %v8486_v35 = vor.u32 %v8978_v6, %v8483_v51  ;;  %v8611_v36 = vld [vmem:[%s14134_s1 + $0x5d8] sm:$0xf0]  ;;  %v11834_v25 = vadd.f32 %v11114_v4, %v11735_v33 }
 0x449   : > { %14778 = vst [vmem:[#allocation112_spill] sm:$0xff] %v11799_v13  ;;  %v4792_v22 = vmul.f32 1.442695, %v4736_v17  ;;  %v9010_v47 = vld [vmem:[%s14134_s1 + $0x5cc] sm:$0xf]  ;;  %v8230_v17 = vor.u32 %v8914_v16, %v8227_v18  ;;  %v4881_v18 = vrot.slane %v11809_v31, 2 }
 0x44a   : > { %v4435_v19 = vpop.xlane.xlu2 %4434  ;;  %v8614_v32 = vor.u32 %v9010_v47, %v8611_v36  ;;  %3921 = vmatpush.bf16.msrb.mxu2 %v8486_v35  ;;  %v4730_v47 = vsub.f32 %v11746_v39, %v4620_v37  ;;  %v4631_v36 = vrot.slane %v4630_v5, 2 }
 0x44b   : > { %9264 = vpow2.f32 %v4792_v22  ;;  %v11821_v10 = vadd.f32 %v11114_v4, %v4435_v19  ;;  %v8946_v22 = vld [vmem:[%s14134_s1 + $0x3cc] sm:$0xf]  ;;  %v8355_v19 = vld [vmem:[%s14134_s1 + $0x3d8] sm:$0xf0]  ;;  %3743 = vmatpush.bf16.msrb.mxu0 %v8230_v17 }
 0x44c   : > { %v3264_v0 = vpop.f32.mrf.mxu2  ;;  %4010 = vmatpush.bf16.msrb.mxu3 %v8614_v32  ;;  %v8358_v16 = vor.u32 %v8946_v22, %v8355_v19  ;;  %9266 = vpow2.f32 %v4774_v48  ;;  %v14783_v32 = vld [vmem:[#allocation11_spill] sm:$0xff] }
 0x44d   : > { %v3265_v56 = vadd.f32 %v3264_v0, %v3176_v57  ;;  %v3353_v27 = vpop.f32.mrf.mxu3  ;;  %v4692_v0 = vrot.slane %v4691_v12, 4  ;;  %v4663_v6 = vsel %vm4487_vm0, %v11821_v10, -inf  ;;  %v8974_v17 = vld [vmem:[%s14134_s1 + $0x4ac] sm:$0xf] }
 0x44e   : > { %v3089_v57 = vpop.f32.mrf.mxu0  ;;  %v3178_v61 = vpop.f32.mrf.mxu1  ;;  %v4664_v45 = vrot.slane %v4663_v6, 4  ;;  %3832 = vmatpush.bf16.msrb.mxu1 %v8358_v16  ;;  %v8910_v19 = vld [vmem:[%s14134_s1 + $0x2ac] sm:$0xf] }
 0x44f   : > { %v11844_v51 = vadd.f32 %v3353_v27, %v3265_v56  ;;  %v3179_v33 = vadd.f32 %v3178_v61, %v3089_v57  ;;  %v4893_v56 = vrot.slane %v11805_v50, 4  ;;  %v4627_v27 = vmax.f32 %v4625_v8, %v4626_v53  ;;  %v14782_v57 = vld [vmem:[#allocation10_spill] sm:$0xff] }
 0x450   : > { %3404 = vmatmul.bf16.gmra.mxu0 %v14780_v41  ;;  %3493 = vmatmul.bf16.gmra.mxu1 %v14781_v40  ;;  %v4665_v35 = vmax.f32 %v4663_v6, %v4664_v45  ;;  %v4649_v61 = vsel %vm4487_vm0, %v11834_v25, -inf  ;;  %v4693_v37 = vmax.f32 %v4691_v12, %v4692_v0  ;;  %v8467_v45 = vld [vmem:[%s14134_s1 + $0x4b8] sm:$0xf0]  ;;  %v4780_v0 = vmul.f32 1.442695, %v4730_v47 }
 0x451   : > { %14779 = vst [vmem:[#allocation70_spill] sm:$0xff] %v11844_v51  ;;  %v11850_v63 = vpop.eup %9264  ;;  %3582 = vmatmul.bf16.gmra.mxu2 %v14782_v57  ;;  %v8470_v22 = vor.u32 %v8974_v17, %v8467_v45  ;;  %v8211_v12 = vld [vmem:[%s14134_s1 + $0x2b8] sm:$0xf0]  ;;  %v4632_v6 = vmax.f32 %v4630_v5, %v4631_v36  ;;  %v9006_v40 = vld [vmem:[%s14134_s1 + $0x5ac] sm:$0xf]  ;;  %v4731_v45 = vsub.f32 %v11758_v11, %v4627_v27  ;;  %v4650_v47 = vrot.slane %v4649_v61, 4 }
 0x452   : > { %v4976_v39 = vsel %vm4487_vm0, %v11850_v63, 0.0  ;;  %3671 = vmatmul.bf16.gmra.mxu3 %v14783_v32  ;;  %v4666_v48 = vrot.slane %v4665_v35, 2  ;;  %v8214_v32 = vor.u32 %v8910_v19, %v8211_v12  ;;  %v8595_v17 = vld [vmem:[%s14134_s1 + $0x5b8] sm:$0xf0]  ;;  %v4694_v5 = vrot.slane %v4693_v37, 2 }
 0x453   : > { %v4977_v8 = vrot.slane %v4976_v39, 4  ;;  %3922 = vmatpush.bf16.msrb.mxu2 %v8470_v22  ;;  %v8598_v14 = vor.u32 %v9006_v40, %v8595_v17  ;;  %v8942_v11 = vld [vmem:[%s14134_s1 + $0x3ac] sm:$0xf]  ;;  %v8339_v40 = vld [vmem:[%s14134_s1 + $0x3b8] sm:$0xf0]  ;;  %v4894_v27 = vadd.f32 %v4893_v56, %v11805_v50  ;;  %9268 = vpow2.f32 %v4780_v0 }
 0x454   : > { %v3267_v53 = vpop.f32.mrf.mxu2  ;;  %v4667_v51 = vmax.f32 %v4665_v35, %v4666_v48  ;;  %3744 = vmatpush.bf16.msrb.mxu0 %v8214_v32  ;;  %v4633_v35 = vrot.slane %v4632_v6, 1  ;;  %v4782_v48 = vmul.f32 1.442695, %v4731_v45 }
 0x455   : > { %v3268_v16 = vadd.f32 %v3267_v53, %v3179_v33  ;;  %v3356_v57 = vpop.f32.mrf.mxu3  ;;  %v4978_v41 = vadd.f32 %v4977_v8, %v4976_v39  ;;  %v11880_v53 = vpop.eup %9266  ;;  %4011 = vmatpush.bf16.msrb.mxu3 %v8598_v14  ;;  %v4882_v39 = vadd.f32 %v4881_v18, %v11809_v31  ;;  %v8342_v8 = vor.u32 %v8942_v11, %v8339_v40  ;;  %v14788_v40 = vld [vmem:[#allocation14_spill] sm:$0xff] }
 0x456   : > { %v3091_v30 = vpop.f32.mrf.mxu0  ;;  %v3180_v36 = vpop.f32.mrf.mxu1  ;;  %v4668_v12 = vrot.slane %v4667_v51, 1  ;;  %v4913_v14 = vsel %vm4487_vm0, %v11880_v53, 0.0  ;;  %v4895_v56 = vrot.slane %v4894_v27, 2  ;;  %9270 = vpow2.f32 %v4782_v48 }
 0x457   : > { %v11878_v33 = vadd.f32 %v3356_v57, %v3268_v16  ;;  %v4979_v19 = vrot.slane %v4978_v41, 2  ;;  %v3181_v13 = vadd.f32 %v3180_v36, %v3091_v30  ;;  %v4651_v30 = vmax.f32 %v4649_v61, %v4650_v47  ;;  %3833 = vmatpush.bf16.msrb.mxu1 %v8342_v8 }
 0x458   : > { %v4669_v22 = vmax.f32 %v4667_v51, %v4668_v12  ;;  %v4695_v57 = vmax.f32 %v4693_v37, %v4694_v5  ;;  %v4634_v36 = vmax.f32 %v4632_v6, %v4633_v35  ;;  %v4883_v0 = vrot.slane %v4882_v39, 1  ;;  %v14786_v5 = vld [vmem:[#allocation73_spill] sm:$0xff]  ;;  %v14787_v6 = vld [vmem:[#allocation74_spill] sm:$0xff] }
 0x459   : > { %14784 = vst [vmem:[#allocation6_spill] sm:$0xff] %v11878_v33  ;;  %v4980_v16 = vadd.f32 %v4979_v19, %v4978_v41  ;;  %v4914_v45 = vrot.slane %v4913_v14, 4  ;;  %v4652_v12 = vrot.slane %v4651_v30, 2  ;;  %v11896_v47 = vpop.eup %9268  ;;  %v4896_v8 = vadd.f32 %v4895_v56, %v4894_v27 }
 0x45a   : > { %4449 = vadd.xlane.f32.xlu2 %v11454_v49  ;;  %v4737_v32 = vsub.f32 %v11821_v10, %v4669_v22  ;;  %v4696_v37 = vrot.slane %v4695_v57, 1  ;;  %v4884_v35 = vadd.f32 %v4883_v0, %v4882_v39  ;;  %v4934_v48 = vsel %vm4487_vm0, %v11896_v47, 0.0 }
 0x45b   : > { %v4981_v50 = vrot.slane %v4980_v16, 1  ;;  %v4915_v11 = vadd.f32 %v4914_v45, %v4913_v14  ;;  %v4653_v22 = vmax.f32 %v4651_v30, %v4652_v12  ;;  %v4935_v45 = vrot.slane %v4934_v48, 4 }
 0x45c   : > { %v3269_v17 = vpop.f32.mrf.mxu2  ;;  %v4794_v41 = vmul.f32 1.442695, %v4737_v32  ;;  %v11905_v32 = vpop.eup %9270  ;;  %v4897_v27 = vrot.slane %v4896_v8, 1 }
 0x45d   : > { %v3270_v31 = vadd.f32 %v3269_v17, %v3181_v13  ;;  %v3358_v18 = vpop.f32.mrf.mxu3  ;;  %v4982_v19 = vadd.f32 %v4981_v50, %v4980_v16  ;;  %v4732_v13 = vsub.f32 %v11783_v52, %v4634_v36  ;;  %v14789_v16 = vld [vmem:[#allocation15_spill] sm:$0xff]  ;;  %v4697_v17 = vmax.f32 %v4695_v57, %v4696_v37 }
 0x45e   : > { %v3094_v51 = vpop.f32.mrf.mxu0  ;;  %v3183_v49 = vpop.f32.mrf.mxu1  ;;  %9272 = vpow2.f32 %v4794_v41  ;;  %v4916_v14 = vrot.slane %v4915_v11, 2  ;;  %v4941_v30 = vsel %vm4487_vm0, %v11905_v32, 0.0  ;;  %v4654_v56 = vrot.slane %v4653_v22, 1 }
 0x45f   : > { %v11894_v61 = vadd.f32 %v3358_v18, %v3270_v31  ;;  %v3184_v10 = vadd.f32 %v3183_v49, %v3094_v51  ;;  %9274 = vrcp.f32 %v4982_v19  ;;  %v4784_v31 = vmul.f32 1.442695, %v4732_v13 }
 0x460   : > { %3409 = vmatmul.bf16.gmra.mxu0 %v14786_v5  ;;  %3498 = vmatmul.bf16.gmra.mxu1 %v14787_v6  ;;  %9276 = vrcp.f32 %v4884_v35  ;;  %v4741_v19 = vsub.f32 %v11797_v28, %v4697_v17  ;;  %v4898_v13 = vadd.f32 %v4897_v27, %v4896_v8  ;;  %v4942_v35 = vrot.slane %v4941_v30, 4 }
 0x461   : > { %14785 = vst [vmem:[#allocation113_spill] sm:$0xff] %v11894_v61  ;;  %3587 = vmatmul.bf16.gmra.mxu2 %v14788_v40  ;;  %9278 = vpow2.f32 %v4784_v31  ;;  %v4936_v40 = vadd.f32 %v4935_v45, %v4934_v48  ;;  %v4655_v6 = vmax.f32 %v4653_v22, %v4654_v56  ;;  %v14793_v56 = vld [vmem:[#allocation18_spill] sm:$0xff] }
 0x462   : > { %3676 = vmatmul.bf16.gmra.mxu3 %v14789_v16  ;;  %v4917_v16 = vadd.f32 %v4916_v14, %v4915_v11  ;;  %v4802_v5 = vmul.f32 1.442695, %v4741_v19  ;;  %9280 = vrcp.f32 %v4898_v13  ;;  %v4943_v31 = vadd.f32 %v4942_v35, %v4941_v30  ;;  %v14791_v14 = vld [vmem:[#allocation76_spill] sm:$0xff] }
 0x463   : > { %v4735_v11 = vsub.f32 %v11834_v25, %v4655_v6 }
 0x464   : > { %v3272_v50 = vpop.f32.mrf.mxu2  ;;  %v11907_v18 = vpop.eup %9272  ;;  %v4918_v48 = vrot.slane %v4917_v16, 1  ;;  %9282 = vpow2.f32 %v4802_v5  ;;  %v4944_v6 = vrot.slane %v4943_v31, 2 }
 0x465   : > { %v3273_v52 = vadd.f32 %v3272_v50, %v3184_v10  ;;  %v3361_v36 = vpop.f32.mrf.mxu3  ;;  %v9275_v39 = vpop.eup %9274  ;;  %v4983_v0 = vsel %vm4487_vm0, %v11907_v18, 0.0 }
 0x466   : > { %v3096_v41 = vpop.f32.mrf.mxu0  ;;  %v3185_v51 = vpop.f32.mrf.mxu1  ;;  %v4984_v12 = vrot.slane %v4983_v0, 4  ;;  %v5088_v37 = vmul.f32 %v9275_v39, %v11850_v63  ;;  %v4937_v63 = vrot.slane %v4936_v40, 2  ;;  %v14792_v39 = vld [vmem:[#allocation77_spill] sm:$0xff]  ;;  %v4919_v25 = vadd.f32 %v4918_v48, %v4917_v16 }
 0x467   : > { %v11913_v57 = vadd.f32 %v3361_v36, %v3273_v52  ;;  %v3186_v49 = vadd.f32 %v3185_v51, %v3096_v41  ;;  %v9277_v50 = vpop.eup %9276  ;;  %v4790_v51 = vmul.f32 1.442695, %v4735_v11  ;;  %v4945_v16 = vadd.f32 %v4944_v6, %v4943_v31 }
 0x468   : > { %v4985_v10 = vadd.f32 %v4984_v12, %v4983_v0  ;;  %5218 = vperm.xlu1 %9062, %v5088_v37   ;;  %v11917_v17 = vpop.eup %9278  ;;  %v5074_v27 = vmul.f32 %v9277_v50, %v11779_v24  ;;  %v11928_v0 = vpop.permute.xlu1 %5123 }
 0x469   : > { %14790 = vst [vmem:[#allocation115_spill] sm:$0xff] %v11913_v57  ;;  %v9281_v5 = vpop.eup %9280 }
 0x46a   : > { %v4986_v61 = vrot.slane %v4985_v10, 2  ;;  %14794 = vst [vmem:[#allocation114_spill] sm:$0xff] %v11928_v0 }
 0x46c   : > { %v3274_v52 = vpop.f32.mrf.mxu2  ;;  %v4987_v28 = vadd.f32 %v4986_v61, %v4985_v10  ;;  %v4948_v61 = vsel %vm4487_vm0, %v11917_v17, 0.0 }
 0x46d   : > { %v3275_v36 = vadd.f32 %v3274_v52, %v3186_v49  ;;  %v3363_v57 = vpop.f32.mrf.mxu3  ;;  %v4949_v24 = vrot.slane %v4948_v61, 4  ;;  %v11931_v49 = vpop.eup %9282 }
 0x46e   : > { %v3099_v33 = vpop.f32.mrf.mxu0  ;;  %v3188_v8 = vpop.f32.mrf.mxu1  ;;  %v4988_v45 = vrot.slane %v4987_v28, 1 }
 0x46f   : > { %v11919_v41 = vadd.f32 %v3363_v57, %v3275_v36  ;;  %v3189_v22 = vadd.f32 %v3188_v8, %v3099_v33  ;;  %v14795_v57 = vld [vmem:[#allocation19_spill] sm:$0xff]  ;;  %v4938_v33 = vadd.f32 %v4937_v63, %v4936_v40  ;;  %v4950_v40 = vadd.f32 %v4949_v24, %v4948_v61 }
 0x470   : > { %3414 = vmatmul.bf16.gmra.mxu0 %v14791_v14  ;;  %3503 = vmatmul.bf16.gmra.mxu1 %v14792_v39  ;;  %v4989_v30 = vadd.f32 %v4988_v45, %v4987_v28  ;;  %v5011_v36 = vsel %vm4487_vm0, %v11931_v49, 0.0  ;;  %v5076_v28 = vmul.f32 %v9281_v5, %v11794_v58 }
 0x471   : > { %3592 = vmatmul.bf16.gmra.mxu2 %v14793_v56  ;;  %v4939_v35 = vrot.slane %v4938_v33, 1 }
 0x472   : > { %5148 = vperm.xlu2 %9061, %v5074_v27   ;;  %3681 = vmatmul.bf16.gmra.mxu3 %v14795_v57  ;;  %9284 = vrcp.f32 %v4989_v30  ;;  %v4946_v27 = vrot.slane %v4945_v16, 1  ;;  %v4951_v30 = vrot.slane %v4950_v40, 2 }
 0x473   : > { %9286 = vrcp.f32 %v4919_v25  ;;  %v4940_v11 = vadd.f32 %v4939_v35, %v4938_v33  ;;  %v14797_v35 = vld [vmem:[#allocation79_spill] sm:$0xff] }
 0x474   : > { %v3277_v19 = vpop.f32.mrf.mxu2  ;;  %9288 = vpow2.f32 %v4790_v51 }
 0x475   : > { %v3366_v12 = vpop.f32.mrf.mxu3  ;;  %v3278_v37 = vadd.f32 %v3277_v19, %v3189_v22  ;;  %v5012_v22 = vrot.slane %v5011_v36, 4  ;;  %9290 = vrcp.f32 %v4940_v11  ;;  %v14796_v19 = vld [vmem:[#allocation78_spill] sm:$0xff] }
 0x476   : > { %v3101_v10 = vpop.f32.mrf.mxu0  ;;  %v3190_v13 = vpop.f32.mrf.mxu1 }
 0x477   : > { %v11933_v50 = vadd.f32 %v3366_v12, %v3278_v37  ;;  %v3191_v52 = vadd.f32 %v3190_v13, %v3101_v10  ;;  %v4947_v12 = vadd.f32 %v4946_v27, %v4945_v16 }
 0x478   : > { %v9285_v63 = vpop.eup %9284 }
 0x479   : > { %v4438_v8 = vpop.xlane.xlu1 %4437  ;;  %v5089_v48 = vmul.f32 %v9285_v63, %v11907_v18  ;;  %v9287_v56 = vpop.eup %9286  ;;  %v5013_v18 = vadd.f32 %v5012_v22, %v5011_v36  ;;  %v14799_v36 = vld [vmem:[#allocation23_spill] sm:$0xff]  ;;  %9292 = vrcp.f32 %v4947_v12 }
 0x47a   : > { %5158 = vperm.xlu2 %9061, %v5076_v28   ;;  %v4481_v45 = vadd.f32 %v11114_v4, %v4438_v8  ;;  %v11940_v57 = vpop.eup %9288  ;;  %v5079_v13 = vmul.f32 %v9287_v56, %v11880_v53  ;;  %v14798_v28 = vld [vmem:[#allocation22_spill] sm:$0xff]  ;;  %v11952_v22 = vpop.permute.xlu2 %5128 }
 0x47b   : > { %5223 = vperm.xlu0 %9063, %v5089_v48   ;;  %v4969_v37 = vsel %vm4487_vm0, %v11940_v57, 0.0  ;;  %v5014_v11 = vrot.slane %v5013_v18, 2  ;;  %14800 = vst [vmem:[#allocation116_spill] sm:$0xff] %v11952_v22  ;;  %v9291_v27 = vpop.eup %9290 }
 0x47c   : > { %v3279_v31 = vpop.f32.mrf.mxu2  ;;  %v4670_v25 = vsel %vm4487_vm0, %v4481_v45, -inf  ;;  %v4970_v48 = vrot.slane %v4969_v37, 4 }
 0x47d   : > { %v3368_v61 = vpop.f32.mrf.mxu3  ;;  %v3280_v58 = vadd.f32 %v3279_v31, %v3191_v52  ;;  %v4671_v6 = vrot.slane %v4670_v25, 4  ;;  %v4952_v52 = vadd.f32 %v4951_v30, %v4950_v40 }
 0x47e   : > { %v3104_v5 = vpop.f32.mrf.mxu0  ;;  %v3193_v51 = vpop.f32.mrf.mxu1 }
 0x47f   : > { %v11943_v33 = vadd.f32 %v3368_v61, %v3280_v58  ;;  %v3194_v24 = vadd.f32 %v3193_v51, %v3104_v5  ;;  %v4672_v10 = vmax.f32 %v4670_v25, %v4671_v6  ;;  %v4953_v40 = vrot.slane %v4952_v52, 1  ;;  %v9293_v22 = vpop.eup %9292 }
 0x480   : > { %3419 = vmatmul.bf16.gmra.mxu0 %v14796_v19  ;;  %3508 = vmatmul.bf16.gmra.mxu1 %v14797_v35  ;;  %v11959_v51 = vadd.f32 %v4970_v48, %v4969_v37 }
 0x481   : > { %3597 = vmatmul.bf16.gmra.mxu2 %v14798_v28  ;;  %v4673_v63 = vrot.slane %v4672_v10, 2  ;;  %v4444_v8 = vpop.xlane.xlu1 %4443 }
 0x482   : > { %5173 = vperm.xlu2 %9061, %v5079_v13   ;;  %3686 = vmatmul.bf16.gmra.mxu3 %v14799_v36  ;;  %v11955_v16 = vadd.f32 %v11114_v4, %v4444_v8  ;;  %v5015_v36 = vadd.f32 %v5014_v11, %v5013_v18  ;;  %v5083_v11 = vmul.f32 %v9293_v22, %v11905_v32  ;;  %v8906_v32 = vld [vmem:[%s14134_s1 + $0x28c] sm:$0xf]  ;;  %v8195_v22 = vld [vmem:[%s14134_s1 + $0x298] sm:$0xf0] }
 0x483   : > { %v4674_v53 = vmax.f32 %v4672_v10, %v4673_v63  ;;  %v5082_v10 = vmul.f32 %v9291_v27, %v11896_v47  ;;  %v4954_v63 = vadd.f32 %v4953_v40, %v4952_v52  ;;  %v8970_v47 = vld [vmem:[%s14134_s1 + $0x48c] sm:$0xf] }
 0x484   : > { %v3282_v56 = vpop.f32.mrf.mxu2  ;;  %v4684_v30 = vsel %vm4487_vm0, %v11955_v16, -inf  ;;  %v5016_v37 = vrot.slane %v5015_v36, 1 }
 0x485   : > { %v3371_v31 = vpop.f32.mrf.mxu3  ;;  %v3283_v61 = vadd.f32 %v3282_v56, %v3194_v24  ;;  %v4675_v58 = vrot.slane %v4674_v53, 1  ;;  %v4685_v5 = vrot.slane %v4684_v30, 4  ;;  %v4972_v56 = vrot.slane %v11959_v51, 2 }
 0x486   : > { %v3106_v25 = vpop.f32.mrf.mxu0  ;;  %v3195_v6 = vpop.f32.mrf.mxu1  ;;  %9294 = vrcp.f32 %v4954_v63  ;;  %v14801_v63 = vld [vmem:[#allocation82_spill] sm:$0xff] }
 0x487   : > { %v11961_v13 = vadd.f32 %v3371_v31, %v3283_v61  ;;  %v3196_v28 = vadd.f32 %v3195_v6, %v3106_v25  ;;  %v4676_v12 = vmax.f32 %v4674_v53, %v4675_v58  ;;  %v4686_v8 = vmax.f32 %v4684_v30, %v4685_v5  ;;  %v9002_v6 = vld [vmem:[%s14134_s1 + $0x58c] sm:$0xf] }
 0x488   : > { %v8198_v5 = vor.u32 %v8906_v32, %v8195_v22  ;;  %v14802_v32 = vld [vmem:[#allocation83_spill] sm:$0xff] }
 0x489   : > { %v4738_v0 = vsub.f32 %v4481_v45, %v4676_v12  ;;  %v4687_v35 = vrot.slane %v4686_v8, 2  ;;  %v4453_v24 = vpop.xlane.xlu1 %4452  ;;  %v8451_v45 = vld [vmem:[%s14134_s1 + $0x498] sm:$0xf0] }
 0x48a   : > { %5188 = vperm.xlu2 %9061, %v5082_v10   ;;  %v11966_v19 = vadd.f32 %v11114_v4, %v4453_v24  ;;  %v8454_v40 = vor.u32 %v8970_v47, %v8451_v45  ;;  %3745 = vmatpush.bf16.msrb.mxu0 %v8198_v5 }
 0x48b   : > { %v4796_v48 = vmul.f32 1.442695, %v4738_v0  ;;  %v4688_v31 = vmax.f32 %v4686_v8, %v4687_v35  ;;  %v4441_v61 = vpop.xlane.xlu2 %4440 }
 0x48c   : > { %v3284_v18 = vpop.f32.mrf.mxu2  ;;  %v4705_v52 = vsel %vm4487_vm0, %v11966_v19, -inf  ;;  %v11978_v27 = vadd.f32 %v11114_v4, %v4441_v61  ;;  %3923 = vmatpush.bf16.msrb.mxu2 %v8454_v40  ;;  %v8323_v61 = vld [vmem:[%s14134_s1 + $0x398] sm:$0xf0] }
 0x48d   : > { %v3285_v0 = vadd.f32 %v3284_v18, %v3196_v28  ;;  %v3373_v35 = vpop.f32.mrf.mxu3  ;;  %9296 = vpow2.f32 %v4796_v48  ;;  %v4689_v30 = vrot.slane %v4688_v31, 1  ;;  %v4706_v25 = vrot.slane %v4705_v52, 4  ;;  %v8579_v28 = vld [vmem:[%s14134_s1 + $0x598] sm:$0xf0]  ;;  %v8938_v48 = vld [vmem:[%s14134_s1 + $0x38c] sm:$0xf] }
 0x48e   : > { %v3109_v53 = vpop.f32.mrf.mxu0  ;;  %v3198_v58 = vpop.f32.mrf.mxu1  ;;  %v4677_v12 = vsel %vm4487_vm0, %v11978_v27, -inf  ;;  %v8582_v24 = vor.u32 %v9002_v6, %v8579_v28  ;;  %v14804_v6 = vld [vmem:[#allocation27_spill] sm:$0xff]  ;;  %v5017_v28 = vadd.f32 %v5016_v37, %v5015_v36 }
 0x48f   : > { %v11994_v8 = vadd.f32 %v3373_v35, %v3285_v0  ;;  %v3199_v10 = vadd.f32 %v3198_v58, %v3109_v53  ;;  %v4690_v18 = vmax.f32 %v4688_v31, %v4689_v30  ;;  %v4707_v47 = vmax.f32 %v4705_v52, %v4706_v25  ;;  %v14803_v35 = vld [vmem:[#allocation26_spill] sm:$0xff]  ;;  %v9295_v53 = vpop.eup %9294 }
 0x490   : > { %3424 = vmatmul.bf16.gmra.mxu0 %v14801_v63  ;;  %v4678_v45 = vrot.slane %v4677_v12, 4  ;;  %3513 = vmatmul.bf16.gmra.mxu1 %v14802_v32  ;;  %v8326_v0 = vor.u32 %v8938_v48, %v8323_v61  ;;  %v4973_v31 = vadd.f32 %v4972_v56, %v11959_v51 }
 0x491   : > { %3602 = vmatmul.bf16.gmra.mxu2 %v14803_v35  ;;  %4012 = vmatpush.bf16.msrb.mxu3 %v8582_v24  ;;  %v4740_v40 = vsub.f32 %v11955_v16, %v4690_v18  ;;  %v4708_v22 = vrot.slane %v4707_v47, 2 }
 0x492   : > { %v4679_v58 = vmax.f32 %v4677_v12, %v4678_v45  ;;  %5193 = vperm.xlu2 %9061, %v5083_v11   ;;  %3691 = vmatmul.bf16.gmra.mxu3 %v14804_v6  ;;  %v4974_v56 = vrot.slane %v4973_v31, 1 }
 0x493   : > { %3834 = vmatpush.bf16.msrb.mxu1 %v8326_v0  ;;  %v12008_v52 = vpop.eup %9296  ;;  %v4800_v30 = vmul.f32 1.442695, %v4740_v40  ;;  %v4709_v25 = vmax.f32 %v4707_v47, %v4708_v22  ;;  %v5084_v40 = vmul.f32 %v9295_v53, %v11917_v17 }
 0x494   : > { %v4680_v5 = vrot.slane %v4679_v58, 2  ;;  %v3287_v48 = vpop.f32.mrf.mxu2  ;;  %v4990_v24 = vsel %vm4487_vm0, %v12008_v52, 0.0 }
 0x495   : > { %v3288_v61 = vadd.f32 %v3287_v48, %v3199_v10  ;;  %v3376_v16 = vpop.f32.mrf.mxu3  ;;  %v4991_v12 = vrot.slane %v4990_v24, 4  ;;  %9298 = vpow2.f32 %v4800_v30  ;;  %v4710_v11 = vrot.slane %v4709_v25, 1 }
 0x496   : > { %v3111_v18 = vpop.f32.mrf.mxu0  ;;  %v4681_v45 = vmax.f32 %v4679_v58, %v4680_v5  ;;  %v3200_v0 = vpop.f32.mrf.mxu1  ;;  %9300 = vrcp.f32 %v5017_v28  ;;  %v4975_v48 = vadd.f32 %v4974_v56, %v4973_v31 }
 0x497   : > { %v12012_v36 = vadd.f32 %v3376_v16, %v3288_v61  ;;  %v3201_v51 = vadd.f32 %v3200_v0, %v3111_v18  ;;  %v4992_v37 = vadd.f32 %v4991_v12, %v4990_v24  ;;  %v4711_v47 = vmax.f32 %v4709_v25, %v4710_v11  ;;  %v14805_v0 = vld [vmem:[#allocation85_spill] sm:$0xff] }
 0x498   : > { %v4682_v35 = vrot.slane %v4681_v45, 1 }
 0x499   : > { %v4993_v22 = vrot.slane %v4992_v37, 2  ;;  %v4743_v10 = vsub.f32 %v11966_v19, %v4711_v47 }
 0x49a   : > { %v4683_v6 = vmax.f32 %v4681_v45, %v4682_v35  ;;  %5198 = vperm.xlu2 %9061, %v5084_v40   ;;  %v8966_v35 = vld [vmem:[%s14134_s1 + $0x46c] sm:$0xf]  ;;  %v8435_v40 = vld [vmem:[%s14134_s1 + $0x478] sm:$0xf0] }
 0x49b   : > { %v12016_v30 = vpop.eup %9298  ;;  %v4806_v58 = vmul.f32 1.442695, %v4743_v10  ;;  %v4994_v16 = vadd.f32 %v4993_v22, %v4992_v37  ;;  %v14806_v37 = vld [vmem:[#allocation86_spill] sm:$0xff]  ;;  %v8438_v10 = vor.u32 %v8966_v35, %v8435_v40 }
 0x49c   : > { %v4739_v5 = vsub.f32 %v11978_v27, %v4683_v6  ;;  %v3289_v61 = vpop.f32.mrf.mxu2  ;;  %v9301_v28 = vpop.eup %9300  ;;  %v5004_v25 = vsel %vm4487_vm0, %v12016_v30, 0.0 }
 0x49d   : > { %v3290_v24 = vadd.f32 %v3289_v61, %v3201_v51  ;;  %v3378_v18 = vpop.f32.mrf.mxu3  ;;  %v5005_v53 = vrot.slane %v5004_v25, 4  ;;  %9302 = vpow2.f32 %v4806_v58  ;;  %v4995_v11 = vrot.slane %v4994_v16, 1  ;;  %v8563_v58 = vld [vmem:[%s14134_s1 + $0x578] sm:$0xf0]  ;;  %3924 = vmatpush.bf16.msrb.mxu2 %v8438_v10 }
 0x49e   : > { %v3114_v17 = vpop.f32.mrf.mxu0  ;;  %v4798_v19 = vmul.f32 1.442695, %v4739_v5  ;;  %v3203_v12 = vpop.f32.mrf.mxu1  ;;  %9304 = vrcp.f32 %v4975_v48  ;;  %v5093_v56 = vmul.f32 %v9301_v28, %v11931_v49  ;;  %v8902_v49 = vld [vmem:[%s14134_s1 + $0x26c] sm:$0xf] }
 0x49f   : > { %v12021_v31 = vadd.f32 %v3378_v18, %v3290_v24  ;;  %v3204_v45 = vadd.f32 %v3203_v12, %v3114_v17  ;;  %v5006_v27 = vadd.f32 %v5005_v53, %v5004_v25  ;;  %v4996_v51 = vadd.f32 %v4995_v11, %v4994_v16  ;;  %v8998_v48 = vld [vmem:[%s14134_s1 + $0x56c] sm:$0xf]  ;;  %v8307_v53 = vld [vmem:[%s14134_s1 + $0x378] sm:$0xf0] }
 0x4a0   : > { %3429 = vmatmul.bf16.gmra.mxu0 %v14805_v0  ;;  %9306 = vpow2.f32 %v4798_v19  ;;  %3518 = vmatmul.bf16.gmra.mxu1 %v14806_v37  ;;  %v8566_v18 = vor.u32 %v8998_v48, %v8563_v58  ;;  %v8934_v17 = vld [vmem:[%s14134_s1 + $0x36c] sm:$0xf] }
 0x4a1   : > { %3607 = vmatmul.bf16.gmra.mxu2 %v14737_v43  ;;  %v5007_v47 = vrot.slane %v5006_v27, 2  ;;  %9308 = vrcp.f32 %v4996_v51 }
 0x4a2   : > { %5243 = vperm.xlu2 %9061, %v5093_v56   ;;  %3696 = vmatmul.bf16.gmra.mxu3 %v14738_v34  ;;  %v8179_v34 = vld [vmem:[%s14134_s1 + $0x278] sm:$0xf0]  ;;  %v8310_v56 = vor.u32 %v8934_v17, %v8307_v53 }
 0x4a3   : > { %v12037_v22 = vpop.eup %9302  ;;  %v5008_v6 = vadd.f32 %v5007_v47, %v5006_v27  ;;  %v8182_v24 = vor.u32 %v8902_v49, %v8179_v34  ;;  %4013 = vmatpush.bf16.msrb.mxu3 %v8566_v18 }
 0x4a4   : > { %v3292_v43 = vpop.f32.mrf.mxu2  ;;  %v9305_v5 = vpop.eup %9304  ;;  %v5025_v61 = vsel %vm4487_vm0, %v12037_v22, 0.0  ;;  %3835 = vmatpush.bf16.msrb.mxu1 %v8310_v56 }
 0x4a5   : > { %v3293_v16 = vadd.f32 %v3292_v43, %v3204_v45  ;;  %v3381_v28 = vpop.f32.mrf.mxu3  ;;  %v5026_v12 = vrot.slane %v5025_v61, 4  ;;  %v5009_v27 = vrot.slane %v5008_v6, 1  ;;  %3746 = vmatpush.bf16.msrb.mxu0 %v8182_v24  ;;  %v5087_v43 = vmul.f32 %v9305_v5, %v11940_v57  ;;  %v14808_v5 = vld [vmem:[#allocation88_spill] sm:$0xff] }
 0x4a6   : > { %v3116_v25 = vpop.f32.mrf.mxu0  ;;  %v9307_v19 = vpop.eup %9306 }
 0x4a7   : > { %v3205_v11 = vpop.f32.mrf.mxu1  ;;  %v4997_v45 = vsel %vm4487_vm0, %v9307_v19, 0.0  ;;  %v12057_v51 = vadd.f32 %v3381_v28, %v3293_v16  ;;  %v9309_v35 = vpop.eup %9308  ;;  %v5027_v40 = vadd.f32 %v5026_v12, %v5025_v61  ;;  %v5010_v34 = vadd.f32 %v5009_v27, %v5008_v6  ;;  %v14807_v6 = vld [vmem:[#allocation87_spill] sm:$0xff] }
 0x4a8   : > { %v3206_v47 = vadd.f32 %v3205_v11, %v3116_v25  ;;  %v4998_v49 = vrot.slane %v4997_v45, 4  ;;  %v5090_v48 = vmul.f32 %v9309_v35, %v12008_v52 }
 0x4a9   : > { %v5028_v58 = vrot.slane %v5027_v40, 2  ;;  %9310 = vrcp.f32 %v5010_v34 }
 0x4aa   : > { %v4999_v10 = vadd.f32 %v4998_v49, %v4997_v45  ;;  %5213 = vperm.xlu2 %9061, %v5087_v43   ;;  %5228 = vperm.xlu1 %9062, %v5090_v48  }
 0x4ab   : > { %v5029_v28 = vadd.f32 %v5028_v58, %v5027_v40 }
 0x4ac   : > { %v5000_v17 = vrot.slane %v4999_v10, 2  ;;  %v3294_v16 = vpop.f32.mrf.mxu2 }
 0x4ad   : > { %v3295_v25 = vadd.f32 %v3294_v16, %v3206_v47  ;;  %v3383_v24 = vpop.f32.mrf.mxu3  ;;  %v5030_v61 = vrot.slane %v5029_v28, 1 }
 0x4ae   : > { %v3395_v18 = vpop.f32.mrf.mxu0  ;;  %v5001_v12 = vadd.f32 %v5000_v17, %v4999_v10 }
 0x4af   : > { %v3484_v53 = vpop.f32.mrf.mxu1  ;;  %v12061_v11 = vadd.f32 %v3383_v24, %v3295_v25  ;;  %v3396_v57 = vadd.f32 %v3395_v18, %v11448_v62  ;;  %v9311_v52 = vpop.eup %9310  ;;  %v5031_v27 = vadd.f32 %v5030_v61, %v5029_v28 }
 0x4b0   : > { %3434 = vmatmul.bf16.gmra.mxu0 %v14807_v6  ;;  %3523 = vmatmul.bf16.gmra.mxu1 %v14808_v5  ;;  %v5002_v56 = vrot.slane %v5001_v12, 1  ;;  %v5092_v47 = vmul.f32 %v9311_v52, %v12016_v30 }
 0x4b1   : > { %v12066_v45 = vadd.f32 %v3484_v53, %v3396_v57  ;;  %3612 = vmatmul.bf16.gmra.mxu2 %v14744_v9  ;;  %9312 = vrcp.f32 %v5031_v27  ;;  %v14809_v53 = vld [vmem:[#allocation91_spill] sm:$0xff] }
 0x4b2   : > { %3701 = vmatmul.bf16.gmra.mxu3 %v14745_v3  ;;  %v5003_v35 = vadd.f32 %v5002_v56, %v5001_v12  ;;  %5238 = vperm.xlu1 %9062, %v5092_v47   ;;  %v12086_v12 = vpop.permute.xlu2 %5138 }
 0x4b3   : > { %14812 = vst [vmem:[#allocation75_spill] sm:$0xff] %v12086_v12 }
 0x4b4   : > { %v3573_v40 = vpop.f32.mrf.mxu2  ;;  %9314 = vrcp.f32 %v5003_v35 }
 0x4b5   : > { %v3662_v62 = vpop.f32.mrf.mxu3 }
 0x4b6   : > { %v12071_v49 = vadd.f32 %v3662_v62, %v3573_v40  ;;  %v3397_v43 = vpop.f32.mrf.mxu0 }
 0x4b7   : > { %v3486_v34 = vpop.f32.mrf.mxu1  ;;  %v3398_v48 = vadd.f32 %v3397_v43, %v11462_v55  ;;  %v9313_v58 = vpop.eup %9312  ;;  %v14810_v55 = vld [vmem:[#allocation92_spill] sm:$0xff] }
 0x4b8   : > { %v5095_v9 = vmul.f32 %v9313_v58, %v12037_v22  ;;  %v14811_v22 = vld [vmem:[#allocation39_spill] sm:$0xff] }
 0x4b9   : > { %v12074_v10 = vadd.f32 %v3486_v34, %v3398_v48 }
 0x4ba   : > { %v9315_v30 = vpop.eup %9314  ;;  %5253 = vperm.xlu1 %9062, %v5095_v9   ;;  %v8419_v9 = vld [vmem:[%s14134_s1 + $0x458] sm:$0xf0] }
 0x4bb   : > { %v5091_v3 = vmul.f32 %v9315_v30, %v9307_v19  ;;  %v8163_v30 = vld [vmem:[%s14134_s1 + $0x258] sm:$0xf0] }
 0x4bc   : > { %v3575_v17 = vpop.f32.mrf.mxu2 }
 0x4bd   : > { %5233 = vperm.xlu0 %9063, %v5091_v3   ;;  %v3664_v16 = vpop.f32.mrf.mxu3 }
 0x4be   : > { %v12077_v28 = vadd.f32 %v3664_v16, %v3575_v17  ;;  %v3400_v25 = vpop.f32.mrf.mxu0  ;;  %v14813_v17 = vld [vmem:[#allocation93_spill] sm:$0xff]  ;;  %v8994_v16 = vld [vmem:[%s14134_s1 + $0x54c] sm:$0xf] }
 0x4bf   : > { %v3489_v24 = vpop.f32.mrf.mxu1  ;;  %v3401_v18 = vadd.f32 %v3400_v25, %v11477_v38  ;;  %v8547_v25 = vld [vmem:[%s14134_s1 + $0x558] sm:$0xf0] }
 0x4c0   : > { %3439 = vmatmul.bf16.gmra.mxu0 %v14809_v53  ;;  %3528 = vmatmul.bf16.gmra.mxu1 %v14810_v55 }
 0x4c1   : > { %v12082_v61 = vadd.f32 %v3489_v24, %v3401_v18  ;;  %3617 = vmatmul.bf16.gmra.mxu2 %v14748_v15  ;;  %v8962_v15 = vld [vmem:[%s14134_s1 + $0x44c] sm:$0xf] }
 0x4c2   : > { %3706 = vmatmul.bf16.gmra.mxu3 %v14811_v22  ;;  %v8930_v24 = vld [vmem:[%s14134_s1 + $0x34c] sm:$0xf]  ;;  %v14814_v22 = vld [vmem:[#allocation94_spill] sm:$0xff] }
 0x4c4   : > { %v3578_v19 = vpop.f32.mrf.mxu2 }
 0x4c5   : > { %v3667_v57 = vpop.f32.mrf.mxu3 }
 0x4c6   : > { %v12088_v52 = vadd.f32 %v3667_v57, %v3578_v19  ;;  %v3402_v27 = vpop.f32.mrf.mxu0  ;;  %v8550_v19 = vor.u32 %v8994_v16, %v8547_v25  ;;  %v8291_v57 = vld [vmem:[%s14134_s1 + $0x358] sm:$0xf0] }
 0x4c7   : > { %v3491_v56 = vpop.f32.mrf.mxu1  ;;  %v3403_v38 = vadd.f32 %v3402_v27, %v11501_v1  ;;  %v8898_v1 = vld [vmem:[%s14134_s1 + $0x24c] sm:$0xf] }
 0x4c8   : > { %4014 = vmatpush.bf16.msrb.mxu3 %v8550_v19 }
 0x4c9   : > { %v12091_v47 = vadd.f32 %v3491_v56, %v3403_v38  ;;  %v8294_v38 = vor.u32 %v8930_v24, %v8291_v57 }
 0x4cb   : > { %3836 = vmatpush.bf16.msrb.mxu1 %v8294_v38  ;;  %v14816_v38 = vld [vmem:[#allocation98_spill] sm:$0xff] }
 0x4cc   : > { %v3580_v35 = vpop.f32.mrf.mxu2 }
 0x4cd   : > { %v4450_v40 = vpop.xlane.xlu2 %4449  ;;  %v3669_v62 = vpop.f32.mrf.mxu3 }
 0x4ce   : > { %v4485_v43 = vadd.f32 %v11114_v4, %v4450_v40  ;;  %v12097_v34 = vadd.f32 %v3669_v62, %v3580_v35  ;;  %v3405_v48 = vpop.f32.mrf.mxu0  ;;  %v8422_v4 = vor.u32 %v8962_v15, %v8419_v9 }
 0x4cf   : > { %v3494_v58 = vpop.f32.mrf.mxu1  ;;  %v3406_v3 = vadd.f32 %v3405_v48, %v11522_v60  ;;  %v8166_v60 = vor.u32 %v8898_v1, %v8163_v30 }
 0x4d0   : > { %3444 = vmatmul.bf16.gmra.mxu0 %v14813_v17  ;;  %v4698_v18 = vsel %vm4487_vm0, %v4485_v43, -inf  ;;  %3533 = vmatmul.bf16.gmra.mxu1 %v14814_v22 }
 0x4d1   : > { %v4699_v27 = vrot.slane %v4698_v18, 4  ;;  %v12124_v56 = vadd.f32 %v3494_v58, %v3406_v3  ;;  %3622 = vmatmul.bf16.gmra.mxu2 %v14750_v23  ;;  %3747 = vmatpush.bf16.msrb.mxu0 %v8166_v60 }
 0x4d2   : > { %3711 = vmatmul.bf16.gmra.mxu3 %v14751_v7  ;;  %3925 = vmatpush.bf16.msrb.mxu2 %v8422_v4 }
 0x4d3   : > { %v4700_v35 = vmax.f32 %v4698_v18, %v4699_v27  ;;  %v14815_v27 = vld [vmem:[#allocation97_spill] sm:$0xff] }
 0x4d4   : > { %v3583_v40 = vpop.f32.mrf.mxu2 }
 0x4d5   : > { %v4701_v62 = vrot.slane %v4700_v35, 2  ;;  %v3672_v15 = vpop.f32.mrf.mxu3 }
 0x4d6   : > { %v12128_v48 = vadd.f32 %v3672_v15, %v3583_v40  ;;  %v3407_v9 = vpop.f32.mrf.mxu0  ;;  %v14818_v40 = vld [vmem:[#allocation47_spill] sm:$0xff] }
 0x4d7   : > { %v3496_v1 = vpop.f32.mrf.mxu1  ;;  %v4702_v30 = vmax.f32 %v4700_v35, %v4701_v62  ;;  %v3408_v58 = vadd.f32 %v3407_v9, %v11533_v46  ;;  %v14817_v35 = vld [vmem:[#allocation46_spill] sm:$0xff]  ;;  %v8403_v62 = vld [vmem:[%s14134_s1 + $0x438] sm:$0xf0]  ;;  %v8894_v9 = vld [vmem:[%s14134_s1 + $0x22c] sm:$0xf] }
 0x4d9   : > { %v4703_v3 = vrot.slane %v4702_v30, 1  ;;  %v12131_v23 = vadd.f32 %v3496_v1, %v3408_v58  ;;  %v8147_v1 = vld [vmem:[%s14134_s1 + $0x238] sm:$0xf0] }
 0x4db   : > { %v4704_v7 = vmax.f32 %v4702_v30, %v4703_v3  ;;  %v8990_v30 = vld [vmem:[%s14134_s1 + $0x52c] sm:$0xf]  ;;  %v8150_v3 = vor.u32 %v8894_v9, %v8147_v1 }
 0x4dc   : > { %v3585_v4 = vpop.f32.mrf.mxu2 }
 0x4dd   : > { %v4742_v16 = vsub.f32 %v4485_v43, %v4704_v7  ;;  %v3674_v25 = vpop.f32.mrf.mxu3  ;;  %v8958_v43 = vld [vmem:[%s14134_s1 + $0x42c] sm:$0xf]  ;;  %v8531_v7 = vld [vmem:[%s14134_s1 + $0x538] sm:$0xf0]  ;;  %3748 = vmatpush.bf16.msrb.mxu0 %v8150_v3 }
 0x4de   : > { %v12133_v24 = vadd.f32 %v3674_v25, %v3585_v4  ;;  %v3410_v18 = vpop.f32.mrf.mxu0  ;;  %v8406_v15 = vor.u32 %v8958_v43, %v8403_v62 }
 0x4df   : > { %v3499_v60 = vpop.f32.mrf.mxu1  ;;  %v4804_v19 = vmul.f32 1.442695, %v4742_v16  ;;  %v3411_v57 = vadd.f32 %v3410_v18, %v11545_v21  ;;  %v8534_v18 = vor.u32 %v8990_v30, %v8531_v7 }
 0x4e0   : > { %3449 = vmatmul.bf16.gmra.mxu0 %v14815_v27  ;;  %3538 = vmatmul.bf16.gmra.mxu1 %v14816_v38 }
 0x4e1   : > { %9316 = vpow2.f32 %v4804_v19  ;;  %v12138_v46 = vadd.f32 %v3499_v60, %v3411_v57  ;;  %3627 = vmatmul.bf16.gmra.mxu2 %v14817_v35  ;;  %v8926_v60 = vld [vmem:[%s14134_s1 + $0x32c] sm:$0xf]  ;;  %v8275_v19 = vld [vmem:[%s14134_s1 + $0x338] sm:$0xf0]  ;;  %4015 = vmatpush.bf16.msrb.mxu3 %v8534_v18 }
 0x4e2   : > { %3716 = vmatmul.bf16.gmra.mxu3 %v14818_v40  ;;  %3926 = vmatpush.bf16.msrb.mxu2 %v8406_v15  ;;  %v8278_v40 = vor.u32 %v8926_v60, %v8275_v19  ;;  %v14823_v19 = vld [vmem:[#allocation51_spill] sm:$0xff] }
 0x4e4   : > { %v3588_v21 = vpop.f32.mrf.mxu2  ;;  %3837 = vmatpush.bf16.msrb.mxu1 %v8278_v40 }
 0x4e5   : > { %v3677_v58 = vpop.f32.mrf.mxu3 }
 0x4e6   : > { %v12160_v4 = vadd.f32 %v3677_v58, %v3588_v21  ;;  %v3412_v16 = vpop.f32.mrf.mxu0 }
 0x4e7   : > { %v3501_v25 = vpop.f32.mrf.mxu1  ;;  %v9317_v57 = vpop.eup %9316  ;;  %v3413_v35 = vadd.f32 %v3412_v16, %v11568_v20  ;;  %v14819_v20 = vld [vmem:[#allocation99_spill] sm:$0xff]  ;;  %v14820_v16 = vld [vmem:[#allocation100_spill] sm:$0xff] }
 0x4e8   : > { %v5018_v43 = vsel %vm4487_vm0, %v9317_v57, 0.0 }
 0x4e9   : > { %v5019_v62 = vrot.slane %v5018_v43, 4  ;;  %v12170_v21 = vadd.f32 %v3501_v25, %v3413_v35  ;;  %v14822_v25 = vld [vmem:[#allocation50_spill] sm:$0xff] }
 0x4eb   : > { %v5020_v15 = vadd.f32 %v5019_v62, %v5018_v43 }
 0x4ec   : > { %v3590_v9 = vpop.f32.mrf.mxu2 }
 0x4ed   : > { %v5021_v1 = vrot.slane %v5020_v15, 2  ;;  %v3679_v30 = vpop.f32.mrf.mxu3 }
 0x4ee   : > { %v12172_v58 = vadd.f32 %v3679_v30, %v3590_v9  ;;  %v3415_v7 = vpop.f32.mrf.mxu0  ;;  %v14825_v9 = vld [vmem:[#allocation89_spill] sm:$0xff] }
 0x4ef   : > { %v3416_v12 = vadd.f32 %v3415_v7, %v11591_v26  ;;  %v3504_v38 = vpop.f32.mrf.mxu1  ;;  %v5022_v3 = vadd.f32 %v5021_v1, %v5020_v15 }
 0x4f0   : > { %3454 = vmatmul.bf16.gmra.mxu0 %v14819_v20  ;;  %3543 = vmatmul.bf16.gmra.mxu1 %v14820_v16  ;;  %v14838_v20 = vld [vmem:[#allocation106_spill] sm:$0xff] }
 0x4f1   : > { %v12177_v18 = vadd.f32 %v3504_v38, %v3416_v12  ;;  %3632 = vmatmul.bf16.gmra.mxu2 %v14822_v25  ;;  %v5023_v60 = vrot.slane %v5022_v3, 1 }
 0x4f2   : > { %3721 = vmatmul.bf16.gmra.mxu3 %v14823_v19 }
 0x4f3   : > { %14821 = vst [vmem:[#allocation118_spill] sm:$0xff] %v12177_v18  ;;  %v5024_v35 = vadd.f32 %v5023_v60, %v5022_v3  ;;  %v14828_v3 = vld [vmem:[#allocation95_spill] sm:$0xff] }
 0x4f4   : > { %v3593_v40 = vpop.f32.mrf.mxu2 }
 0x4f5   : > { %v3682_v43 = vpop.f32.mrf.mxu3  ;;  %9318 = vrcp.f32 %v5024_v35  ;;  %v14829_v35 = vld [vmem:[#allocation103_spill] sm:$0xff] }
 0x4f6   : > { %v12181_v62 = vadd.f32 %v3682_v43, %v3593_v40  ;;  %v3417_v26 = vpop.f32.mrf.mxu0  ;;  %v14830_v40 = vld [vmem:[#allocation104_spill] sm:$0xff] }
 0x4f7   : > { %v3418_v30 = vadd.f32 %v3417_v26, %v14825_v9  ;;  %v3506_v7 = vpop.f32.mrf.mxu1  ;;  %v14832_v26 = vld [vmem:[#allocation54_spill] sm:$0xff]  ;;  %v14833_v9 = vld [vmem:[#allocation55_spill] sm:$0xff] }
 0x4f8   : > { %14824 = vst [vmem:[#allocation117_spill] sm:$0xff] %v12181_v62 }
 0x4f9   : > { %v12184_v15 = vadd.f32 %v3506_v7, %v3418_v30  ;;  %v8387_v7 = vld [vmem:[%s14134_s1 + $0x418] sm:$0xf0] }
 0x4fb   : > { %14826 = vst [vmem:[#allocation120_spill] sm:$0xff] %v12184_v15  ;;  %v9319_v1 = vpop.eup %9318  ;;  %v14837_v15 = vld [vmem:[#allocation105_spill] sm:$0xff] }
 0x4fc   : > { %v3595_v12 = vpop.f32.mrf.mxu2  ;;  %v5094_v38 = vmul.f32 %v9319_v1, %v9317_v57 }
 0x4fd   : > { %v3684_v18 = vpop.f32.mrf.mxu3 }
 0x4fe   : > { %v12186_v25 = vadd.f32 %v3684_v18, %v3595_v12  ;;  %5248 = vperm.xlu0 %9063, %v5094_v38   ;;  %v3420_v19 = vpop.f32.mrf.mxu0  ;;  %v8954_v18 = vld [vmem:[%s14134_s1 + $0x40c] sm:$0xf] }
 0x4ff   : > { %v3421_v60 = vadd.f32 %v3420_v19, %v14828_v3  ;;  %v3509_v16 = vpop.f32.mrf.mxu1  ;;  %v8390_v38 = vor.u32 %v8954_v18, %v8387_v7  ;;  %v8131_v19 = vld [vmem:[%s14134_s1 + $0x218] sm:$0xf0]  ;;  %v8986_v3 = vld [vmem:[%s14134_s1 + $0x50c] sm:$0xf] }
 0x500   : > { %14827 = vst [vmem:[#allocation119_spill] sm:$0xff] %v12186_v25  ;;  %3459 = vmatmul.bf16.gmra.mxu0 %v14829_v35  ;;  %3548 = vmatmul.bf16.gmra.mxu1 %v14830_v40  ;;  %v8259_v18 = vld [vmem:[%s14134_s1 + $0x318] sm:$0xf0] }
 0x501   : > { %v12191_v43 = vadd.f32 %v3509_v16, %v3421_v60  ;;  %3637 = vmatmul.bf16.gmra.mxu2 %v14832_v26  ;;  %v8890_v16 = vld [vmem:[%s14134_s1 + $0x20c] sm:$0xf]  ;;  %v14835_v60 = vld [vmem:[#allocation96_spill] sm:$0xff] }
 0x502   : > { %3726 = vmatmul.bf16.gmra.mxu3 %v14833_v9  ;;  %v8134_v62 = vor.u32 %v8890_v16, %v8131_v19  ;;  %3927 = vmatpush.bf16.msrb.mxu2 %v8390_v38 }
 0x503   : > { %14831 = vst [vmem:[#allocation121_spill] sm:$0xff] %v12191_v43  ;;  %v14836_v43 = vld [vmem:[#allocation101_spill] sm:$0xff] }
 0x504   : > { %v3598_v30 = vpop.f32.mrf.mxu2  ;;  %3749 = vmatpush.bf16.msrb.mxu0 %v8134_v62 }
 0x505   : > { %v3687_v57 = vpop.f32.mrf.mxu3 }
 0x506   : > { %v12201_v1 = vadd.f32 %v3687_v57, %v3598_v30  ;;  %v3422_v12 = vpop.f32.mrf.mxu0  ;;  %v8515_v30 = vld [vmem:[%s14134_s1 + $0x518] sm:$0xf0]  ;;  %v8922_v57 = vld [vmem:[%s14134_s1 + $0x30c] sm:$0xf] }
 0x507   : > { %v3423_v26 = vadd.f32 %v3422_v12, %v14835_v60  ;;  %v3511_v9 = vpop.f32.mrf.mxu1  ;;  %v8518_v7 = vor.u32 %v8986_v3, %v8515_v30  ;;  %v14839_v3 = vld [vmem:[#allocation58_spill] sm:$0xff] }
 0x508   : > { %14834 = vst [vmem:[#allocation80_spill] sm:$0xff] %v12201_v1  ;;  %v8262_v1 = vor.u32 %v8922_v57, %v8259_v18  ;;  %v14841_v57 = vld [vmem:[#allocation102_spill] sm:$0xff] }
 0x509   : > { %v12222_v25 = vadd.f32 %v3511_v9, %v3423_v26  ;;  %4016 = vmatpush.bf16.msrb.mxu3 %v8518_v7  ;;  %v14840_v26 = vld [vmem:[#allocation59_spill] sm:$0xff] }
 0x50a   : > { %3838 = vmatpush.bf16.msrb.mxu1 %v8262_v1 }
 0x50c   : > { %v3600_v12 = vpop.f32.mrf.mxu2 }
 0x50d   : > { %v3689_v16 = vpop.f32.mrf.mxu3 }
 0x50e   : > { %v12224_v19 = vadd.f32 %v3689_v16, %v3600_v12  ;;  %v3425_v60 = vpop.f32.mrf.mxu0 }
 0x50f   : > { %v3426_v40 = vadd.f32 %v3425_v60, %v14836_v43  ;;  %v3514_v35 = vpop.f32.mrf.mxu1 }
 0x510   : > { %3464 = vmatmul.bf16.gmra.mxu0 %v14837_v15  ;;  %3553 = vmatmul.bf16.gmra.mxu1 %v14838_v20  ;;  %v14844_v20 = vld [vmem:[#allocation109_spill] sm:$0xff] }
 0x511   : > { %v12229_v38 = vadd.f32 %v3514_v35, %v3426_v40  ;;  %3642 = vmatmul.bf16.gmra.mxu2 %v14839_v3 }
 0x512   : > { %3731 = vmatmul.bf16.gmra.mxu3 %v14840_v26  ;;  %v14845_v26 = vld [vmem:[#allocation110_spill] sm:$0xff] }
 0x514   : > { %v3603_v62 = vpop.f32.mrf.mxu2 }
 0x515   : > { %v3692_v1 = vpop.f32.mrf.mxu3 }
 0x516   : > { %v12233_v9 = vadd.f32 %v3692_v1, %v3603_v62  ;;  %v3427_v30 = vpop.f32.mrf.mxu0  ;;  %v14846_v1 = vld [vmem:[#allocation62_spill] sm:$0xff] }
 0x517   : > { %v3428_v18 = vadd.f32 %v3427_v30, %v14841_v57  ;;  %v3516_v7 = vpop.f32.mrf.mxu1  ;;  %v14847_v30 = vld [vmem:[#allocation63_spill] sm:$0xff] }
 0x519   : > { %v12236_v43 = vadd.f32 %v3516_v7, %v3428_v18 }
 0x51b   : > { %14842 = vst [vmem:[#allocation81_spill] sm:$0xff] %v12236_v43 }
 0x51c   : > { %v3605_v12 = vpop.f32.mrf.mxu2 }
 0x51d   : > { %v3694_v16 = vpop.f32.mrf.mxu3 }
 0x51e   : > { %v12238_v60 = vadd.f32 %v3694_v16, %v3605_v12  ;;  %v3430_v35 = vpop.f32.mrf.mxu0 }
 0x51f   : > { %v3431_v40 = vadd.f32 %v3430_v35, %v11731_v42  ;;  %v3519_v3 = vpop.f32.mrf.mxu1 }
 0x520   : > { %14843 = vst [vmem:[#allocation122_spill] sm:$0xff] %v12238_v60  ;;  %3469 = vmatmul.bf16.gmra.mxu0 %v14844_v20  ;;  %3558 = vmatmul.bf16.gmra.mxu1 %v14845_v26  ;;  %v14848_v26 = vld [vmem:[#allocation4_spill] sm:$0xff] }
 0x521   : > { %v12243_v62 = vadd.f32 %v3519_v3, %v3431_v40  ;;  %3647 = vmatmul.bf16.gmra.mxu2 %v14846_v1 }
 0x522   : > { %3736 = vmatmul.bf16.gmra.mxu3 %v14847_v30  ;;  %v14849_v30 = vld [vmem:[#allocation5_spill] sm:$0xff] }
 0x524   : > { %v3608_v57 = vpop.f32.mrf.mxu2 }
 0x525   : > { %v3697_v18 = vpop.f32.mrf.mxu3 }
 0x526   : > { %v12247_v7 = vadd.f32 %v3697_v18, %v3608_v57  ;;  %v3432_v12 = vpop.f32.mrf.mxu0 }
 0x527   : > { %v3433_v16 = vadd.f32 %v3432_v12, %v11737_v44  ;;  %v3521_v43 = vpop.f32.mrf.mxu1 }
 0x529   : > { %v12250_v42 = vadd.f32 %v3521_v43, %v3433_v16 }
 0x52c   : > { %v3610_v35 = vpop.f32.mrf.mxu2 }
 0x52d   : > { %v3699_v20 = vpop.f32.mrf.mxu3 }
 0x52e   : > { %v12252_v60 = vadd.f32 %v3699_v20, %v3610_v35  ;;  %v3435_v40 = vpop.f32.mrf.mxu0 }
 0x52f   : > { %v3436_v3 = vadd.f32 %v3435_v40, %v11760_v54  ;;  %v3524_v1 = vpop.f32.mrf.mxu1 }
 0x530   : > { %3750 = vmatmul.bf16.vlgmr.msrb.gmra.mxu0 %v14848_v26  ;;  %3839 = vmatmul.bf16.vlgmr.msrb.gmra.mxu1 %v14849_v30 }
 0x531   : > { %v12257_v57 = vadd.f32 %v3524_v1, %v3436_v3  ;;  %3928 = vmatmul.bf16.vlgmr.msrb.gmra.mxu2 %v14770_v2  ;;  %v14854_v1 = vld [vmem:[#allocation112_spill] sm:$0xff] }
 0x532   : > { %4017 = vmatmul.bf16.vlgmr.msrb.gmra.mxu3 %v14771_v29  ;;  %v14856_v29 = vld [vmem:[#allocation9_spill] sm:$0xff] }
 0x533   : > { %14850 = vst [vmem:[#allocation124_spill] sm:$0xff] %v12257_v57  ;;  %v14855_v57 = vld [vmem:[#allocation8_spill] sm:$0xff] }
 0x534   : > { %v3613_v44 = vpop.f32.mrf.mxu2 }
 0x535   : > { %v3702_v43 = vpop.f32.mrf.mxu3 }
 0x536   : > { %v12261_v18 = vadd.f32 %v3702_v43, %v3613_v44  ;;  %v3437_v20 = vpop.f32.mrf.mxu0  ;;  %v14858_v43 = vld [vmem:[#allocation68_spill] sm:$0xff] }
 0x537   : > { %v3438_v12 = vadd.f32 %v3437_v20, %v11774_v59  ;;  %v3526_v16 = vpop.f32.mrf.mxu1  ;;  %v14859_v59 = vld [vmem:[#allocation69_spill] sm:$0xff] }
 0x538   : > { %14851 = vst [vmem:[#allocation84_spill] sm:$0xff] %v12261_v18 }
 0x539   : > { %v12264_v54 = vadd.f32 %v3526_v16, %v3438_v12 }
 0x53b   : > { %14852 = vst [vmem:[#allocation123_spill] sm:$0xff] %v12264_v54 }
 0x53c   : > { %v3615_v35 = vpop.f32.mrf.mxu2 }
 0x53d   : > { %v3704_v26 = vpop.f32.mrf.mxu3 }
 0x53e   : > { %v12266_v40 = vadd.f32 %v3704_v26, %v3615_v35  ;;  %v3440_v3 = vpop.f32.mrf.mxu0  ;;  %v14861_v26 = vld [vmem:[#allocation70_spill] sm:$0xff] }
 0x53f   : > { %v3441_v30 = vadd.f32 %v3440_v3, %v14854_v1  ;;  %v3529_v2 = vpop.f32.mrf.mxu1 }
 0x540   : > { %14853 = vst [vmem:[#allocation126_spill] sm:$0xff] %v12266_v40  ;;  %3755 = vmatmul.bf16.gmra.mxu0 %v14855_v57  ;;  %3844 = vmatmul.bf16.gmra.mxu1 %v14856_v29 }
 0x541   : > { %v12271_v44 = vadd.f32 %v3529_v2, %v3441_v30  ;;  %3933 = vmatmul.bf16.gmra.mxu2 %v14858_v43  ;;  %v14864_v2 = vld [vmem:[#allocation6_spill] sm:$0xff] }
 0x542   : > { %4022 = vmatmul.bf16.gmra.mxu3 %v14859_v59  ;;  %v14866_v59 = vld [vmem:[#allocation13_spill] sm:$0xff] }
 0x543   : > { %14857 = vst [vmem:[#allocation125_spill] sm:$0xff] %v12271_v44  ;;  %v14865_v44 = vld [vmem:[#allocation12_spill] sm:$0xff] }
 0x544   : > { %v3618_v20 = vpop.f32.mrf.mxu2 }
 0x545   : > { %v3707_v12 = vpop.f32.mrf.mxu3 }
 0x546   : > { %v12275_v16 = vadd.f32 %v3707_v12, %v3618_v20  ;;  %v3442_v35 = vpop.f32.mrf.mxu0  ;;  %v14868_v12 = vld [vmem:[#allocation71_spill] sm:$0xff] }
 0x547   : > { %v3443_v18 = vadd.f32 %v3442_v35, %v14861_v26  ;;  %v3531_v40 = vpop.f32.mrf.mxu1  ;;  %v14869_v35 = vld [vmem:[#allocation72_spill] sm:$0xff] }
 0x548   : > { %14860 = vst [vmem:[#allocation128_spill] sm:$0xff] %v12275_v16 }
 0x549   : > { %v12278_v3 = vadd.f32 %v3531_v40, %v3443_v18 }
 0x54b   : > { %14862 = vst [vmem:[#allocation30_spill] sm:$0xff] %v12278_v3  ;;  %v12294_v3 = vpop.permute.xlu2 %5148 }
 0x54c   : > { %v3620_v1 = vpop.f32.mrf.mxu2 }
 0x54d   : > { %v3709_v57 = vpop.f32.mrf.mxu3 }
 0x54e   : > { %v12280_v54 = vadd.f32 %v3709_v57, %v3620_v1  ;;  %v3445_v30 = vpop.f32.mrf.mxu0  ;;  %v14871_v57 = vld [vmem:[#allocation113_spill] sm:$0xff] }
 0x54f   : > { %v3446_v29 = vadd.f32 %v3445_v30, %v14864_v2  ;;  %v3534_v43 = vpop.f32.mrf.mxu1 }
 0x550   : > { %14863 = vst [vmem:[#allocation31_spill] sm:$0xff] %v12280_v54  ;;  %3760 = vmatmul.bf16.gmra.mxu0 %v14865_v44  ;;  %3849 = vmatmul.bf16.gmra.mxu1 %v14866_v59  ;;  %v14874_v59 = vld [vmem:[#allocation115_spill] sm:$0xff] }
 0x551   : > { %v12285_v20 = vadd.f32 %v3534_v43, %v3446_v29  ;;  %3938 = vmatmul.bf16.gmra.mxu2 %v14868_v12 }
 0x552   : > { %4027 = vmatmul.bf16.gmra.mxu3 %v14869_v35 }
 0x553   : > { %14867 = vst [vmem:[#allocation130_spill] sm:$0xff] %v12285_v20  ;;  %v14875_v20 = vld [vmem:[#allocation16_spill] sm:$0xff] }
 0x554   : > { %v3623_v18 = vpop.f32.mrf.mxu2 }
 0x555   : > { %v3712_v40 = vpop.f32.mrf.mxu3 }
 0x556   : > { %v12289_v26 = vadd.f32 %v3712_v40, %v3623_v18  ;;  %v3447_v1 = vpop.f32.mrf.mxu0  ;;  %v14876_v18 = vld [vmem:[#allocation17_spill] sm:$0xff] }
 0x557   : > { %v3448_v54 = vadd.f32 %v3447_v1, %v14871_v57  ;;  %v3536_v16 = vpop.f32.mrf.mxu1  ;;  %v14878_v1 = vld [vmem:[#allocation73_spill] sm:$0xff] }
 0x558   : > { %14870 = vst [vmem:[#allocation127_spill] sm:$0xff] %v12289_v26 }
 0x559   : > { %v12292_v30 = vadd.f32 %v3536_v16, %v3448_v54  ;;  %v14879_v54 = vld [vmem:[#allocation74_spill] sm:$0xff] }
 0x55b   : > { %14872 = vst [vmem:[#allocation129_spill] sm:$0xff] %v12292_v30 }
 0x55c   : > { %v3625_v2 = vpop.f32.mrf.mxu2 }
 0x55d   : > { %v3714_v44 = vpop.f32.mrf.mxu3 }
 0x55e   : > { %v12296_v29 = vadd.f32 %v3714_v44, %v3625_v2  ;;  %v3450_v43 = vpop.f32.mrf.mxu0 }
 0x55f   : > { %v3451_v12 = vadd.f32 %v3450_v43, %v14874_v59  ;;  %v3539_v35 = vpop.f32.mrf.mxu1  ;;  %v12308_v43 = vpop.permute.xlu2 %5158 }
 0x560   : > { %14873 = vst [vmem:[#allocation34_spill] sm:$0xff] %v12296_v29  ;;  %3765 = vmatmul.bf16.gmra.mxu0 %v14875_v20  ;;  %3854 = vmatmul.bf16.gmra.mxu1 %v14876_v18 }
 0x561   : > { %v12301_v40 = vadd.f32 %v3539_v35, %v3451_v12  ;;  %3943 = vmatmul.bf16.gmra.mxu2 %v14878_v1 }
 0x562   : > { %4032 = vmatmul.bf16.gmra.mxu3 %v14879_v54 }
 0x563   : > { %14877 = vst [vmem:[#allocation35_spill] sm:$0xff] %v12301_v40  ;;  %v14883_v40 = vld [vmem:[#allocation20_spill] sm:$0xff] }
 0x564   : > { %v3628_v16 = vpop.f32.mrf.mxu2 }
 0x565   : > { %v3717_v57 = vpop.f32.mrf.mxu3 }
 0x566   : > { %v12305_v26 = vadd.f32 %v3717_v57, %v3628_v16  ;;  %v3452_v2 = vpop.f32.mrf.mxu0  ;;  %v14884_v16 = vld [vmem:[#allocation21_spill] sm:$0xff] }
 0x567   : > { %v3453_v44 = vadd.f32 %v3452_v2, %v11919_v41  ;;  %v3541_v29 = vpop.f32.mrf.mxu1  ;;  %v12320_v41 = vpop.permute.xlu2 %5173 }
 0x568   : > { %14880 = vst [vmem:[#allocation38_spill] sm:$0xff] %v12305_v26  ;;  %v14890_v26 = vld [vmem:[#allocation24_spill] sm:$0xff] }
 0x569   : > { %v12310_v59 = vadd.f32 %v3541_v29, %v3453_v44 }
 0x56b   : > { %14881 = vst [vmem:[#allocation42_spill] sm:$0xff] %v12310_v59 }
 0x56c   : > { %v3630_v20 = vpop.f32.mrf.mxu2 }
 0x56d   : > { %v3719_v18 = vpop.f32.mrf.mxu3 }
 0x56e   : > { %v12312_v12 = vadd.f32 %v3719_v18, %v3630_v20  ;;  %v3455_v35 = vpop.f32.mrf.mxu0 }
 0x56f   : > { %v3456_v1 = vadd.f32 %v3455_v35, %v11933_v50  ;;  %v3544_v54 = vpop.f32.mrf.mxu1 }
 0x570   : > { %14882 = vst [vmem:[#allocation43_spill] sm:$0xff] %v12312_v12  ;;  %3770 = vmatmul.bf16.gmra.mxu0 %v14883_v40  ;;  %3859 = vmatmul.bf16.gmra.mxu1 %v14884_v16  ;;  %v12328_v40 = vpop.permute.xlu2 %5188 }
 0x571   : > { %v12317_v57 = vadd.f32 %v3544_v54, %v3456_v1  ;;  %3948 = vmatmul.bf16.gmra.mxu2 %v14791_v14  ;;  %14888 = vst [vmem:[#allocation10_spill] sm:$0xff] %v12328_v40 }
 0x572   : > { %4037 = vmatmul.bf16.gmra.mxu3 %v14792_v39 }
 0x573   : > { %14885 = vst [vmem:[#allocation66_spill] sm:$0xff] %v12317_v57 }
 0x574   : > { %v3633_v29 = vpop.f32.mrf.mxu2 }
 0x575   : > { %v3722_v2 = vpop.f32.mrf.mxu3 }
 0x576   : > { %v12323_v44 = vadd.f32 %v3722_v2, %v3633_v29  ;;  %v3457_v20 = vpop.f32.mrf.mxu0  ;;  %v14891_v29 = vld [vmem:[#allocation25_spill] sm:$0xff] }
 0x577   : > { %v3458_v50 = vadd.f32 %v3457_v20, %v11943_v33  ;;  %v3546_v18 = vpop.f32.mrf.mxu1  ;;  %v14893_v33 = vld [vmem:[#allocation78_spill] sm:$0xff]  ;;  %v14894_v20 = vld [vmem:[#allocation79_spill] sm:$0xff] }
 0x578   : > { %14886 = vst [vmem:[#allocation67_spill] sm:$0xff] %v12323_v44  ;;  %v12339_v44 = vpop.permute.xlu2 %5193 }
 0x579   : > { %v12326_v35 = vadd.f32 %v3546_v18, %v3458_v50  ;;  %14895 = vst [vmem:[#allocation15_spill] sm:$0xff] %v12339_v44 }
 0x57b   : > { %14887 = vst [vmem:[#allocation7_spill] sm:$0xff] %v12326_v35 }
 0x57c   : > { %v3635_v1 = vpop.f32.mrf.mxu2 }
 0x57d   : > { %v3724_v54 = vpop.f32.mrf.mxu3 }
 0x57e   : > { %v12330_v16 = vadd.f32 %v3724_v54, %v3635_v1  ;;  %v3460_v14 = vpop.f32.mrf.mxu0 }
 0x57f   : > { %v3461_v12 = vadd.f32 %v3460_v14, %v11961_v13  ;;  %v3549_v39 = vpop.f32.mrf.mxu1 }
 0x580   : > { %14889 = vst [vmem:[#allocation11_spill] sm:$0xff] %v12330_v16  ;;  %3775 = vmatmul.bf16.gmra.mxu0 %v14890_v26  ;;  %3864 = vmatmul.bf16.gmra.mxu1 %v14891_v29  ;;  %v12350_v35 = vpop.permute.xlu2 %5198 }
 0x581   : > { %v12335_v2 = vadd.f32 %v3549_v39, %v3461_v12  ;;  %3953 = vmatmul.bf16.gmra.mxu2 %v14893_v33  ;;  %14900 = vst [vmem:[#allocation19_spill] sm:$0xff] %v12350_v35 }
 0x582   : > { %4042 = vmatmul.bf16.gmra.mxu3 %v14894_v20 }
 0x583   : > { %14892 = vst [vmem:[#allocation14_spill] sm:$0xff] %v12335_v2  ;;  %v14899_v2 = vld [vmem:[#allocation28_spill] sm:$0xff] }
 0x584   : > { %v3638_v50 = vpop.f32.mrf.mxu2 }
 0x585   : > { %v3727_v18 = vpop.f32.mrf.mxu3 }
 0x586   : > { %v12341_v1 = vadd.f32 %v3727_v18, %v3638_v50  ;;  %v3462_v54 = vpop.f32.mrf.mxu0  ;;  %v14901_v50 = vld [vmem:[#allocation29_spill] sm:$0xff] }
 0x587   : > { %v3463_v13 = vadd.f32 %v3462_v54, %v11994_v8  ;;  %v3551_v14 = vpop.f32.mrf.mxu1 }
 0x588   : > { %14896 = vst [vmem:[#allocation76_spill] sm:$0xff] %v12341_v1 }
 0x589   : > { %v12344_v16 = vadd.f32 %v3551_v14, %v3463_v13 }
 0x58b   : > { %14897 = vst [vmem:[#allocation77_spill] sm:$0xff] %v12344_v16 }
 0x58c   : > { %v3640_v26 = vpop.f32.mrf.mxu2 }
 0x58d   : > { %v3729_v29 = vpop.f32.mrf.mxu3 }
 0x58e   : > { %v12346_v12 = vadd.f32 %v3729_v29, %v3640_v26  ;;  %v3465_v39 = vpop.f32.mrf.mxu0 }
 0x58f   : > { %v3466_v33 = vadd.f32 %v3465_v39, %v12012_v36  ;;  %v3554_v20 = vpop.f32.mrf.mxu1 }
 0x590   : > { %14898 = vst [vmem:[#allocation18_spill] sm:$0xff] %v12346_v12  ;;  %3780 = vmatmul.bf16.gmra.mxu0 %v14899_v2  ;;  %3869 = vmatmul.bf16.gmra.mxu1 %v14901_v50  ;;  %v12360_v2 = vpop.permute.xlu2 %5243 }
 0x591   : > { %v12353_v18 = vadd.f32 %v3554_v20, %v3466_v33  ;;  %3958 = vmatmul.bf16.gmra.mxu2 %v14801_v63  ;;  %14904 = vst [vmem:[#allocation82_spill] sm:$0xff] %v12360_v2 }
 0x592   : > { %4047 = vmatmul.bf16.gmra.mxu3 %v14802_v32 }
 0x593   : > { %14902 = vst [vmem:[#allocation22_spill] sm:$0xff] %v12353_v18 }
 0x594   : > { %v3643_v8 = vpop.f32.mrf.mxu2 }
 0x595   : > { %v3732_v54 = vpop.f32.mrf.mxu3 }
 0x596   : > { %v12357_v13 = vadd.f32 %v3732_v54, %v3643_v8  ;;  %v3467_v14 = vpop.f32.mrf.mxu0  ;;  %v14907_v8 = vld [vmem:[#allocation32_spill] sm:$0xff]  ;;  %v14908_v54 = vld [vmem:[#allocation33_spill] sm:$0xff] }
 0x597   : > { %v3468_v36 = vadd.f32 %v3467_v14, %v12021_v31  ;;  %v3556_v26 = vpop.f32.mrf.mxu1 }
 0x598   : > { %14903 = vst [vmem:[#allocation23_spill] sm:$0xff] %v12357_v13 }
 0x599   : > { %v3557_v29 = vadd.f32 %v3556_v26, %v3468_v36 }
 0x59b   : > { %v12363_v39 = vmul.f32 %v12360_v2, %v3557_v29 }
 0x59c   : > { %v3645_v33 = vpop.f32.mrf.mxu2 }
 0x59d   : > { %14905 = vst [vmem:[#allocation83_spill] sm:$0xff] %v12363_v39  ;;  %v3734_v20 = vpop.f32.mrf.mxu3 }
 0x59e   : > { %v12365_v50 = vadd.f32 %v3734_v20, %v3645_v33  ;;  %v3470_v63 = vpop.f32.mrf.mxu0 }
 0x59f   : > { %v3471_v32 = vadd.f32 %v3470_v63, %v12057_v51  ;;  %v3559_v12 = vpop.f32.mrf.mxu1 }
 0x5a0   : > { %14906 = vst [vmem:[#allocation26_spill] sm:$0xff] %v12365_v50  ;;  %3785 = vmatmul.bf16.gmra.mxu0 %v14907_v8  ;;  %3874 = vmatmul.bf16.gmra.mxu1 %v14908_v54  ;;  %v14913_v54 = vld [vmem:[#allocation36_spill] sm:$0xff] }
 0x5a1   : > { %v12370_v31 = vadd.f32 %v3559_v12, %v3471_v32  ;;  %3963 = vmatmul.bf16.gmra.mxu2 %v14805_v0  ;;  %v14914_v0 = vld [vmem:[#allocation37_spill] sm:$0xff] }
 0x5a2   : > { %4052 = vmatmul.bf16.gmra.mxu3 %v14806_v37 }
 0x5a3   : > { %14909 = vst [vmem:[#allocation27_spill] sm:$0xff] %v12370_v31 }
 0x5a4   : > { %v3648_v14 = vpop.f32.mrf.mxu2 }
 0x5a5   : > { %v3737_v36 = vpop.f32.mrf.mxu3 }
 0x5a6   : > { %v12374_v26 = vadd.f32 %v3737_v36, %v3648_v14  ;;  %v3472_v29 = vpop.f32.mrf.mxu0 }
 0x5a7   : > { %v3473_v33 = vadd.f32 %v3472_v29, %v12061_v11  ;;  %v3561_v20 = vpop.f32.mrf.mxu1 }
 0x5a8   : > { %14910 = vst [vmem:[#allocation85_spill] sm:$0xff] %v12374_v26 }
 0x5a9   : > { %v12377_v51 = vadd.f32 %v3561_v20, %v3473_v33 }
 0x5ab   : > { %14911 = vst [vmem:[#allocation86_spill] sm:$0xff] %v12377_v51 }
 0x5ac   : > { %v3650_v63 = vpop.f32.mrf.mxu2 }
 0x5ad   : > { %v3739_v8 = vpop.f32.mrf.mxu3 }
 0x5ae   : > { %v12379_v2 = vadd.f32 %v3739_v8, %v3650_v63  ;;  %v3751_v12 = vpop.f32.mrf.mxu0  ;;  %v14915_v8 = vld [vmem:[#allocation40_spill] sm:$0xff] }
 0x5af   : > { %v3840_v32 = vpop.f32.mrf.mxu1  ;;  %v3752_v40 = vadd.f32 %v3751_v12, %v12071_v49 }
 0x5b0   : > { %14912 = vst [vmem:[#allocation87_spill] sm:$0xff] %v12379_v2  ;;  %3790 = vmatmul.bf16.gmra.mxu0 %v14913_v54  ;;  %3879 = vmatmul.bf16.gmra.mxu1 %v14914_v0  ;;  %v14916_v2 = vld [vmem:[#allocation41_spill] sm:$0xff]  ;;  %v14917_v54 = vld [vmem:[#allocation90_spill] sm:$0xff] }
 0x5b1   : > { %3968 = vmatmul.bf16.gmra.mxu2 %v14807_v6  ;;  %v5256_v0 = vmul.f32 %v14917_v54, %v12066_v45  ;;  %v14918_v6 = vld [vmem:[#allocation111_spill] sm:$0xff] }
 0x5b2   : > { %4057 = vmatmul.bf16.gmra.mxu3 %v14808_v5  ;;  %v5258_v5 = vmul.f32 %v14918_v6, %v12074_v10 }
 0x5b3   : > { %v5320_v50 = vrot.slane %v5256_v0, 4 }
 0x5b4   : > { %v3929_v37 = vpop.f32.mrf.mxu2  ;;  %v5332_v51 = vrot.slane %v5258_v5, 4 }
 0x5b5   : > { %v12385_v14 = vpop.f32.mrf.mxu3  ;;  %v5321_v1 = vadd.f32 %v5320_v50, %v5256_v0 }
 0x5b6   : > { %v3753_v11 = vpop.f32.mrf.mxu0 }
 0x5b7   : > { %v3842_v36 = vpop.f32.mrf.mxu1  ;;  %v5322_v57 = vrot.slane %v5321_v1, 2 }
 0x5bc   : > { %v3931_v29 = vpop.f32.mrf.mxu2 }
 0x5bd   : > { %v4020_v33 = vpop.f32.mrf.mxu3 }
 0x5be   : > { %v3756_v20 = vpop.f32.mrf.mxu0 }
 0x5bf   : > { %v3845_v63 = vpop.f32.mrf.mxu1  ;;  %v3757_v18 = vadd.f32 %v3756_v20, %v12088_v52  ;;  %v14920_v52 = vld [vmem:[#allocation44_spill] sm:$0xff] }
 0x5c0   : > { %3795 = vmatmul.bf16.gmra.mxu0 %v14915_v8  ;;  %3884 = vmatmul.bf16.gmra.mxu1 %v14916_v2  ;;  %v3754_v8 = vadd.f32 %v3753_v11, %v12077_v28  ;;  %v5333_v2 = vadd.f32 %v5332_v51, %v5258_v5  ;;  %v14921_v11 = vld [vmem:[#allocation45_spill] sm:$0xff] }
 0x5c1   : > { %3973 = vmatmul.bf16.gmra.mxu2 %v14809_v53  ;;  %v14919_v53 = vld [vmem:[#allocation107_spill] sm:$0xff]  ;;  %v3846_v35 = vadd.f32 %v3845_v63, %v3757_v18 }
 0x5c2   : > { %4062 = vmatmul.bf16.gmra.mxu3 %v14810_v55  ;;  %v5260_v16 = vmul.f32 %v14919_v53, %v12082_v61  ;;  %v3843_v55 = vadd.f32 %v3842_v36, %v3754_v8  ;;  %v5334_v30 = vrot.slane %v5333_v2, 2  ;;  %v5323_v61 = vadd.f32 %v5322_v57, %v5321_v1 }
 0x5c3   : > { %v3841_v36 = vadd.f32 %v3840_v32, %v3752_v40 }
 0x5c4   : > { %v3934_v26 = vpop.f32.mrf.mxu2  ;;  %v3932_v50 = vadd.f32 %v3931_v29, %v3843_v55  ;;  %v5335_v18 = vadd.f32 %v5334_v30, %v5333_v2 }
 0x5c5   : > { %v4023_v13 = vpop.f32.mrf.mxu3  ;;  %v3930_v63 = vadd.f32 %v3929_v37, %v3841_v36 }
 0x5c6   : > { %v3758_v39 = vpop.f32.mrf.mxu0  ;;  %v4021_v49 = vadd.f32 %v4020_v33, %v3932_v50 }
 0x5c7   : > { %v3847_v31 = vpop.f32.mrf.mxu1  ;;  %v3759_v45 = vadd.f32 %v3758_v39, %v12097_v34  ;;  %v5344_v34 = vrot.slane %v5260_v16, 4  ;;  %v3935_v39 = vadd.f32 %v3934_v26, %v3846_v35  ;;  %v14922_v26 = vld [vmem:[#allocation108_spill] sm:$0xff] }
 0x5c8   : > { %v5262_v57 = vmul.f32 %v14922_v26, %v12091_v47  ;;  %v4019_v47 = vadd.f32 %v12385_v14, %v3930_v63  ;;  %v14926_v14 = vld [vmem:[#allocation3_spill] sm:$0xff] }
 0x5c9   : > { %v3848_v0 = vadd.f32 %v3847_v31, %v3759_v45  ;;  %v5345_v31 = vadd.f32 %v5344_v34, %v5260_v16  ;;  %v4024_v29 = vadd.f32 %v4023_v13, %v3935_v39  ;;  %v5336_v45 = vrot.slane %v5335_v18, 1 }
 0x5ca   : > { %v5356_v2 = vrot.slane %v5262_v57, 4  ;;  %v5270_v39 = vmul.f32 %v14926_v14, %v12170_v21 }
 0x5cb   : > { %v5346_v32 = vrot.slane %v5345_v31, 2  ;;  %v5261_v16 = vmul.f32 %v14919_v53, %v4024_v29  ;;  %v5337_v50 = vadd.f32 %v5336_v45, %v5335_v18  ;;  %v14928_v45 = vld [vmem:[#allocation49_spill] sm:$0xff] }
 0x5cc   : > { %v3936_v10 = vpop.f32.mrf.mxu2  ;;  %v5357_v18 = vadd.f32 %v5356_v2, %v5262_v57 }
 0x5cd   : > { %v4025_v59 = vpop.f32.mrf.mxu3  ;;  %v3937_v20 = vadd.f32 %v3936_v10, %v3848_v0 }
 0x5ce   : > { %v3761_v44 = vpop.f32.mrf.mxu0 }
 0x5cf   : > { %v3762_v28 = vadd.f32 %v3761_v44, %v12128_v48  ;;  %v3850_v51 = vpop.f32.mrf.mxu1  ;;  %v5324_v44 = vrot.slane %v5323_v61, 1  ;;  %v4026_v5 = vadd.f32 %v4025_v59, %v3937_v20  ;;  %v9340_v59 = vld [vmem:[%s14137_s4] sm:$0xff] }
 0x5d0   : > { %3800 = vmatmul.bf16.gmra.mxu0 %v14920_v52  ;;  %3889 = vmatmul.bf16.gmra.mxu1 %v14921_v11  ;;  %v12414_v37 = vperm.slane %v9340_v59, 3  ;;  %v14925_v52 = vld [vmem:[#allocation116_spill] sm:$0xff]  ;;  %v5350_v11 = vrot.slane %v5261_v16, 4  ;;  %v14929_v59 = vld [vmem:[#allocation98_spill] sm:$0xff] }
 0x5d1   : > { %3978 = vmatmul.bf16.gmra.mxu2 %v14813_v17  ;;  %v3851_v12 = vadd.f32 %v3850_v51, %v3762_v28  ;;  %v5259_v17 = vmul.f32 %v14918_v6, %v4021_v49  ;;  %v5325_v13 = vadd.f32 %v5324_v44, %v5323_v61  ;;  %v5263_v33 = vmul.f32 %v14922_v26, %v4026_v5  ;;  %v14923_v6 = vld [vmem:[#allocation2_spill] sm:$0xff] }
 0x5d2   : > { %4067 = vmatmul.bf16.gmra.mxu3 %v14814_v22  ;;  %v5264_v10 = vmul.f32 %v14923_v6, %v12124_v56  ;;  %v5347_v51 = vadd.f32 %v5346_v32, %v5345_v31  ;;  %v5268_v34 = vmul.f32 %v14925_v52, %v12138_v46  ;;  %v5257_v56 = vmul.f32 %v14917_v54, %v4019_v47 }
 0x5d3   : > { %v5338_v0 = vrot.slane %v5259_v17, 4  ;;  %v12428_v20 = vadd.f32 %v12414_v37, %v5325_v13  ;;  %v12432_v46 = vadd.f32 %v12414_v37, %v5337_v50  ;;  %v5404_v26 = vrot.slane %v5270_v39, 4 }
 0x5d4   : > { %v3939_v48 = vpop.f32.mrf.mxu2  ;;  %v5392_v54 = vrot.slane %v5268_v34, 4 }
 0x5d5   : > { %v3940_v8 = vadd.f32 %v3939_v48, %v3851_v12  ;;  %v4028_v35 = vpop.f32.mrf.mxu3  ;;  %v5368_v12 = vrot.slane %v5264_v10, 4  ;;  %v5339_v44 = vadd.f32 %v5338_v0, %v5259_v17  ;;  %v14363_v57 = vmax.f32 %v12428_v20, 0.0 }
 0x5d6   : > { %v3763_v1 = vpop.f32.mrf.mxu0  ;;  %v5358_v17 = vrot.slane %v5357_v18, 2  ;;  %v14369_v47 = vmax.f32 %v12432_v46, 0.0  ;;  %v5393_v0 = vadd.f32 %v5392_v54, %v5268_v34 }
 0x5d7   : > { %v4029_v22 = vadd.f32 %v4028_v35, %v3940_v8  ;;  %v3764_v30 = vadd.f32 %v3763_v1, %v12133_v24  ;;  %v3852_v40 = vpop.f32.mrf.mxu1  ;;  %v14924_v24 = vld [vmem:[#allocation114_spill] sm:$0xff]  ;;  %v14927_v8 = vld [vmem:[#allocation48_spill] sm:$0xff]  ;;  %v5348_v35 = vrot.slane %v5347_v51, 1  ;;  %v5351_v1 = vadd.f32 %v5350_v11, %v5261_v16 }
 0x5d8   : > { %v5266_v55 = vmul.f32 %v14924_v24, %v12131_v23  ;;  %v5362_v23 = vrot.slane %v5263_v33, 4  ;;  %v5369_v32 = vadd.f32 %v5368_v12, %v5264_v10  ;;  %v5340_v2 = vrot.slane %v5339_v44, 2 }
 0x5d9   : > { %v5265_v53 = vmul.f32 %v14923_v6, %v4029_v22  ;;  %v3853_v28 = vadd.f32 %v3852_v40, %v3764_v30  ;;  %v5326_v22 = vrot.slane %v5257_v56, 4  ;;  %v5349_v50 = vadd.f32 %v5348_v35, %v5347_v51 }
 0x5da   : > { %v5380_v29 = vrot.slane %v5266_v55, 4  ;;  %v5363_v30 = vadd.f32 %v5362_v23, %v5263_v33  ;;  %v5352_v11 = vrot.slane %v5351_v1, 2  ;;  %v5359_v10 = vadd.f32 %v5358_v17, %v5357_v18 }
 0x5db   : > { %v5374_v31 = vrot.slane %v5265_v53, 4  ;;  %v12444_v34 = vadd.f32 %v12414_v37, %v5349_v50 }
 0x5dc   : > { %v3941_v61 = vpop.f32.mrf.mxu2 }
 0x5dd   : > { %v3942_v36 = vadd.f32 %v3941_v61, %v3853_v28  ;;  %v4030_v49 = vpop.f32.mrf.mxu3  ;;  %v5375_v13 = vadd.f32 %v5374_v31, %v5265_v53  ;;  %v5405_v28 = vadd.f32 %v5404_v26, %v5270_v39  ;;  %v5327_v61 = vadd.f32 %v5326_v22, %v5257_v56 }
 0x5de   : > { %v3766_v48 = vpop.f32.mrf.mxu0  ;;  %v5394_v39 = vrot.slane %v5393_v0, 2 }
 0x5df   : > { %v4031_v21 = vadd.f32 %v4030_v49, %v3942_v36  ;;  %v3767_v63 = vadd.f32 %v3766_v48, %v12160_v4  ;;  %v3855_v5 = vpop.f32.mrf.mxu1  ;;  %v5381_v4 = vadd.f32 %v5380_v29, %v5266_v55  ;;  %v5370_v55 = vrot.slane %v5369_v32, 2 }
 0x5e0   : > { %3805 = vmatmul.bf16.gmra.mxu0 %v14927_v8  ;;  %3894 = vmatmul.bf16.gmra.mxu1 %v14928_v45  ;;  %v5376_v49 = vrot.slane %v5375_v13, 2  ;;  %v5341_v29 = vadd.f32 %v5340_v2, %v5339_v44  ;;  %v5406_v56 = vrot.slane %v5405_v28, 2  ;;  %v5328_v18 = vrot.slane %v5327_v61, 2 }
 0x5e1   : > { %v5267_v40 = vmul.f32 %v14924_v24, %v4031_v21  ;;  %3983 = vmatmul.bf16.gmra.mxu2 %v14815_v27  ;;  %v3856_v6 = vadd.f32 %v3855_v5, %v3767_v63  ;;  %v5364_v24 = vrot.slane %v5363_v30, 2  ;;  %v5382_v53 = vrot.slane %v5381_v4, 2 }
 0x5e2   : > { %4072 = vmatmul.bf16.gmra.mxu3 %v14929_v59  ;;  %v5353_v63 = vadd.f32 %v5352_v11, %v5351_v1  ;;  %v5898_v5 = vrot.slane %v14369_v47, 7  ;;  %v5360_v44 = vrot.slane %v5359_v10, 1  ;;  %v5371_v54 = vadd.f32 %v5370_v55, %v5369_v32  ;;  %v14945_v47 = vld [vmem:[#allocation103_spill] sm:$0xff] }
 0x5e3   : > { %v5386_v16 = vrot.slane %v5267_v40, 4  ;;  %v5365_v8 = vadd.f32 %v5364_v24, %v5363_v30  ;;  %v5383_v26 = vadd.f32 %v5382_v53, %v5381_v4  ;;  %v5377_v45 = vadd.f32 %v5376_v49, %v5375_v13 }
 0x5e4   : > { %v3944_v33 = vpop.f32.mrf.mxu2  ;;  %v14364_v59 = vmax.f32 %v12444_v34, 0.0  ;;  %v5395_v2 = vadd.f32 %v5394_v39, %v5393_v0  ;;  %v5407_v1 = vadd.f32 %v5406_v56, %v5405_v28  ;;  %v5329_v50 = vadd.f32 %v5328_v18, %v5327_v61  ;;  %v14930_v0 = vld [vmem:[#allocation52_spill] sm:$0xff]  ;;  %v14932_v56 = vld [vmem:[#allocation99_spill] sm:$0xff] }
 0x5e5   : > { %v5387_v23 = vadd.f32 %v5386_v16, %v5267_v40  ;;  %v3945_v27 = vadd.f32 %v3944_v33, %v3856_v6  ;;  %v4033_v36 = vpop.f32.mrf.mxu3  ;;  %v5354_v16 = vrot.slane %v5353_v63, 1  ;;  %v5366_v11 = vrot.slane %v5365_v8, 1 }
 0x5e6   : > { %v3768_v12 = vpop.f32.mrf.mxu0  ;;  %v5361_v24 = vadd.f32 %v5360_v44, %v5359_v10  ;;  %v5384_v32 = vrot.slane %v5383_v26, 1  ;;  %v5378_v4 = vrot.slane %v5377_v45, 1  ;;  %v5396_v28 = vrot.slane %v5395_v2, 1  ;;  %v9341_v10 = vld [vmem:[%s14137_s4 + $0x8] sm:$0xff] }
 0x5e7   : > { %v5388_v31 = vrot.slane %v5387_v23, 2  ;;  %v4034_v48 = vadd.f32 %v4033_v36, %v3945_v27  ;;  %v3769_v21 = vadd.f32 %v3768_v12, %v12172_v58  ;;  %v3857_v51 = vpop.f32.mrf.mxu1  ;;  %v5342_v58 = vrot.slane %v5341_v29, 1 }
 0x5e8   : > { %v5372_v27 = vrot.slane %v5371_v54, 1  ;;  %v5408_v61 = vrot.slane %v5407_v1, 1  ;;  %v12458_v12 = vperm.slane %v9341_v10, 3  ;;  %v12464_v18 = vadd.f32 %v12414_v37, %v5361_v24 }
 0x5e9   : > { %v5269_v35 = vmul.f32 %v14925_v52, %v4034_v48  ;;  %v5389_v22 = vadd.f32 %v5388_v31, %v5387_v23  ;;  %v3858_v17 = vadd.f32 %v3857_v51, %v3769_v21  ;;  %v5343_v23 = vadd.f32 %v5342_v58, %v5341_v29  ;;  %v14931_v48 = vld [vmem:[#allocation53_spill] sm:$0xff] }
 0x5ea   : > { %v5355_v31 = vadd.f32 %v5354_v16, %v5353_v63  ;;  %v5330_v29 = vrot.slane %v5329_v50, 1  ;;  %v5367_v21 = vadd.f32 %v5366_v11, %v5365_v8  ;;  %v5385_v44 = vadd.f32 %v5384_v32, %v5383_v26 }
 0x5eb   : > { %v5398_v40 = vrot.slane %v5269_v35, 4  ;;  %v5390_v36 = vrot.slane %v5389_v22, 1  ;;  %v5379_v58 = vadd.f32 %v5378_v4, %v5377_v45  ;;  %v5397_v8 = vadd.f32 %v5396_v28, %v5395_v2 }
 0x5ec   : > { %v3946_v6 = vpop.f32.mrf.mxu2  ;;  %v5409_v11 = vadd.f32 %v5408_v61, %v5407_v1  ;;  %v5331_v26 = vadd.f32 %v5330_v29, %v5329_v50  ;;  %v12479_v45 = vadd.f32 %v12458_v12, %v5367_v21  ;;  %v5901_v2 = vrot.slane %v14364_v59, 6  ;;  %v14940_v59 = vld [vmem:[#allocation56_spill] sm:$0xff] }
 0x5ed   : > { %v5399_v30 = vadd.f32 %v5398_v40, %v5269_v35  ;;  %v3947_v33 = vadd.f32 %v3946_v6, %v3858_v17  ;;  %v4035_v52 = vpop.f32.mrf.mxu3  ;;  %v5373_v35 = vadd.f32 %v5372_v27, %v5371_v54  ;;  %v14933_v40 = vld [vmem:[#allocation100_spill] sm:$0xff]  ;;  %v12468_v17 = vadd.f32 %v12458_v12, %v5343_v23 }
 0x5ee   : > { %v12450_v13 = vpop.f32.mrf.mxu0  ;;  %v5391_v63 = vadd.f32 %v5390_v36, %v5389_v22  ;;  %v5900_v54 = vsel %vm5899_vm1, %v5898_v5, %v14363_v57  ;;  %v14360_v1 = vmax.f32 %v12464_v18, 0.0  ;;  %v12490_v27 = vadd.f32 %v12458_v12, %v5379_v58 }
 0x5ef   : > { %v5400_v55 = vrot.slane %v5399_v30, 2  ;;  %v4036_v53 = vadd.f32 %v4035_v52, %v3947_v33  ;;  %v12452_v49 = vpop.f32.mrf.mxu1  ;;  %v12487_v24 = vadd.f32 %v12414_v37, %v5373_v35  ;;  %v12495_v50 = vadd.f32 %v12414_v37, %v5385_v44 }
 0x5f0   : > { %3810 = vmatmul.bf16.gmra.mxu0 %v14930_v0  ;;  %3899 = vmatmul.bf16.gmra.mxu1 %v14931_v48  ;;  %v14362_v32 = vmax.f32 %v12468_v17, 0.0  ;;  %v12499_v4 = vadd.f32 %v12458_v12, %v5391_v63  ;;  %v12511_v28 = vadd.f32 %v12458_v12, %v5331_v26  ;;  %v14368_v61 = vmax.f32 %v12479_v45, 0.0 }
 0x5f1   : > { %v5401_v51 = vadd.f32 %v5400_v55, %v5399_v30  ;;  %v5271_v39 = vmul.f32 %v14926_v14, %v4036_v53  ;;  %3988 = vmatmul.bf16.gmra.mxu2 %v14932_v56  ;;  %v12471_v14 = vadd.f32 %v12458_v12, %v5355_v31  ;;  %14934 = vst [vmem:[#allocation88_spill] sm:$0xff] %v12495_v50  ;;  %v5904_v48 = vrot.slane %v14360_v1, 5 }
 0x5f2   : > { %4077 = vmatmul.bf16.gmra.mxu3 %v14933_v40  ;;  %14935 = vst [vmem:[#allocation91_spill] sm:$0xff] %v12499_v4  ;;  %v12504_v55 = vadd.f32 %v12414_v37, %v5397_v8  ;;  %v12515_v31 = vadd.f32 %v12414_v37, %v5409_v11  ;;  %v14365_v29 = vmax.f32 %v12487_v24, 0.0  ;;  %v14366_v21 = vmax.f32 %v12490_v27, 0.0 }
 0x5f3   : > { %v5402_v16 = vrot.slane %v5401_v51, 1  ;;  %v5410_v6 = vrot.slane %v5271_v39, 4  ;;  %v14361_v53 = vmax.f32 %v12471_v14, 0.0  ;;  %v5919_v56 = vrot.slane %v14362_v32, 7 }
 0x5f4   : > { %v12473_v30 = vpop.f32.mrf.mxu2  ;;  %14936 = vst [vmem:[#allocation92_spill] sm:$0xff] %v12504_v55  ;;  %v14370_v35 = vmax.f32 %v12499_v4, 0.0  ;;  %v14372_v58 = vmax.f32 %v12504_v55, 0.0  ;;  %v14371_v8 = vmax.f32 %v12511_v28, 0.0  ;;  %v5923_v11 = vrot.slane %v14368_v61, 5  ;;  %v14951_v55 = vld [vmem:[#allocation60_spill] sm:$0xff] }
 0x5f5   : > { %v5403_v33 = vadd.f32 %v5402_v16, %v5401_v51  ;;  %v5411_v22 = vadd.f32 %v5410_v6, %v5271_v39  ;;  %v12481_v52 = vpop.f32.mrf.mxu3  ;;  %14938 = vst [vmem:[#allocation93_spill] sm:$0xff] %v12515_v31  ;;  %v5903_v51 = vsel %vm5902_vm2, %v5901_v2, %v5900_v54  ;;  %v14367_v39 = vmax.f32 %v12495_v50, 0.0  ;;  %v12532_v6 = vpop.permute.xlu0 %5143  ;;  %v14939_v2 = vld [vmem:[#allocation120_spill] sm:$0xff] }
 0x5f6   : > { %v12492_v5 = vpop.f32.mrf.mxu0  ;;  %v5921_v40 = vrot.slane %v14361_v53, 6  ;;  %v5925_v1 = vrot.slane %v14366_v21, 4  ;;  %v5906_v32 = vsel %vm5905_vm3, %v5904_v48, %v5903_v51  ;;  %v14942_v21 = vld [vmem:[#allocation57_spill] sm:$0xff]  ;;  %v5913_v48 = vrot.slane %v14372_v58, 2  ;;  %v14946_v58 = vld [vmem:[#allocation104_spill] sm:$0xff] }
 0x5f7   : > { %v5412_v23 = vrot.slane %v5411_v22, 2  ;;  %v12501_v36 = vpop.f32.mrf.mxu1  ;;  %v12508_v0 = vadd.f32 %v12458_v12, %v5403_v33  ;;  %v14375_v33 = vmax.f32 %v12515_v31, 0.0 }
 0x5f9   : > { %14937 = vst [vmem:[#allocation39_spill] sm:$0xff] %v12508_v0  ;;  %v5413_v10 = vadd.f32 %v5412_v23, %v5411_v22  ;;  %v14373_v63 = vmax.f32 %v12508_v0, 0.0  ;;  %v5907_v22 = vrot.slane %v14365_v29, 4  ;;  %v5274_v23 = vmul.f32 %v12532_v6, %v14939_v2 }
 0x5fa   : > { %v5920_v29 = vsel %vm5899_vm1, %v5919_v56, %v14371_v8  ;;  %v5927_v2 = vrot.slane %v14370_v35, 3  ;;  %v5916_v35 = vrot.slane %v14375_v33, 1 }
 0x5fb   : > { %v5414_v44 = vrot.slane %v5413_v10, 1  ;;  %v5929_v51 = vrot.slane %v14373_v63, 2  ;;  %v5428_v8 = vrot.slane %v5274_v23, 4 }
 0x5fc   : > { %v12530_v16 = vpop.f32.mrf.mxu2 }
 0x5fd   : > { %v5415_v54 = vadd.f32 %v5414_v44, %v5413_v10  ;;  %v12537_v26 = vpop.f32.mrf.mxu3  ;;  %v5910_v44 = vrot.slane %v14367_v39, 3  ;;  %v14944_v39 = vld [vmem:[#allocation75_spill] sm:$0xff] }
 0x5fe   : > { %v3776_v53 = vpop.f32.mrf.mxu0 }
 0x5ff   : > { %v3865_v57 = vpop.f32.mrf.mxu1  ;;  %v12549_v10 = vadd.f32 %v12458_v12, %v5415_v54  ;;  %v14943_v54 = vld [vmem:[#allocation118_spill] sm:$0xff] }
 0x600   : > { %3815 = vmatmul.bf16.gmra.mxu0 %v14940_v59  ;;  %3904 = vmatmul.bf16.gmra.mxu1 %v14942_v21  ;;  %v5922_v59 = vsel %vm5902_vm2, %v5921_v40, %v5920_v29  ;;  %v5272_v61 = vmul.f32 %v14944_v39, %v14943_v54  ;;  %v5909_v29 = vsel %vm5908_vm4, %v5907_v22, %v5906_v32 }
 0x601   : > { %14941 = vst [vmem:[#allocation94_spill] sm:$0xff] %v12549_v10  ;;  %3993 = vmatmul.bf16.gmra.mxu2 %v14945_v47  ;;  %v14377_v56 = vmax.f32 %v12549_v10, 0.0  ;;  %v5924_v21 = vsel %vm5905_vm3, %v5923_v11, %v5922_v59  ;;  %v5912_v63 = vsel %vm5911_vm5, %v5910_v44, %v5909_v29  ;;  %v5429_v22 = vadd.f32 %v5428_v8, %v5274_v23  ;;  %v12584_v29 = vpop.permute.xlu1 %5153 }
 0x602   : > { %4082 = vmatmul.bf16.gmra.mxu3 %v14946_v58  ;;  %v5926_v40 = vsel %vm5908_vm4, %v5925_v1, %v5924_v21  ;;  %v5915_v33 = vsel %vm5914_vm6, %v5913_v48, %v5912_v63  ;;  %v5416_v59 = vrot.slane %v5272_v61, 4  ;;  %v14947_v1 = vld [vmem:[#allocation121_spill] sm:$0xff]  ;;  %v5278_v63 = vmul.f32 %v12584_v29, %v12222_v25 }
 0x603   : > { %v5928_v54 = vsel %vm5911_vm5, %v5927_v2, %v5926_v40  ;;  %v5931_v47 = vrot.slane %v14377_v56, 1  ;;  %v5918_v58 = vsel %vm5917_vm7, %v5916_v35, %v5915_v33  ;;  %v5276_v44 = vmul.f32 %v12294_v3, %v14947_v1 }
 0x604   : > { %v3954_v0 = vpop.f32.mrf.mxu2  ;;  %v5930_v11 = vsel %vm5914_vm6, %v5929_v51, %v5928_v54  ;;  %v5417_v48 = vadd.f32 %v5416_v59, %v5272_v61  ;;  %v14948_v51 = vld [vmem:[#allocation119_spill] sm:$0xff]  ;;  %v5430_v35 = vrot.slane %v5429_v22, 2 }
 0x605   : > { %v4043_v31 = vpop.f32.mrf.mxu3  ;;  %v5932_v32 = vsel %vm5917_vm7, %v5931_v47, %v5930_v11  ;;  %v3774_v54 = vadd.f32 %v12492_v5, %v14948_v51  ;;  %v5440_v33 = vrot.slane %v5276_v44, 4  ;;  %v14949_v47 = vld [vmem:[#allocation80_spill] sm:$0xff]  ;;  %v5452_v11 = vrot.slane %v5278_v63, 4  ;;  %v14950_v5 = vld [vmem:[#allocation117_spill] sm:$0xff] }
 0x606   : > { %v3778_v21 = vpop.f32.mrf.mxu0  ;;  %v6025_v2 = vadd.f32 %v5932_v32, %v5918_v58  ;;  %v3777_v8 = vadd.f32 %v3776_v53, %v14949_v47  ;;  %v5280_v58 = vmul.f32 %v12308_v43, %v12229_v38  ;;  %v5418_v1 = vrot.slane %v5417_v48, 2 }
 0x607   : > { %v3867_v40 = vpop.f32.mrf.mxu1  ;;  %v3779_v23 = vadd.f32 %v3778_v21, %v12224_v19  ;;  %v3863_v56 = vadd.f32 %v12501_v36, %v3774_v54  ;;  %v5441_v61 = vadd.f32 %v5440_v33, %v5276_v44  ;;  %v3772_v51 = vadd.f32 %v12450_v13, %v14950_v5  ;;  %v14952_v36 = vld [vmem:[#allocation61_spill] sm:$0xff]  ;;  %v14953_v54 = vld [vmem:[#allocation106_spill] sm:$0xff] }
 0x608   : > { %6026 = vadd.xlane.f32.xlu0 %v6025_v2  ;;  %v5431_v2 = vadd.f32 %v5430_v35, %v5429_v22  ;;  %v3866_v59 = vadd.f32 %v3865_v57, %v3777_v8  ;;  %v5453_v38 = vadd.f32 %v5452_v11, %v5278_v63  ;;  %v5464_v4 = vrot.slane %v5280_v58, 4  ;;  %v5164_v11 = vpop.permute.xlu0 %5163 }
 0x609   : > { %v3952_v53 = vadd.f32 %v12530_v16, %v3863_v56  ;;  %v3868_v47 = vadd.f32 %v3867_v40, %v3779_v23  ;;  %v5419_v22 = vadd.f32 %v5418_v1, %v5417_v48  ;;  %v5442_v57 = vrot.slane %v5441_v61, 2 }
 0x60a   : > { %v3955_v50 = vadd.f32 %v3954_v0, %v3866_v59  ;;  %v5432_v13 = vrot.slane %v5431_v2, 1  ;;  %v3861_v16 = vadd.f32 %v12452_v49, %v3772_v51  ;;  %v5454_v56 = vrot.slane %v5453_v38, 2  ;;  %v14954_v59 = vld [vmem:[#allocation122_spill] sm:$0xff] }
 0x60b   : > { %v5420_v0 = vrot.slane %v5419_v22, 1 }
 0x60c   : > { %v3956_v32 = vpop.f32.mrf.mxu2  ;;  %v4044_v40 = vadd.f32 %v4043_v31, %v3955_v50  ;;  %v3950_v35 = vadd.f32 %v12473_v30, %v3861_v16  ;;  %v5455_v51 = vadd.f32 %v5454_v56, %v5453_v38  ;;  %v14955_v50 = vld [vmem:[#allocation81_spill] sm:$0xff]  ;;  %v12610_v30 = vpop.permute.xlu1 %5168 }
 0x60d   : > { %v4045_v25 = vpop.f32.mrf.mxu3  ;;  %v3957_v44 = vadd.f32 %v3956_v32, %v3868_v47  ;;  %v5433_v32 = vadd.f32 %v5432_v13, %v5431_v2  ;;  %v5282_v31 = vmul.f32 %v5164_v11, %v14955_v50  ;;  %v5286_v47 = vmul.f32 %v12320_v41, %v12250_v42 }
 0x60e   : > { %v3781_v10 = vpop.f32.mrf.mxu0 }
 0x60f   : > { %v3782_v19 = vadd.f32 %v3781_v10, %v12233_v9  ;;  %v3870_v21 = vpop.f32.mrf.mxu1  ;;  %v4041_v9 = vadd.f32 %v12537_v26, %v3952_v53  ;;  %v4046_v48 = vadd.f32 %v4045_v25, %v3957_v44  ;;  %v5421_v25 = vadd.f32 %v5420_v0, %v5419_v22 }
 0x610   : > { %3820 = vmatmul.bf16.gmra.mxu0 %v14951_v55  ;;  %3909 = vmatmul.bf16.gmra.mxu1 %v14952_v36  ;;  %v5465_v55 = vadd.f32 %v5464_v4, %v5280_v58  ;;  %v5277_v58 = vmul.f32 %v12294_v3, %v4044_v40  ;;  %v5456_v36 = vrot.slane %v5455_v51, 1  ;;  %v5476_v44 = vrot.slane %v5282_v31, 4 }
 0x611   : > { %3998 = vmatmul.bf16.gmra.mxu2 %v14837_v15  ;;  %v3871_v10 = vadd.f32 %v3870_v21, %v3782_v19  ;;  %v5443_v15 = vadd.f32 %v5442_v57, %v5441_v61  ;;  %v5275_v1 = vmul.f32 %v12532_v6, %v4041_v9  ;;  %v4039_v61 = vadd.f32 %v12481_v52, %v3950_v35 }
 0x612   : > { %4087 = vmatmul.bf16.gmra.mxu3 %v14953_v54  ;;  %v5466_v4 = vrot.slane %v5465_v55, 2  ;;  %v5279_v53 = vmul.f32 %v12584_v29, %v4046_v48  ;;  %v5284_v6 = vmul.f32 %v12610_v30, %v12243_v62  ;;  %v12620_v21 = vadd.f32 %v12414_v37, %v5433_v32  ;;  %v14957_v48 = vld [vmem:[#allocation64_spill] sm:$0xff]  ;;  %v14958_v32 = vld [vmem:[#allocation65_spill] sm:$0xff] }
 0x613   : > { %v5444_v2 = vrot.slane %v5443_v15, 1  ;;  %v5434_v3 = vrot.slane %v5275_v1, 4  ;;  %v5446_v52 = vrot.slane %v5277_v58, 4  ;;  %v12623_v29 = vadd.f32 %v12414_v37, %v5421_v25  ;;  %v14960_v25 = vld [vmem:[#allocation110_spill] sm:$0xff] }
 0x614   : > { %v3959_v63 = vpop.f32.mrf.mxu2  ;;  %v5467_v22 = vadd.f32 %v5466_v4, %v5465_v55  ;;  %v5273_v62 = vmul.f32 %v14944_v39, %v4039_v61  ;;  %v5458_v54 = vrot.slane %v5279_v53, 4  ;;  %v5500_v9 = vrot.slane %v5286_v47, 4 }
 0x615   : > { %v3960_v33 = vadd.f32 %v3959_v63, %v3871_v10  ;;  %v4048_v8 = vpop.f32.mrf.mxu3  ;;  %14956 = vst [vmem:[#allocation97_spill] sm:$0xff] %v12623_v29  ;;  %v5445_v16 = vadd.f32 %v5444_v2, %v5443_v15  ;;  %v14387_v40 = vmax.f32 %v12620_v21, 0.0  ;;  %v5435_v63 = vadd.f32 %v5434_v3, %v5275_v1 }
 0x616   : > { %v3783_v23 = vpop.f32.mrf.mxu0  ;;  %v5477_v39 = vadd.f32 %v5476_v44, %v5282_v31  ;;  %v14384_v15 = vmax.f32 %v12623_v29, 0.0  ;;  %v5501_v4 = vadd.f32 %v5500_v9, %v5286_v47  ;;  %v14991_v29 = vld [vmem:[#allocation127_spill] sm:$0xff] }
 0x617   : > { %v4049_v49 = vadd.f32 %v4048_v8, %v3960_v33  ;;  %v3784_v26 = vadd.f32 %v3783_v23, %v14954_v59  ;;  %v3872_v5 = vpop.f32.mrf.mxu1  ;;  %v5457_v33 = vadd.f32 %v5456_v36, %v5455_v51  ;;  %v5468_v8 = vrot.slane %v5467_v22, 1 }
 0x618   : > { %v5447_v23 = vadd.f32 %v5446_v52, %v5277_v58  ;;  %v5459_v59 = vadd.f32 %v5458_v54, %v5279_v53  ;;  %v12633_v1 = vadd.f32 %v12414_v37, %v5445_v16  ;;  %v5933_v51 = vrot.slane %v14387_v40, 7 }
 0x619   : > { %v5281_v19 = vmul.f32 %v12308_v43, %v4049_v49  ;;  %v3873_v38 = vadd.f32 %v3872_v5, %v3784_v26  ;;  %v5488_v43 = vrot.slane %v5284_v6, 4  ;;  %v5422_v49 = vrot.slane %v5273_v62, 4  ;;  %v14959_v5 = vld [vmem:[#allocation109_spill] sm:$0xff] }
 0x61a   : > { %v5436_v31 = vrot.slane %v5435_v63, 2  ;;  %v12639_v2 = vadd.f32 %v12414_v37, %v5457_v33  ;;  %v5478_v53 = vrot.slane %v5477_v39, 2  ;;  %v5448_v3 = vrot.slane %v5447_v23, 2 }
 0x61b   : > { %v5470_v10 = vrot.slane %v5281_v19, 4  ;;  %v5423_v36 = vadd.f32 %v5422_v49, %v5273_v62  ;;  %v5460_v44 = vrot.slane %v5459_v59, 2  ;;  %v14386_v52 = vmax.f32 %v12633_v1, 0.0 }
 0x61c   : > { %v3961_v57 = vpop.f32.mrf.mxu2  ;;  %14961 = vst [vmem:[#allocation46_spill] sm:$0xff] %v12639_v2  ;;  %v5502_v54 = vrot.slane %v5501_v4, 2  ;;  %v5437_v16 = vadd.f32 %v5436_v31, %v5435_v63  ;;  %v5934_v63 = vsel %vm5899_vm1, %v5933_v51, %v14384_v15 }
 0x61d   : > { %v3962_v13 = vadd.f32 %v3961_v57, %v3873_v38  ;;  %v4050_v42 = vpop.f32.mrf.mxu3  ;;  %v5471_v50 = vadd.f32 %v5470_v10, %v5281_v19 }
 0x61e   : > { %v3786_v56 = vpop.f32.mrf.mxu0 }
 0x61f   : > { %v4051_v55 = vadd.f32 %v4050_v42, %v3962_v13  ;;  %v3787_v0 = vadd.f32 %v3786_v56, %v12247_v7  ;;  %v3875_v35 = vpop.f32.mrf.mxu1  ;;  %v5489_v7 = vadd.f32 %v5488_v43, %v5284_v6  ;;  %v5472_v13 = vrot.slane %v5471_v50, 2 }
 0x620   : > { %3825 = vmatmul.bf16.gmra.mxu0 %v14957_v48  ;;  %3914 = vmatmul.bf16.gmra.mxu1 %v14958_v32  ;;  %v14383_v56 = vmax.f32 %v12639_v2, 0.0  ;;  %v5461_v48 = vadd.f32 %v5460_v44, %v5459_v59  ;;  %v5503_v32 = vadd.f32 %v5502_v54, %v5501_v4 }
 0x621   : > { %v5283_v26 = vmul.f32 %v5164_v11, %v4051_v55  ;;  %4003 = vmatmul.bf16.gmra.mxu2 %v14959_v5  ;;  %v3876_v61 = vadd.f32 %v3875_v35, %v3787_v0  ;;  %v5469_v11 = vadd.f32 %v5468_v8, %v5467_v22  ;;  %v5490_v57 = vrot.slane %v5489_v7, 2 }
 0x622   : > { %4092 = vmatmul.bf16.gmra.mxu3 %v14960_v25  ;;  %v5479_v55 = vadd.f32 %v5478_v53, %v5477_v39  ;;  %v5449_v0 = vadd.f32 %v5448_v3, %v5447_v23  ;;  %v5424_v35 = vrot.slane %v5423_v36, 2  ;;  %v5935_v8 = vrot.slane %v14386_v52, 6 }
 0x623   : > { %v5482_v58 = vrot.slane %v5283_v26, 4  ;;  %v12645_v62 = vadd.f32 %v12414_v37, %v5469_v11  ;;  %v5473_v49 = vadd.f32 %v5472_v13, %v5471_v50  ;;  %v5937_v39 = vrot.slane %v14383_v56, 5 }
 0x624   : > { %v3964_v38 = vpop.f32.mrf.mxu2  ;;  %v5450_v59 = vrot.slane %v5449_v0, 1  ;;  %v5462_v51 = vrot.slane %v5461_v48, 1  ;;  %v5504_v4 = vrot.slane %v5503_v32, 1  ;;  %v5936_v44 = vsel %vm5902_vm2, %v5935_v8, %v5934_v63  ;;  %v14963_v8 = vld [vmem:[#allocation124_spill] sm:$0xff] }
 0x625   : > { %v5483_v6 = vadd.f32 %v5482_v58, %v5283_v26  ;;  %v3965_v47 = vadd.f32 %v3964_v38, %v3876_v61  ;;  %v4053_v19 = vpop.f32.mrf.mxu3  ;;  %14962 = vst [vmem:[#allocation47_spill] sm:$0xff] %v12645_v62  ;;  %v5438_v26 = vrot.slane %v5437_v16, 1  ;;  %v14382_v23 = vmax.f32 %v12645_v62, 0.0 }
 0x626   : > { %v3788_v42 = vpop.f32.mrf.mxu0  ;;  %v5425_v61 = vadd.f32 %v5424_v35, %v5423_v36  ;;  %v5474_v50 = vrot.slane %v5473_v49, 1  ;;  %v5505_v63 = vadd.f32 %v5504_v4, %v5503_v32 }
 0x627   : > { %v5484_v43 = vrot.slane %v5483_v6, 2  ;;  %v4054_v9 = vadd.f32 %v4053_v19, %v3965_v47  ;;  %v3789_v10 = vadd.f32 %v3788_v42, %v12252_v60  ;;  %v3877_v22 = vpop.f32.mrf.mxu1  ;;  %v5491_v60 = vadd.f32 %v5490_v57, %v5489_v7 }
 0x628   : > { %v5939_v36 = vrot.slane %v14382_v23, 4  ;;  %v5451_v42 = vadd.f32 %v5450_v59, %v5449_v0  ;;  %v14965_v59 = vld [vmem:[#allocation123_spill] sm:$0xff] }
 0x629   : > { %v5285_v33 = vmul.f32 %v12610_v30, %v4054_v9  ;;  %v5485_v5 = vadd.f32 %v5484_v43, %v5483_v6  ;;  %v3878_v31 = vadd.f32 %v3877_v22, %v3789_v10  ;;  %v5480_v30 = vrot.slane %v5479_v55, 1  ;;  %v12664_v9 = vpop.permute.xlu0 %5178 }
 0x62a   : > { %v5492_v7 = vrot.slane %v5491_v60, 1  ;;  %v5439_v6 = vadd.f32 %v5438_v26, %v5437_v16  ;;  %v5938_v43 = vsel %vm5905_vm3, %v5937_v39, %v5936_v44  ;;  %v5426_v10 = vrot.slane %v5425_v61, 1 }
 0x62b   : > { %v5494_v25 = vrot.slane %v5285_v33, 4  ;;  %v5486_v47 = vrot.slane %v5485_v5, 1  ;;  %v5481_v13 = vadd.f32 %v5480_v30, %v5479_v55  ;;  %v5463_v22 = vadd.f32 %v5462_v51, %v5461_v48  ;;  %v14967_v51 = vld [vmem:[#allocation10_spill] sm:$0xff] }
 0x62c   : > { %v3966_v58 = vpop.f32.mrf.mxu2  ;;  %v5493_v16 = vadd.f32 %v5492_v7, %v5491_v60  ;;  %v5288_v26 = vmul.f32 %v12664_v9, %v14963_v8  ;;  %v12672_v55 = vadd.f32 %v12458_v12, %v5439_v6  ;;  %v12679_v60 = vadd.f32 %v12458_v12, %v5451_v42 }
 0x62d   : > { %v5495_v11 = vadd.f32 %v5494_v25, %v5285_v33  ;;  %v3967_v53 = vadd.f32 %v3966_v58, %v3878_v31  ;;  %v4055_v3 = vpop.f32.mrf.mxu3  ;;  %v5475_v25 = vadd.f32 %v5474_v50, %v5473_v49  ;;  %v12669_v31 = vpop.permute.xlu1 %5183  ;;  %v5487_v0 = vadd.f32 %v5486_v47, %v5485_v5  ;;  %v14966_v58 = vld [vmem:[#allocation125_spill] sm:$0xff] }
 0x62e   : > { %v12656_v38 = vpop.f32.mrf.mxu0  ;;  %14964 = vst [vmem:[#allocation50_spill] sm:$0xff] %v12672_v55  ;;  %v5290_v48 = vmul.f32 %v12669_v31, %v14965_v59  ;;  %v5940_v49 = vsel %vm5908_vm4, %v5939_v36, %v5938_v43  ;;  %v12690_v4 = vadd.f32 %v12414_v37, %v5481_v13  ;;  %v12693_v50 = vadd.f32 %v12414_v37, %v5493_v16  ;;  %v14975_v43 = vld [vmem:[#allocation30_spill] sm:$0xff] }
 0x62f   : > { %v5496_v19 = vrot.slane %v5495_v11, 2  ;;  %v4056_v57 = vadd.f32 %v4055_v3, %v3967_v53  ;;  %v12659_v54 = vpop.f32.mrf.mxu1  ;;  %14968 = vst [vmem:[#allocation51_spill] sm:$0xff] %v12679_v60  ;;  %v12685_v53 = vadd.f32 %v12458_v12, %v5463_v22  ;;  %v5512_v44 = vrot.slane %v5288_v26, 4 }
 0x630   : > { %14970 = vst [vmem:[#allocation95_spill] sm:$0xff] %v12690_v4  ;;  %v12696_v6 = vadd.f32 %v12458_v12, %v5475_v25  ;;  %v12707_v13 = vadd.f32 %v12414_v37, %v5505_v63  ;;  %v5524_v42 = vrot.slane %v5290_v48, 4  ;;  %v14394_v63 = vmax.f32 %v12693_v50, 0.0 }
 0x631   : > { %v5497_v35 = vadd.f32 %v5496_v19, %v5495_v11  ;;  %v5287_v33 = vmul.f32 %v12320_v41, %v4056_v57  ;;  %v5292_v41 = vmul.f32 %v14967_v51, %v14966_v58  ;;  %v5427_v11 = vadd.f32 %v5426_v10, %v5425_v61  ;;  %14969 = vst [vmem:[#allocation89_spill] sm:$0xff] %v12685_v53  ;;  %v14976_v10 = vld [vmem:[#allocation15_spill] sm:$0xff] }
 0x632   : > { %14971 = vst [vmem:[#allocation54_spill] sm:$0xff] %v12693_v50  ;;  %v14385_v61 = vmax.f32 %v12672_v55, 0.0  ;;  %v12702_v19 = vadd.f32 %v12458_v12, %v5487_v0  ;;  %v5294_v22 = vmul.f32 %v14976_v10, %v14975_v43  ;;  %v14390_v25 = vmax.f32 %v12685_v53, 0.0  ;;  %v14983_v53 = vld [vmem:[#allocation19_spill] sm:$0xff]  ;;  %v14989_v55 = vld [vmem:[#allocation42_spill] sm:$0xff] }
 0x633   : > { %v5498_v39 = vrot.slane %v5497_v35, 1  ;;  %v5506_v30 = vrot.slane %v5287_v33, 4  ;;  %14972 = vst [vmem:[#allocation55_spill] sm:$0xff] %v12696_v6  ;;  %v5536_v16 = vrot.slane %v5292_v41, 4  ;;  %v12716_v8 = vadd.f32 %v12458_v12, %v5427_v11 }
 0x634   : > { %v12681_v32 = vpop.f32.mrf.mxu2  ;;  %14973 = vst [vmem:[#allocation96_spill] sm:$0xff] %v12702_v19  ;;  %v14389_v59 = vmax.f32 %v12696_v6, 0.0  ;;  %v5947_v58 = vrot.slane %v14385_v61, 7  ;;  %v14399_v23 = vmax.f32 %v12707_v13, 0.0  ;;  %v5525_v11 = vadd.f32 %v5524_v42, %v5290_v48 }
 0x635   : > { %v5499_v5 = vadd.f32 %v5498_v39, %v5497_v35  ;;  %v5507_v3 = vadd.f32 %v5506_v30, %v5287_v33  ;;  %v12687_v7 = vpop.f32.mrf.mxu3  ;;  %14974 = vst [vmem:[#allocation101_spill] sm:$0xff] %v12707_v13  ;;  %v14388_v35 = vmax.f32 %v12679_v60, 0.0  ;;  %v14393_v39 = vmax.f32 %v12690_v4, 0.0 }
 0x636   : > { %v12698_v47 = vpop.f32.mrf.mxu0  ;;  %14978 = vst [vmem:[#allocation58_spill] sm:$0xff] %v12716_v8  ;;  %v5513_v30 = vadd.f32 %v5512_v44, %v5288_v26  ;;  %v5548_v56 = vrot.slane %v5294_v22, 4  ;;  %v5537_v26 = vadd.f32 %v5536_v16, %v5292_v41  ;;  %v14401_v44 = vmax.f32 %v12716_v8, 0.0 }
 0x637   : > { %v5508_v57 = vrot.slane %v5507_v3, 2  ;;  %v12704_v36 = vpop.f32.mrf.mxu1  ;;  %v12713_v33 = vadd.f32 %v12458_v12, %v5499_v5  ;;  %v5951_v61 = vrot.slane %v14390_v25, 5  ;;  %v5953_v48 = vrot.slane %v14389_v59, 4 }
 0x638   : > { %v5514_v5 = vrot.slane %v5513_v30, 2  ;;  %v14980_v59 = vmax.f32 %v12702_v19, 0.0  ;;  %v5526_v6 = vrot.slane %v5525_v11, 2  ;;  %v5549_v4 = vadd.f32 %v5548_v56, %v5294_v22  ;;  %v12766_v19 = vpop.permute.xlu0 %5203 }
 0x639   : > { %14977 = vst [vmem:[#allocation105_spill] sm:$0xff] %v12713_v33  ;;  %v5509_v0 = vadd.f32 %v5508_v57, %v5507_v3  ;;  %v5949_v3 = vrot.slane %v14388_v35, 6  ;;  %v5941_v35 = vrot.slane %v14393_v39, 3  ;;  %v5943_v57 = vrot.slane %v14394_v63, 2 }
 0x63a   : > { %v5955_v25 = vrot.slane %v14980_v59, 3  ;;  %v14981_v63 = vmax.f32 %v12713_v33, 0.0  ;;  %v5538_v62 = vrot.slane %v5537_v26, 2 }
 0x63b   : > { %v5510_v43 = vrot.slane %v5509_v0, 1 }
 0x63c   : > { %v12729_v15 = vpop.f32.mrf.mxu2  ;;  %v5957_v50 = vrot.slane %v14981_v63, 2  ;;  %v5515_v63 = vadd.f32 %v5514_v5, %v5513_v30 }
 0x63d   : > { %v5511_v52 = vadd.f32 %v5510_v43, %v5509_v0  ;;  %v12734_v40 = vpop.f32.mrf.mxu3  ;;  %v5945_v0 = vrot.slane %v14399_v23, 1  ;;  %v5948_v43 = vsel %vm5899_vm1, %v5947_v58, %v14401_v44  ;;  %v5942_v58 = vsel %vm5911_vm5, %v5941_v35, %v5940_v49 }
 0x63e   : > { %v3796_v42 = vpop.f32.mrf.mxu0  ;;  %v5950_v39 = vsel %vm5902_vm2, %v5949_v3, %v5948_v43  ;;  %v5944_v59 = vsel %vm5914_vm6, %v5943_v57, %v5942_v58  ;;  %v5527_v3 = vadd.f32 %v5526_v6, %v5525_v11  ;;  %v5550_v43 = vrot.slane %v5549_v4, 2  ;;  %v14984_v57 = vld [vmem:[#allocation129_spill] sm:$0xff] }
 0x63f   : > { %v3885_v41 = vpop.f32.mrf.mxu1  ;;  %v12743_v16 = vadd.f32 %v12458_v12, %v5511_v52  ;;  %v14982_v52 = vld [vmem:[#allocation130_spill] sm:$0xff]  ;;  %v5952_v13 = vsel %vm5905_vm3, %v5951_v61, %v5950_v39  ;;  %v5539_v61 = vadd.f32 %v5538_v62, %v5537_v26  ;;  %v5516_v11 = vrot.slane %v5515_v63, 1  ;;  %v12774_v26 = vpop.permute.xlu1 %5208 }
 0x640   : > { %v5296_v2 = vmul.f32 %v14983_v53, %v14982_v52  ;;  %v5954_v44 = vsel %vm5908_vm4, %v5953_v48, %v5952_v13  ;;  %v5946_v13 = vsel %vm5917_vm7, %v5945_v0, %v5944_v59  ;;  %v5528_v6 = vrot.slane %v5527_v3, 1  ;;  %v14986_v59 = vld [vmem:[#allocation128_spill] sm:$0xff] }
 0x641   : > { %14979 = vst [vmem:[#allocation59_spill] sm:$0xff] %v12743_v16  ;;  %v14404_v23 = vmax.f32 %v12743_v16, 0.0  ;;  %v5956_v56 = vsel %vm5911_vm5, %v5955_v25, %v5954_v44  ;;  %v5298_v25 = vmul.f32 %v12766_v19, %v14984_v57  ;;  %v5551_v5 = vadd.f32 %v5550_v43, %v5549_v4  ;;  %v12780_v43 = vpop.permute.xlu2 %5213 }
 0x642   : > { %v5958_v52 = vsel %vm5914_vm6, %v5957_v50, %v5956_v56  ;;  %v5560_v39 = vrot.slane %v5296_v2, 4  ;;  %v5540_v50 = vrot.slane %v5539_v61, 1  ;;  %v14985_v56 = vld [vmem:[#allocation126_spill] sm:$0xff] }
 0x643   : > { %v5959_v22 = vrot.slane %v14404_v23, 1  ;;  %v3794_v62 = vadd.f32 %v12698_v47, %v14985_v56  ;;  %v5572_v0 = vrot.slane %v5298_v25, 4  ;;  %v14988_v23 = vld [vmem:[#allocation31_spill] sm:$0xff]  ;;  %v5552_v16 = vrot.slane %v5551_v5, 1 }
 0x644   : > { %v3974_v33 = vpop.f32.mrf.mxu2  ;;  %v5561_v58 = vadd.f32 %v5560_v39, %v5296_v2  ;;  %v5541_v2 = vadd.f32 %v5540_v50, %v5539_v61 }
 0x645   : > { %v4063_v49 = vpop.f32.mrf.mxu3  ;;  %v5960_v35 = vsel %vm5917_vm7, %v5959_v22, %v5958_v52  ;;  %v3797_v22 = vadd.f32 %v3796_v42, %v14986_v59  ;;  %v14987_v52 = vld [vmem:[#allocation35_spill] sm:$0xff]  ;;  %v3883_v47 = vadd.f32 %v12704_v36, %v3794_v62  ;;  %v5573_v60 = vadd.f32 %v5572_v0, %v5298_v25  ;;  %v14990_v59 = vld [vmem:[#allocation84_spill] sm:$0xff] }
 0x646   : > { %v3798_v44 = vpop.f32.mrf.mxu0  ;;  %v6028_v48 = vadd.f32 %v5960_v35, %v5946_v13  ;;  %v5300_v57 = vmul.f32 %v12774_v26, %v14987_v52  ;;  %v5529_v35 = vadd.f32 %v5528_v6, %v5527_v3  ;;  %v5562_v39 = vrot.slane %v5561_v58, 2 }
 0x647   : > { %v3887_v30 = vpop.f32.mrf.mxu1  ;;  %v3799_v13 = vadd.f32 %v3798_v44, %v14988_v23  ;;  %v5302_v42 = vmul.f32 %v12780_v43, %v14989_v55  ;;  %v3792_v52 = vadd.f32 %v12656_v38, %v14990_v59  ;;  %v3886_v8 = vadd.f32 %v3885_v41, %v3797_v22 }
 0x648   : > { %6029 = vadd.xlane.f32.xlu2 %v6028_v48  ;;  %v5517_v48 = vadd.f32 %v5516_v11, %v5515_v63  ;;  %v5584_v3 = vrot.slane %v5300_v57, 4  ;;  %v3972_v44 = vadd.f32 %v12729_v15, %v3883_v47  ;;  %v12790_v11 = vadd.f32 %v12414_v37, %v5529_v35 }
 0x649   : > { %v3888_v6 = vadd.f32 %v3887_v30, %v3799_v13  ;;  %v5553_v36 = vadd.f32 %v5552_v16, %v5551_v5  ;;  %v3975_v25 = vadd.f32 %v3974_v33, %v3886_v8  ;;  %v12793_v50 = vadd.f32 %v12414_v37, %v5541_v2 }
 0x64a   : > { %v5563_v55 = vadd.f32 %v5562_v39, %v5561_v58  ;;  %v5574_v38 = vrot.slane %v5573_v60, 2  ;;  %v5596_v41 = vrot.slane %v5302_v42, 4  ;;  %v3881_v0 = vadd.f32 %v12659_v54, %v3792_v52  ;;  %v14992_v52 = vld [vmem:[#allocation34_spill] sm:$0xff] }
 0x64b   : > { %v12797_v15 = vadd.f32 %v12414_v37, %v5517_v48  ;;  %v5585_v30 = vadd.f32 %v5584_v3, %v5300_v57  ;;  %v14415_v13 = vmax.f32 %v12790_v11, 0.0  ;;  %v12802_v33 = vadd.f32 %v12414_v37, %v5553_v36 }
 0x64c   : > { %v3976_v4 = vpop.f32.mrf.mxu2  ;;  %v3970_v8 = vadd.f32 %v12681_v32, %v3881_v0  ;;  %v4064_v16 = vadd.f32 %v4063_v49, %v3975_v25  ;;  %v14414_v58 = vmax.f32 %v12793_v50, 0.0  ;;  %v5564_v35 = vrot.slane %v5563_v55, 1  ;;  %v14993_v25 = vld [vmem:[#allocation66_spill] sm:$0xff] }
 0x64d   : > { %v4065_v56 = vpop.f32.mrf.mxu3  ;;  %v3977_v62 = vadd.f32 %v3976_v4, %v3888_v6  ;;  %v5575_v2 = vadd.f32 %v5574_v38, %v5573_v60  ;;  %v5597_v57 = vadd.f32 %v5596_v41, %v5302_v42  ;;  %v5961_v32 = vrot.slane %v14415_v13, 7  ;;  %v12813_v6 = vpop.permute.xlu1 %5218 }
 0x64e   : > { %v3801_v23 = vpop.f32.mrf.mxu0  ;;  %v14413_v49 = vmax.f32 %v12802_v33, 0.0  ;;  %v14411_v60 = vmax.f32 %v12797_v15, 0.0  ;;  %v5565_v42 = vadd.f32 %v5564_v35, %v5563_v55 }
 0x64f   : > { %v3802_v63 = vadd.f32 %v3801_v23, %v14991_v29  ;;  %v3890_v61 = vpop.f32.mrf.mxu1  ;;  %v4061_v29 = vadd.f32 %v12734_v40, %v3972_v44  ;;  %v4066_v54 = vadd.f32 %v4065_v56, %v3977_v62  ;;  %v5586_v40 = vrot.slane %v5585_v30, 2 }
 0x650   : > { %v4059_v44 = vadd.f32 %v12687_v7, %v3970_v8  ;;  %v5293_v56 = vmul.f32 %v14967_v51, %v4064_v16  ;;  %v5598_v36 = vrot.slane %v5597_v57, 2  ;;  %v5304_v62 = vmul.f32 %v12813_v6, %v14993_v25 }
 0x651   : > { %v3891_v22 = vadd.f32 %v3890_v61, %v3802_v63  ;;  %v5291_v47 = vmul.f32 %v12669_v31, %v4061_v29  ;;  %v5963_v31 = vrot.slane %v14414_v58, 6  ;;  %v5295_v63 = vmul.f32 %v14976_v10, %v4066_v54 }
 0x652   : > { %v5576_v61 = vrot.slane %v5575_v2, 1  ;;  %v5587_v7 = vadd.f32 %v5586_v40, %v5585_v30  ;;  %v5965_v0 = vrot.slane %v14413_v49, 5  ;;  %v5289_v29 = vmul.f32 %v12664_v9, %v4059_v44  ;;  %v12832_v9 = vpop.permute.xlu0 %5223  ;;  %v14995_v44 = vld [vmem:[#allocation7_spill] sm:$0xff] }
 0x653   : > { %v5530_v41 = vrot.slane %v5291_v47, 4  ;;  %v5962_v10 = vsel %vm5899_vm1, %v5961_v32, %v14411_v60  ;;  %v12829_v55 = vadd.f32 %v12414_v37, %v5565_v42  ;;  %v5554_v16 = vrot.slane %v5295_v63, 4 }
 0x654   : > { %v3979_v5 = vpop.f32.mrf.mxu2  ;;  %v5964_v30 = vsel %vm5902_vm2, %v5963_v31, %v5962_v10  ;;  %v5577_v35 = vadd.f32 %v5576_v61, %v5575_v2  ;;  %v5599_v54 = vadd.f32 %v5598_v36, %v5597_v57  ;;  %v5588_v40 = vrot.slane %v5587_v7, 1 }
 0x655   : > { %v3980_v4 = vadd.f32 %v3979_v5, %v3891_v22  ;;  %v4068_v48 = vpop.f32.mrf.mxu3  ;;  %v5542_v22 = vrot.slane %v5293_v56, 4  ;;  %v5306_v42 = vmul.f32 %v12832_v9, %v14995_v44  ;;  %v5518_v25 = vrot.slane %v5289_v29, 4 }
 0x656   : > { %v3803_v39 = vpop.f32.mrf.mxu0  ;;  %v5966_v31 = vsel %vm5905_vm3, %v5965_v0, %v5964_v30  ;;  %v14410_v2 = vmax.f32 %v12829_v55, 0.0  ;;  %v5555_v57 = vadd.f32 %v5554_v16, %v5295_v63  ;;  %v12841_v36 = vadd.f32 %v12414_v37, %v5577_v35 }
 0x657   : > { %v4069_v59 = vadd.f32 %v4068_v48, %v3980_v4  ;;  %v3804_v23 = vadd.f32 %v3803_v39, %v14992_v52  ;;  %v3892_v3 = vpop.f32.mrf.mxu1  ;;  %v5608_v4 = vrot.slane %v5304_v62, 4  ;;  %v5589_v10 = vadd.f32 %v5588_v40, %v5587_v7 }
 0x658   : > { %14996 = vst [vmem:[#allocation102_spill] sm:$0xff] %v12841_v36  ;;  %v5519_v44 = vadd.f32 %v5518_v25, %v5289_v29  ;;  %v9354_v0 = vmov 256.0   ;;  %v5967_v63 = vrot.slane %v14410_v2, 4 }
 0x659   : > { %v5297_v38 = vmul.f32 %v14983_v53, %v4069_v59  ;;  %v3893_v51 = vadd.f32 %v3892_v3, %v3804_v23  ;;  %v5531_v59 = vadd.f32 %v5530_v41, %v5291_v47  ;;  %v14994_v23 = vld [vmem:[#allocation38_spill] sm:$0xff]  ;;  %v5600_v47 = vrot.slane %v5599_v54, 1 }
 0x65a   : > { %v5609_v41 = vadd.f32 %v5608_v4, %v5304_v62  ;;  %9320 = vrcp.f32 %v9354_v0  ;;  %v14412_v62 = vmax.f32 %v12841_v36, 0.0  ;;  %v12848_v0 = vadd.f32 %v12414_v37, %v5589_v10 }
 0x65b   : > { %v5566_v48 = vrot.slane %v5297_v38, 4  ;;  %v5520_v60 = vrot.slane %v5519_v44, 2 }
 0x65c   : > { %v3981_v8 = vpop.f32.mrf.mxu2  ;;  %v5610_v7 = vrot.slane %v5609_v41, 2  ;;  %14998 = vst [vmem:[#allocation62_spill] sm:$0xff] %v12848_v0 }
 0x65d   : > { %v3982_v5 = vadd.f32 %v3981_v8, %v3893_v51  ;;  %v4070_v53 = vpop.f32.mrf.mxu3  ;;  %v5543_v51 = vadd.f32 %v5542_v22, %v5293_v56  ;;  %v5567_v8 = vadd.f32 %v5566_v48, %v5297_v38  ;;  %v5601_v38 = vadd.f32 %v5600_v47, %v5599_v54 }
 0x65e   : > { %v3806_v39 = vpop.f32.mrf.mxu0  ;;  %v5968_v54 = vsel %vm5908_vm4, %v5967_v63, %v5966_v31  ;;  %v12860_v63 = vpop.permute.xlu0 %5233 }
 0x65f   : > { %v4071_v52 = vadd.f32 %v4070_v53, %v3982_v5  ;;  %v3807_v3 = vadd.f32 %v3806_v39, %v14994_v23  ;;  %v3895_v32 = vpop.f32.mrf.mxu1  ;;  %v5532_v5 = vrot.slane %v5531_v59, 2  ;;  %v5620_v23 = vrot.slane %v5306_v42, 4 }
 0x660   : > { %v5544_v56 = vrot.slane %v5543_v51, 2  ;;  %v5568_v4 = vrot.slane %v5567_v8, 2  ;;  %v12852_v47 = vpop.eup %9320 }
 0x661   : > { %v5299_v61 = vmul.f32 %v12766_v19, %v4071_v52  ;;  %v3896_v39 = vadd.f32 %v3895_v32, %v3807_v3  ;;  %v5556_v19 = vrot.slane %v5555_v57, 2  ;;  %v5533_v40 = vadd.f32 %v5532_v5, %v5531_v59  ;;  %v14997_v3 = vld [vmem:[#allocation43_spill] sm:$0xff] }
 0x662   : > { %v5621_v2 = vadd.f32 %v5620_v23, %v5306_v42  ;;  %v5569_v59 = vadd.f32 %v5568_v4, %v5567_v8  ;;  %v12855_v5 = vadd.f32 %v12414_v37, %v5601_v38  ;;  %vm6042_vm8 = vweird.f32 %v12852_v47 }
 0x663   : > { %v5578_v53 = vrot.slane %v5299_v61, 4  ;;  %v5534_v10 = vrot.slane %v5533_v40, 1 }
 0x664   : > { %v3984_v22 = vpop.f32.mrf.mxu2  ;;  %14999 = vst [vmem:[#allocation63_spill] sm:$0xff] %v12855_v5 }
 0x665   : > { %v5579_v16 = vadd.f32 %v5578_v53, %v5299_v61  ;;  %v3985_v30 = vadd.f32 %v3984_v22, %v3896_v39  ;;  %v4073_v35 = vpop.f32.mrf.mxu3  ;;  %v5545_v61 = vadd.f32 %v5544_v56, %v5543_v51  ;;  %v5557_v53 = vadd.f32 %v5556_v19, %v5555_v57 }
 0x666   : > { %v3808_v48 = vpop.f32.mrf.mxu0  ;;  %v5611_v22 = vadd.f32 %v5610_v7, %v5609_v41  ;;  %v14416_v51 = vmax.f32 %v12848_v0, 0.0  ;;  %v5622_v57 = vrot.slane %v5621_v2, 2  ;;  %v6038_v7 = vmul.f32 256.0, %v12852_v47 }
 0x667   : > { %v5580_v52 = vrot.slane %v5579_v16, 2  ;;  %v4074_v29 = vadd.f32 %v4073_v35, %v3985_v30  ;;  %v3809_v32 = vadd.f32 %v3808_v48, %v14997_v3  ;;  %v3897_v25 = vpop.f32.mrf.mxu1  ;;  %v5969_v30 = vrot.slane %v14412_v62, 3 }
 0x668   : > { %v5546_v56 = vrot.slane %v5545_v61, 1  ;;  %v5558_v41 = vrot.slane %v5557_v53, 1  ;;  %v5612_v4 = vrot.slane %v5611_v22, 1  ;;  %v5570_v48 = vrot.slane %v5569_v59, 1 }
 0x669   : > { %v5301_v39 = vmul.f32 %v12774_v26, %v4074_v29  ;;  %v5581_v35 = vadd.f32 %v5580_v52, %v5579_v16  ;;  %v3898_v23 = vadd.f32 %v3897_v25, %v3809_v32  ;;  %v5521_v26 = vadd.f32 %v5520_v60, %v5519_v44 }
 0x66a   : > { %v5970_v52 = vsel %vm5911_vm5, %v5969_v30, %v5968_v54  ;;  %v5535_v3 = vadd.f32 %v5534_v10, %v5533_v40  ;;  %v5623_v62 = vadd.f32 %v5622_v57, %v5621_v2  ;;  %v6039_v16 = vsub.f32 1.0, %v6038_v7  ;;  %v15000_v40 = vld [vmem:[#allocation14_spill] sm:$0xff] }
 0x66b   : > { %v5590_v42 = vrot.slane %v5301_v39, 4  ;;  %v5582_v32 = vrot.slane %v5581_v35, 1  ;;  %v5522_v49 = vrot.slane %v5521_v26, 1  ;;  %v5613_v54 = vadd.f32 %v5612_v4, %v5611_v22 }
 0x66c   : > { %v3986_v31 = vpop.f32.mrf.mxu2  ;;  %v5571_v10 = vadd.f32 %v5570_v48, %v5569_v59 }
 0x66d   : > { %v5591_v8 = vadd.f32 %v5590_v42, %v5301_v39  ;;  %v3987_v19 = vadd.f32 %v3986_v31, %v3898_v23  ;;  %v4075_v38 = vpop.f32.mrf.mxu3  ;;  %v5547_v39 = vadd.f32 %v5546_v56, %v5545_v61  ;;  %v5971_v42 = vrot.slane %v14416_v51, 2  ;;  %v12869_v23 = vpop.permute.xlu1 %5228 }
 0x66e   : > { %v3811_v29 = vpop.f32.mrf.mxu0  ;;  %v5559_v31 = vadd.f32 %v5558_v41, %v5557_v53  ;;  %v5308_v30 = vmul.f32 %v12869_v23, %v15000_v40  ;;  %v12877_v61 = vadd.f32 %v12458_v12, %v5535_v3  ;;  %v5583_v57 = vadd.f32 %v5582_v32, %v5581_v35 }
 0x66f   : > { %v5592_v60 = vrot.slane %v5591_v8, 2  ;;  %v4076_v44 = vadd.f32 %v4075_v38, %v3987_v19  ;;  %v12865_v25 = vpop.f32.mrf.mxu1  ;;  %v15001_v19 = vmax.f32 %v12855_v5, 0.0  ;;  %v5624_v51 = vrot.slane %v5623_v62, 1 }
 0x670   : > { %v5523_v53 = vadd.f32 %v5522_v49, %v5521_v26  ;;  %v12880_v41 = vadd.f32 %v12458_v12, %v5547_v39  ;;  %v5972_v22 = vsel %vm5914_vm6, %v5971_v42, %v5970_v52  ;;  %v12886_v59 = vadd.f32 %v12458_v12, %v5559_v31  ;;  %v15004_v31 = vld [vmem:[#allocation11_spill] sm:$0xff] }
 0x671   : > { %v5593_v58 = vadd.f32 %v5592_v60, %v5591_v8  ;;  %v5303_v13 = vmul.f32 %v12780_v43, %v4076_v44  ;;  %v5973_v2 = vrot.slane %v15001_v19, 1  ;;  %v12883_v8 = vpop.permute.xlu0 %5248  ;;  %v6040_v35 = vmul.f32 %v12852_v47, %v6039_v16 }
 0x672   : > { %15002 = vst [vmem:[#allocation4_spill] sm:$0xff] %v12886_v59  ;;  %v5632_v3 = vrot.slane %v5308_v30, 4  ;;  %v12892_v49 = vadd.f32 %v12458_v12, %v5571_v10  ;;  %v12898_v52 = vadd.f32 %v12414_v37, %v5613_v54  ;;  %v14417_v60 = vmax.f32 %v12877_v61, 0.0 }
 0x673   : > { %v5594_v56 = vrot.slane %v5593_v58, 1  ;;  %v5602_v38 = vrot.slane %v5303_v13, 4  ;;  %v12895_v32 = vsel %vm5917_vm7, %v5973_v2, %v5972_v22  ;;  %v5625_v39 = vadd.f32 %v5624_v51, %v5623_v62  ;;  %v15006_v51 = vld [vmem:[#allocation77_spill] sm:$0xff] }
 0x674   : > { %v3989_v43 = vpop.f32.mrf.mxu2  ;;  %15003 = vst [vmem:[#allocation5_spill] sm:$0xff] %v12892_v49  ;;  %v14420_v16 = vmax.f32 %v12880_v41, 0.0  ;;  %v12910_v10 = vadd.f32 %v12458_v12, %v5523_v53  ;;  %v14422_v54 = vmax.f32 %v12886_v59, 0.0  ;;  %v6041_v2 = vadd.f32 %v12852_v47, %v6040_v35 }
 0x675   : > { %v5595_v7 = vadd.f32 %v5594_v56, %v5593_v58  ;;  %v5603_v4 = vadd.f32 %v5602_v38, %v5303_v13  ;;  %v12888_v48 = vpop.f32.mrf.mxu3  ;;  %v12902_v58 = vadd.f32 %v12458_v12, %v5583_v57  ;;  %v5633_v57 = vadd.f32 %v5632_v3, %v5308_v30  ;;  %v15005_v38 = vld [vmem:[#allocation67_spill] sm:$0xff] }
 0x676   : > { %v3813_v26 = vpop.f32.mrf.mxu0  ;;  %v3812_v62 = vadd.f32 %v3811_v29, %v15005_v38  ;;  %v5310_v22 = vmul.f32 %v12860_v63, %v15006_v51  ;;  %v5977_v30 = vrot.slane %v14420_v16, 6  ;;  %v5979_v38 = vrot.slane %v14422_v54, 5 }
 0x677   : > { %v5604_v13 = vrot.slane %v5603_v4, 2  ;;  %v3902_v44 = vpop.f32.mrf.mxu1  ;;  %v12906_v42 = vadd.f32 %v12458_v12, %v5595_v7  ;;  %v3814_v40 = vadd.f32 %v3813_v26, %v15004_v31  ;;  %v5975_v7 = vrot.slane %v14417_v60, 7  ;;  %v12922_v31 = vpop.permute.xlu1 %5238 }
 0x678   : > { %v12934_v60 = vsel %vm6042_vm8, %v12852_v47, %v6041_v2  ;;  %v15007_v5 = vmax.f32 %v12892_v49, 0.0  ;;  %v3901_v16 = vadd.f32 %v12865_v25, %v3812_v62  ;;  %v15009_v2 = vmax.f32 %v12902_v58, 0.0 }
 0x679   : > { %v5605_v19 = vadd.f32 %v5604_v13, %v5603_v4  ;;  %v12925_v4 = vadd.f32 %v12414_v37, %v5625_v39  ;;  %v3903_v35 = vadd.f32 %v3902_v44, %v3814_v40  ;;  %v5634_v39 = vrot.slane %v5633_v57, 2 }
 0x67a   : > { %v5981_v0 = vrot.slane %v15007_v5, 4  ;;  %v5644_v40 = vrot.slane %v5310_v22, 4  ;;  %v3990_v54 = vadd.f32 %v3989_v43, %v3901_v16  ;;  %v15010_v25 = vmax.f32 %v12906_v42, 0.0  ;;  %v15013_v16 = vld [vmem:[#allocation27_spill] sm:$0xff] }
 0x67b   : > { %v5606_v26 = vrot.slane %v5605_v19, 1  ;;  %v6027_v53 = vpop.xlane.xlu0 %6026 }
 0x67c   : > { %v3991_v3 = vpop.f32.mrf.mxu2  ;;  %v12948_v49 = vmul.f32 %v12934_v60, %v6027_v53  ;;  %v5985_v62 = vrot.slane %v15010_v25, 2  ;;  %v12963_v53 = vmul.f32 %v12883_v8, %v15013_v16  ;;  %v12968_v25 = vadd.f32 %v5644_v40, %v5310_v22 }
 0x67d   : > { %v5607_v51 = vadd.f32 %v5606_v26, %v5605_v19  ;;  %v4080_v56 = vpop.f32.mrf.mxu3  ;;  %v3992_v29 = vadd.f32 %v3991_v3, %v3903_v35  ;;  %v15008_v19 = vmax.f32 %v12910_v10, 0.0  ;;  %v5983_v26 = vrot.slane %v15009_v2, 3  ;;  %v15011_v35 = vld [vmem:[#allocation22_spill] sm:$0xff] }
 0x67e   : > { %v3816_v44 = vpop.f32.mrf.mxu0  ;;  %v12955_v3 = vmul.f32 %v12922_v31, %v15011_v35  ;;  %v12966_v2 = vadd.f32 %v5634_v39, %v5633_v57  ;;  %v6052_v16 = vrot.slane %v12948_v49, 1  ;;  %v15014_v57 = vld [vmem:[#allocation83_spill] sm:$0xff] }
 0x67f   : > { %v3905_v36 = vpop.f32.mrf.mxu1  ;;  %v12940_v13 = vadd.f32 %v12458_v12, %v5607_v51  ;;  %v5976_v47 = vsel %vm5899_vm1, %v5975_v7, %v15008_v19  ;;  %v15012_v51 = vld [vmem:[#allocation76_spill] sm:$0xff] }
 0x680   : > { %v5978_v5 = vsel %vm5902_vm2, %v5977_v30, %v5976_v47  ;;  %v3817_v59 = vadd.f32 %v3816_v44, %v15012_v51  ;;  %v4081_v30 = vadd.f32 %v4080_v56, %v3992_v29  ;;  %v6053_v56 = vrot.slane %v12948_v49, 2 }
 0x681   : > { %v14425_v7 = vmax.f32 %v12940_v13, 0.0  ;;  %v5980_v19 = vsel %vm5905_vm3, %v5979_v38, %v5978_v5  ;;  %v4079_v38 = vadd.f32 %v12888_v48, %v3990_v54  ;;  %v15028_v29 = vmax.f32 %v12464_v18, 0.0 }
 0x682   : > { %v5982_v47 = vsel %vm5908_vm4, %v5981_v0, %v5980_v19  ;;  %v3906_v22 = vadd.f32 %v3905_v36, %v3817_v59  ;;  %v12984_v48 = vmul.f32 %v12832_v9, %v4081_v30  ;;  %v15016_v59 = vld [vmem:[#allocation18_spill] sm:$0xff]  ;;  %v6056_v9 = vrot.slane %v12948_v49, 5 }
 0x683   : > { %v5984_v35 = vsel %vm5911_vm5, %v5983_v26, %v5982_v47  ;;  %v5987_v44 = vrot.slane %v14425_v7, 1  ;;  %v12980_v26 = vpop.permute.xlu1 %5253  ;;  %v6054_v47 = vrot.slane %v12948_v49, 3  ;;  %v12995_v19 = vmul.f32 %v12813_v6, %v4079_v38 }
 0x684   : > { %v3994_v5 = vpop.f32.mrf.mxu2  ;;  %v5986_v51 = vsel %vm5914_vm6, %v5985_v62, %v5984_v35  ;;  %v15015_v35 = vld [vmem:[#allocation86_spill] sm:$0xff]  ;;  %v15022_v38 = vmax.f32 %v12511_v28, 0.0  ;;  %v15030_v28 = vmax.f32 %v12479_v45, 0.0 }
 0x685   : > { %v4083_v39 = vpop.f32.mrf.mxu3  ;;  %v5988_v40 = vsel %vm5917_vm7, %v5987_v44, %v5986_v51  ;;  %v12990_v7 = vmul.f32 %v12980_v26, %v15015_v35  ;;  %v3995_v36 = vadd.f32 %v3994_v5, %v3906_v22  ;;  %v6055_v51 = vrot.slane %v12948_v49, 4 }
 0x686   : > { %v3818_v54 = vpop.f32.mrf.mxu0  ;;  %v6031_v62 = vadd.f32 %v5988_v40, %v12895_v32  ;;  %v15017_v32 = vmax.f32 %v12432_v46, 0.0  ;;  %v15019_v40 = vmax.f32 %v12444_v34, 0.0  ;;  %v6057_v5 = vrot.slane %v12948_v49, 6 }
 0x687   : > { %v3819_v43 = vadd.f32 %v3818_v54, %v15016_v59  ;;  %v3907_v44 = vpop.f32.mrf.mxu1  ;;  %v6058_v22 = vrot.slane %v12948_v49, 7  ;;  %v15021_v54 = vmax.f32 %v12428_v20, 0.0  ;;  %v15024_v34 = vmax.f32 %v12468_v17, 0.0 }
 0x688   : > { %6032 = vadd.xlane.f32.xlu1 %v6031_v62  ;;  %v13000_v30 = vsub.f32 %v15017_v32, %v6052_v16  ;;  %v13004_v35 = vsub.f32 %v15019_v40, %v6053_v56  ;;  %v13016_v62 = vsub.f32 %v15022_v38, %v12948_v49  ;;  %v15026_v32 = vmax.f32 %v12471_v14, 0.0 }
 0x689   : > { %v13011_v6 = vsub.f32 %v15021_v54, %v12948_v49  ;;  %v13021_v59 = vsub.f32 %v15024_v34, %v6052_v16  ;;  %v13029_v20 = vsub.f32 %v15028_v29, %v6054_v47  ;;  %v4084_v54 = vadd.f32 %v4083_v39, %v3995_v36 }
 0x68a   : > { %15018 = vst [vmem:[#allocation112_spill] sm:$0xff] %v13000_v30  ;;  %v13025_v40 = vsub.f32 %v15026_v32, %v6053_v56  ;;  %v3908_v0 = vadd.f32 %v3907_v44, %v3819_v43  ;;  %v13033_v49 = vsub.f32 %v15030_v28, %v6054_v47  ;;  %v15032_v38 = vmax.f32 %v12487_v24, 0.0  ;;  %v15036_v56 = vld [vmem:[#allocation88_spill] sm:$0xff]  ;;  %v15039_v24 = vld [vmem:[#allocation91_spill] sm:$0xff] }
 0x68b   : > { %15020 = vst [vmem:[#allocation8_spill] sm:$0xff] %v13004_v35  ;;  %v15034_v16 = vmax.f32 %v12490_v27, 0.0  ;;  %v15037_v34 = vmax.f32 %v15036_v56, 0.0  ;;  %v6178_v43 = vmul.f32 %v13000_v30, %v13000_v30  ;;  %v6180_v45 = vmul.f32 %v13004_v35, %v13004_v35  ;;  %v15042_v44 = vld [vmem:[#allocation92_spill] sm:$0xff]  ;;  %v15045_v32 = vld [vmem:[#allocation39_spill] sm:$0xff]  ;;  %v15048_v56 = vld [vmem:[#allocation93_spill] sm:$0xff] }
 0x68c   : > { %15023 = vst [vmem:[#allocation9_spill] sm:$0xff] %v13016_v62  ;;  %v13037_v46 = vsub.f32 %v15032_v38, %v6055_v51  ;;  %v3996_v17 = vpop.f32.mrf.mxu2  ;;  %v15040_v47 = vmax.f32 %v15039_v24, 0.0  ;;  %v15043_v27 = vmax.f32 %v15042_v44, 0.0  ;;  %v15046_v28 = vmax.f32 %v15045_v32, 0.0  ;;  %v15051_v35 = vld [vmem:[#allocation94_spill] sm:$0xff] }
 0x68d   : > { %15025 = vst [vmem:[#allocation68_spill] sm:$0xff] %v13021_v59  ;;  %v13041_v14 = vsub.f32 %v15034_v16, %v6055_v51  ;;  %v13045_v18 = vsub.f32 %v15037_v34, %v6056_v9  ;;  %v3997_v29 = vadd.f32 %v3996_v17, %v3908_v0  ;;  %v4085_v39 = vpop.f32.mrf.mxu3  ;;  %v15049_v34 = vmax.f32 %v15048_v56, 0.0 }
 0x68e   : > { %15027 = vst [vmem:[#allocation69_spill] sm:$0xff] %v13025_v40  ;;  %v13053_v36 = vsub.f32 %v15040_v47, %v6056_v9  ;;  %v13057_v51 = vsub.f32 %v15043_v27, %v6057_v5  ;;  %v13061_v38 = vsub.f32 %v15046_v28, %v6057_v5  ;;  %v3821_v16 = vpop.f32.mrf.mxu0  ;;  %v15052_v0 = vmax.f32 %v15051_v35, 0.0 }
 0x68f   : > { %15029 = vst [vmem:[#allocation70_spill] sm:$0xff] %v13029_v20  ;;  %v13065_v30 = vsub.f32 %v15049_v34, %v6058_v22  ;;  %v6176_v9 = vmul.f32 %v13011_v6, %v13011_v6  ;;  %v6182_v24 = vmul.f32 %v13029_v20, %v13029_v20  ;;  %v5309_v47 = vmul.f32 %v12869_v23, %v4084_v54  ;;  %v3910_v44 = vpop.f32.mrf.mxu1 }
 0x690   : > { %15031 = vst [vmem:[#allocation6_spill] sm:$0xff] %v13033_v49  ;;  %v13069_v17 = vsub.f32 %v15052_v0, %v6058_v22  ;;  %v6177_v5 = vmul.f32 %v13016_v62, %v13016_v62  ;;  %v6179_v27 = vmul.f32 %v13021_v59, %v13021_v59  ;;  %v6184_v35 = vmul.f32 %v13037_v46, %v13037_v46  ;;  %v15053_v59 = vld [vmem:[#allocation23_spill] sm:$0xff] }
 0x691   : > { %15033 = vst [vmem:[#allocation12_spill] sm:$0xff] %v13037_v46  ;;  %v6181_v22 = vmul.f32 %v13025_v40, %v13025_v40  ;;  %v6186_v32 = vmul.f32 %v13045_v18, %v13045_v18  ;;  %v6304_v28 = vrot.slane %v6178_v43, 7  ;;  %v6306_v56 = vrot.slane %v6180_v45, 6 }
 0x692   : > { %15035 = vst [vmem:[#allocation13_spill] sm:$0xff] %v13041_v14  ;;  %v4086_v34 = vadd.f32 %v4085_v39, %v3997_v29  ;;  %v6183_v23 = vmul.f32 %v13033_v49, %v13033_v49  ;;  %v6185_v54 = vmul.f32 %v13041_v14, %v13041_v14  ;;  %v6188_v0 = vmul.f32 %v13057_v51, %v13057_v51 }
 0x693   : > { %15038 = vst [vmem:[#allocation71_spill] sm:$0xff] %v13045_v18  ;;  %v3822_v62 = vadd.f32 %v3821_v16, %v15053_v59  ;;  %v6187_v40 = vmul.f32 %v13053_v36, %v13053_v36  ;;  %v6305_v46 = vsel %vm5899_vm1, %v6304_v28, %v6176_v9  ;;  %v6308_v18 = vrot.slane %v6182_v24, 5 }
 0x694   : > { %15041 = vst [vmem:[#allocation72_spill] sm:$0xff] %v13053_v36  ;;  %v6189_v43 = vmul.f32 %v13061_v38, %v13061_v38  ;;  %v6190_v45 = vmul.f32 %v13065_v30, %v13065_v30  ;;  %v6307_v29 = vsel %vm5902_vm2, %v6306_v56, %v6305_v46  ;;  %v6310_v39 = vrot.slane %v6184_v35, 4  ;;  %v3999_v16 = vpop.f32.mrf.mxu2 }
 0x695   : > { %15044 = vst [vmem:[#allocation113_spill] sm:$0xff] %v13057_v51  ;;  %v6309_v14 = vsel %vm5905_vm3, %v6308_v18, %v6307_v29  ;;  %v6312_v49 = vrot.slane %v6186_v32, 3  ;;  %v6318_v51 = vrot.slane %v6179_v27, 7  ;;  %v6320_v59 = vrot.slane %v6181_v22, 6 }
 0x696   : > { %15047 = vst [vmem:[#allocation115_spill] sm:$0xff] %v13061_v38  ;;  %v5311_v36 = vmul.f32 %v12860_v63, %v4086_v34  ;;  %v6191_v9 = vmul.f32 %v13069_v17, %v13069_v17  ;;  %v6311_v24 = vsel %vm5908_vm4, %v6310_v39, %v6309_v14  ;;  %v6314_v28 = vrot.slane %v6188_v0, 2  ;;  %v4088_v38 = vpop.f32.mrf.mxu3  ;;  %v3823_v18 = vpop.f32.mrf.mxu0 }
 0x697   : > { %15050 = vst [vmem:[#allocation16_spill] sm:$0xff] %v13065_v30  ;;  %v3911_v20 = vadd.f32 %v3910_v44, %v3822_v62  ;;  %v6313_v30 = vsel %vm5911_vm5, %v6312_v49, %v6311_v24  ;;  %v6319_v46 = vsel %vm5899_vm1, %v6318_v51, %v6177_v5  ;;  %v6322_v35 = vrot.slane %v6183_v23, 5  ;;  %v3912_v56 = vpop.f32.mrf.mxu1  ;;  %v15054_v44 = vld [vmem:[#allocation26_spill] sm:$0xff] }
 0x698   : > { %v5638_v32 = vrot.slane %v5309_v47, 4  ;;  %v6315_v27 = vsel %vm5914_vm6, %v6314_v28, %v6313_v30  ;;  %v6321_v22 = vsel %vm5902_vm2, %v6320_v59, %v6319_v46  ;;  %v6324_v63 = vrot.slane %v6185_v54, 4 }
 0x699   : > { %v6316_v34 = vrot.slane %v6190_v45, 1  ;;  %v6323_v29 = vsel %vm5905_vm3, %v6322_v35, %v6321_v22  ;;  %v6326_v14 = vrot.slane %v6187_v40, 3  ;;  %v4000_v0 = vadd.f32 %v3999_v16, %v3911_v20 }
 0x69a   : > { %v5650_v39 = vrot.slane %v5311_v36, 4  ;;  %v6325_v62 = vsel %vm5908_vm4, %v6324_v63, %v6323_v29  ;;  %v6328_v49 = vrot.slane %v6189_v43, 2  ;;  %v3824_v51 = vadd.f32 %v3823_v18, %v15054_v44 }
 0x69b   : > { %v6317_v5 = vsel %vm5917_vm7, %v6316_v34, %v6315_v27  ;;  %v6327_v23 = vsel %vm5911_vm5, %v6326_v14, %v6325_v62  ;;  %v6330_v30 = vrot.slane %v6191_v9, 1  ;;  %v4089_v24 = vadd.f32 %v4088_v38, %v4000_v0  ;;  %v15059_v0 = vld [vmem:[#allocation85_spill] sm:$0xff] }
 0x69c   : > { %v15055_v54 = vrot.slane %v12955_v3, 4  ;;  %v15056_v40 = vrot.slane %v12984_v48, 4  ;;  %v6329_v59 = vsel %vm5914_vm6, %v6328_v49, %v6327_v23  ;;  %v3913_v16 = vadd.f32 %v3912_v56, %v3824_v51  ;;  %v4001_v9 = vpop.f32.mrf.mxu2 }
 0x69d   : > { %v5692_v43 = vrot.slane %v12990_v7, 4  ;;  %v5639_v28 = vadd.f32 %v5638_v32, %v5309_v47  ;;  %v6331_v46 = vsel %vm5917_vm7, %v6330_v30, %v6329_v59  ;;  %v5313_v35 = vmul.f32 %v12922_v31, %v4089_v24  ;;  %v15060_v30 = vld [vmem:[#allocation82_spill] sm:$0xff] }
 0x69e   : > { %v5657_v45 = vadd.f32 %v15055_v54, %v12955_v3  ;;  %v5627_v20 = vadd.f32 %v15056_v40, %v12984_v48  ;;  %v5614_v38 = vrot.slane %v12995_v19, 4  ;;  %v5651_v18 = vadd.f32 %v5650_v39, %v5311_v36  ;;  %v4090_v22 = vpop.f32.mrf.mxu3  ;;  %v3826_v29 = vpop.f32.mrf.mxu0 }
 0x69f   : > { %v6424_v27 = vadd.f32 %v6331_v46, %v6317_v5  ;;  %v4002_v3 = vadd.f32 %v4001_v9, %v3913_v16  ;;  %v5646_v63 = vrot.slane %v12968_v25, 2  ;;  %v15057_v48 = vrot.slane %v15014_v57, 4  ;;  %v3915_v5 = vpop.f32.mrf.mxu1 }
 0x6a0   : > { %v15058_v47 = vrot.slane %v12963_v53, 4  ;;  %v5662_v34 = vrot.slane %v5313_v35, 4  ;;  %v5636_v31 = vrot.slane %v12966_v2, 1  ;;  %v5628_v14 = vrot.slane %v5627_v20, 2 }
 0x6a1   : > { %v5669_v56 = vadd.f32 %v15057_v48, %v15014_v57  ;;  %6425 = vadd.xlane.f32.xlu0 %v6424_v27  ;;  %v4091_v36 = vadd.f32 %v4090_v22, %v4002_v3  ;;  %v3827_v39 = vadd.f32 %v3826_v29, %v15059_v0  ;;  %v5658_v62 = vrot.slane %v5657_v45, 2 }
 0x6a2   : > { %v5681_v32 = vadd.f32 %v15058_v47, %v12963_v53  ;;  %v5693_v49 = vadd.f32 %v5692_v43, %v12990_v7  ;;  %v5640_v44 = vrot.slane %v5639_v28, 2  ;;  %v5663_v51 = vadd.f32 %v5662_v34, %v5313_v35 }
 0x6a3   : > { %v5615_v23 = vadd.f32 %v5614_v38, %v12995_v19  ;;  %v5652_v53 = vrot.slane %v5651_v18, 2  ;;  %v5315_v24 = vmul.f32 %v15060_v30, %v4091_v36  ;;  %v5647_v54 = vadd.f32 %v5646_v63, %v12968_v25 }
 0x6a4   : > { %v5670_v40 = vrot.slane %v5669_v56, 2  ;;  %v5682_v59 = vrot.slane %v5681_v32, 2  ;;  %v5664_v16 = vrot.slane %v5663_v51, 2  ;;  %v15061_v46 = vmax.f32 %v12925_v4, 0.0  ;;  %v4004_v19 = vpop.f32.mrf.mxu2 }
 0x6a5   : > { %v5629_v27 = vadd.f32 %v5628_v14, %v5627_v20  ;;  %v5674_v7 = vrot.slane %v5315_v24, 4  ;;  %v3916_v43 = vadd.f32 %v3915_v5, %v3827_v39  ;;  %v5637_v35 = vadd.f32 %v5636_v31, %v12966_v2  ;;  %v15062_v39 = vld [vmem:[#allocation87_spill] sm:$0xff] }
 0x6a6   : > { %v5989_v9 = vrot.slane %v15061_v46, 7  ;;  %v5659_v3 = vadd.f32 %v5658_v62, %v5657_v45  ;;  %v5694_v22 = vrot.slane %v5693_v49, 2  ;;  %v5641_v48 = vadd.f32 %v5640_v44, %v5639_v28  ;;  %v4093_v25 = vpop.f32.mrf.mxu3  ;;  %v3828_v57 = vpop.f32.mrf.mxu0 }
 0x6a7   : > { %v5616_v38 = vrot.slane %v5615_v23, 2  ;;  %v5653_v47 = vadd.f32 %v5652_v53, %v5651_v18  ;;  %v5675_v34 = vadd.f32 %v5674_v7, %v5315_v24  ;;  %v4005_v29 = vadd.f32 %v4004_v19, %v3916_v43 }
 0x6a8   : > { %v5648_v63 = vrot.slane %v5647_v54, 1  ;;  %v5671_v36 = vadd.f32 %v5670_v40, %v5669_v56  ;;  %v5683_v0 = vadd.f32 %v5682_v59, %v5681_v32  ;;  %v5665_v30 = vadd.f32 %v5664_v16, %v5663_v51  ;;  %v3917_v59 = vpop.f32.mrf.mxu1 }
 0x6a9   : > { %v5630_v46 = vrot.slane %v5629_v27, 1  ;;  %v5676_v20 = vrot.slane %v5675_v34, 2  ;;  %v4094_v14 = vadd.f32 %v4093_v25, %v4005_v29  ;;  %v3829_v5 = vadd.f32 %v3828_v57, %v15062_v39 }
 0x6aa   : > { %v5660_v2 = vrot.slane %v5659_v3, 1  ;;  %v5695_v45 = vadd.f32 %v5694_v22, %v5693_v49  ;;  %v5642_v31 = vrot.slane %v5641_v48, 1  ;;  %v15063_v28 = vmax.f32 %v12898_v52, 0.0 }
 0x6ab   : > { %v5617_v62 = vadd.f32 %v5616_v38, %v5615_v23  ;;  %v5654_v44 = vrot.slane %v5653_v47, 1  ;;  %v5677_v53 = vadd.f32 %v5676_v20, %v5675_v34  ;;  %v5317_v56 = vmul.f32 %v12883_v8, %v4094_v14 }
 0x6ac   : > { %v13147_v18 = vsel %vm5899_vm1, %v5989_v9, %v15063_v28  ;;  %v5649_v32 = vadd.f32 %v5648_v63, %v5647_v54  ;;  %v5672_v51 = vrot.slane %v5671_v36, 1  ;;  %v5684_v24 = vrot.slane %v5683_v0, 1  ;;  %v4006_v23 = vpop.f32.mrf.mxu2 }
 0x6ad   : > { %v5666_v40 = vrot.slane %v5665_v30, 1  ;;  %v5631_v16 = vadd.f32 %v5630_v46, %v5629_v27  ;;  %v5678_v57 = vrot.slane %v5677_v53, 1  ;;  %v5686_v7 = vrot.slane %v5317_v56, 4 }
 0x6ae   : > { %v3918_v49 = vadd.f32 %v3917_v59, %v3829_v5  ;;  %v13151_v43 = vadd.f32 %v12414_v37, %v5637_v35  ;;  %v5661_v22 = vadd.f32 %v5660_v2, %v5659_v3  ;;  %v5696_v9 = vrot.slane %v5695_v45, 1  ;;  %v4095_v46 = vpop.f32.mrf.mxu3 }
 0x6af   : > { %v5643_v19 = vadd.f32 %v5642_v31, %v5641_v48  ;;  %v5618_v38 = vrot.slane %v5617_v62, 1  ;;  %v5655_v34 = vadd.f32 %v5654_v44, %v5653_v47  ;;  %v5687_v29 = vadd.f32 %v5686_v7, %v5317_v56 }
 0x6b0   : > { %v4007_v8 = vadd.f32 %v4006_v23, %v3918_v49  ;;  %v13154_v54 = vadd.f32 %v12414_v37, %v5649_v32  ;;  %v5673_v25 = vadd.f32 %v5672_v51, %v5671_v36  ;;  %v5685_v63 = vadd.f32 %v5684_v24, %v5683_v0  ;;  %v9024_v49 = vld [vmem:[%s14135_s2 + $0x38] sm:$0xff] }
 0x6b1   : > { %v5667_v27 = vadd.f32 %v5666_v40, %v5665_v30  ;;  %v13157_v20 = vadd.f32 %v12458_v12, %v5631_v16  ;;  %v5679_v35 = vadd.f32 %v5678_v57, %v5677_v53  ;;  %v5688_v14 = vrot.slane %v5687_v29, 2  ;;  %7185 = vmatpush.bf16.msra.mxu0 %v9024_v49  ;;  %9041 = vmatpush.bf16.msra.mxu3 %v9024_v49 }
 0x6b2   : > { %v4096_v3 = vadd.f32 %v4095_v46, %v4007_v8  ;;  %v14453_v48 = vmax.f32 %v13151_v43, 0.0  ;;  %v13161_v39 = vadd.f32 %v12414_v37, %v5661_v22  ;;  %v5697_v47 = vadd.f32 %v5696_v9, %v5695_v45  ;;  %v9032_v22 = vld [vmem:[%s14135_s2 + $0x78] sm:$0xff] }
 0x6b3   : > { %v13164_v5 = vadd.f32 %v12458_v12, %v5643_v19  ;;  %v5619_v2 = vadd.f32 %v5618_v38, %v5617_v62  ;;  %v13167_v36 = vadd.f32 %v12458_v12, %v5655_v34  ;;  %v5689_v0 = vadd.f32 %v5688_v14, %v5687_v29  ;;  %7204 = vmatpush.bf16.msra.mxu1 %v9032_v22 }
 0x6b4   : > { %v5319_v30 = vmul.f32 %v12980_v26, %v4096_v3  ;;  %v14448_v31 = vmax.f32 %v13154_v54, 0.0  ;;  %v13172_v28 = vadd.f32 %v12414_v37, %v5673_v25  ;;  %v13175_v44 = vadd.f32 %v12414_v37, %v5685_v63 }
 0x6b5   : > { %v13178_v45 = vadd.f32 %v12458_v12, %v5667_v27  ;;  %v14451_v53 = vmax.f32 %v13157_v20, 0.0  ;;  %v13182_v62 = vadd.f32 %v12458_v12, %v5679_v35  ;;  %v5690_v56 = vrot.slane %v5689_v0, 1 }
 0x6b6   : > { %v5698_v32 = vrot.slane %v5319_v30, 4  ;;  %v5991_v26 = vrot.slane %v14453_v48, 6  ;;  %v14446_v51 = vmax.f32 %v13161_v39, 0.0  ;;  %v14450_v24 = vmax.f32 %v13164_v5, 0.0 }
 0x6b7   : > { %v13189_v40 = vadd.f32 %v12414_v37, %v5697_v47  ;;  %v13192_v59 = vadd.f32 %v12458_v12, %v5619_v2  ;;  %v14447_v16 = vmax.f32 %v13167_v36, 0.0  ;;  %v5691_v57 = vadd.f32 %v5690_v56, %v5689_v0 }
 0x6b8   : > { %v5699_v7 = vadd.f32 %v5698_v32, %v5319_v30  ;;  %v5993_v9 = vrot.slane %v14448_v31, 5  ;;  %v14441_v37 = vmax.f32 %v13172_v28, 0.0  ;;  %v14440_v19 = vmax.f32 %v13175_v44, 0.0 }
 0x6b9   : > { %v14443_v23 = vmax.f32 %v13178_v45, 0.0  ;;  %v6003_v38 = vrot.slane %v14451_v53, 7  ;;  %v14442_v34 = vmax.f32 %v13182_v62, 0.0  ;;  %v13210_v29 = vadd.f32 %v12458_v12, %v5691_v57 }
 0x6ba   : > { %v5700_v8 = vrot.slane %v5699_v7, 2  ;;  %v5995_v25 = vrot.slane %v14446_v51, 4  ;;  %v6005_v63 = vrot.slane %v14450_v24, 6  ;;  %v14444_v27 = vmax.f32 %v13189_v40, 0.0 }
 0x6bb   : > { %v5992_v46 = vsel %vm5902_vm2, %v5991_v26, %v13147_v18  ;;  %v14452_v35 = vmax.f32 %v13192_v59, 0.0  ;;  %v6007_v14 = vrot.slane %v14447_v16, 5  ;;  %v14445_v3 = vmax.f32 %v13210_v29, 0.0  ;;  %v6030_v32 = vpop.xlane.xlu2 %6029 }
 0x6bc   : > { %v5701_v47 = vadd.f32 %v5700_v8, %v5699_v7  ;;  %v6009_v2 = vrot.slane %v14443_v23, 4  ;;  %v5994_v0 = vsel %vm5905_vm3, %v5993_v9, %v5992_v46  ;;  %v5997_v30 = vrot.slane %v14441_v37, 3 }
 0x6bd   : > { %v5999_v18 = vrot.slane %v14440_v19, 2  ;;  %v6004_v26 = vsel %vm5899_vm1, %v6003_v38, %v14452_v35  ;;  %v6011_v57 = vrot.slane %v14442_v34, 3  ;;  %v6045_v7 = vmul.f32 %v12934_v60, %v6030_v32 }
 0x6be   : > { %v5702_v56 = vrot.slane %v5701_v47, 1  ;;  %v6001_v49 = vrot.slane %v14444_v27, 1  ;;  %v6006_v22 = vsel %vm5902_vm2, %v6005_v63, %v6004_v26  ;;  %v6013_v9 = vrot.slane %v14445_v3, 2  ;;  %v15076_v3 = vld [vmem:[#allocation46_spill] sm:$0xff] }
 0x6bf   : > { %v5996_v46 = vsel %vm5908_vm4, %v5995_v25, %v5994_v0  ;;  %v6008_v19 = vsel %vm5905_vm3, %v6007_v14, %v6006_v22  ;;  %v6059_v34 = vrot.slane %v6045_v7, 1  ;;  %v6060_v23 = vrot.slane %v6045_v7, 2 }
 0x6c0   : > { %v5703_v8 = vadd.f32 %v5702_v56, %v5701_v47  ;;  %v5998_v38 = vsel %vm5911_vm5, %v5997_v30, %v5996_v46  ;;  %v6010_v37 = vsel %vm5908_vm4, %v6009_v2, %v6008_v19  ;;  %v6061_v26 = vrot.slane %v6045_v7, 3  ;;  %v15071_v46 = vld [vmem:[#allocation50_spill] sm:$0xff] }
 0x6c1   : > { %v6000_v27 = vsel %vm5914_vm6, %v5999_v18, %v5998_v38  ;;  %v6012_v63 = vsel %vm5911_vm5, %v6011_v57, %v6010_v37  ;;  %v6062_v0 = vrot.slane %v6045_v7, 4  ;;  %v6063_v14 = vrot.slane %v6045_v7, 5  ;;  %v15067_v37 = vld [vmem:[#allocation97_spill] sm:$0xff] }
 0x6c2   : > { %v13246_v32 = vadd.f32 %v12458_v12, %v5703_v8  ;;  %v6002_v47 = vsel %vm5917_vm7, %v6001_v49, %v6000_v27  ;;  %v6014_v25 = vsel %vm5914_vm6, %v6013_v9, %v6012_v63  ;;  %v6064_v56 = vrot.slane %v6045_v7, 6  ;;  %v15069_v27 = vld [vmem:[#allocation58_spill] sm:$0xff] }
 0x6c3   : > { %v15064_v19 = vmax.f32 %v12620_v21, 0.0  ;;  %v15065_v12 = vmax.f32 %v12633_v1, 0.0  ;;  %v6065_v18 = vrot.slane %v6045_v7, 7  ;;  %v15068_v57 = vmax.f32 %v15067_v37, 0.0 }
 0x6c4   : > { %v14449_v30 = vmax.f32 %v13246_v32, 0.0  ;;  %v15070_v49 = vmax.f32 %v15069_v27, 0.0  ;;  %v15072_v38 = vmax.f32 %v15071_v46, 0.0  ;;  %v15077_v51 = vmax.f32 %v15076_v3, 0.0 }
 0x6c5   : > { %v13255_v2 = vsub.f32 %v15064_v19, %v6059_v34  ;;  %v13259_v22 = vsub.f32 %v15065_v12, %v6060_v23  ;;  %v13263_v8 = vsub.f32 %v15068_v57, %v6045_v7  ;;  %v15073_v19 = vld [vmem:[#allocation51_spill] sm:$0xff]  ;;  %v15079_v57 = vld [vmem:[#allocation89_spill] sm:$0xff] }
 0x6c6   : > { %v13267_v9 = vsub.f32 %v15070_v49, %v6045_v7  ;;  %v13271_v63 = vsub.f32 %v15072_v38, %v6059_v34  ;;  %v6015_v21 = vrot.slane %v14449_v30, 1  ;;  %v15074_v1 = vmax.f32 %v15073_v19, 0.0  ;;  %v15082_v7 = vld [vmem:[#allocation47_spill] sm:$0xff] }
 0x6c7   : > { %15066 = vst [vmem:[#allocation17_spill] sm:$0xff] %v13259_v22  ;;  %v13281_v37 = vsub.f32 %v15077_v51, %v6061_v26  ;;  %v15080_v16 = vmax.f32 %v15079_v57, 0.0  ;;  %v15083_v49 = vmax.f32 %v15082_v7, 0.0  ;;  %v15085_v34 = vld [vmem:[#allocation55_spill] sm:$0xff]  ;;  %v6194_v7 = vmul.f32 %v13255_v2, %v13255_v2 }
 0x6c8   : > { %v13277_v12 = vsub.f32 %v15074_v1, %v6060_v23  ;;  %v15086_v38 = vmax.f32 %v15085_v34, 0.0  ;;  %v15088_v30 = vld [vmem:[#allocation95_spill] sm:$0xff]  ;;  %v15091_v1 = vld [vmem:[#allocation96_spill] sm:$0xff]  ;;  %v6016_v57 = vsel %vm5917_vm7, %v6015_v21, %v6014_v25  ;;  %v6195_v25 = vmul.f32 %v13271_v63, %v13271_v63 }
 0x6c9   : > { %15078 = vst [vmem:[#allocation74_spill] sm:$0xff] %v13281_v37  ;;  %v13285_v27 = vsub.f32 %v15080_v16, %v6061_v26  ;;  %v13289_v46 = vsub.f32 %v15083_v49, %v6062_v0  ;;  %v15089_v19 = vmax.f32 %v15088_v30, 0.0  ;;  %v15092_v3 = vmax.f32 %v15091_v1, 0.0  ;;  %v15094_v16 = vld [vmem:[#allocation54_spill] sm:$0xff]  ;;  %v15097_v30 = vld [vmem:[#allocation105_spill] sm:$0xff]  ;;  %v15103_v21 = vld [vmem:[#allocation59_spill] sm:$0xff] }
 0x6ca   : > { %15075 = vst [vmem:[#allocation73_spill] sm:$0xff] %v13277_v12  ;;  %v13293_v31 = vsub.f32 %v15086_v38, %v6062_v0  ;;  %v15095_v26 = vmax.f32 %v15094_v16, 0.0  ;;  %v6196_v0 = vmul.f32 %v13259_v22, %v13259_v22  ;;  %v6034_v49 = vadd.f32 %v6016_v57, %v6002_v47 }
 0x6cb   : > { %15081 = vst [vmem:[#allocation20_spill] sm:$0xff] %v13285_v27  ;;  %v13297_v23 = vsub.f32 %v15089_v19, %v6063_v14  ;;  %v13301_v51 = vsub.f32 %v15092_v3, %v6063_v14  ;;  %v15098_v34 = vmax.f32 %v15097_v30, 0.0  ;;  %v15100_v19 = vld [vmem:[#allocation101_spill] sm:$0xff]  ;;  %v15104_v3 = vmax.f32 %v15103_v21, 0.0 }
 0x6cc   : > { %15084 = vst [vmem:[#allocation21_spill] sm:$0xff] %v13289_v46  ;;  %v13306_v24 = vsub.f32 %v15095_v26, %v6064_v56  ;;  %v15101_v14 = vmax.f32 %v15100_v19, 0.0  ;;  %v6192_v26 = vmul.f32 %v13263_v8, %v13263_v8  ;;  %v6197_v47 = vmul.f32 %v13277_v12, %v13277_v12  ;;  %6035 = vadd.xlane.f32.xlu2 %v6034_v49 }
 0x6cd   : > { %15087 = vst [vmem:[#allocation24_spill] sm:$0xff] %v13293_v31  ;;  %v13314_v38 = vsub.f32 %v15098_v34, %v6064_v56  ;;  %v13324_v16 = vsub.f32 %v15104_v3, %v6065_v18  ;;  %v6198_v56 = vmul.f32 %v13281_v37, %v13281_v37  ;;  %v6193_v57 = vmul.f32 %v13267_v9, %v13267_v9 }
 0x6ce   : > { %15090 = vst [vmem:[#allocation25_spill] sm:$0xff] %v13297_v23  ;;  %v13318_v1 = vsub.f32 %v15101_v14, %v6065_v18  ;;  %v6199_v30 = vmul.f32 %v13285_v27, %v13285_v27  ;;  %v6200_v18 = vmul.f32 %v13289_v46, %v13289_v46  ;;  %v6201_v34 = vmul.f32 %v13293_v31, %v13293_v31 }
 0x6cf   : > { %15093 = vst [vmem:[#allocation78_spill] sm:$0xff] %v13301_v51  ;;  %v6202_v19 = vmul.f32 %v13297_v23, %v13297_v23  ;;  %v6203_v14 = vmul.f32 %v13301_v51, %v13301_v51  ;;  %v6332_v21 = vrot.slane %v6194_v7, 7  ;;  %v6334_v49 = vrot.slane %v6196_v0, 6 }
 0x6d0   : > { %15096 = vst [vmem:[#allocation79_spill] sm:$0xff] %v13306_v24  ;;  %v6204_v3 = vmul.f32 %v13306_v24, %v13306_v24  ;;  %v6205_v53 = vmul.f32 %v13314_v38, %v13314_v38  ;;  %v6206_v35 = vmul.f32 %v13318_v1, %v13318_v1  ;;  %v6346_v48 = vrot.slane %v6195_v25, 7 }
 0x6d1   : > { %15099 = vst [vmem:[#allocation28_spill] sm:$0xff] %v13314_v38  ;;  %v6207_v31 = vmul.f32 %v13324_v16, %v13324_v16  ;;  %v6333_v23 = vsel %vm5899_vm1, %v6332_v21, %v6192_v26  ;;  %v6336_v46 = vrot.slane %v6198_v56, 5  ;;  %v6348_v27 = vrot.slane %v6197_v47, 6 }
 0x6d2   : > { %15102 = vst [vmem:[#allocation29_spill] sm:$0xff] %v13318_v1  ;;  %v6335_v7 = vsel %vm5902_vm2, %v6334_v49, %v6333_v23  ;;  %v6338_v0 = vrot.slane %v6200_v18, 4  ;;  %v6347_v51 = vsel %vm5899_vm1, %v6346_v48, %v6193_v57  ;;  %v6350_v24 = vrot.slane %v6199_v30, 5 }
 0x6d3   : > { %15105 = vst [vmem:[#allocation32_spill] sm:$0xff] %v13324_v16  ;;  %v6337_v37 = vsel %vm5905_vm3, %v6336_v46, %v6335_v7  ;;  %v6340_v38 = vrot.slane %v6202_v19, 3  ;;  %v6349_v12 = vsel %vm5902_vm2, %v6348_v27, %v6347_v51  ;;  %v6352_v1 = vrot.slane %v6201_v34, 4 }
 0x6d4   : > { %v6339_v25 = vsel %vm5908_vm4, %v6338_v0, %v6337_v37  ;;  %v6342_v22 = vrot.slane %v6204_v3, 2  ;;  %v6351_v16 = vsel %vm5905_vm3, %v6350_v24, %v6349_v12  ;;  %v6354_v26 = vrot.slane %v6203_v14, 3 }
 0x6d5   : > { %v6341_v47 = vsel %vm5911_vm5, %v6340_v38, %v6339_v25  ;;  %v6344_v56 = vrot.slane %v6206_v35, 1  ;;  %v6353_v23 = vsel %vm5908_vm4, %v6352_v1, %v6351_v16  ;;  %v6356_v18 = vrot.slane %v6205_v53, 2 }
 0x6d6   : > { %v6343_v48 = vsel %vm5914_vm6, %v6342_v22, %v6341_v47  ;;  %v6355_v46 = vsel %vm5911_vm5, %v6354_v26, %v6353_v23  ;;  %v6358_v57 = vrot.slane %v6207_v31, 1  ;;  %v15106_v34 = vmax.f32 %v12790_v11, 0.0 }
 0x6d7   : > { %v6345_v27 = vsel %vm5917_vm7, %v6344_v56, %v6343_v48  ;;  %v6357_v51 = vsel %vm5914_vm6, %v6356_v18, %v6355_v46  ;;  %v15107_v19 = vmax.f32 %v12793_v50, 0.0  ;;  %v15108_v49 = vmax.f32 %v12877_v61, 0.0  ;;  %v15116_v18 = vld [vmem:[#allocation4_spill] sm:$0xff]  ;;  %v15119_v46 = vld [vmem:[#allocation5_spill] sm:$0xff] }
 0x6d8   : > { %v6359_v37 = vsel %vm5917_vm7, %v6358_v57, %v6357_v51  ;;  %v15109_v7 = vmax.f32 %v12802_v33, 0.0  ;;  %v15110_v25 = vmax.f32 %v12797_v15, 0.0  ;;  %v15111_v11 = vmax.f32 %v12910_v10, 0.0 }
 0x6d9   : > { %v6427_v30 = vadd.f32 %v6359_v37, %v6345_v27  ;;  %v15113_v50 = vmax.f32 %v12880_v41, 0.0  ;;  %v15115_v61 = vmax.f32 %v12829_v55, 0.0  ;;  %v15117_v33 = vmax.f32 %v15116_v18, 0.0  ;;  %v15122_v27 = vld [vmem:[#allocation102_spill] sm:$0xff] }
 0x6da   : > { %v15120_v15 = vmax.f32 %v15119_v46, 0.0  ;;  %v15123_v10 = vmax.f32 %v15122_v27, 0.0  ;;  %v15124_v41 = vmax.f32 %v12902_v58, 0.0  ;;  %v15133_v58 = vmax.f32 %v12940_v13, 0.0 }
 0x6db   : > { %6428 = vadd.xlane.f32.xlu1 %v6427_v30  ;;  %v15126_v30 = vld [vmem:[#allocation62_spill] sm:$0xff] }
 0x6dc   : > { %v15127_v55 = vmax.f32 %v15126_v30, 0.0 }
 0x6fb   : > { %v6033_v24 = vpop.xlane.xlu1 %6032 }
 0x6fc   : > { %v6046_v12 = vmul.f32 %v12934_v60, %v6033_v24 }
 0x6fe   : > { %v6066_v35 = vrot.slane %v6046_v12, 1  ;;  %v6067_v38 = vrot.slane %v6046_v12, 2  ;;  %v6068_v1 = vrot.slane %v6046_v12, 3  ;;  %v6069_v53 = vrot.slane %v6046_v12, 4 }
 0x6ff   : > { %v6070_v16 = vrot.slane %v6046_v12, 5  ;;  %v6071_v22 = vrot.slane %v6046_v12, 6  ;;  %v6072_v21 = vrot.slane %v6046_v12, 7  ;;  %v13385_v26 = vsub.f32 %v15110_v25, %v6046_v12 }
 0x700   : > { %v13369_v31 = vsub.f32 %v15106_v34, %v6066_v35  ;;  %v13373_v14 = vsub.f32 %v15107_v19, %v6067_v38  ;;  %v13377_v3 = vsub.f32 %v15108_v49, %v6066_v35  ;;  %v13381_v0 = vsub.f32 %v15109_v7, %v6068_v1 }
 0x701   : > { %v13389_v47 = vsub.f32 %v15111_v11, %v6046_v12  ;;  %v13393_v56 = vsub.f32 %v15113_v50, %v6067_v38  ;;  %v13397_v23 = vsub.f32 %v15115_v61, %v6069_v53  ;;  %v13401_v48 = vsub.f32 %v15117_v33, %v6068_v1 }
 0x702   : > { %v13405_v57 = vsub.f32 %v15120_v15, %v6069_v53  ;;  %v13409_v51 = vsub.f32 %v15123_v10, %v6070_v16  ;;  %v13413_v37 = vsub.f32 %v15124_v41, %v6070_v16  ;;  %v13417_v24 = vsub.f32 %v15127_v55, %v6071_v22  ;;  %v15130_v53 = vld [vmem:[#allocation63_spill] sm:$0xff] }
 0x703   : > { %15112 = vst [vmem:[#allocation33_spill] sm:$0xff] %v13389_v47  ;;  %v15128_v12 = vmax.f32 %v12906_v42, 0.0  ;;  %v6210_v38 = vmul.f32 %v13369_v31, %v13369_v31  ;;  %v6212_v1 = vmul.f32 %v13373_v14, %v13373_v14  ;;  %v15131_v34 = vmax.f32 %v15130_v53, 0.0 }
 0x704   : > { %15114 = vst [vmem:[#allocation36_spill] sm:$0xff] %v13393_v56  ;;  %v13433_v16 = vsub.f32 %v15133_v58, %v6072_v21  ;;  %v6211_v49 = vmul.f32 %v13377_v3, %v13377_v3  ;;  %v6214_v42 = vmul.f32 %v13381_v0, %v13381_v0  ;;  %v6209_v7 = vmul.f32 %v13389_v47, %v13389_v47 }
 0x705   : > { %15118 = vst [vmem:[#allocation37_spill] sm:$0xff] %v13401_v48  ;;  %v13421_v35 = vsub.f32 %v15128_v12, %v6071_v22  ;;  %v13429_v19 = vsub.f32 %v15131_v34, %v6072_v21  ;;  %v6208_v22 = vmul.f32 %v13385_v26, %v13385_v26  ;;  %v6213_v25 = vmul.f32 %v13393_v56, %v13393_v56 }
 0x706   : > { %15121 = vst [vmem:[#allocation40_spill] sm:$0xff] %v13405_v57  ;;  %v6216_v13 = vmul.f32 %v13397_v23, %v13397_v23  ;;  %v6215_v21 = vmul.f32 %v13401_v48, %v13401_v48  ;;  %v6217_v11 = vmul.f32 %v13405_v57, %v13405_v57  ;;  %v6218_v50 = vmul.f32 %v13409_v51, %v13409_v51 }
 0x707   : > { %15125 = vst [vmem:[#allocation41_spill] sm:$0xff] %v13413_v37  ;;  %v6360_v61 = vrot.slane %v6210_v38, 7  ;;  %v6219_v18 = vmul.f32 %v13413_v37, %v13413_v37  ;;  %v6220_v33 = vmul.f32 %v13417_v24, %v13417_v24  ;;  %v6221_v46 = vmul.f32 %v13421_v35, %v13421_v35 }
 0x708   : > { %15129 = vst [vmem:[#allocation90_spill] sm:$0xff] %v13421_v35  ;;  %v6362_v15 = vrot.slane %v6212_v1, 6  ;;  %v6222_v27 = vmul.f32 %v13429_v19, %v13429_v19  ;;  %v6364_v41 = vrot.slane %v6214_v42, 5  ;;  %v6374_v30 = vrot.slane %v6211_v49, 7  ;;  %v9023_v49 = vld [vmem:[%s14135_s2 + $0x30] sm:$0xff] }
 0x709   : > { %15132 = vst [vmem:[#allocation111_spill] sm:$0xff] %v13429_v19  ;;  %v6361_v10 = vsel %vm5899_vm1, %v6360_v61, %v6208_v22  ;;  %v6223_v55 = vmul.f32 %v13433_v16, %v13433_v16  ;;  %v6366_v38 = vrot.slane %v6216_v13, 4  ;;  %v6376_v53 = vrot.slane %v6213_v25, 6  ;;  %v9031_v25 = vld [vmem:[%s14135_s2 + $0x70] sm:$0xff]  ;;  %7186 = vmatpush.bf16.msra.mxu0 %v9023_v49  ;;  %9042 = vmatpush.bf16.msra.mxu3 %v9023_v49  ;;  %v15144_v19 = vld [vmem:[#allocation69_spill] sm:$0xff] }
 0x70a   : > { %15134 = vst [vmem:[#allocation107_spill] sm:$0xff] %v13433_v16  ;;  %v6363_v12 = vsel %vm5902_vm2, %v6362_v15, %v6361_v10  ;;  %v6368_v58 = vrot.slane %v6218_v50, 3  ;;  %v6375_v35 = vsel %vm5899_vm1, %v6374_v30, %v6209_v7  ;;  %v6378_v1 = vrot.slane %v6215_v21, 5  ;;  %7205 = vmatpush.bf16.msra.mxu1 %v9031_v25 }
 0x70b   : > { %v6365_v34 = vsel %vm5905_vm3, %v6364_v41, %v6363_v12  ;;  %v6370_v57 = vrot.slane %v6220_v33, 2  ;;  %v6377_v22 = vsel %vm5902_vm2, %v6376_v53, %v6375_v35  ;;  %v6380_v42 = vrot.slane %v6217_v11, 4 }
 0x70c   : > { %v6367_v37 = vsel %vm5908_vm4, %v6366_v38, %v6365_v34  ;;  %v6372_v50 = vrot.slane %v6222_v27, 1  ;;  %v6379_v7 = vsel %vm5905_vm3, %v6378_v1, %v6377_v22  ;;  %v6382_v21 = vrot.slane %v6219_v18, 3  ;;  %v9030_v18 = vld [vmem:[%s14135_s2 + $0x68] sm:$0xff]  ;;  %v9342_v22 = vld [vmem:[%s14137_s4] sm:$0xff] }
 0x70d   : > { %v6369_v13 = vsel %vm5911_vm5, %v6368_v58, %v6367_v37  ;;  %v6381_v33 = vsel %vm5908_vm4, %v6380_v42, %v6379_v7  ;;  %v6384_v35 = vrot.slane %v6221_v46, 2  ;;  %v6386_v10 = vrot.slane %v6223_v55, 1  ;;  %v9022_v37 = vld [vmem:[%s14135_s2 + $0x28] sm:$0xff] }
 0x70e   : > { %v6371_v61 = vsel %vm5914_vm6, %v6370_v57, %v6369_v13  ;;  %v6383_v15 = vsel %vm5911_vm5, %v6382_v21, %v6381_v33  ;;  %7187 = vmatpush.bf16.msra.mxu0 %v9022_v37  ;;  %7206 = vmatpush.bf16.msra.mxu1 %v9030_v18  ;;  %v13493_v42 = vperm.slane %v9342_v22, 4  ;;  %v15137_v18 = vld [vmem:[#allocation70_spill] sm:$0xff] }
 0x70f   : > { %v6373_v11 = vsel %vm5917_vm7, %v6372_v50, %v6371_v61  ;;  %v6385_v57 = vsel %vm5914_vm6, %v6384_v35, %v6383_v15  ;;  %9043 = vmatpush.bf16.msra.mxu3 %v9022_v37  ;;  %v15135_v35 = vld [vmem:[#allocation112_spill] sm:$0xff]  ;;  %v13507_v37 = vperm.slane %v9342_v22, 5 }
 0x710   : > { %v6387_v46 = vsel %vm5917_vm7, %v6386_v10, %v6385_v57  ;;  %v15136_v15 = vld [vmem:[#allocation8_spill] sm:$0xff] }
 0x711   : > { %v6430_v41 = vadd.f32 %v6387_v46, %v6373_v11 }
 0x713   : > { %6431 = vadd.xlane.f32.xlu2 %v6430_v41 }
 0x714   : > { %v6426_v27 = vpop.xlane.xlu0 %6425 }
 0x715   : > { %v6436_v30 = vmul.f32 %v6426_v27, %v12934_v60 }
 0x717   : > { %v6440_v55 = vadd.f32 1e-05, %v6436_v30  ;;  %v15138_v30 = vld [vmem:[#allocation12_spill] sm:$0xff] }
 0x719   : > { %9322 = vrsqrt.f32 %v6440_v55  ;;  %vm6450_vm10 = vweird.f32 %v6440_v55 }
 0x71f   : > { %v9323_v12 = vpop.eup %9322 }
 0x720   : > { %v6445_v38 = vmul.f32 %v9323_v12, %v6440_v55  ;;  %vm6451_vm9 = vweird.f32 %v9323_v12 }
 0x721   : > { %vm6452_vm11 = vmor %vm6450_vm10, %vm6451_vm9 }
 0x722   : > { %v6446_v53 = vmul.f32 %v9323_v12, %v6445_v38  ;;  %v15140_v38 = vld [vmem:[#allocation113_spill] sm:$0xff] }
 0x724   : > { %v6447_v34 = vmul.f32 0.5, %v6446_v53 }
 0x726   : > { %v6448_v58 = vsub.f32 1.5, %v6447_v34 }
 0x728   : > { %v6449_v1 = vmul.f32 %v9323_v12, %v6448_v58 }
 0x72a   : > { %v13495_v49 = vsel %vm6452_vm11, %v9323_v12, %v6449_v1  ;;  %v15139_v12 = vld [vmem:[#allocation71_spill] sm:$0xff]  ;;  %v15141_v1 = vld [vmem:[#allocation16_spill] sm:$0xff] }
 0x72b   : > { %v6488_v25 = vrot.slane %v13495_v49, 1  ;;  %v6489_v13 = vrot.slane %v13495_v49, 2  ;;  %v6490_v50 = vrot.slane %v13495_v49, 3  ;;  %v6491_v7 = vrot.slane %v13495_v49, 4 }
 0x72c   : > { %v6492_v21 = vrot.slane %v13495_v49, 5  ;;  %v6548_v61 = vmul.f32 %v13495_v49, %v13011_v6  ;;  %v6493_v33 = vrot.slane %v13495_v49, 6  ;;  %v6494_v41 = vrot.slane %v13495_v49, 7 }
 0x72d   : > { %v6550_v11 = vmul.f32 %v6488_v25, %v15135_v35  ;;  %v6552_v10 = vmul.f32 %v6489_v13, %v15136_v15  ;;  %v6554_v57 = vmul.f32 %v6490_v50, %v15137_v18  ;;  %v6556_v55 = vmul.f32 %v6491_v7, %v15138_v30 }
 0x72e   : > { %v6614_v46 = vmul.f32 %v13493_v42, %v6548_v61  ;;  %v6558_v6 = vmul.f32 %v6492_v21, %v15139_v12  ;;  %v6560_v53 = vmul.f32 %v6493_v33, %v15140_v38  ;;  %v6562_v22 = vmul.f32 %v6494_v41, %v15141_v1 }
 0x72f   : > { %v6616_v27 = vmul.f32 %v13493_v42, %v6550_v11  ;;  %v6618_v34 = vmul.f32 %v13493_v42, %v6552_v10  ;;  %v6620_v58 = vmul.f32 %v13493_v42, %v6554_v57  ;;  %v6622_v35 = vmul.f32 %v13493_v42, %v6556_v55 }
 0x730   : > { %v6680_v61 = vadd.f32 %v13507_v37, %v6614_v46  ;;  %v6624_v38 = vmul.f32 %v13493_v42, %v6558_v6  ;;  %v6626_v10 = vmul.f32 %v13493_v42, %v6560_v53  ;;  %v6628_v57 = vmul.f32 %v13493_v42, %v6562_v22  ;;  %v15143_v53 = vld [vmem:[#allocation68_spill] sm:$0xff] }
 0x731   : > { %v6682_v11 = vadd.f32 %v13507_v37, %v6616_v27  ;;  %v6684_v15 = vadd.f32 %v13507_v37, %v6618_v34  ;;  %v6686_v18 = vadd.f32 %v13507_v37, %v6620_v58  ;;  %v6688_v1 = vadd.f32 %v13507_v37, %v6622_v35  ;;  %v9343_v27 = vld [vmem:[%s14137_s4 + $0x8] sm:$0xff]  ;;  %v15142_v58 = vld [vmem:[#allocation9_spill] sm:$0xff] }
 0x732   : > { %v6744_v30 = vpack.c.bf16 %v6680_v61, %v6680_v61  ;;  %v13531_v34 = vperm.slane %v9343_v27, 4  ;;  %v6549_v61 = vmul.f32 %v13495_v49, %v15142_v58  ;;  %v13537_v22 = vadd.f32 %v13507_v37, %v6624_v38  ;;  %v15146_v58 = vld [vmem:[#allocation13_spill] sm:$0xff] }
 0x733   : > { %v6746_v12 = vpack.c.bf16 %v6682_v11, %v6682_v11  ;;  %v6748_v16 = vpack.c.bf16 %v6684_v15, %v6684_v15  ;;  %v6750_v55 = vpack.c.bf16 %v6686_v18, %v6686_v18  ;;  %v6551_v15 = vmul.f32 %v6488_v25, %v15143_v53 }
 0x734   : > { %v6905_v6 = vunpack.c.l.b16 %v6744_v30  ;;  %v13540_v35 = vadd.f32 %v13507_v37, %v6626_v10  ;;  %v13543_v18 = vadd.f32 %v13507_v37, %v6628_v57  ;;  %v6553_v49 = vmul.f32 %v6489_v13, %v15144_v19 }
 0x735   : > { %v6907_v48 = vunpack.c.l.b16 %v6746_v12  ;;  %v6909_v46 = vunpack.c.l.b16 %v6748_v16  ;;  %v6752_v12 = vpack.c.bf16 %v6688_v1, %v6688_v1  ;;  %v6911_v47 = vunpack.c.l.b16 %v6750_v55 }
 0x736   : > { %v13547_v30 = vperm.slane %v9343_v27, 5  ;;  %v6557_v38 = vmul.f32 %v6491_v7, %v15146_v58  ;;  %v6615_v53 = vmul.f32 %v13531_v34, %v6549_v61  ;;  %v6617_v10 = vmul.f32 %v13531_v34, %v6551_v15  ;;  %v15147_v27 = vld [vmem:[#allocation72_spill] sm:$0xff] }
 0x737   : > { %v6969_v11 = vrot.slane %v6907_v48, 7  ;;  %v6971_v16 = vrot.slane %v6909_v46, 6  ;;  %v15145_v48 = vld [vmem:[#allocation6_spill] sm:$0xff]  ;;  %v6754_v57 = vpack.c.bf16 %v13537_v22, %v13537_v22  ;;  %v13560_v13 = vunpack.c.l.b16 %v6752_v12 }
 0x738   : > { %v6555_v25 = vmul.f32 %v6490_v50, %v15145_v48  ;;  %v6973_v50 = vrot.slane %v6911_v47, 5  ;;  %v13564_v61 = vmul.f32 %v6492_v21, %v15147_v27  ;;  %v13574_v22 = vmul.f32 %v6494_v41, %v13069_v17 }
 0x739   : > { %v6970_v56 = vsel %vm5899_vm1, %v6969_v11, %v6905_v6  ;;  %v15148_v6 = vld [vmem:[#allocation115_spill] sm:$0xff]  ;;  %v13578_v47 = vmul.f32 %v13531_v34, %v6557_v38  ;;  %v13581_v27 = vadd.f32 %v13547_v30, %v6615_v53  ;;  %v15149_v17 = vmax.f32 %v12925_v4, 0.0 }
 0x73a   : > { %v6972_v1 = vsel %vm5902_vm2, %v6971_v16, %v6970_v56  ;;  %v13567_v11 = vmul.f32 %v6493_v33, %v15148_v6  ;;  %v6619_v56 = vmul.f32 %v13531_v34, %v6553_v49  ;;  %v6621_v16 = vmul.f32 %v13531_v34, %v6555_v25 }
 0x73b   : > { %v13571_v15 = vsel %vm5905_vm3, %v6973_v50, %v6972_v1  ;;  %v13584_v49 = vadd.f32 %v13547_v30, %v6617_v10  ;;  %v15151_v25 = vmax.f32 %v13151_v43, 0.0  ;;  %v15153_v6 = vmax.f32 %v12898_v52, 0.0 }
 0x73c   : > { %v13595_v50 = vadd.f32 %v13547_v30, %v6619_v56  ;;  %v15154_v53 = vmax.f32 %v13192_v59, 0.0  ;;  %v15156_v46 = vmax.f32 %v13157_v20, 0.0  ;;  %v15158_v43 = vmax.f32 %v13164_v5, 0.0  ;;  %v9029_v5 = vld [vmem:[%s14135_s2 + $0x60] sm:$0xff] }
 0x73d   : > { %v15160_v56 = vmax.f32 %v13154_v54, 0.0  ;;  %v15166_v54 = vmax.f32 %v13178_v45, 0.0  ;;  %v15176_v45 = vmax.f32 %v13189_v40, 0.0  ;;  %7207 = vmatpush.bf16.msra.mxu1 %v9029_v5 }
 0x73f   : > { %v6036_v55 = vpop.xlane.xlu2 %6035 }
 0x740   : > { %v6047_v7 = vmul.f32 %v12934_v60, %v6036_v55 }
 0x742   : > { %v6073_v12 = vrot.slane %v6047_v7, 1  ;;  %v6074_v48 = vrot.slane %v6047_v7, 2  ;;  %v6075_v21 = vrot.slane %v6047_v7, 3  ;;  %v6076_v58 = vrot.slane %v6047_v7, 4 }
 0x743   : > { %v6077_v55 = vrot.slane %v6047_v7, 5  ;;  %v6078_v33 = vrot.slane %v6047_v7, 6  ;;  %v6079_v1 = vrot.slane %v6047_v7, 7  ;;  %v13599_v19 = vsub.f32 %v15153_v6, %v6047_v7 }
 0x744   : > { %v13588_v41 = vsub.f32 %v15149_v17, %v6073_v12  ;;  %v13592_v38 = vsub.f32 %v15151_v25, %v6074_v48  ;;  %v13603_v10 = vsub.f32 %v15154_v53, %v6047_v7  ;;  %v13607_v4 = vsub.f32 %v15156_v46, %v6073_v12  ;;  %v9021_v46 = vld [vmem:[%s14135_s2 + $0x20] sm:$0xff] }
 0x745   : > { %v13610_v17 = vadd.f32 %v13547_v30, %v6621_v16  ;;  %v13614_v25 = vsub.f32 %v15158_v43, %v6074_v48  ;;  %v13618_v52 = vsub.f32 %v15160_v56, %v6075_v21  ;;  %v15162_v6 = vmax.f32 %v13167_v36, 0.0  ;;  %7188 = vmatpush.bf16.msra.mxu0 %v9021_v46  ;;  %9044 = vmatpush.bf16.msra.mxu3 %v9021_v46 }
 0x746   : > { %15150 = vst [vmem:[#allocation44_spill] sm:$0xff] %v13588_v41  ;;  %v15164_v7 = vmax.f32 %v13161_v39, 0.0  ;;  %v13636_v16 = vsub.f32 %v15166_v54, %v6076_v58  ;;  %v15168_v36 = vmax.f32 %v13172_v28, 0.0  ;;  %v15170_v39 = vmax.f32 %v13182_v62, 0.0 }
 0x747   : > { %15152 = vst [vmem:[#allocation45_spill] sm:$0xff] %v13592_v38  ;;  %v13622_v59 = vsub.f32 %v15162_v6, %v6075_v21  ;;  %v15172_v21 = vmax.f32 %v13175_v44, 0.0  ;;  %v15174_v43 = vmax.f32 %v13210_v29, 0.0  ;;  %v6226_v28 = vmul.f32 %v13588_v41, %v13588_v41  ;;  %v9028_v6 = vld [vmem:[%s14135_s2 + $0x58] sm:$0xff] }
 0x748   : > { %15155 = vst [vmem:[#allocation108_spill] sm:$0xff] %v13603_v10  ;;  %v13626_v20 = vsub.f32 %v15164_v7, %v6076_v58  ;;  %v13640_v12 = vsub.f32 %v15168_v36, %v6077_v55  ;;  %v13644_v48 = vsub.f32 %v15170_v39, %v6077_v55  ;;  %v13656_v58 = vsub.f32 %v15176_v45, %v6079_v1 }
 0x749   : > { %15157 = vst [vmem:[#allocation2_spill] sm:$0xff] %v13607_v4  ;;  %v13648_v53 = vsub.f32 %v15172_v21, %v6078_v33  ;;  %v13652_v56 = vsub.f32 %v15174_v43, %v6078_v33  ;;  %v6228_v62 = vmul.f32 %v13592_v38, %v13592_v38  ;;  %v15178_v44 = vmax.f32 %v13246_v32, 0.0  ;;  %v9020_v33 = vld [vmem:[%s14135_s2 + $0x18] sm:$0xff]  ;;  %7208 = vmatpush.bf16.msra.mxu1 %v9028_v6 }
 0x74a   : > { %15159 = vst [vmem:[#allocation114_spill] sm:$0xff] %v13614_v25  ;;  %v6224_v29 = vmul.f32 %v13599_v19, %v13599_v19  ;;  %v6225_v40 = vmul.f32 %v13603_v10, %v13603_v10  ;;  %v13676_v7 = vunpack.c.l.b16 %v6754_v57  ;;  %v6227_v32 = vmul.f32 %v13607_v4, %v13607_v4  ;;  %7189 = vmatpush.bf16.msra.mxu0 %v9020_v33 }
 0x74b   : > { %15161 = vst [vmem:[#allocation116_spill] sm:$0xff] %v13618_v52  ;;  %v13664_v55 = vsub.f32 %v15178_v44, %v6079_v1  ;;  %v6229_v1 = vmul.f32 %v13614_v25, %v13614_v25  ;;  %v6230_v5 = vmul.f32 %v13618_v52, %v13618_v52  ;;  %v6231_v54 = vmul.f32 %v13622_v59, %v13622_v59 }
 0x74c   : > { %15163 = vst [vmem:[#allocation3_spill] sm:$0xff] %v13622_v59  ;;  %v6232_v36 = vmul.f32 %v13626_v20, %v13626_v20  ;;  %v6233_v57 = vmul.f32 %v13636_v16, %v13636_v16  ;;  %v6234_v39 = vmul.f32 %v13640_v12, %v13640_v12  ;;  %v6235_v21 = vmul.f32 %v13644_v48, %v13644_v48 }
 0x74d   : > { %15165 = vst [vmem:[#allocation48_spill] sm:$0xff] %v13626_v20  ;;  %v6236_v45 = vmul.f32 %v13648_v53, %v13648_v53  ;;  %v6237_v44 = vmul.f32 %v13652_v56, %v13652_v56  ;;  %v6388_v46 = vrot.slane %v6226_v28, 7  ;;  %v6390_v59 = vrot.slane %v6228_v62, 6  ;;  %9045 = vmatpush.bf16.msra.mxu3 %v9020_v33 }
 0x74e   : > { %15167 = vst [vmem:[#allocation49_spill] sm:$0xff] %v13636_v16  ;;  %v6429_v43 = vpop.xlane.xlu1 %6428  ;;  %v6238_v16 = vmul.f32 %v13656_v58, %v13656_v58  ;;  %v6239_v4 = vmul.f32 %v13664_v55, %v13664_v55  ;;  %v6975_v28 = vrot.slane %v13560_v13, 4  ;;  %v6402_v10 = vrot.slane %v6227_v32, 7 }
 0x74f   : > { %15169 = vst [vmem:[#allocation98_spill] sm:$0xff] %v13640_v12  ;;  %v6437_v25 = vmul.f32 %v6429_v43, %v12934_v60  ;;  %v6389_v62 = vsel %vm5899_vm1, %v6388_v46, %v6224_v29  ;;  %v6392_v43 = vrot.slane %v6230_v5, 5  ;;  %v6396_v12 = vrot.slane %v6234_v39, 3 }
 0x750   : > { %15171 = vst [vmem:[#allocation52_spill] sm:$0xff] %v13644_v48  ;;  %v9019_v48 = vld [vmem:[%s14135_s2 + $0x10] sm:$0xff]  ;;  %v6391_v6 = vsel %vm5902_vm2, %v6390_v59, %v6389_v62  ;;  %v6398_v52 = vrot.slane %v6236_v45, 2  ;;  %v6403_v38 = vsel %vm5899_vm1, %v6402_v10, %v6225_v40  ;;  %v6406_v41 = vrot.slane %v6231_v54, 5  ;;  %v9026_v59 = vld [vmem:[%s14135_s2 + $0x48] sm:$0xff] }
 0x751   : > { %15173 = vst [vmem:[#allocation53_spill] sm:$0xff] %v13648_v53  ;;  %v13711_v53 = vadd.f32 1e-05, %v6437_v25  ;;  %v6393_v20 = vsel %vm5905_vm3, %v6392_v43, %v6391_v6  ;;  %v6408_v32 = vrot.slane %v6233_v57, 4  ;;  %7190 = vmatpush.bf16.msra.mxu0 %v9019_v48  ;;  %v9018_v25 = vld [vmem:[%s14135_s2 + $0x8] sm:$0xff]  ;;  %v6400_v40 = vrot.slane %v6238_v16, 1  ;;  %9046 = vmatpush.bf16.msra.mxu3 %v9019_v48 }
 0x752   : > { %15175 = vst [vmem:[#allocation99_spill] sm:$0xff] %v13652_v56  ;;  %v9027_v56 = vld [vmem:[%s14135_s2 + $0x50] sm:$0xff]  ;;  %v6414_v54 = vrot.slane %v6239_v4, 1  ;;  %v6749_v16 = vpack.c.bf16 %v13595_v50, %v13595_v50  ;;  %v9025_v50 = vld [vmem:[%s14135_s2 + $0x40] sm:$0xff]  ;;  %v6689_v4 = vadd.f32 %v13547_v30, %v13578_v47  ;;  %v6977_v45 = vrot.slane %v13676_v7, 3 }
 0x753   : > { %15177 = vst [vmem:[#allocation100_spill] sm:$0xff] %v13656_v58  ;;  %v6404_v58 = vrot.slane %v6229_v1, 6  ;;  %9324 = vrsqrt.f32 %v13711_v53  ;;  %7209 = vmatpush.bf16.msra.mxu1 %v9027_v56  ;;  %v6410_v1 = vrot.slane %v6235_v21, 3  ;;  %v6412_v56 = vrot.slane %v6237_v44, 2 }
 0x754   : > { %15179 = vst [vmem:[#allocation120_spill] sm:$0xff] %v13664_v55  ;;  %v6394_v55 = vrot.slane %v6232_v36, 4  ;;  %v6745_v36 = vpack.c.bf16 %v13581_v27, %v13581_v27  ;;  %v6910_v44 = vunpack.c.l.b16 %v6749_v16  ;;  %v6627_v27 = vmul.f32 %v13531_v34, %v13567_v11 }
 0x755   : > { %v6405_v29 = vsel %vm5902_vm2, %v6404_v58, %v6403_v38  ;;  %v6747_v58 = vpack.c.bf16 %v13584_v49, %v13584_v49  ;;  %7191 = vmatpush.bf16.msra.mxu0 %v9018_v25  ;;  %v6625_v49 = vmul.f32 %v13531_v34, %v13564_v61  ;;  %9047 = vmatpush.bf16.msra.mxu3 %v9018_v25  ;;  %vm6460_vm13 = vweird.f32 %v13711_v53 }
 0x756   : > { %v6395_v13 = vsel %vm5908_vm4, %v6394_v55, %v6393_v20  ;;  %v6407_v33 = vsel %vm5905_vm3, %v6406_v41, %v6405_v29  ;;  %v6629_v62 = vmul.f32 %v13531_v34, %v13574_v22  ;;  %v6753_v6 = vpack.c.bf16 %v6689_v4, %v6689_v4 }
 0x757   : > { %v6397_v10 = vsel %vm5911_vm5, %v6396_v12, %v6395_v13  ;;  %v6409_v20 = vsel %vm5908_vm4, %v6408_v32, %v6407_v33  ;;  %7210 = vmatpush.bf16.msra.mxu1 %v9026_v59  ;;  %v6976_v12 = vsel %vm5908_vm4, %v6975_v28, %v13571_v15  ;;  %v6908_v57 = vunpack.c.l.b16 %v6747_v58 }
 0x758   : > { %v6399_v38 = vsel %vm5914_vm6, %v6398_v52, %v6397_v10  ;;  %v6411_v5 = vsel %vm5911_vm5, %v6410_v1, %v6409_v20  ;;  %v9017_v52 = vld [vmem:[%s14135_s2] sm:$0xff]  ;;  %v15180_v15 = vpack.c.bf16 %v13540_v35, %v13540_v35  ;;  %v6751_v28 = vpack.c.bf16 %v13610_v17, %v13610_v17 }
 0x759   : > { %v6401_v55 = vsel %vm5917_vm7, %v6400_v40, %v6399_v38  ;;  %v6413_v41 = vsel %vm5914_vm6, %v6412_v56, %v6411_v5  ;;  %v9325_v39 = vpop.eup %9324  ;;  %7192 = vmatpush.bf16.msra.mxu0 %v9017_v52  ;;  %v6978_v47 = vsel %vm5911_vm5, %v6977_v45, %v6976_v12  ;;  %v6983_v35 = vrot.slane %v6908_v57, 7  ;;  %9048 = vmatpush.bf16.msra.mxu3 %v9017_v52  ;;  %v15182_v45 = vld [vmem:[#allocation17_spill] sm:$0xff] }
 0x75a   : > { %v6415_v48 = vsel %vm5917_vm7, %v6414_v54, %v6413_v41  ;;  %v6917_v61 = vunpack.c.l.b16 %v15180_v15  ;;  %v6455_v46 = vmul.f32 %v9325_v39, %v13711_v53  ;;  %v6691_v7 = vadd.f32 %v13547_v30, %v6625_v49 }
 0x75b   : > { %v6433_v21 = vadd.f32 %v6415_v48, %v6401_v55  ;;  %7211 = vmatpush.bf16.msra.mxu1 %v9025_v50  ;;  %v6906_v13 = vunpack.c.l.b16 %v6745_v36  ;;  %v15181_v17 = vpack.c.bf16 %v13543_v18, %v13543_v18  ;;  %v6985_v25 = vrot.slane %v6910_v44, 6 }
 0x75c   : > { %v6456_v43 = vmul.f32 %v9325_v39, %v6455_v46  ;;  %v6979_v32 = vrot.slane %v6917_v61, 2  ;;  %v6912_v10 = vunpack.c.l.b16 %v6751_v28  ;;  %v13770_v40 = vadd.f32 %v13547_v30, %v6627_v27  ;;  %v15183_v46 = vld [vmem:[#allocation73_spill] sm:$0xff] }
 0x75d   : > { %6434 = vadd.xlane.f32.xlu0 %v6433_v21  ;;  %v6919_v29 = vunpack.c.l.b16 %v15181_v17  ;;  %v6984_v11 = vsel %vm5899_vm1, %v6983_v35, %v6906_v13  ;;  %v13773_v33 = vadd.f32 %v13547_v30, %v6629_v62  ;;  %vm6461_vm12 = vweird.f32 %v9325_v39  ;;  %v15185_v62 = vld [vmem:[#allocation20_spill] sm:$0xff]  ;;  %v15187_v13 = vld [vmem:[#allocation25_spill] sm:$0xff] }
 0x75e   : > { %v6457_v59 = vmul.f32 0.5, %v6456_v43  ;;  %v6980_v22 = vsel %vm5914_vm6, %v6979_v32, %v6978_v47  ;;  %v6755_v38 = vpack.c.bf16 %v6691_v7, %v6691_v7  ;;  %v13775_v20 = vunpack.c.l.b16 %v6753_v6  ;;  %vm6462_vm14 = vmor %vm6460_vm13, %vm6461_vm12  ;;  %v15184_v47 = vld [vmem:[#allocation74_spill] sm:$0xff]  ;;  %v15186_v6 = vld [vmem:[#allocation21_spill] sm:$0xff] }
 0x75f   : > { %v6981_v18 = vrot.slane %v6919_v29, 1  ;;  %v6986_v56 = vsel %vm5902_vm2, %v6985_v25, %v6984_v11  ;;  %v6987_v55 = vrot.slane %v6912_v10, 5  ;;  %v6757_v54 = vpack.c.bf16 %v13770_v40, %v13770_v40  ;;  %v15188_v29 = vld [vmem:[#allocation79_spill] sm:$0xff]  ;;  %v15189_v10 = vld [vmem:[#allocation29_spill] sm:$0xff] }
 0x760   : > { %v6458_v1 = vsub.f32 1.5, %v6457_v59  ;;  %v6759_v16 = vpack.c.bf16 %v13773_v33, %v13773_v33  ;;  %v13788_v52 = vunpack.c.l.b16 %v6755_v38  ;;  %v6989_v53 = vrot.slane %v13775_v20, 4 }
 0x761   : > { %v13780_v5 = vsel %vm5917_vm7, %v6981_v18, %v6980_v22  ;;  %v13791_v12 = vsel %vm5905_vm3, %v6987_v55, %v6986_v56 }
 0x762   : > { %v6459_v58 = vmul.f32 %v9325_v39, %v6458_v1 }
 0x764   : > { %v13786_v41 = vsel %vm6462_vm14, %v9325_v39, %v6459_v58 }
 0x765   : > { %v6495_v49 = vrot.slane %v13786_v41, 1  ;;  %v6496_v48 = vrot.slane %v13786_v41, 2  ;;  %v6497_v50 = vrot.slane %v13786_v41, 3  ;;  %v6498_v4 = vrot.slane %v13786_v41, 4 }
 0x766   : > { %v6499_v36 = vrot.slane %v13786_v41, 5  ;;  %v6564_v57 = vmul.f32 %v13786_v41, %v13263_v8  ;;  %v6565_v39 = vmul.f32 %v13786_v41, %v13267_v9  ;;  %v6500_v21 = vrot.slane %v13786_v41, 6 }
 0x767   : > { %v6566_v15 = vmul.f32 %v6495_v49, %v13255_v2  ;;  %v6567_v61 = vmul.f32 %v6495_v49, %v13271_v63  ;;  %v6568_v44 = vmul.f32 %v6496_v48, %v15182_v45  ;;  %v6569_v28 = vmul.f32 %v6496_v48, %v15183_v46 }
 0x768   : > { %v6570_v27 = vmul.f32 %v6497_v50, %v15184_v47  ;;  %v6571_v35 = vmul.f32 %v6497_v50, %v15185_v62  ;;  %v6630_v43 = vmul.f32 %v13493_v42, %v6564_v57  ;;  %v6631_v8 = vmul.f32 %v13531_v34, %v6565_v39 }
 0x769   : > { %v6632_v9 = vmul.f32 %v13493_v42, %v6566_v15  ;;  %v6633_v7 = vmul.f32 %v13531_v34, %v6567_v61  ;;  %v6501_v2 = vrot.slane %v13786_v41, 7  ;;  %v6572_v63 = vmul.f32 %v6498_v4, %v15186_v6 }
 0x76a   : > { %v6574_v17 = vmul.f32 %v6499_v36, %v15187_v13  ;;  %v6576_v32 = vmul.f32 %v6500_v21, %v15188_v29  ;;  %v6634_v25 = vmul.f32 %v13493_v42, %v6568_v44  ;;  %v6636_v59 = vmul.f32 %v13493_v42, %v6570_v27 }
 0x76b   : > { %v6578_v11 = vmul.f32 %v6501_v2, %v15189_v10  ;;  %v6638_v22 = vmul.f32 %v13493_v42, %v6572_v63  ;;  %v6696_v1 = vadd.f32 %v13507_v37, %v6630_v43  ;;  %v6698_v38 = vadd.f32 %v13507_v37, %v6632_v9 }
 0x76c   : > { %v6640_v18 = vmul.f32 %v13493_v42, %v6574_v17  ;;  %v6642_v56 = vmul.f32 %v13493_v42, %v6576_v32  ;;  %v6700_v58 = vadd.f32 %v13507_v37, %v6634_v25  ;;  %v6702_v55 = vadd.f32 %v13507_v37, %v6636_v59  ;;  %v15190_v17 = vld [vmem:[#allocation24_spill] sm:$0xff] }
 0x76d   : > { %v6644_v41 = vmul.f32 %v13493_v42, %v6578_v11  ;;  %v6704_v49 = vadd.f32 %v13507_v37, %v6638_v22  ;;  %v6760_v48 = vpack.c.bf16 %v6696_v1, %v6696_v1  ;;  %v6762_v50 = vpack.c.bf16 %v6698_v38, %v6698_v38  ;;  %v15191_v38 = vld [vmem:[#allocation78_spill] sm:$0xff] }
 0x76e   : > { %v6706_v57 = vadd.f32 %v13507_v37, %v6640_v18  ;;  %v6708_v39 = vadd.f32 %v13507_v37, %v6642_v56  ;;  %v6764_v15 = vpack.c.bf16 %v6700_v58, %v6700_v58  ;;  %v6766_v61 = vpack.c.bf16 %v6702_v55, %v6702_v55 }
 0x76f   : > { %v6710_v45 = vadd.f32 %v13507_v37, %v6644_v41  ;;  %v6768_v44 = vpack.c.bf16 %v6704_v49, %v6704_v49  ;;  %v6921_v46 = vunpack.c.l.b16 %v6760_v48  ;;  %v6923_v47 = vunpack.c.l.b16 %v6762_v50  ;;  %v15192_v41 = vld [vmem:[#allocation28_spill] sm:$0xff] }
 0x770   : > { %v6770_v27 = vpack.c.bf16 %v6706_v57, %v6706_v57  ;;  %v6772_v62 = vpack.c.bf16 %v6708_v39, %v6708_v39  ;;  %v6925_v43 = vunpack.c.l.b16 %v6764_v15  ;;  %v6927_v9 = vunpack.c.l.b16 %v6766_v61 }
 0x771   : > { %v6774_v6 = vpack.c.bf16 %v6710_v45, %v6710_v45  ;;  %v6929_v63 = vunpack.c.l.b16 %v6768_v44  ;;  %v6997_v13 = vrot.slane %v6923_v47, 7  ;;  %v6573_v29 = vmul.f32 %v6498_v4, %v15190_v17  ;;  %v15193_v4 = vld [vmem:[#allocation32_spill] sm:$0xff] }
 0x772   : > { %v6931_v32 = vunpack.c.l.b16 %v6770_v27  ;;  %v6933_v25 = vunpack.c.l.b16 %v6772_v62  ;;  %v6999_v59 = vrot.slane %v6925_v43, 6  ;;  %v7001_v10 = vrot.slane %v6927_v9, 5 }
 0x773   : > { %v6935_v11 = vunpack.c.l.b16 %v6774_v6  ;;  %v6998_v22 = vsel %vm5899_vm1, %v6997_v13, %v6921_v46  ;;  %v7003_v1 = vrot.slane %v6929_v63, 4  ;;  %v6575_v18 = vmul.f32 %v6499_v36, %v15191_v38 }
 0x774   : > { %v7000_v56 = vsel %vm5902_vm2, %v6999_v59, %v6998_v22  ;;  %v7005_v58 = vrot.slane %v6931_v32, 3  ;;  %v7007_v55 = vrot.slane %v6933_v25, 2  ;;  %v6577_v49 = vmul.f32 %v6500_v21, %v15192_v41 }
 0x775   : > { %v7002_v48 = vsel %vm5905_vm3, %v7001_v10, %v7000_v56  ;;  %v7009_v50 = vrot.slane %v6935_v11, 1  ;;  %v6579_v57 = vmul.f32 %v6501_v2, %v15193_v4  ;;  %v6635_v39 = vmul.f32 %v13531_v34, %v6569_v28 }
 0x776   : > { %v7004_v15 = vsel %vm5908_vm4, %v7003_v1, %v7002_v48  ;;  %v6637_v61 = vmul.f32 %v13531_v34, %v6571_v35  ;;  %v6639_v45 = vmul.f32 %v13531_v34, %v6573_v29  ;;  %v6641_v36 = vmul.f32 %v13531_v34, %v6575_v18 }
 0x777   : > { %v7006_v44 = vsel %vm5911_vm5, %v7005_v58, %v7004_v15  ;;  %v6643_v46 = vmul.f32 %v13531_v34, %v6577_v49  ;;  %v6645_v21 = vmul.f32 %v13531_v34, %v6579_v57  ;;  %v6697_v47 = vadd.f32 %v13547_v30, %v6631_v8 }
 0x778   : > { %v7008_v2 = vsel %vm5914_vm6, %v7007_v55, %v7006_v44  ;;  %v6699_v28 = vadd.f32 %v13547_v30, %v6633_v7  ;;  %v6701_v27 = vadd.f32 %v13547_v30, %v6635_v39  ;;  %v6703_v35 = vadd.f32 %v13547_v30, %v6637_v61 }
 0x779   : > { %v7010_v62 = vsel %vm5917_vm7, %v7009_v50, %v7008_v2  ;;  %v6705_v43 = vadd.f32 %v13547_v30, %v6639_v45  ;;  %v6707_v9 = vadd.f32 %v13547_v30, %v6641_v36  ;;  %v6709_v6 = vadd.f32 %v13547_v30, %v6643_v46 }
 0x77a   : > { %v7081_v63 = vpack.c.b16 %v7010_v62, %v13780_v5  ;;  %v6711_v8 = vadd.f32 %v13547_v30, %v6645_v21  ;;  %v6761_v13 = vpack.c.bf16 %v6697_v47, %v6697_v47  ;;  %v6763_v17 = vpack.c.bf16 %v6699_v28, %v6699_v28 }
 0x77b   : > { %v6765_v29 = vpack.c.bf16 %v6701_v27, %v6701_v27  ;;  %v6767_v7 = vpack.c.bf16 %v6703_v35, %v6703_v35  ;;  %v6769_v32 = vpack.c.bf16 %v6705_v43, %v6705_v43  ;;  %v6771_v25 = vpack.c.bf16 %v6707_v9, %v6707_v9 }
 0x77c   : > { %7193 = vmatmul.bf16.vlgmr.msra.gmra.mxu0 %v7081_v63  ;;  %v6773_v59 = vpack.c.bf16 %v6709_v6, %v6709_v6  ;;  %v6775_v10 = vpack.c.bf16 %v6711_v8, %v6711_v8  ;;  %v6918_v11 = vunpack.c.l.b16 %v6757_v54  ;;  %v6924_v22 = vunpack.c.l.b16 %v6763_v17 }
 0x77d   : > { %v6926_v1 = vunpack.c.l.b16 %v6765_v29  ;;  %v6928_v38 = vunpack.c.l.b16 %v6767_v7  ;;  %v6930_v18 = vunpack.c.l.b16 %v6769_v32  ;;  %v6990_v5 = vsel %vm5908_vm4, %v6989_v53, %v13791_v12 }
 0x77e   : > { %v6922_v56 = vunpack.c.l.b16 %v6761_v13  ;;  %v6932_v58 = vunpack.c.l.b16 %v6771_v25  ;;  %v6991_v55 = vrot.slane %v13788_v52, 3  ;;  %v7011_v41 = vrot.slane %v6924_v22, 7 }
 0x77f   : > { %v6920_v49 = vunpack.c.l.b16 %v6759_v16  ;;  %v6934_v40 = vunpack.c.l.b16 %v6773_v59  ;;  %v7013_v54 = vrot.slane %v6926_v1, 6  ;;  %v6936_v48 = vunpack.c.l.b16 %v6775_v10 }
 0x780   : > { %v6992_v50 = vsel %vm5911_vm5, %v6991_v55, %v6990_v5  ;;  %v7012_v4 = vsel %vm5899_vm1, %v7011_v41, %v6922_v56  ;;  %v7015_v57 = vrot.slane %v6928_v38, 5  ;;  %v6993_v20 = vrot.slane %v6918_v11, 2 }
 0x781   : > { %v7014_v12 = vsel %vm5902_vm2, %v7013_v54, %v7012_v4  ;;  %v7017_v53 = vrot.slane %v6930_v18, 4  ;;  %v7019_v52 = vrot.slane %v6932_v58, 3  ;;  %v7021_v16 = vrot.slane %v6934_v40, 2 }
 0x782   : > { %v7016_v39 = vsel %vm5905_vm3, %v7015_v57, %v7014_v12  ;;  %v6994_v15 = vsel %vm5914_vm6, %v6993_v20, %v6992_v50  ;;  %v6995_v61 = vrot.slane %v6920_v49, 1  ;;  %v7023_v36 = vrot.slane %v6936_v48, 1 }
 0x783   : > { %v7018_v33 = vsel %vm5908_vm4, %v7017_v53, %v7016_v39  ;;  %v15194_v53 = vld [vmem:[#allocation111_spill] sm:$0xff] }
 0x784   : > { %v7020_v45 = vsel %vm5911_vm5, %v7019_v52, %v7018_v33  ;;  %v6996_v46 = vsel %vm5917_vm7, %v6995_v61, %v6994_v15 }
 0x785   : > { %v7022_v44 = vsel %vm5914_vm6, %v7021_v16, %v7020_v45 }
 0x786   : > { %v7024_v21 = vsel %vm5917_vm7, %v7023_v36, %v7022_v44  ;;  %v6432_v2 = vpop.xlane.xlu2 %6431 }
 0x787   : > { %v7082_v47 = vpack.c.b16 %v7024_v21, %v6996_v46  ;;  %v6438_v28 = vmul.f32 %v6432_v2, %v12934_v60  ;;  %v15195_v46 = vld [vmem:[#allocation36_spill] sm:$0xff] }
 0x789   : > { %7212 = vmatmul.bf16.vlgmr.msra.gmra.mxu1 %v7082_v47  ;;  %v6442_v27 = vadd.f32 1e-05, %v6438_v28 }
 0x78b   : > { %9326 = vrsqrt.f32 %v6442_v27  ;;  %vm6470_vm0 = vweird.f32 %v6442_v27 }
 0x791   : > { %v9327_v35 = vpop.eup %9326 }
 0x792   : > { %v6465_v62 = vmul.f32 %v9327_v35, %v6442_v27  ;;  %vm6471_vm15 = vweird.f32 %v9327_v35 }
 0x793   : > { %vm6472_vm8 = vmor %vm6470_vm0, %vm6471_vm15 }
 0x794   : > { %v6466_v43 = vmul.f32 %v9327_v35, %v6465_v62 }
 0x796   : > { %v6467_v9 = vmul.f32 0.5, %v6466_v43  ;;  %v15197_v43 = vld [vmem:[#allocation37_spill] sm:$0xff] }
 0x798   : > { %v6468_v6 = vsub.f32 1.5, %v6467_v9 }
 0x79a   : > { %v6469_v63 = vmul.f32 %v9327_v35, %v6468_v6 }
 0x79c   : > { %v13881_v8 = vsel %vm6472_vm8, %v9327_v35, %v6469_v63  ;;  %v15196_v35 = vld [vmem:[#allocation33_spill] sm:$0xff]  ;;  %v15198_v63 = vld [vmem:[#allocation40_spill] sm:$0xff] }
 0x79d   : > { %v6502_v13 = vrot.slane %v13881_v8, 1  ;;  %v6503_v17 = vrot.slane %v13881_v8, 2  ;;  %v6504_v32 = vrot.slane %v13881_v8, 3  ;;  %v6580_v59 = vmul.f32 %v13881_v8, %v13385_v26 }
 0x79e   : > { %v6505_v10 = vrot.slane %v13881_v8, 4  ;;  %v6506_v38 = vrot.slane %v13881_v8, 5  ;;  %v6507_v26 = vrot.slane %v13881_v8, 6  ;;  %v6508_v54 = vrot.slane %v13881_v8, 7 }
 0x79f   : > { %v6582_v29 = vmul.f32 %v6502_v13, %v13369_v31  ;;  %v6584_v7 = vmul.f32 %v6503_v17, %v13373_v14  ;;  %v6586_v22 = vmul.f32 %v6504_v32, %v13381_v0  ;;  %v6646_v31 = vmul.f32 %v13493_v42, %v6580_v59 }
 0x7a0   : > { %v6588_v14 = vmul.f32 %v6505_v10, %v13397_v23  ;;  %v6590_v58 = vmul.f32 %v6506_v38, %v13409_v51  ;;  %v6592_v23 = vmul.f32 %v6507_v26, %v13417_v24  ;;  %v6583_v12 = vmul.f32 %v6502_v13, %v13377_v3 }
 0x7a1   : > { %v6648_v25 = vmul.f32 %v13493_v42, %v6582_v29  ;;  %v6650_v11 = vmul.f32 %v13493_v42, %v6584_v7  ;;  %v6652_v5 = vmul.f32 %v13493_v42, %v6586_v22  ;;  %v6712_v55 = vadd.f32 %v13507_v37, %v6646_v31 }
 0x7a2   : > { %v6654_v0 = vmul.f32 %v13493_v42, %v6588_v14  ;;  %v6656_v48 = vmul.f32 %v13493_v42, %v6590_v58  ;;  %v6594_v39 = vmul.f32 %v6508_v54, %v15194_v53  ;;  %v6658_v52 = vmul.f32 %v13493_v42, %v6592_v23  ;;  %v15200_v14 = vld [vmem:[#allocation90_spill] sm:$0xff] }
 0x7a3   : > { %v6714_v1 = vadd.f32 %v13507_v37, %v6648_v25  ;;  %v6716_v18 = vadd.f32 %v13507_v37, %v6650_v11  ;;  %v6718_v49 = vadd.f32 %v13507_v37, %v6652_v5  ;;  %v6776_v50 = vpack.c.bf16 %v6712_v55, %v6712_v55 }
 0x7a4   : > { %v6720_v4 = vadd.f32 %v13507_v37, %v6654_v0  ;;  %v6722_v33 = vadd.f32 %v13507_v37, %v6656_v48  ;;  %v6585_v21 = vmul.f32 %v6503_v17, %v15195_v46  ;;  %v6649_v47 = vmul.f32 %v13531_v34, %v6583_v12 }
 0x7a5   : > { %v6778_v56 = vpack.c.bf16 %v6714_v1, %v6714_v1  ;;  %v6780_v41 = vpack.c.bf16 %v6716_v18, %v6716_v18  ;;  %v6782_v20 = vpack.c.bf16 %v6718_v49, %v6718_v49  ;;  %v6937_v16 = vunpack.c.l.b16 %v6776_v50 }
 0x7a6   : > { %v6784_v61 = vpack.c.bf16 %v6720_v4, %v6720_v4  ;;  %v6660_v2 = vmul.f32 %v13493_v42, %v6594_v39  ;;  %v6724_v28 = vadd.f32 %v13507_v37, %v6658_v52  ;;  %v6786_v27 = vpack.c.bf16 %v6722_v33, %v6722_v33 }
 0x7a7   : > { %v6939_v40 = vunpack.c.l.b16 %v6778_v56  ;;  %v6941_v57 = vunpack.c.l.b16 %v6780_v41  ;;  %v6943_v36 = vunpack.c.l.b16 %v6782_v20  ;;  %v6581_v62 = vmul.f32 %v13881_v8, %v15196_v35  ;;  %v15199_v8 = vld [vmem:[#allocation41_spill] sm:$0xff] }
 0x7a8   : > { %v6945_v9 = vunpack.c.l.b16 %v6784_v61  ;;  %v6589_v13 = vmul.f32 %v6505_v10, %v15198_v63  ;;  %v6651_v29 = vmul.f32 %v13531_v34, %v6585_v21  ;;  %v6715_v7 = vadd.f32 %v13547_v30, %v6649_v47 }
 0x7a9   : > { %v7025_v51 = vrot.slane %v6939_v40, 7  ;;  %v7027_v45 = vrot.slane %v6941_v57, 6  ;;  %v7029_v17 = vrot.slane %v6943_v36, 5  ;;  %v6726_v25 = vadd.f32 %v13507_v37, %v6660_v2  ;;  %v15201_v40 = vld [vmem:[#allocation107_spill] sm:$0xff] }
 0x7aa   : > { %v6788_v59 = vpack.c.bf16 %v6724_v28, %v6724_v28  ;;  %v6947_v11 = vunpack.c.l.b16 %v6786_v27  ;;  %v6591_v1 = vmul.f32 %v6506_v38, %v15199_v8  ;;  %v7031_v31 = vrot.slane %v6945_v9, 4 }
 0x7ab   : > { %v7026_v44 = vsel %vm5899_vm1, %v7025_v51, %v6937_v16  ;;  %v6593_v18 = vmul.f32 %v6507_v26, %v15200_v14  ;;  %v6655_v5 = vmul.f32 %v13531_v34, %v6589_v13  ;;  %v6717_v56 = vadd.f32 %v13547_v30, %v6651_v29 }
 0x7ac   : > { %v7028_v6 = vsel %vm5902_vm2, %v7027_v45, %v7026_v44  ;;  %v6779_v58 = vpack.c.bf16 %v6715_v7, %v6715_v7  ;;  %v6790_v0 = vpack.c.bf16 %v6726_v25, %v6726_v25  ;;  %v6949_v41 = vunpack.c.l.b16 %v6788_v59 }
 0x7ad   : > { %v7030_v22 = vsel %vm5905_vm3, %v7029_v17, %v7028_v6  ;;  %v6595_v23 = vmul.f32 %v6508_v54, %v15201_v40  ;;  %v7033_v48 = vrot.slane %v6947_v11, 3  ;;  %v6657_v50 = vmul.f32 %v13531_v34, %v6591_v1  ;;  %v15202_v1 = vld [vmem:[#allocation44_spill] sm:$0xff] }
 0x7ae   : > { %v7032_v49 = vsel %vm5908_vm4, %v7031_v31, %v7030_v22  ;;  %v6659_v4 = vmul.f32 %v13531_v34, %v6593_v18  ;;  %v6721_v20 = vadd.f32 %v13547_v30, %v6655_v5  ;;  %v6781_v53 = vpack.c.bf16 %v6717_v56, %v6717_v56  ;;  %v15203_v31 = vld [vmem:[#allocation45_spill] sm:$0xff]  ;;  %v15204_v18 = vld [vmem:[#allocation116_spill] sm:$0xff] }
 0x7af   : > { %v7034_v12 = vsel %vm5911_vm5, %v7033_v48, %v7032_v49  ;;  %v6940_v39 = vunpack.c.l.b16 %v6779_v58  ;;  %v6951_v52 = vunpack.c.l.b16 %v6790_v0  ;;  %v6661_v54 = vmul.f32 %v13531_v34, %v6595_v23  ;;  %v15205_v40 = vld [vmem:[#allocation48_spill] sm:$0xff] }
 0x7b0   : > { %v6723_v16 = vadd.f32 %v13547_v30, %v6657_v50  ;;  %v6725_v45 = vadd.f32 %v13547_v30, %v6659_v4  ;;  %v6785_v44 = vpack.c.bf16 %v6721_v20, %v6721_v20  ;;  %v6942_v21 = vunpack.c.l.b16 %v6781_v53 }
 0x7b1   : > { %v7039_v47 = vrot.slane %v6940_v39, 7  ;;  %v7037_v2 = vrot.slane %v6951_v52, 1  ;;  %v13947_v28 = vadd.f32 %v13547_v30, %v6661_v54 }
 0x7b2   : > { %v6787_v35 = vpack.c.bf16 %v6723_v16, %v6723_v16  ;;  %v13956_v63 = vunpack.c.l.b16 %v6785_v44  ;;  %v7041_v17 = vrot.slane %v6942_v21, 6 }
 0x7b3   : > { %v6791_v22 = vpack.c.bf16 %v13947_v28, %v13947_v28 }
 0x7b4   : > { %v13968_v8 = vunpack.c.l.b16 %v6787_v35 }
 0x7d0   : > { %v6435_v15 = vpop.xlane.xlu0 %6434 }
 0x7d1   : > { %v6439_v24 = vmul.f32 %v6435_v15, %v12934_v60  ;;  %v6587_v60 = vmul.f32 %v6504_v32, %v15197_v43  ;;  %v6647_v32 = vmul.f32 %v13531_v34, %v6581_v62  ;;  %v7035_v15 = vrot.slane %v6949_v41, 2 }
 0x7d3   : > { %v6443_v3 = vadd.f32 1e-05, %v6439_v24  ;;  %v6653_v10 = vmul.f32 %v13531_v34, %v6587_v60  ;;  %v6713_v26 = vadd.f32 %v13547_v30, %v6647_v32  ;;  %v7036_v61 = vsel %vm5914_vm6, %v7035_v15, %v7034_v12 }
 0x7d4   : > { %v13950_v43 = vsel %vm5917_vm7, %v7037_v2, %v7036_v61  ;;  %v6789_v60 = vpack.c.bf16 %v6725_v45, %v6725_v45 }
 0x7d5   : > { %9328 = vrsqrt.f32 %v6443_v3  ;;  %v6719_v57 = vadd.f32 %v13547_v30, %v6653_v10  ;;  %v6777_v24 = vpack.c.bf16 %v6713_v26, %v6713_v26  ;;  %vm6480_vm10 = vweird.f32 %v6443_v3 }
 0x7d6   : > { %v13973_v5 = vunpack.c.l.b16 %v6789_v60 }
 0x7d7   : > { %v6783_v36 = vpack.c.bf16 %v6719_v57, %v6719_v57  ;;  %v6938_v62 = vunpack.c.l.b16 %v6777_v24  ;;  %v15207_v57 = vld [vmem:[#allocation53_spill] sm:$0xff] }
 0x7d9   : > { %v13952_v9 = vunpack.c.l.b16 %v6783_v36  ;;  %v7040_v13 = vsel %vm5899_vm1, %v7039_v47, %v6938_v62 }
 0x7da   : > { %v13977_v58 = vsel %vm5902_vm2, %v7041_v17, %v7040_v13  ;;  %v15209_v17 = vld [vmem:[#allocation108_spill] sm:$0xff] }
 0x7db   : > { %v9329_v55 = vpop.eup %9328 }
 0x7dc   : > { %v6475_v38 = vmul.f32 %v9329_v55, %v6443_v3  ;;  %vm6481_vm9 = vweird.f32 %v9329_v55 }
 0x7dd   : > { %vm6482_vm11 = vmor %vm6480_vm10, %vm6481_vm9 }
 0x7de   : > { %v6476_v51 = vmul.f32 %v9329_v55, %v6475_v38  ;;  %v15206_v38 = vld [vmem:[#allocation98_spill] sm:$0xff] }
 0x7e0   : > { %v6477_v33 = vmul.f32 0.5, %v6476_v51  ;;  %v15208_v51 = vld [vmem:[#allocation100_spill] sm:$0xff] }
 0x7e2   : > { %v6478_v46 = vsub.f32 1.5, %v6477_v33 }
 0x7e4   : > { %v6479_v27 = vmul.f32 %v9329_v55, %v6478_v46 }
 0x7e6   : > { %v13954_v6 = vsel %vm6482_vm11, %v9329_v55, %v6479_v27  ;;  %v7045_v55 = vrot.slane %v13956_v63, 4 }
 0x7e7   : > { %v6509_v29 = vrot.slane %v13954_v6, 1  ;;  %v6510_v3 = vrot.slane %v13954_v6, 2  ;;  %v6511_v7 = vrot.slane %v13954_v6, 3  ;;  %v6512_v25 = vrot.slane %v13954_v6, 4 }
 0x7e8   : > { %v6513_v59 = vrot.slane %v13954_v6, 5  ;;  %v6596_v11 = vmul.f32 %v13954_v6, %v13599_v19  ;;  %v7043_v19 = vrot.slane %v13952_v9, 5  ;;  %v6514_v41 = vrot.slane %v13954_v6, 6 }
 0x7e9   : > { %v6598_v32 = vmul.f32 %v6509_v29, %v15202_v1  ;;  %v6600_v14 = vmul.f32 %v6510_v3, %v15203_v31  ;;  %v6602_v10 = vmul.f32 %v6511_v7, %v15204_v18  ;;  %v6515_v49 = vrot.slane %v13954_v6, 7 }
 0x7ea   : > { %v6662_v56 = vmul.f32 %v13493_v42, %v6596_v11  ;;  %v6604_v23 = vmul.f32 %v6512_v25, %v15205_v40  ;;  %v6606_v48 = vmul.f32 %v6513_v59, %v15206_v38  ;;  %v6608_v20 = vmul.f32 %v6514_v41, %v15207_v57  ;;  %v15212_v57 = vld [vmem:[#allocation3_spill] sm:$0xff] }
 0x7eb   : > { %v6664_v0 = vmul.f32 %v13493_v42, %v6598_v32  ;;  %v6666_v50 = vmul.f32 %v13493_v42, %v6600_v14  ;;  %v6668_v26 = vmul.f32 %v13493_v42, %v6602_v10  ;;  %v6610_v12 = vmul.f32 %v6515_v49, %v15208_v51 }
 0x7ec   : > { %v6728_v4 = vadd.f32 %v13507_v37, %v6662_v56  ;;  %v6670_v53 = vmul.f32 %v13493_v42, %v6604_v23  ;;  %v6672_v52 = vmul.f32 %v13493_v42, %v6606_v48  ;;  %v6674_v16 = vmul.f32 %v13493_v42, %v6608_v20  ;;  %v15210_v56 = vld [vmem:[#allocation2_spill] sm:$0xff] }
 0x7ed   : > { %v6730_v39 = vadd.f32 %v13507_v37, %v6664_v0  ;;  %v6732_v15 = vadd.f32 %v13507_v37, %v6666_v50  ;;  %v6734_v54 = vadd.f32 %v13507_v37, %v6668_v26  ;;  %v6676_v24 = vmul.f32 %v13493_v42, %v6610_v12  ;;  %v15211_v26 = vld [vmem:[#allocation114_spill] sm:$0xff] }
 0x7ee   : > { %v6792_v33 = vpack.c.bf16 %v6728_v4, %v6728_v4  ;;  %v6736_v61 = vadd.f32 %v13507_v37, %v6670_v53  ;;  %v6738_v36 = vadd.f32 %v13507_v37, %v6672_v52  ;;  %v6740_v47 = vadd.f32 %v13507_v37, %v6674_v16 }
 0x7ef   : > { %v6794_v45 = vpack.c.bf16 %v6730_v39, %v6730_v39  ;;  %v6796_v44 = vpack.c.bf16 %v6732_v15, %v6732_v15  ;;  %v6798_v46 = vpack.c.bf16 %v6734_v54, %v6734_v54  ;;  %v6742_v2 = vadd.f32 %v13507_v37, %v6676_v24  ;;  %v15213_v39 = vld [vmem:[#allocation49_spill] sm:$0xff]  ;;  %v15214_v15 = vld [vmem:[#allocation52_spill] sm:$0xff] }
 0x7f0   : > { %v6953_v21 = vunpack.c.l.b16 %v6792_v33  ;;  %v6800_v27 = vpack.c.bf16 %v6736_v61, %v6736_v61  ;;  %v6802_v62 = vpack.c.bf16 %v6738_v36, %v6738_v36  ;;  %v6597_v42 = vmul.f32 %v13954_v6, %v15209_v17  ;;  %v15215_v33 = vld [vmem:[#allocation99_spill] sm:$0xff]  ;;  %v15216_v24 = vld [vmem:[#allocation120_spill] sm:$0xff] }
 0x7f1   : > { %v6955_v35 = vunpack.c.l.b16 %v6794_v45  ;;  %v6957_v60 = vunpack.c.l.b16 %v6796_v44  ;;  %v6959_v13 = vunpack.c.l.b16 %v6798_v46  ;;  %v6804_v11 = vpack.c.bf16 %v6740_v47, %v6740_v47 }
 0x7f2   : > { %v6806_v1 = vpack.c.bf16 %v6742_v2, %v6742_v2  ;;  %v6961_v32 = vunpack.c.l.b16 %v6800_v27  ;;  %v6963_v14 = vunpack.c.l.b16 %v6802_v62  ;;  %v6599_v0 = vmul.f32 %v6509_v29, %v15210_v56 }
 0x7f3   : > { %v7053_v31 = vrot.slane %v6955_v35, 7  ;;  %v7055_v18 = vrot.slane %v6957_v60, 6  ;;  %v7057_v10 = vrot.slane %v6959_v13, 5  ;;  %v6965_v40 = vunpack.c.l.b16 %v6804_v11 }
 0x7f4   : > { %v6967_v23 = vunpack.c.l.b16 %v6806_v1  ;;  %v7059_v38 = vrot.slane %v6961_v32, 4  ;;  %v7061_v50 = vrot.slane %v6963_v14, 3  ;;  %v6601_v4 = vmul.f32 %v6510_v3, %v15211_v26 }
 0x7f5   : > { %v7054_v37 = vsel %vm5899_vm1, %v7053_v31, %v6953_v21  ;;  %v6603_v20 = vmul.f32 %v6511_v7, %v15212_v57  ;;  %v7063_v12 = vrot.slane %v6965_v40, 2  ;;  %v6605_v29 = vmul.f32 %v6512_v25, %v15213_v39 }
 0x7f6   : > { %v7056_v48 = vsel %vm5902_vm2, %v7055_v18, %v7054_v37  ;;  %v7065_v53 = vrot.slane %v6967_v23, 1  ;;  %v6607_v54 = vmul.f32 %v6513_v59, %v15214_v15  ;;  %v6609_v16 = vmul.f32 %v6514_v41, %v15215_v33 }
 0x7f7   : > { %v7058_v51 = vsel %vm5905_vm3, %v7057_v10, %v7056_v48  ;;  %v6611_v3 = vmul.f32 %v6515_v49, %v15216_v24  ;;  %v6663_v61 = vmul.f32 %v13531_v34, %v6597_v42  ;;  %v6665_v45 = vmul.f32 %v13531_v34, %v6599_v0 }
 0x7f8   : > { %v7060_v52 = vsel %vm5908_vm4, %v7059_v38, %v7058_v51  ;;  %v6667_v36 = vmul.f32 %v13531_v34, %v6601_v4  ;;  %v6669_v44 = vmul.f32 %v13531_v34, %v6603_v20  ;;  %v6671_v46 = vmul.f32 %v13531_v34, %v6605_v29 }
 0x7f9   : > { %v7062_v7 = vsel %vm5911_vm5, %v7061_v50, %v7060_v52  ;;  %v6673_v6 = vmul.f32 %v13531_v34, %v6607_v54  ;;  %v6675_v41 = vmul.f32 %v13531_v34, %v6609_v16  ;;  %v6677_v49 = vmul.f32 %v13531_v34, %v6611_v3  ;;  %v7194_v14 = vpop.f32.mrf.mxu0 }
 0x7fa   : > { %v7064_v25 = vsel %vm5914_vm6, %v7063_v12, %v7062_v7  ;;  %v6729_v21 = vadd.f32 %v13547_v30, %v6663_v61  ;;  %v6731_v2 = vadd.f32 %v13547_v30, %v6665_v45  ;;  %v6733_v27 = vadd.f32 %v13547_v30, %v6667_v36 }
 0x7fb   : > { %v7066_v59 = vsel %vm5917_vm7, %v7065_v53, %v7064_v25  ;;  %v7044_v35 = vsel %vm5905_vm3, %v7043_v19, %v13977_v58  ;;  %v6735_v62 = vadd.f32 %v13547_v30, %v6669_v44  ;;  %v6737_v60 = vadd.f32 %v13547_v30, %v6671_v46  ;;  %v14050_v58 = vld [vmem:[%s14137_s4] sm:$0xff] }
 0x7fc   : > { %v7083_v47 = vpack.c.b16 %v7066_v59, %v13950_v43  ;;  %v6739_v13 = vadd.f32 %v13547_v30, %v6673_v6  ;;  %v6741_v34 = vadd.f32 %v13547_v30, %v6675_v41  ;;  %v6743_v43 = vadd.f32 %v13547_v30, %v6677_v49 }
 0x7fd   : > { %v6793_v17 = vpack.c.bf16 %v6729_v21, %v6729_v21  ;;  %v6795_v42 = vpack.c.bf16 %v6731_v2, %v6731_v2  ;;  %v6797_v11 = vpack.c.bf16 %v6733_v27, %v6733_v27  ;;  %v6799_v1 = vpack.c.bf16 %v6735_v62, %v6735_v62  ;;  %v9039_v27 = vld [vmem:[%s14136_s3 + $0x30] sm:$0xff] }
 0x7fe   : > { %7198 = vmatmul.bf16.vlgmr.msra.gmra.mxu3 %v7083_v47  ;;  %v6801_v32 = vpack.c.bf16 %v6737_v60, %v6737_v60  ;;  %v6803_v31 = vpack.c.bf16 %v6739_v13, %v6739_v13  ;;  %v6805_v9 = vpack.c.bf16 %v6741_v34, %v6741_v34  ;;  %v14053_v19 = vperm.slane %v14050_v58, 6  ;;  %v9040_v47 = vld [vmem:[%s14136_s3 + $0x38] sm:$0xff]  ;;  %v9037_v60 = vld [vmem:[%s14136_s3 + $0x20] sm:$0xff] }
 0x7ff   : > { %v6807_v18 = vpack.c.bf16 %v6743_v43, %v6743_v43  ;;  %v6956_v10 = vunpack.c.l.b16 %v6795_v42  ;;  %v6958_v56 = vunpack.c.l.b16 %v6797_v11  ;;  %v6960_v30 = vunpack.c.l.b16 %v6799_v1  ;;  %7391 = vmatpush.bf16.msra.mxu2 %v9040_v47 }
 0x800   : > { %v6962_v0 = vunpack.c.l.b16 %v6801_v32  ;;  %v7046_v40 = vsel %vm5908_vm4, %v7045_v55, %v7044_v35  ;;  %v7047_v23 = vrot.slane %v13968_v8, 3  ;;  %v6954_v37 = vunpack.c.l.b16 %v6793_v17  ;;  %v9038_v35 = vld [vmem:[%s14136_s3 + $0x28] sm:$0xff] }
 0x801   : > { %v6964_v38 = vunpack.c.l.b16 %v6803_v31  ;;  %v7067_v48 = vrot.slane %v6956_v10, 7  ;;  %v7069_v50 = vrot.slane %v6958_v56, 6  ;;  %v6952_v26 = vunpack.c.l.b16 %v6791_v22  ;;  %v7196_v61 = vpop.f32.mrf.mxu0 }
 0x802   : > { %v6966_v4 = vunpack.c.l.b16 %v6805_v9  ;;  %v6968_v57 = vunpack.c.l.b16 %v6807_v18  ;;  %v7048_v20 = vsel %vm5911_vm5, %v7047_v23, %v7046_v40  ;;  %v7071_v12 = vrot.slane %v6960_v30, 5 }
 0x803   : > { %v7068_v51 = vsel %vm5899_vm1, %v7067_v48, %v6954_v37  ;;  %v7195_v63 = vadd.f32 %v7194_v14, %v14053_v19  ;;  %v7049_v55 = vrot.slane %v13973_v5, 2  ;;  %v7073_v53 = vrot.slane %v6962_v0, 4  ;;  %7392 = vmatpush.bf16.msra.mxu2 %v9039_v27 }
 0x804   : > { %v7070_v8 = vsel %vm5902_vm2, %v7069_v50, %v7068_v51  ;;  %v7075_v29 = vrot.slane %v6964_v38, 3  ;;  %v7077_v52 = vrot.slane %v6966_v4, 2  ;;  %v7051_v54 = vrot.slane %v6952_v26, 1 }
 0x805   : > { %v7072_v39 = vsel %vm5905_vm3, %v7071_v12, %v7070_v8  ;;  %v7050_v28 = vsel %vm5914_vm6, %v7049_v55, %v7048_v20  ;;  %v7079_v16 = vrot.slane %v6968_v57, 1  ;;  %v7197_v25 = vadd.f32 %v7196_v61, %v14053_v19 }
 0x806   : > { %v7074_v22 = vsel %vm5908_vm4, %v7073_v53, %v7072_v39  ;;  %v7213_v15 = vpop.f32.mrf.mxu1  ;;  %v7052_v5 = vsel %vm5917_vm7, %v7051_v54, %v7050_v28  ;;  %v9355_v59 = vmov 128.0   ;;  %v9034_v28 = vld [vmem:[%s14136_s3 + $0x8] sm:$0xff] }
 0x807   : > { %v7076_v33 = vsel %vm5911_vm5, %v7075_v29, %v7074_v22  ;;  %v7214_v24 = vadd.f32 %v7213_v15, %v7195_v63  ;;  %9330 = vrcp.f32 %v9355_v59  ;;  %7393 = vmatpush.bf16.msra.mxu2 %v9038_v35  ;;  %v9035_v63 = vld [vmem:[%s14136_s3 + $0x10] sm:$0xff] }
 0x808   : > { %v7078_v3 = vsel %vm5914_vm6, %v7077_v52, %v7076_v33  ;;  %v9033_v33 = vld [vmem:[%s14136_s3] sm:$0xff] }
 0x809   : > { %v7080_v7 = vsel %vm5917_vm7, %v7079_v16, %v7078_v3  ;;  %v7223_v45 = vmax.f32 %v7214_v24, 0.0 }
 0x80a   : > { %v7084_v36 = vpack.c.b16 %v7080_v7, %v7052_v5 }
 0x80b   : > { %7227 = vadd.xlane.f32.xlu1 %v7223_v45  ;;  %7394 = vmatpush.bf16.msra.mxu2 %v9037_v60 }
 0x80c   : > { %7217 = vmatmul.bf16.gmra.mxu1 %v7084_v36 }
 0x80d   : > { %v9331_v41 = vpop.eup %9330 }
 0x80e   : > { %v7215_v44 = vpop.f32.mrf.mxu1  ;;  %v7236_v49 = vmul.f32 128.0, %v9331_v41  ;;  %vm7240_vm1 = vweird.f32 %v9331_v41 }
 0x80f   : > { %v7216_v46 = vadd.f32 %v7215_v44, %v7197_v25  ;;  %v7314_v25 = vperm.slane %v14050_v58, 7 }
 0x810   : > { %v7237_v21 = vsub.f32 1.0, %v7236_v49 }
 0x811   : > { %v7224_v6 = vmax.f32 %v7216_v46, 0.0  ;;  %v233_v46 = vld [vmem:[%s14137_s4 + $0x10] sm:$0x3] }
 0x812   : > { %v7238_v2 = vmul.f32 %v9331_v41, %v7237_v21 }
 0x813   : > { %7229 = vadd.xlane.f32.xlu2 %v7224_v6 }
 0x814   : > { %v7239_v62 = vadd.f32 %v9331_v41, %v7238_v2 }
 0x816   : > { %v14087_v13 = vsel %vm7240_vm1, %v9331_v41, %v7239_v62  ;;  %v7319_v41 = vperm.slane %v233_v46, 0 }
 0x87e   : > { %v7228_v34 = vpop.xlane.xlu1 %7227 }
 0x87f   : > { %v7242_v43 = vmul.f32 %v14087_v13, %v7228_v34 }
 0x881   : > { %v7199_v17 = vpop.f32.mrf.mxu3  ;;  %v7246_v42 = vsub.f32 %v7223_v45, %v7242_v43 }
 0x882   : > { %v7200_v1 = vadd.f32 %v7199_v17, %v14053_v19 }
 0x883   : > { %v7250_v11 = vmul.f32 %v7246_v42, %v7246_v42 }
 0x885   : > { %7254 = vadd.xlane.f32.xlu2 %v7250_v11 }
 0x886   : > { %v7230_v31 = vpop.xlane.xlu2 %7229 }
 0x887   : > { %v7243_v18 = vmul.f32 %v14087_v13, %v7230_v31 }
 0x889   : > { %v7218_v32 = vpop.f32.mrf.mxu1  ;;  %v7201_v14 = vpop.f32.mrf.mxu3  ;;  %v7247_v30 = vsub.f32 %v7224_v6, %v7243_v18 }
 0x88a   : > { %v7219_v9 = vadd.f32 %v7218_v32, %v7200_v1  ;;  %v7202_v56 = vadd.f32 %v7201_v14, %v14053_v19  ;;  %v9036_v19 = vld [vmem:[%s14136_s3 + $0x18] sm:$0xff] }
 0x88b   : > { %v7251_v37 = vmul.f32 %v7247_v30, %v7247_v30  ;;  %7395 = vmatpush.bf16.msra.mxu2 %v9036_v19 }
 0x88c   : > { %v7225_v10 = vmax.f32 %v7219_v9, 0.0 }
 0x88e   : > { %7231 = vadd.xlane.f32.xlu0 %v7225_v10 }
 0x88f   : > { %7396 = vmatpush.bf16.msra.mxu2 %v9035_v63 }
 0x891   : > { %v7220_v0 = vpop.f32.mrf.mxu1 }
 0x892   : > { %v7221_v40 = vadd.f32 %v7220_v0, %v7202_v56 }
 0x893   : > { %7397 = vmatpush.bf16.msra.mxu2 %v9034_v28 }
 0x894   : > { %v7226_v23 = vmax.f32 %v7221_v40, 0.0 }
 0x896   : > { %7233 = vadd.xlane.f32.xlu1 %v7226_v23  ;;  %7256 = vadd.xlane.f32.xlu0 %v7251_v37 }
 0x897   : > { %7398 = vmatpush.bf16.msra.mxu2 %v9033_v33 }
 0x8f8   : > { %v7255_v38 = vpop.xlane.xlu2 %7254 }
 0x8f9   : > { %v7262_v48 = vmul.f32 %v7255_v38, %v14087_v13 }
 0x8fb   : > { %v7266_v50 = vadd.f32 1e-05, %v7262_v48 }
 0x8fd   : > { %9332 = vrsqrt.f32 %v7266_v50  ;;  %vm7276_vm3 = vweird.f32 %v7266_v50 }
 0x901   : > { %v7232_v26 = vpop.xlane.xlu0 %7231 }
 0x902   : > { %v7244_v4 = vmul.f32 %v14087_v13, %v7232_v26 }
 0x903   : > { %v9333_v57 = vpop.eup %9332 }
 0x904   : > { %v14095_v20 = vsub.f32 %v7225_v10, %v7244_v4  ;;  %v7271_v51 = vmul.f32 %v9333_v57, %v7266_v50  ;;  %vm7277_vm2 = vweird.f32 %v9333_v57 }
 0x905   : > { %vm7278_vm4 = vmor %vm7276_vm3, %vm7277_vm2 }
 0x906   : > { %v7252_v12 = vmul.f32 %v14095_v20, %v14095_v20  ;;  %v7272_v55 = vmul.f32 %v9333_v57, %v7271_v51 }
 0x908   : > { %7258 = vadd.xlane.f32.xlu1 %v7252_v12  ;;  %v7273_v15 = vmul.f32 0.5, %v7272_v55 }
 0x909   : > { %v7234_v8 = vpop.xlane.xlu1 %7233  ;;  %v7257_v53 = vpop.xlane.xlu0 %7256 }
 0x90a   : > { %v7245_v39 = vmul.f32 %v14087_v13, %v7234_v8  ;;  %v7263_v29 = vmul.f32 %v7257_v53, %v14087_v13  ;;  %v7274_v16 = vsub.f32 1.5, %v7273_v15 }
 0x90c   : > { %v14110_v22 = vsub.f32 %v7226_v23, %v7245_v39  ;;  %v7267_v52 = vadd.f32 1e-05, %v7263_v29  ;;  %v7275_v3 = vmul.f32 %v9333_v57, %v7274_v16 }
 0x90e   : > { %9334 = vrsqrt.f32 %v7267_v52  ;;  %v7253_v54 = vmul.f32 %v14110_v22, %v14110_v22  ;;  %v7279_v61 = vsel %vm7278_vm4, %v9333_v57, %v7275_v3  ;;  %vm7286_vm6 = vweird.f32 %v7267_v52 }
 0x90f   : > { %v7310_v44 = vmul.f32 %v7279_v61, %v7246_v42  ;;  %v7342_v57 = vperm.slane %v233_v46, 1 }
 0x910   : > { %7260 = vadd.xlane.f32.xlu2 %v7253_v54 }
 0x911   : > { %v7315_v49 = vmul.f32 %v7314_v25, %v7310_v44 }
 0x913   : > { %v7320_v2 = vadd.f32 %v7319_v41, %v7315_v49 }
 0x914   : > { %v9335_v24 = vpop.eup %9334 }
 0x915   : > { %v7281_v5 = vmul.f32 %v9335_v24, %v7267_v52  ;;  %vm7287_vm5 = vweird.f32 %v9335_v24 }
 0x916   : > { %vm7288_vm7 = vmor %vm7286_vm6, %vm7287_vm5 }
 0x917   : > { %v7282_v7 = vmul.f32 %v9335_v24, %v7281_v5 }
 0x919   : > { %v7283_v45 = vmul.f32 0.5, %v7282_v7 }
 0x91b   : > { %v7284_v36 = vsub.f32 1.5, %v7283_v45 }
 0x91d   : > { %v7285_v6 = vmul.f32 %v9335_v24, %v7284_v36 }
 0x91f   : > { %v7289_v59 = vsel %vm7288_vm7, %v9335_v24, %v7285_v6 }
 0x920   : > { %v7311_v21 = vmul.f32 %v7289_v59, %v7247_v30 }
 0x922   : > { %v7316_v47 = vmul.f32 %v7314_v25, %v7311_v21 }
 0x924   : > { %v7321_v27 = vadd.f32 %v7319_v41, %v7316_v47 }
 0x926   : > { %v7324_v35 = vpack.c.bf16 %v7321_v27, %v7320_v2 }
 0x928   : > { %7399 = vmatmul.bf16.vlgmr.msra.gmra.mxu2 %v7324_v35 }
 0x97b   : > { %v7259_v62 = vpop.xlane.xlu1 %7258 }
 0x97c   : > { %v7264_v58 = vmul.f32 %v7259_v62, %v14087_v13 }
 0x97e   : > { %v7268_v60 = vadd.f32 1e-05, %v7264_v58 }
 0x980   : > { %9336 = vrsqrt.f32 %v7268_v60  ;;  %vm7296_vm13 = vweird.f32 %v7268_v60 }
 0x983   : > { %v7261_v34 = vpop.xlane.xlu2 %7260 }
 0x984   : > { %v7265_v43 = vmul.f32 %v7261_v34, %v14087_v13 }
 0x986   : > { %v9337_v17 = vpop.eup %9336  ;;  %v7269_v42 = vadd.f32 1e-05, %v7265_v43 }
 0x987   : > { %v7291_v11 = vmul.f32 %v9337_v17, %v7268_v60  ;;  %vm7297_vm12 = vweird.f32 %v9337_v17 }
 0x988   : > { %9338 = vrsqrt.f32 %v7269_v42  ;;  %vm7298_vm14 = vmor %vm7296_vm13, %vm7297_vm12  ;;  %vm7306_vm0 = vweird.f32 %v7269_v42 }
 0x989   : > { %v7292_v1 = vmul.f32 %v9337_v17, %v7291_v11 }
 0x98b   : > { %v7293_v32 = vmul.f32 0.5, %v7292_v1 }
 0x98d   : > { %v7294_v31 = vsub.f32 1.5, %v7293_v32 }
 0x98e   : > { %v9339_v9 = vpop.eup %9338 }
 0x98f   : > { %v7295_v14 = vmul.f32 %v9337_v17, %v7294_v31  ;;  %v7301_v18 = vmul.f32 %v9339_v9, %v7269_v42  ;;  %vm7307_vm15 = vweird.f32 %v9339_v9 }
 0x990   : > { %vm7308_vm8 = vmor %vm7306_vm0, %vm7307_vm15 }
 0x991   : > { %v7302_v10 = vmul.f32 %v9339_v9, %v7301_v18  ;;  %v7299_v56 = vsel %vm7298_vm14, %v9337_v17, %v7295_v14 }
 0x992   : > { %v7312_v13 = vmul.f32 %v7299_v56, %v14095_v20 }
 0x993   : > { %v7303_v30 = vmul.f32 0.5, %v7302_v10 }
 0x994   : > { %v7317_v38 = vmul.f32 %v7314_v25, %v7312_v13 }
 0x995   : > { %v7304_v0 = vsub.f32 1.5, %v7303_v30 }
 0x996   : > { %v7322_v50 = vadd.f32 %v7319_v41, %v7317_v38 }
 0x997   : > { %v7305_v40 = vmul.f32 %v9339_v9, %v7304_v0 }
 0x999   : > { %v7309_v23 = vsel %vm7308_vm8, %v9339_v9, %v7305_v40 }
 0x99a   : > { %v7313_v37 = vmul.f32 %v7309_v23, %v14110_v22 }
 0x99c   : > { %v7318_v48 = vmul.f32 %v7314_v25, %v7313_v37 }
 0x99e   : > { %v7323_v26 = vadd.f32 %v7319_v41, %v7318_v48 }
 0x9a0   : > { %v7325_v4 = vpack.c.bf16 %v7323_v26, %v7322_v50 }
 0x9a2   : > { %7404 = vmatmul.bf16.gmra.mxu2 %v7325_v4 }
 0x9ab   : > { %v7400_v20 = vpop.f32.mrf.mxu2 }
 0x9ac   : > { %v7401_v19 = vadd.f32 %v7400_v20, %v7342_v57 }
 0x9ae   : > { %7410 = vst [vmem:[%s229_s21] sm:$0xff] %v7401_v19 }
 0x9b3   : > { %v7402_v51 = vpop.f32.mrf.mxu2 }
 0x9b4   : > { %v7403_v12 = vadd.f32 %v7402_v51, %v7342_v57 }
 0x9b6   : > { %7411 = vst [vmem:[%s229_s21 + $0x8] sm:$0xff] %v7403_v12 }
 0xa25   : > { %v7405_v63 = vpop.f32.mrf.mxu2 }
 0xa26   : > { %v7406_v55 = vadd.f32 %v7405_v63, %v7342_v57 }
 0xa28   : > { %7412 = vst [vmem:[%s229_s21 + $0x10] sm:$0xff] %v7406_v55 }
 0xa2d   : > { %v7407_v8 = vpop.f32.mrf.mxu2 }
 0xa2e   : > { %v7408_v53 = vadd.f32 %v7407_v8, %v7342_v57 }
 0xa30   : > { %7413 = vst [vmem:[%s229_s21 + $0x18] sm:$0xff] %v7408_v53 }
 0xa31 PF: > { %s15_s18 = sadd.s32 1, %s9351_s18  }
 0xa32   : > { %p12_p5 = scmp.ge.s32.totalorder %s15_s18, 4  }
 0xa34   :  { %14 = sbr.rel (!%p12_p5) target bundleno = 1 (0x1), region = 70 }

</bundles_post_ra>
